<compile_context>
chip_gen: v6e
topology: v6e:2x2x1
jax: 0.10.0
libtpu: 0.0.40
codegen_flags: <defaults>
</compile_context>

<pallas_src>
import functools

import jax
import jax.numpy as jnp
from jax.experimental import pallas as pl
from jax.experimental.pallas import tpu as pltpu

TAU = 2.0        # MultiStepLIFNode default tau
V_TH = 1.0       # default v_threshold
BN_EPS = 1e-5
_STAT_ROWS = 8   # sublane-aligned row count for per-tile partial BN stats
# Above the 16 MiB (v5e) / 32 MiB (v6e, v7x) scoped defaults, below v7x's
# 64 MiB physical VMEM.
_VMEM_LIMIT = 48 * 1024 * 1024


# ------------------------- block-size helpers --------------------------------

def _pick_img_block(imgs, hw, target_rows):
    """Largest divisor d of `imgs` with d*hw <= target_rows and 8-aligned rows."""
    best = imgs
    for d in range(1, imgs + 1):
        if imgs % d:
            continue
        if d * hw <= target_rows and ((d * hw) % 8 == 0 or d == imgs):
            best = d
    return best


def _pick_row_block(rows, target):
    """Largest divisor of `rows` that is <= target and 8-aligned (or full)."""
    best = rows
    for d in range(1, rows + 1):
        if rows % d:
            continue
        if d <= target and (d % 8 == 0 or d == rows):
            best = d
    return best


# ------------- fused 3x3 conv (9 in-kernel taps) + per-tile BN stats ----------

def _conv3x3_kernel(x_ref, w_ref, *refs):
    # x_ref : (B, H, W, Cin)    un-padded input block (f32 or bf16)
    # w_ref : (9, Cin, Cout)    bf16 taps, tap index = kh*3 + kw
    # refs  : (*out_refs, psum_ref, psq_ref, xpad_ref)
    #   out_refs : n_split refs of shape (B*H*W, Cout/n_split), bf16
    #   psum/psq : (1, 8, Cout) per-tile partial sum / sum of squares (f32)
    #   xpad_ref : (B, H+2, W+2, Cin) bf16 VMEM scratch (zero halo)
    out_refs = refs[:-3]
    psum_ref, psq_ref, xpad_ref = refs[-3:]

    b, h, w, cin = x_ref.shape
    cout = w_ref.shape[-1]
    m = b * h * w

    # In-kernel zero padding: zero the halo buffer, store the block interior
    # (cast to bf16 so the MXU runs single-pass bf16 x bf16).
    xpad_ref[...] = jnp.zeros_like(xpad_ref)
    xpad_ref[:, 1:h + 1, 1:w + 1, :] = x_ref[...].astype(jnp.bfloat16)

    # 9 shifted-window matmuls accumulated in a local f32 value (single store,
    # no read-modify-write of the output block).
    acc = None
    for kh in range(3):
        for kw in range(3):
            a = xpad_ref[:, kh:kh + h, kw:kw + w, :].reshape(m, cin)
            part = jnp.dot(a, w_ref[3 * kh + kw],
                           preferred_element_type=jnp.float32)
            acc = part if acc is None else acc + part

    n = len(out_refs)
    cper = cout // n
    for k, o_ref in enumerate(out_refs):
        chunk = acc if n == 1 else acc[:, k * cper:(k + 1) * cper]
        o_ref[...] = chunk.astype(o_ref.dtype)

    s = jnp.sum(acc, axis=0, keepdims=True)                  # (1, Cout) f32
    sq = jnp.sum(acc * acc, axis=0, keepdims=True)
    psum_ref[0] = jnp.broadcast_to(s, (_STAT_ROWS, cout))
    psq_ref[0] = jnp.broadcast_to(sq, (_STAT_ROWS, cout))


def conv3x3_bn_stats(x_tnhwc, w9, *, n_split=1, block_rows=1024):
    """3x3 same-conv (stride 1, no bias) + per-channel batch statistics.

    x: (T, N, H, W, Cin); w9: (9, Cin, Cout) bf16.
    Returns (tuple of n_split bf16 row tensors (T*N*H*W, Cout/n_split),
             mean (Cout,) f32, var (Cout,) f32).
    """
    T, N, H, W, Cin = x_tnhwc.shape
    Cout = w9.shape[-1]
    assert Cout % n_split == 0
    cper = Cout // n_split
    imgs = T * N
    x = x_tnhwc.reshape(imgs, H, W, Cin)
    b_blk = _pick_img_block(imgs, H * W, block_rows)
    n_tiles = imgs // b_blk
    M = imgs * H * W

    flops = 2 * M * 9 * Cin * Cout
    bytes_accessed = int(x.size * x.dtype.itemsize
                         + w9.size * w9.dtype.itemsize
                         + M * Cout * 2
                         + 2 * n_tiles * _STAT_ROWS * Cout * 4)

    out_shape = tuple(jax.ShapeDtypeStruct((M, cper), jnp.bfloat16)
                      for _ in range(n_split))
    out_shape += (jax.ShapeDtypeStruct((n_tiles, _STAT_ROWS, Cout), jnp.float32),
                  jax.ShapeDtypeStruct((n_tiles, _STAT_ROWS, Cout), jnp.float32))
    out_specs = tuple(pl.BlockSpec((b_blk * H * W, cper), lambda i: (i, 0))
                      for _ in range(n_split))
    out_specs += (pl.BlockSpec((1, _STAT_ROWS, Cout), lambda i: (i, 0, 0)),
                  pl.BlockSpec((1, _STAT_ROWS, Cout), lambda i: (i, 0, 0)))

    results = pl.pallas_call(
        _conv3x3_kernel,
        out_shape=out_shape,
        grid_spec=pltpu.PrefetchScalarGridSpec(
            num_scalar_prefetch=0,
            grid=(n_tiles,),
            in_specs=[pl.BlockSpec((b_blk, H, W, Cin), lambda i: (i, 0, 0, 0)),
                      pl.BlockSpec((9, Cin, Cout), lambda i: (0, 0, 0))],
            out_specs=out_specs,
            scratch_shapes=[pltpu.VMEM((b_blk, H + 2, W + 2, Cin),
                                       jnp.bfloat16)]),
        compiler_params=pltpu.CompilerParams(
            dimension_semantics=("parallel",),
            vmem_limit_bytes=_VMEM_LIMIT),
        cost_estimate=pl.CostEstimate(flops=flops, transcendentals=0,
                                      bytes_accessed=bytes_accessed),
    )(x, w9)

    outs = results[:n_split]
    psum, psq = results[n_split], results[n_split + 1]
    s = jnp.sum(psum[:, 0, :], axis=0)
    sq = jnp.sum(psq[:, 0, :], axis=0)
    mean = s / M
    var = jnp.maximum(sq / M - mean * mean, 0.0)   # biased, clamped >= 0
    return outs, mean, var


# ------------- fused BatchNorm affine + multi-step LIF (two branches) ---------

def _bn_lif2_kernel(c1_ref, c3_ref, sc1_ref, sh1_ref, sc3_ref, sh3_ref,
                    s1_ref, s3_ref, v1_ref, v3_ref):
    @pl.when(pl.program_id(1) == 0)
    def _():
        v1_ref[...] = jnp.zeros_like(v1_ref)
        v3_ref[...] = jnp.zeros_like(v3_ref)

    decay = 1.0 - 1.0 / TAU   # LIF charge, decay_input=False, v_reset=0

    x1 = c1_ref[0].astype(jnp.float32) * sc1_ref[...] + sh1_ref[...]
    v1 = v1_ref[...] * decay + x1
    sp1 = (v1 >= V_TH).astype(jnp.float32)
    v1_ref[...] = v1 * (1.0 - sp1)                 # hard reset to 0
    s1_ref[0] = sp1.astype(s1_ref.dtype)

    x3 = c3_ref[0].astype(jnp.float32) * sc3_ref[...] + sh3_ref[...]
    v3 = v3_ref[...] * decay + x3
    sp3 = (v3 >= V_TH).astype(jnp.float32)
    v3_ref[...] = v3 * (1.0 - sp3)
    s3_ref[0] = sp3.astype(s3_ref.dtype)


def bn_lif2(c1, c3, scale1, shift1, scale3, shift3, *,
            out_dtype=jnp.bfloat16, row_block=256):
    """Dual-branch BN-affine + multi-step LIF; c1/c3: (T, R, L) lane-flat."""
    T, R, L = c1.shape
    rb = _pick_row_block(R, row_block)
    vec = lambda a: a.reshape(1, L)
    blk = lambda s, t: (t, s, 0)
    vspec = pl.BlockSpec((1, L), lambda s, t: (0, 0))
    return pl.pallas_call(
        _bn_lif2_kernel,
        out_shape=(jax.ShapeDtypeStruct((T, R, L), out_dtype),
                   jax.ShapeDtypeStruct((T, R, L), out_dtype)),
        grid_spec=pltpu.PrefetchScalarGridSpec(
            num_scalar_prefetch=0,
            grid=(R // rb, T),
            in_specs=[pl.BlockSpec((1, rb, L), blk),
                      pl.BlockSpec((1, rb, L), blk),
                      vspec, vspec, vspec, vspec],
            out_specs=(pl.BlockSpec((1, rb, L), blk),
                       pl.BlockSpec((1, rb, L), blk)),
            scratch_shapes=[pltpu.VMEM((rb, L), jnp.float32),
                            pltpu.VMEM((rb, L), jnp.float32)]),
        compiler_params=pltpu.CompilerParams(
            dimension_semantics=("parallel", "arbitrary"),
            vmem_limit_bytes=_VMEM_LIMIT),
    )(c1, c3, vec(scale1), vec(shift1), vec(scale3), vec(shift3))


# -------- final stage: BN + LIF for both branches fused with the combine -----

def _bn_lif_combine_kernel(c2_ref, c4_ref, id_ref, s2_ref, h2_ref,
                           s4_ref, h4_ref, out_ref, v2_ref, v4_ref):
    @pl.when(pl.program_id(1) == 0)
    def _():
        v2_ref[...] = jnp.zeros_like(v2_ref)
        v4_ref[...] = jnp.zeros_like(v4_ref)

    decay = 1.0 - 1.0 / TAU

    x2 = c2_ref[0].astype(jnp.float32) * s2_ref[...] + h2_ref[...]
    v2 = v2_ref[...] * decay + x2
    out = (v2 >= V_TH).astype(jnp.float32)
    v2_ref[...] = v2 * (1.0 - out)

    x4 = c4_ref[0].astype(jnp.float32) * s4_ref[...] + h4_ref[...]
    v4 = v4_ref[...] * decay + x4
    out2 = (v4 >= V_TH).astype(jnp.float32)
    v4_ref[...] = v4 * (1.0 - out2)

    ident = id_ref[0].astype(jnp.float32)
    out_ref[0] = (ident * out
                  + (1.0 - ident) * out * (1.0 - out2)
                  + ident * (1.0 - out) * (1.0 - out2))


def bn_lif_combine(c2, c4, identity, scale2, shift2, scale4, shift4, *,
                   row_block=256):
    T, R, L = c2.shape
    rb = _pick_row_block(R, row_block)
    vec = lambda a: a.reshape(1, L)
    blk = lambda s, t: (t, s, 0)
    vspec = pl.BlockSpec((1, L), lambda s, t: (0, 0))
    return pl.pallas_call(
        _bn_lif_combine_kernel,
        out_shape=jax.ShapeDtypeStruct((T, R, L), jnp.float32),
        grid_spec=pltpu.PrefetchScalarGridSpec(
            num_scalar_prefetch=0,
            grid=(R // rb, T),
            in_specs=[pl.BlockSpec((1, rb, L), blk),
                      pl.BlockSpec((1, rb, L), blk),
                      pl.BlockSpec((1, rb, L), blk),
                      vspec, vspec, vspec, vspec],
            out_specs=pl.BlockSpec((1, rb, L), blk),
            scratch_shapes=[pltpu.VMEM((rb, L), jnp.float32),
                            pltpu.VMEM((rb, L), jnp.float32)]),
        compiler_params=pltpu.CompilerParams(
            dimension_semantics=("parallel", "arbitrary"),
            vmem_limit_bytes=_VMEM_LIMIT),
    )(c2, c4, identity, vec(scale2), vec(shift2), vec(scale4), vec(shift4))


# ---------------- BasicBlock forward ------------------------------------------

def torch_conv_weight_to_taps(w_oihw):
    """(Cout, Cin, 3, 3) -> (9, Cin, Cout), tap index = kh*3 + kw."""
    cout, cin = w_oihw.shape[0], w_oihw.shape[1]
    return jnp.transpose(w_oihw, (2, 3, 1, 0)).reshape(9, cin, cout)


def _bn_affine(mean, var, gamma, beta, width):
    """Per-channel BN affine, tiled over W so it lines up with (w, c) lanes."""
    inv_std = gamma * jax.lax.rsqrt(var + BN_EPS)
    scale = jnp.tile(inv_std, width)
    shift = jnp.tile(beta - mean * inv_std, width)
    return scale, shift


def basic_block_forward_nhwc(x_tnhwc, params, *, block_rows=1024, row_block=256):
    """BasicBlock forward, channels-last [T, N, H, W, C] in/out."""
    T, N, H, W, C = x_tnhwc.shape
    P = params["w1"].shape[-1]
    assert C == P, "stride=1 / downsample=None path needs inplanes == planes"

    x = x_tnhwc.astype(jnp.float32)
    L = W * P

    # --- stage A: conv1 || conv3 share the input -> one fused bf16 conv -----
    w13 = jnp.concatenate([params["w1"], params["w3"]],
                          axis=-1).astype(jnp.bfloat16)          # (9, C, 2P)
    (c1, c3), meanA, varA = conv3x3_bn_stats(x, w13, n_split=2,
                                             block_rows=block_rows)
    scale1, shift1 = _bn_affine(meanA[:P], varA[:P],
                                params["g1"], params["b1"], W)
    scale3, shift3 = _bn_affine(meanA[P:], varA[P:],
                                params["g3"], params["b3"], W)

    s1, s3 = bn_lif2(c1.reshape(T, N * H, L), c3.reshape(T, N * H, L),
                     scale1, shift1, scale3, shift3,
                     out_dtype=jnp.bfloat16, row_block=row_block)

    # --- stage B: conv2(spike1) and conv4(spike3), bf16 spikes + weights ----
    s1_im = s1.reshape(T, N, H, W, P)          # pure dim-split reshapes
    s3_im = s3.reshape(T, N, H, W, P)
    w2 = params["w2"].astype(jnp.bfloat16)
    w4 = params["w4"].astype(jnp.bfloat16)
    (c2,), mean2, var2 = conv3x3_bn_stats(s1_im, w2, block_rows=block_rows)
    (c4,), mean4, var4 = conv3x3_bn_stats(s3_im, w4, block_rows=block_rows)
    scale2, shift2 = _bn_affine(mean2, var2, params["g2"], params["b2"], W)
    scale4, shift4 = _bn_affine(mean4, var4, params["g4"], params["b4"], W)

    # --- stage C: BN+LIF for both branches fused with the residual combine --
    identity = x.reshape(T, N * H, L)           # downsample is None (f32)
    y = bn_lif_combine(c2.reshape(T, N * H, L), c4.reshape(T, N * H, L),
                       identity, scale2, shift2, scale4, shift4,
                       row_block=row_block)
    return y.reshape(T, N, H, W, P)


def basic_block_forward(x_tnchw, params, *, block_rows=1024, row_block=256):
    """NCHW wrapper. When chaining blocks, call basic_block_forward_nhwc
    directly to keep the activations channels-last and skip the transposes."""
    x = jnp.transpose(x_tnchw, (0, 1, 3, 4, 2))                  # (T,N,H,W,C)
    y = basic_block_forward_nhwc(x, params,
                                 block_rows=block_rows, row_block=row_block)
    return jnp.transpose(y, (0, 1, 4, 2, 3))                     # (T,N,C,H,W)


def init_params(key, inplanes, planes):
    ks = jax.random.split(key, 4)

    def conv_w(k, cin, cout):
        w = jax.random.normal(k, (cout, cin, 3, 3), jnp.float32)
        w = w * (1.0 / jnp.sqrt(9.0 * cin))
        return torch_conv_weight_to_taps(w)

    p = {
        "w1": conv_w(ks[0], inplanes, planes),
        "w2": conv_w(ks[1], planes, planes),
        "w3": conv_w(ks[2], inplanes, planes),
        "w4": conv_w(ks[3], planes, planes),
    }
    for i in range(1, 5):
        p[f"g{i}"] = jnp.ones((planes,), jnp.float32)    # BN weight
        p[f"b{i}"] = jnp.zeros((planes,), jnp.float32)   # BN bias
    return p


if __name__ == "__main__":
    # small, module-consistent shapes: time=4, batch=2, channels=8, 8x8 spatial
    T, N, C, H, W = 4, 2, 8, 8, 8
    key = jax.random.PRNGKey(0)
    kx, kp = jax.random.split(key)
    x = jax.random.normal(kx, (T, N, C, H, W), jnp.float32)
    params = init_params(kp, C, C)

    # Small block sizes here so the demo exercises multi-tile grids; defaults
    # (block_rows=1024, row_block=256) are the tuned sizes for real shapes.
    fwd = jax.jit(functools.partial(basic_block_forward,
                                    block_rows=256, row_block=8))
    y = jax.block_until_ready(fwd(x, params))

    assert y.shape == (T, N, C, H, W), y.shape
    assert bool(jnp.all(jnp.isfinite(y)))
    print("KERNEL_OK")
</pallas_src>

<mosaic_0001>
module attributes {stable_mosaic.version = 11 : i64} {
  func.func @_conv3x3_kernel(%arg0: i32, %arg1: memref<4x8x8x8xf32, #tpu.memory_space<vmem>>, %arg2: memref<9x8x16xbf16, #tpu.memory_space<vmem>>, %arg3: memref<256x8xbf16, #tpu.memory_space<vmem>>, %arg4: memref<256x8xbf16, #tpu.memory_space<vmem>>, %arg5: memref<1x8x16xf32, #tpu.memory_space<vmem>>, %arg6: memref<1x8x16xf32, #tpu.memory_space<vmem>>, %arg7: memref<4x10x10x8xbf16, #tpu.memory_space<vmem>>) attributes {dimension_semantics = [#tpu.dimension_semantics<parallel>], iteration_bounds = array<i64: 2>, scalar_prefetch = 0 : i64, scratch_operands = 1 : i64, tpu.core_type = #tpu.core_type<tc>, window_params = [{transform_indices = @transform_0, window_bounds = array<i64: 4, 8, 8, 8>}, {pipeline_mode = #tpu.pipeline_mode<synchronous>, transform_indices = @transform_1, window_bounds = array<i64: 9, 8, 16>}, {transform_indices = @transform_2, window_bounds = array<i64: 256, 8>}, {transform_indices = @transform_3, window_bounds = array<i64: 256, 8>}, {transform_indices = @transform_4, window_bounds = array<i64: 1, 8, 16>}, {transform_indices = @transform_5, window_bounds = array<i64: 1, 8, 16>}]} {
    %cst = arith.constant 0.000000e+00 : bf16
    %0 = vector.broadcast %cst : bf16 to vector<4x10x10x8xbf16>
    %c0 = arith.constant 0 : index
    %c0_0 = arith.constant 0 : index
    %c0_1 = arith.constant 0 : index
    %c0_2 = arith.constant 0 : index
    %1 = vector.load %arg7[%c0, %c0_0, %c0_1, %c0_2] : memref<4x10x10x8xbf16, #tpu.memory_space<vmem>>, vector<4x10x10x8xbf16>
    tpu.vector_store %arg7[%c0, %c0_0, %c0_1, %c0_2], %0 {strides = array<i32>} : memref<4x10x10x8xbf16, #tpu.memory_space<vmem>>, vector<4x10x10x8xbf16>,
    %c0_3 = arith.constant 0 : index
    %c0_4 = arith.constant 0 : index
    %c0_5 = arith.constant 0 : index
    %c0_6 = arith.constant 0 : index
    %2 = vector.load %arg1[%c0_3, %c0_4, %c0_5, %c0_6] : memref<4x8x8x8xf32, #tpu.memory_space<vmem>>, vector<4x8x8x8xf32>
    %3 = arith.truncf %2 : vector<4x8x8x8xf32> to vector<4x8x8x8xbf16>
    %c0_7 = arith.constant 0 : index
    %c1 = arith.constant 1 : index
    %c1_8 = arith.constant 1 : index
    %c0_9 = arith.constant 0 : index
    %4 = vector.load %arg7[%c0_7, %c1, %c1_8, %c0_9] : memref<4x10x10x8xbf16, #tpu.memory_space<vmem>>, vector<4x8x8x8xbf16>
    tpu.vector_store %arg7[%c0_7, %c1, %c1_8, %c0_9], %3 {strides = array<i32>} : memref<4x10x10x8xbf16, #tpu.memory_space<vmem>>, vector<4x8x8x8xbf16>,
    %c0_10 = arith.constant 0 : index
    %c0_11 = arith.constant 0 : index
    %c0_12 = arith.constant 0 : index
    %c0_13 = arith.constant 0 : index
    %5 = vector.load %arg7[%c0_10, %c0_11, %c0_12, %c0_13] : memref<4x10x10x8xbf16, #tpu.memory_space<vmem>>, vector<4x8x8x8xbf16>
    %6 = vector.shape_cast %5 : vector<4x8x8x8xbf16> to vector<256x8xbf16>
    %c0_14 = arith.constant 0 : index
    %c0_15 = arith.constant 0 : index
    %c0_16 = arith.constant 0 : index
    %7 = vector.load %arg2[%c0_14, %c0_15, %c0_16] : memref<9x8x16xbf16, #tpu.memory_space<vmem>>, vector<1x8x16xbf16>
    %8 = vector.shape_cast %7 : vector<1x8x16xbf16> to vector<8x16xbf16>
    %cst_17 = arith.constant dense<0.000000e+00> : vector<256x16xf32>
    %9 = tpu.matmul %6, %8, %cst_17 {dimension_numbers = #tpu.dot_dimension_numbers<[1], [0], [0], [1], [0, 0, 1, 1], [], []>} : vector<256x8xbf16>, vector<8x16xbf16>, vector<256x16xf32> -> vector<256x16xf32>
    %c0_18 = arith.constant 0 : index
    %c0_19 = arith.constant 0 : index
    %c1_20 = arith.constant 1 : index
    %c0_21 = arith.constant 0 : index
    %10 = vector.load %arg7[%c0_18, %c0_19, %c1_20, %c0_21] : memref<4x10x10x8xbf16, #tpu.memory_space<vmem>>, vector<4x8x8x8xbf16>
    %11 = vector.shape_cast %10 : vector<4x8x8x8xbf16> to vector<256x8xbf16>
    %c1_22 = arith.constant 1 : index
    %c0_23 = arith.constant 0 : index
    %c0_24 = arith.constant 0 : index
    %12 = vector.load %arg2[%c1_22, %c0_23, %c0_24] : memref<9x8x16xbf16, #tpu.memory_space<vmem>>, vector<1x8x16xbf16>
    %13 = vector.shape_cast %12 : vector<1x8x16xbf16> to vector<8x16xbf16>
    %cst_25 = arith.constant dense<0.000000e+00> : vector<256x16xf32>
    %14 = tpu.matmul %11, %13, %cst_25 {dimension_numbers = #tpu.dot_dimension_numbers<[1], [0], [0], [1], [0, 0, 1, 1], [], []>} : vector<256x8xbf16>, vector<8x16xbf16>, vector<256x16xf32> -> vector<256x16xf32>
    %15 = arith.addf %9, %14 : vector<256x16xf32>
    %c0_26 = arith.constant 0 : index
    %c0_27 = arith.constant 0 : index
    %c2 = arith.constant 2 : index
    %c0_28 = arith.constant 0 : index
    %16 = vector.load %arg7[%c0_26, %c0_27, %c2, %c0_28] : memref<4x10x10x8xbf16, #tpu.memory_space<vmem>>, vector<4x8x8x8xbf16>
    %17 = vector.shape_cast %16 : vector<4x8x8x8xbf16> to vector<256x8xbf16>
    %c2_29 = arith.constant 2 : index
    %c0_30 = arith.constant 0 : index
    %c0_31 = arith.constant 0 : index
    %18 = vector.load %arg2[%c2_29, %c0_30, %c0_31] : memref<9x8x16xbf16, #tpu.memory_space<vmem>>, vector<1x8x16xbf16>
    %19 = vector.shape_cast %18 : vector<1x8x16xbf16> to vector<8x16xbf16>
    %cst_32 = arith.constant dense<0.000000e+00> : vector<256x16xf32>
    %20 = tpu.matmul %17, %19, %cst_32 {dimension_numbers = #tpu.dot_dimension_numbers<[1], [0], [0], [1], [0, 0, 1, 1], [], []>} : vector<256x8xbf16>, vector<8x16xbf16>, vector<256x16xf32> -> vector<256x16xf32>
    %21 = arith.addf %15, %20 : vector<256x16xf32>
    %c0_33 = arith.constant 0 : index
    %c1_34 = arith.constant 1 : index
    %c0_35 = arith.constant 0 : index
    %c0_36 = arith.constant 0 : index
    %22 = vector.load %arg7[%c0_33, %c1_34, %c0_35, %c0_36] : memref<4x10x10x8xbf16, #tpu.memory_space<vmem>>, vector<4x8x8x8xbf16>
    %23 = vector.shape_cast %22 : vector<4x8x8x8xbf16> to vector<256x8xbf16>
    %c3 = arith.constant 3 : index
    %c0_37 = arith.constant 0 : index
    %c0_38 = arith.constant 0 : index
    %24 = vector.load %arg2[%c3, %c0_37, %c0_38] : memref<9x8x16xbf16, #tpu.memory_space<vmem>>, vector<1x8x16xbf16>
    %25 = vector.shape_cast %24 : vector<1x8x16xbf16> to vector<8x16xbf16>
    %cst_39 = arith.constant dense<0.000000e+00> : vector<256x16xf32>
    %26 = tpu.matmul %23, %25, %cst_39 {dimension_numbers = #tpu.dot_dimension_numbers<[1], [0], [0], [1], [0, 0, 1, 1], [], []>} : vector<256x8xbf16>, vector<8x16xbf16>, vector<256x16xf32> -> vector<256x16xf32>
    %27 = arith.addf %21, %26 : vector<256x16xf32>
    %c0_40 = arith.constant 0 : index
    %c1_41 = arith.constant 1 : index
    %c1_42 = arith.constant 1 : index
    %c0_43 = arith.constant 0 : index
    %28 = vector.load %arg7[%c0_40, %c1_41, %c1_42, %c0_43] : memref<4x10x10x8xbf16, #tpu.memory_space<vmem>>, vector<4x8x8x8xbf16>
    %29 = vector.shape_cast %28 : vector<4x8x8x8xbf16> to vector<256x8xbf16>
    %c4 = arith.constant 4 : index
    %c0_44 = arith.constant 0 : index
    %c0_45 = arith.constant 0 : index
    %30 = vector.load %arg2[%c4, %c0_44, %c0_45] : memref<9x8x16xbf16, #tpu.memory_space<vmem>>, vector<1x8x16xbf16>
    %31 = vector.shape_cast %30 : vector<1x8x16xbf16> to vector<8x16xbf16>
    %cst_46 = arith.constant dense<0.000000e+00> : vector<256x16xf32>
    %32 = tpu.matmul %29, %31, %cst_46 {dimension_numbers = #tpu.dot_dimension_numbers<[1], [0], [0], [1], [0, 0, 1, 1], [], []>} : vector<256x8xbf16>, vector<8x16xbf16>, vector<256x16xf32> -> vector<256x16xf32>
    %33 = arith.addf %27, %32 : vector<256x16xf32>
    %c0_47 = arith.constant 0 : index
    %c1_48 = arith.constant 1 : index
    %c2_49 = arith.constant 2 : index
    %c0_50 = arith.constant 0 : index
    %34 = vector.load %arg7[%c0_47, %c1_48, %c2_49, %c0_50] : memref<4x10x10x8xbf16, #tpu.memory_space<vmem>>, vector<4x8x8x8xbf16>
    %35 = vector.shape_cast %34 : vector<4x8x8x8xbf16> to vector<256x8xbf16>
    %c5 = arith.constant 5 : index
    %c0_51 = arith.constant 0 : index
    %c0_52 = arith.constant 0 : index
    %36 = vector.load %arg2[%c5, %c0_51, %c0_52] : memref<9x8x16xbf16, #tpu.memory_space<vmem>>, vector<1x8x16xbf16>
    %37 = vector.shape_cast %36 : vector<1x8x16xbf16> to vector<8x16xbf16>
    %cst_53 = arith.constant dense<0.000000e+00> : vector<256x16xf32>
    %38 = tpu.matmul %35, %37, %cst_53 {dimension_numbers = #tpu.dot_dimension_numbers<[1], [0], [0], [1], [0, 0, 1, 1], [], []>} : vector<256x8xbf16>, vector<8x16xbf16>, vector<256x16xf32> -> vector<256x16xf32>
    %39 = arith.addf %33, %38 : vector<256x16xf32>
    %c0_54 = arith.constant 0 : index
    %c2_55 = arith.constant 2 : index
    %c0_56 = arith.constant 0 : index
    %c0_57 = arith.constant 0 : index
    %40 = vector.load %arg7[%c0_54, %c2_55, %c0_56, %c0_57] : memref<4x10x10x8xbf16, #tpu.memory_space<vmem>>, vector<4x8x8x8xbf16>
    %41 = vector.shape_cast %40 : vector<4x8x8x8xbf16> to vector<256x8xbf16>
    %c6 = arith.constant 6 : index
    %c0_58 = arith.constant 0 : index
    %c0_59 = arith.constant 0 : index
    %42 = vector.load %arg2[%c6, %c0_58, %c0_59] : memref<9x8x16xbf16, #tpu.memory_space<vmem>>, vector<1x8x16xbf16>
    %43 = vector.shape_cast %42 : vector<1x8x16xbf16> to vector<8x16xbf16>
    %cst_60 = arith.constant dense<0.000000e+00> : vector<256x16xf32>
    %44 = tpu.matmul %41, %43, %cst_60 {dimension_numbers = #tpu.dot_dimension_numbers<[1], [0], [0], [1], [0, 0, 1, 1], [], []>} : vector<256x8xbf16>, vector<8x16xbf16>, vector<256x16xf32> -> vector<256x16xf32>
    %45 = arith.addf %39, %44 : vector<256x16xf32>
    %c0_61 = arith.constant 0 : index
    %c2_62 = arith.constant 2 : index
    %c1_63 = arith.constant 1 : index
    %c0_64 = arith.constant 0 : index
    %46 = vector.load %arg7[%c0_61, %c2_62, %c1_63, %c0_64] : memref<4x10x10x8xbf16, #tpu.memory_space<vmem>>, vector<4x8x8x8xbf16>
    %47 = vector.shape_cast %46 : vector<4x8x8x8xbf16> to vector<256x8xbf16>
    %c7 = arith.constant 7 : index
    %c0_65 = arith.constant 0 : index
    %c0_66 = arith.constant 0 : index
    %48 = vector.load %arg2[%c7, %c0_65, %c0_66] : memref<9x8x16xbf16, #tpu.memory_space<vmem>>, vector<1x8x16xbf16>
    %49 = vector.shape_cast %48 : vector<1x8x16xbf16> to vector<8x16xbf16>
    %cst_67 = arith.constant dense<0.000000e+00> : vector<256x16xf32>
    %50 = tpu.matmul %47, %49, %cst_67 {dimension_numbers = #tpu.dot_dimension_numbers<[1], [0], [0], [1], [0, 0, 1, 1], [], []>} : vector<256x8xbf16>, vector<8x16xbf16>, vector<256x16xf32> -> vector<256x16xf32>
    %51 = arith.addf %45, %50 : vector<256x16xf32>
    %c0_68 = arith.constant 0 : index
    %c2_69 = arith.constant 2 : index
    %c2_70 = arith.constant 2 : index
    %c0_71 = arith.constant 0 : index
    %52 = vector.load %arg7[%c0_68, %c2_69, %c2_70, %c0_71] : memref<4x10x10x8xbf16, #tpu.memory_space<vmem>>, vector<4x8x8x8xbf16>
    %53 = vector.shape_cast %52 : vector<4x8x8x8xbf16> to vector<256x8xbf16>
    %c8 = arith.constant 8 : index
    %c0_72 = arith.constant 0 : index
    %c0_73 = arith.constant 0 : index
    %54 = vector.load %arg2[%c8, %c0_72, %c0_73] : memref<9x8x16xbf16, #tpu.memory_space<vmem>>, vector<1x8x16xbf16>
    %55 = vector.shape_cast %54 : vector<1x8x16xbf16> to vector<8x16xbf16>
    %cst_74 = arith.constant dense<0.000000e+00> : vector<256x16xf32>
    %56 = tpu.matmul %53, %55, %cst_74 {dimension_numbers = #tpu.dot_dimension_numbers<[1], [0], [0], [1], [0, 0, 1, 1], [], []>} : vector<256x8xbf16>, vector<8x16xbf16>, vector<256x16xf32> -> vector<256x16xf32>
    %57 = arith.addf %51, %56 : vector<256x16xf32>
    %58 = vector.extract_strided_slice %57 {offsets = [0, 0], sizes = [256, 8], strides = [1, 1]} : vector<256x16xf32> to vector<256x8xf32>
    %59 = arith.truncf %58 : vector<256x8xf32> to vector<256x8xbf16>
    %c0_75 = arith.constant 0 : index
    %c0_76 = arith.constant 0 : index
    %60 = vector.load %arg3[%c0_75, %c0_76] : memref<256x8xbf16, #tpu.memory_space<vmem>>, vector<256x8xbf16>
    tpu.vector_store %arg3[%c0_75, %c0_76], %59 {strides = array<i32>} : memref<256x8xbf16, #tpu.memory_space<vmem>>, vector<256x8xbf16>,
    %61 = vector.extract_strided_slice %57 {offsets = [0, 8], sizes = [256, 8], strides = [1, 1]} : vector<256x16xf32> to vector<256x8xf32>
    %62 = arith.truncf %61 : vector<256x8xf32> to vector<256x8xbf16>
    %c0_77 = arith.constant 0 : index
    %c0_78 = arith.constant 0 : index
    %63 = vector.load %arg4[%c0_77, %c0_78] : memref<256x8xbf16, #tpu.memory_space<vmem>>, vector<256x8xbf16>
    tpu.vector_store %arg4[%c0_77, %c0_78], %62 {strides = array<i32>} : memref<256x8xbf16, #tpu.memory_space<vmem>>, vector<256x8xbf16>,
    %cst_79 = arith.constant dense<0.000000e+00> : vector<16xf32>
    %64 = vector.multi_reduction <add>, %57, %cst_79 [0] : vector<256x16xf32> to vector<16xf32>
    %65 = vector.shape_cast %64 : vector<16xf32> to vector<1x16xf32>
    %66 = arith.mulf %57, %57 : vector<256x16xf32>
    %cst_80 = arith.constant dense<0.000000e+00> : vector<16xf32>
    %67 = vector.multi_reduction <add>, %66, %cst_80 [0] : vector<256x16xf32> to vector<16xf32>
    %68 = vector.shape_cast %67 : vector<16xf32> to vector<1x16xf32>
    %69 = vector.shape_cast %65 : vector<1x16xf32> to vector<1x16xf32>
    %70 = vector.broadcast %69 : vector<1x16xf32> to vector<8x16xf32>
    %c0_81 = arith.constant 0 : index
    %c0_82 = arith.constant 0 : index
    %c0_83 = arith.constant 0 : index
    %71 = vector.load %arg5[%c0_81, %c0_82, %c0_83] : memref<1x8x16xf32, #tpu.memory_space<vmem>>, vector<1x8x16xf32>
    %72 = vector.shape_cast %71 : vector<1x8x16xf32> to vector<8x16xf32>
    %73 = vector.shape_cast %70 : vector<8x16xf32> to vector<1x8x16xf32>
    tpu.vector_store %arg5[%c0_81, %c0_82, %c0_83], %73 {strides = array<i32>} : memref<1x8x16xf32, #tpu.memory_space<vmem>>, vector<1x8x16xf32>,
    %74 = vector.shape_cast %68 : vector<1x16xf32> to vector<1x16xf32>
    %75 = vector.broadcast %74 : vector<1x16xf32> to vector<8x16xf32>
    %c0_84 = arith.constant 0 : index
    %c0_85 = arith.constant 0 : index
    %c0_86 = arith.constant 0 : index
    %76 = vector.load %arg6[%c0_84, %c0_85, %c0_86] : memref<1x8x16xf32, #tpu.memory_space<vmem>>, vector<1x8x16xf32>
    %77 = vector.shape_cast %76 : vector<1x8x16xf32> to vector<8x16xf32>
    %78 = vector.shape_cast %75 : vector<8x16xf32> to vector<1x8x16xf32>
    tpu.vector_store %arg6[%c0_84, %c0_85, %c0_86], %78 {strides = array<i32>} : memref<1x8x16xf32, #tpu.memory_space<vmem>>, vector<1x8x16xf32>,
    return
  }
  func.func @transform_0(%arg0: i32) -> (i32, i32, i32, i32) {
    %c0_i32 = arith.constant 0 : i32
    %c0_i32_0 = arith.constant 0 : i32
    %c0_i32_1 = arith.constant 0 : i32
    %c0_i32_2 = arith.constant 0 : i32
    return %arg0, %c0_i32, %c0_i32_0, %c0_i32_1 : i32, i32, i32, i32
  }
  func.func @transform_1(%arg0: i32) -> (i32, i32, i32) {
    %c0_i32 = arith.constant 0 : i32
    %c0_i32_0 = arith.constant 0 : i32
    %c0_i32_1 = arith.constant 0 : i32
    %c0_i32_2 = arith.constant 0 : i32
    return %c0_i32, %c0_i32_0, %c0_i32_1 : i32, i32, i32
  }
  func.func @transform_2(%arg0: i32) -> (i32, i32) {
    %c0_i32 = arith.constant 0 : i32
    %c0_i32_0 = arith.constant 0 : i32
    return %arg0, %c0_i32 : i32, i32
  }
  func.func @transform_3(%arg0: i32) -> (i32, i32) {
    %c0_i32 = arith.constant 0 : i32
    %c0_i32_0 = arith.constant 0 : i32
    return %arg0, %c0_i32 : i32, i32
  }
  func.func @transform_4(%arg0: i32) -> (i32, i32, i32) {
    %c0_i32 = arith.constant 0 : i32
    %c0_i32_0 = arith.constant 0 : i32
    %c0_i32_1 = arith.constant 0 : i32
    return %arg0, %c0_i32, %c0_i32_0 : i32, i32, i32
  }
  func.func @transform_5(%arg0: i32) -> (i32, i32, i32) {
    %c0_i32 = arith.constant 0 : i32
    %c0_i32_0 = arith.constant 0 : i32
    %c0_i32_1 = arith.constant 0 : i32
    return %arg0, %c0_i32, %c0_i32_0 : i32, i32, i32
  }
}

module attributes {stable_mosaic.version = 11 : i64} {
  func.func @_bn_lif2_kernel(%arg0: i32, %arg1: i32, %arg2: memref<1x8x64xbf16, #tpu.memory_space<vmem>>, %arg3: memref<1x8x64xbf16, #tpu.memory_space<vmem>>, %arg4: memref<1x64xf32, #tpu.memory_space<vmem>>, %arg5: memref<1x64xf32, #tpu.memory_space<vmem>>, %arg6: memref<1x64xf32, #tpu.memory_space<vmem>>, %arg7: memref<1x64xf32, #tpu.memory_space<vmem>>, %arg8: memref<1x8x64xbf16, #tpu.memory_space<vmem>>, %arg9: memref<1x8x64xbf16, #tpu.memory_space<vmem>>, %arg10: memref<8x64xf32, #tpu.memory_space<vmem>>, %arg11: memref<8x64xf32, #tpu.memory_space<vmem>>) attributes {dimension_semantics = [#tpu.dimension_semantics<parallel>, #tpu.dimension_semantics<arbitrary>], iteration_bounds = array<i64: 2, 4>, scalar_prefetch = 0 : i64, scratch_operands = 2 : i64, tpu.core_type = #tpu.core_type<tc>, window_params = [{transform_indices = @transform_0, window_bounds = array<i64: 1, 8, 64>}, {transform_indices = @transform_1, window_bounds = array<i64: 1, 8, 64>}, {pipeline_mode = #tpu.pipeline_mode<synchronous>, transform_indices = @transform_2, window_bounds = array<i64: 1, 64>}, {pipeline_mode = #tpu.pipeline_mode<synchronous>, transform_indices = @transform_3, window_bounds = array<i64: 1, 64>}, {pipeline_mode = #tpu.pipeline_mode<synchronous>, transform_indices = @transform_4, window_bounds = array<i64: 1, 64>}, {pipeline_mode = #tpu.pipeline_mode<synchronous>, transform_indices = @transform_5, window_bounds = array<i64: 1, 64>}, {transform_indices = @transform_6, window_bounds = array<i64: 1, 8, 64>}, {transform_indices = @transform_7, window_bounds = array<i64: 1, 8, 64>}]} {
    %c0_i32 = arith.constant 0 : i32
    %0 = arith.cmpi eq, %arg1, %c0_i32 : i32
    %1 = arith.extui %0 : i1 to i32
    %c0_i32_0 = arith.constant 0 : i32
    %2 = arith.cmpi ne, %1, %c0_i32_0 : i32
    scf.if %2 {
      %cst_33 = arith.constant 0.000000e+00 : f32
      %53 = vector.broadcast %cst_33 : f32 to vector<8x64xf32>
      %c0_34 = arith.constant 0 : index
      %c0_35 = arith.constant 0 : index
      %54 = vector.load %arg10[%c0_34, %c0_35] : memref<8x64xf32, #tpu.memory_space<vmem>>, vector<8x64xf32>
      tpu.vector_store %arg10[%c0_34, %c0_35], %53 {strides = array<i32>} : memref<8x64xf32, #tpu.memory_space<vmem>>, vector<8x64xf32>,
      %cst_36 = arith.constant 0.000000e+00 : f32
      %55 = vector.broadcast %cst_36 : f32 to vector<8x64xf32>
      %c0_37 = arith.constant 0 : index
      %c0_38 = arith.constant 0 : index
      %56 = vector.load %arg11[%c0_37, %c0_38] : memref<8x64xf32, #tpu.memory_space<vmem>>, vector<8x64xf32>
      tpu.vector_store %arg11[%c0_37, %c0_38], %55 {strides = array<i32>} : memref<8x64xf32, #tpu.memory_space<vmem>>, vector<8x64xf32>,
    } else {
    }
    %c0 = arith.constant 0 : index
    %c0_1 = arith.constant 0 : index
    %c0_2 = arith.constant 0 : index
    %3 = vector.load %arg2[%c0, %c0_1, %c0_2] : memref<1x8x64xbf16, #tpu.memory_space<vmem>>, vector<1x8x64xbf16>
    %4 = vector.shape_cast %3 : vector<1x8x64xbf16> to vector<8x64xbf16>
    %5 = arith.extf %4 : vector<8x64xbf16> to vector<8x64xf32>
    %c0_3 = arith.constant 0 : index
    %c0_4 = arith.constant 0 : index
    %6 = vector.load %arg4[%c0_3, %c0_4] : memref<1x64xf32, #tpu.memory_space<vmem>>, vector<1x64xf32>
    %7 = vector.broadcast %6 : vector<1x64xf32> to vector<8x64xf32>
    %8 = arith.mulf %5, %7 : vector<8x64xf32>
    %c0_5 = arith.constant 0 : index
    %c0_6 = arith.constant 0 : index
    %9 = vector.load %arg5[%c0_5, %c0_6] : memref<1x64xf32, #tpu.memory_space<vmem>>, vector<1x64xf32>
    %10 = vector.broadcast %9 : vector<1x64xf32> to vector<8x64xf32>
    %11 = arith.addf %8, %10 : vector<8x64xf32>
    %c0_7 = arith.constant 0 : index
    %c0_8 = arith.constant 0 : index
    %12 = vector.load %arg10[%c0_7, %c0_8] : memref<8x64xf32, #tpu.memory_space<vmem>>, vector<8x64xf32>
    %cst = arith.constant 5.000000e-01 : f32
    %13 = vector.broadcast %cst : f32 to vector<8x64xf32>
    %14 = arith.mulf %12, %13 : vector<8x64xf32>
    %15 = arith.addf %14, %11 : vector<8x64xf32>
    %cst_9 = arith.constant 1.000000e+00 : f32
    %16 = vector.broadcast %cst_9 : f32 to vector<8x64xf32>
    %17 = arith.cmpf oge, %15, %16 : vector<8x64xf32>
    %18 = arith.extui %17 : vector<8x64xi1> to vector<8x64xi32>
    %19 = arith.sitofp %18 : vector<8x64xi32> to vector<8x64xf32>
    %cst_10 = arith.constant 1.000000e+00 : f32
    %20 = vector.broadcast %cst_10 : f32 to vector<8x64xf32>
    %21 = arith.subf %20, %19 : vector<8x64xf32>
    %22 = arith.mulf %15, %21 : vector<8x64xf32>
    %c0_11 = arith.constant 0 : index
    %c0_12 = arith.constant 0 : index
    %23 = vector.load %arg10[%c0_11, %c0_12] : memref<8x64xf32, #tpu.memory_space<vmem>>, vector<8x64xf32>
    tpu.vector_store %arg10[%c0_11, %c0_12], %22 {strides = array<i32>} : memref<8x64xf32, #tpu.memory_space<vmem>>, vector<8x64xf32>,
    %24 = arith.truncf %19 : vector<8x64xf32> to vector<8x64xbf16>
    %c0_13 = arith.constant 0 : index
    %c0_14 = arith.constant 0 : index
    %c0_15 = arith.constant 0 : index
    %25 = vector.load %arg8[%c0_13, %c0_14, %c0_15] : memref<1x8x64xbf16, #tpu.memory_space<vmem>>, vector<1x8x64xbf16>
    %26 = vector.shape_cast %25 : vector<1x8x64xbf16> to vector<8x64xbf16>
    %27 = vector.shape_cast %24 : vector<8x64xbf16> to vector<1x8x64xbf16>
    tpu.vector_store %arg8[%c0_13, %c0_14, %c0_15], %27 {strides = array<i32>} : memref<1x8x64xbf16, #tpu.memory_space<vmem>>, vector<1x8x64xbf16>,
    %c0_16 = arith.constant 0 : index
    %c0_17 = arith.constant 0 : index
    %c0_18 = arith.constant 0 : index
    %28 = vector.load %arg3[%c0_16, %c0_17, %c0_18] : memref<1x8x64xbf16, #tpu.memory_space<vmem>>, vector<1x8x64xbf16>
    %29 = vector.shape_cast %28 : vector<1x8x64xbf16> to vector<8x64xbf16>
    %30 = arith.extf %29 : vector<8x64xbf16> to vector<8x64xf32>
    %c0_19 = arith.constant 0 : index
    %c0_20 = arith.constant 0 : index
    %31 = vector.load %arg6[%c0_19, %c0_20] : memref<1x64xf32, #tpu.memory_space<vmem>>, vector<1x64xf32>
    %32 = vector.broadcast %31 : vector<1x64xf32> to vector<8x64xf32>
    %33 = arith.mulf %30, %32 : vector<8x64xf32>
    %c0_21 = arith.constant 0 : index
    %c0_22 = arith.constant 0 : index
    %34 = vector.load %arg7[%c0_21, %c0_22] : memref<1x64xf32, #tpu.memory_space<vmem>>, vector<1x64xf32>
    %35 = vector.broadcast %34 : vector<1x64xf32> to vector<8x64xf32>
    %36 = arith.addf %33, %35 : vector<8x64xf32>
    %c0_23 = arith.constant 0 : index
    %c0_24 = arith.constant 0 : index
    %37 = vector.load %arg11[%c0_23, %c0_24] : memref<8x64xf32, #tpu.memory_space<vmem>>, vector<8x64xf32>
    %cst_25 = arith.constant 5.000000e-01 : f32
    %38 = vector.broadcast %cst_25 : f32 to vector<8x64xf32>
    %39 = arith.mulf %37, %38 : vector<8x64xf32>
    %40 = arith.addf %39, %36 : vector<8x64xf32>
    %cst_26 = arith.constant 1.000000e+00 : f32
    %41 = vector.broadcast %cst_26 : f32 to vector<8x64xf32>
    %42 = arith.cmpf oge, %40, %41 : vector<8x64xf32>
    %43 = arith.extui %42 : vector<8x64xi1> to vector<8x64xi32>
    %44 = arith.sitofp %43 : vector<8x64xi32> to vector<8x64xf32>
    %cst_27 = arith.constant 1.000000e+00 : f32
    %45 = vector.broadcast %cst_27 : f32 to vector<8x64xf32>
    %46 = arith.subf %45, %44 : vector<8x64xf32>
    %47 = arith.mulf %40, %46 : vector<8x64xf32>
    %c0_28 = arith.constant 0 : index
    %c0_29 = arith.constant 0 : index
    %48 = vector.load %arg11[%c0_28, %c0_29] : memref<8x64xf32, #tpu.memory_space<vmem>>, vector<8x64xf32>
    tpu.vector_store %arg11[%c0_28, %c0_29], %47 {strides = array<i32>} : memref<8x64xf32, #tpu.memory_space<vmem>>, vector<8x64xf32>,
    %49 = arith.truncf %44 : vector<8x64xf32> to vector<8x64xbf16>
    %c0_30 = arith.constant 0 : index
    %c0_31 = arith.constant 0 : index
    %c0_32 = arith.constant 0 : index
    %50 = vector.load %arg9[%c0_30, %c0_31, %c0_32] : memref<1x8x64xbf16, #tpu.memory_space<vmem>>, vector<1x8x64xbf16>
    %51 = vector.shape_cast %50 : vector<1x8x64xbf16> to vector<8x64xbf16>
    %52 = vector.shape_cast %49 : vector<8x64xbf16> to vector<1x8x64xbf16>
    tpu.vector_store %arg9[%c0_30, %c0_31, %c0_32], %52 {strides = array<i32>} : memref<1x8x64xbf16, #tpu.memory_space<vmem>>, vector<1x8x64xbf16>,
    return
  }
  func.func @transform_0(%arg0: i32, %arg1: i32) -> (i32, i32, i32) {
    %c0_i32 = arith.constant 0 : i32
    %c0_i32_0 = arith.constant 0 : i32
    return %arg1, %arg0, %c0_i32 : i32, i32, i32
  }
  func.func @transform_1(%arg0: i32, %arg1: i32) -> (i32, i32, i32) {
    %c0_i32 = arith.constant 0 : i32
    %c0_i32_0 = arith.constant 0 : i32
    return %arg1, %arg0, %c0_i32 : i32, i32, i32
  }
  func.func @transform_2(%arg0: i32, %arg1: i32) -> (i32, i32) {
    %c0_i32 = arith.constant 0 : i32
    %c0_i32_0 = arith.constant 0 : i32
    %c0_i32_1 = arith.constant 0 : i32
    return %c0_i32, %c0_i32_0 : i32, i32
  }
  func.func @transform_3(%arg0: i32, %arg1: i32) -> (i32, i32) {
    %c0_i32 = arith.constant 0 : i32
    %c0_i32_0 = arith.constant 0 : i32
    %c0_i32_1 = arith.constant 0 : i32
    return %c0_i32, %c0_i32_0 : i32, i32
  }
  func.func @transform_4(%arg0: i32, %arg1: i32) -> (i32, i32) {
    %c0_i32 = arith.constant 0 : i32
    %c0_i32_0 = arith.constant 0 : i32
    %c0_i32_1 = arith.constant 0 : i32
    return %c0_i32, %c0_i32_0 : i32, i32
  }
  func.func @transform_5(%arg0: i32, %arg1: i32) -> (i32, i32) {
    %c0_i32 = arith.constant 0 : i32
    %c0_i32_0 = arith.constant 0 : i32
    %c0_i32_1 = arith.constant 0 : i32
    return %c0_i32, %c0_i32_0 : i32, i32
  }
  func.func @transform_6(%arg0: i32, %arg1: i32) -> (i32, i32, i32) {
    %c0_i32 = arith.constant 0 : i32
    %c0_i32_0 = arith.constant 0 : i32
    return %arg1, %arg0, %c0_i32 : i32, i32, i32
  }
  func.func @transform_7(%arg0: i32, %arg1: i32) -> (i32, i32, i32) {
    %c0_i32 = arith.constant 0 : i32
    %c0_i32_0 = arith.constant 0 : i32
    return %arg1, %arg0, %c0_i32 : i32, i32, i32
  }
}

module attributes {stable_mosaic.version = 11 : i64} {
  func.func @_conv3x3_kernel(%arg0: i32, %arg1: memref<4x8x8x8xbf16, #tpu.memory_space<vmem>>, %arg2: memref<9x8x8xbf16, #tpu.memory_space<vmem>>, %arg3: memref<256x8xbf16, #tpu.memory_space<vmem>>, %arg4: memref<1x8x8xf32, #tpu.memory_space<vmem>>, %arg5: memref<1x8x8xf32, #tpu.memory_space<vmem>>, %arg6: memref<4x10x10x8xbf16, #tpu.memory_space<vmem>>) attributes {dimension_semantics = [#tpu.dimension_semantics<parallel>], iteration_bounds = array<i64: 2>, scalar_prefetch = 0 : i64, scratch_operands = 1 : i64, tpu.core_type = #tpu.core_type<tc>, window_params = [{transform_indices = @transform_0, window_bounds = array<i64: 4, 8, 8, 8>}, {pipeline_mode = #tpu.pipeline_mode<synchronous>, transform_indices = @transform_1, window_bounds = array<i64: 9, 8, 8>}, {transform_indices = @transform_2, window_bounds = array<i64: 256, 8>}, {transform_indices = @transform_3, window_bounds = array<i64: 1, 8, 8>}, {transform_indices = @transform_4, window_bounds = array<i64: 1, 8, 8>}]} {
    %cst = arith.constant 0.000000e+00 : bf16
    %0 = vector.broadcast %cst : bf16 to vector<4x10x10x8xbf16>
    %c0 = arith.constant 0 : index
    %c0_0 = arith.constant 0 : index
    %c0_1 = arith.constant 0 : index
    %c0_2 = arith.constant 0 : index
    %1 = vector.load %arg6[%c0, %c0_0, %c0_1, %c0_2] : memref<4x10x10x8xbf16, #tpu.memory_space<vmem>>, vector<4x10x10x8xbf16>
    tpu.vector_store %arg6[%c0, %c0_0, %c0_1, %c0_2], %0 {strides = array<i32>} : memref<4x10x10x8xbf16, #tpu.memory_space<vmem>>, vector<4x10x10x8xbf16>,
    %c0_3 = arith.constant 0 : index
    %c0_4 = arith.constant 0 : index
    %c0_5 = arith.constant 0 : index
    %c0_6 = arith.constant 0 : index
    %2 = vector.load %arg1[%c0_3, %c0_4, %c0_5, %c0_6] : memref<4x8x8x8xbf16, #tpu.memory_space<vmem>>, vector<4x8x8x8xbf16>
    %c0_7 = arith.constant 0 : index
    %c1 = arith.constant 1 : index
    %c1_8 = arith.constant 1 : index
    %c0_9 = arith.constant 0 : index
    %3 = vector.load %arg6[%c0_7, %c1, %c1_8, %c0_9] : memref<4x10x10x8xbf16, #tpu.memory_space<vmem>>, vector<4x8x8x8xbf16>
    tpu.vector_store %arg6[%c0_7, %c1, %c1_8, %c0_9], %2 {strides = array<i32>} : memref<4x10x10x8xbf16, #tpu.memory_space<vmem>>, vector<4x8x8x8xbf16>,
    %c0_10 = arith.constant 0 : index
    %c0_11 = arith.constant 0 : index
    %c0_12 = arith.constant 0 : index
    %c0_13 = arith.constant 0 : index
    %4 = vector.load %arg6[%c0_10, %c0_11, %c0_12, %c0_13] : memref<4x10x10x8xbf16, #tpu.memory_space<vmem>>, vector<4x8x8x8xbf16>
    %5 = vector.shape_cast %4 : vector<4x8x8x8xbf16> to vector<256x8xbf16>
    %c0_14 = arith.constant 0 : index
    %c0_15 = arith.constant 0 : index
    %c0_16 = arith.constant 0 : index
    %6 = vector.load %arg2[%c0_14, %c0_15, %c0_16] : memref<9x8x8xbf16, #tpu.memory_space<vmem>>, vector<1x8x8xbf16>
    %7 = vector.shape_cast %6 : vector<1x8x8xbf16> to vector<8x8xbf16>
    %cst_17 = arith.constant dense<0.000000e+00> : vector<256x8xf32>
    %8 = tpu.matmul %5, %7, %cst_17 {dimension_numbers = #tpu.dot_dimension_numbers<[1], [0], [0], [1], [0, 0, 1, 1], [], []>} : vector<256x8xbf16>, vector<8x8xbf16>, vector<256x8xf32> -> vector<256x8xf32>
    %c0_18 = arith.constant 0 : index
    %c0_19 = arith.constant 0 : index
    %c1_20 = arith.constant 1 : index
    %c0_21 = arith.constant 0 : index
    %9 = vector.load %arg6[%c0_18, %c0_19, %c1_20, %c0_21] : memref<4x10x10x8xbf16, #tpu.memory_space<vmem>>, vector<4x8x8x8xbf16>
    %10 = vector.shape_cast %9 : vector<4x8x8x8xbf16> to vector<256x8xbf16>
    %c1_22 = arith.constant 1 : index
    %c0_23 = arith.constant 0 : index
    %c0_24 = arith.constant 0 : index
    %11 = vector.load %arg2[%c1_22, %c0_23, %c0_24] : memref<9x8x8xbf16, #tpu.memory_space<vmem>>, vector<1x8x8xbf16>
    %12 = vector.shape_cast %11 : vector<1x8x8xbf16> to vector<8x8xbf16>
    %cst_25 = arith.constant dense<0.000000e+00> : vector<256x8xf32>
    %13 = tpu.matmul %10, %12, %cst_25 {dimension_numbers = #tpu.dot_dimension_numbers<[1], [0], [0], [1], [0, 0, 1, 1], [], []>} : vector<256x8xbf16>, vector<8x8xbf16>, vector<256x8xf32> -> vector<256x8xf32>
    %14 = arith.addf %8, %13 : vector<256x8xf32>
    %c0_26 = arith.constant 0 : index
    %c0_27 = arith.constant 0 : index
    %c2 = arith.constant 2 : index
    %c0_28 = arith.constant 0 : index
    %15 = vector.load %arg6[%c0_26, %c0_27, %c2, %c0_28] : memref<4x10x10x8xbf16, #tpu.memory_space<vmem>>, vector<4x8x8x8xbf16>
    %16 = vector.shape_cast %15 : vector<4x8x8x8xbf16> to vector<256x8xbf16>
    %c2_29 = arith.constant 2 : index
    %c0_30 = arith.constant 0 : index
    %c0_31 = arith.constant 0 : index
    %17 = vector.load %arg2[%c2_29, %c0_30, %c0_31] : memref<9x8x8xbf16, #tpu.memory_space<vmem>>, vector<1x8x8xbf16>
    %18 = vector.shape_cast %17 : vector<1x8x8xbf16> to vector<8x8xbf16>
    %cst_32 = arith.constant dense<0.000000e+00> : vector<256x8xf32>
    %19 = tpu.matmul %16, %18, %cst_32 {dimension_numbers = #tpu.dot_dimension_numbers<[1], [0], [0], [1], [0, 0, 1, 1], [], []>} : vector<256x8xbf16>, vector<8x8xbf16>, vector<256x8xf32> -> vector<256x8xf32>
    %20 = arith.addf %14, %19 : vector<256x8xf32>
    %c0_33 = arith.constant 0 : index
    %c1_34 = arith.constant 1 : index
    %c0_35 = arith.constant 0 : index
    %c0_36 = arith.constant 0 : index
    %21 = vector.load %arg6[%c0_33, %c1_34, %c0_35, %c0_36] : memref<4x10x10x8xbf16, #tpu.memory_space<vmem>>, vector<4x8x8x8xbf16>
    %22 = vector.shape_cast %21 : vector<4x8x8x8xbf16> to vector<256x8xbf16>
    %c3 = arith.constant 3 : index
    %c0_37 = arith.constant 0 : index
    %c0_38 = arith.constant 0 : index
    %23 = vector.load %arg2[%c3, %c0_37, %c0_38] : memref<9x8x8xbf16, #tpu.memory_space<vmem>>, vector<1x8x8xbf16>
    %24 = vector.shape_cast %23 : vector<1x8x8xbf16> to vector<8x8xbf16>
    %cst_39 = arith.constant dense<0.000000e+00> : vector<256x8xf32>
    %25 = tpu.matmul %22, %24, %cst_39 {dimension_numbers = #tpu.dot_dimension_numbers<[1], [0], [0], [1], [0, 0, 1, 1], [], []>} : vector<256x8xbf16>, vector<8x8xbf16>, vector<256x8xf32> -> vector<256x8xf32>
    %26 = arith.addf %20, %25 : vector<256x8xf32>
    %c0_40 = arith.constant 0 : index
    %c1_41 = arith.constant 1 : index
    %c1_42 = arith.constant 1 : index
    %c0_43 = arith.constant 0 : index
    %27 = vector.load %arg6[%c0_40, %c1_41, %c1_42, %c0_43] : memref<4x10x10x8xbf16, #tpu.memory_space<vmem>>, vector<4x8x8x8xbf16>
    %28 = vector.shape_cast %27 : vector<4x8x8x8xbf16> to vector<256x8xbf16>
    %c4 = arith.constant 4 : index
    %c0_44 = arith.constant 0 : index
    %c0_45 = arith.constant 0 : index
    %29 = vector.load %arg2[%c4, %c0_44, %c0_45] : memref<9x8x8xbf16, #tpu.memory_space<vmem>>, vector<1x8x8xbf16>
    %30 = vector.shape_cast %29 : vector<1x8x8xbf16> to vector<8x8xbf16>
    %cst_46 = arith.constant dense<0.000000e+00> : vector<256x8xf32>
    %31 = tpu.matmul %28, %30, %cst_46 {dimension_numbers = #tpu.dot_dimension_numbers<[1], [0], [0], [1], [0, 0, 1, 1], [], []>} : vector<256x8xbf16>, vector<8x8xbf16>, vector<256x8xf32> -> vector<256x8xf32>
    %32 = arith.addf %26, %31 : vector<256x8xf32>
    %c0_47 = arith.constant 0 : index
    %c1_48 = arith.constant 1 : index
    %c2_49 = arith.constant 2 : index
    %c0_50 = arith.constant 0 : index
    %33 = vector.load %arg6[%c0_47, %c1_48, %c2_49, %c0_50] : memref<4x10x10x8xbf16, #tpu.memory_space<vmem>>, vector<4x8x8x8xbf16>
    %34 = vector.shape_cast %33 : vector<4x8x8x8xbf16> to vector<256x8xbf16>
    %c5 = arith.constant 5 : index
    %c0_51 = arith.constant 0 : index
    %c0_52 = arith.constant 0 : index
    %35 = vector.load %arg2[%c5, %c0_51, %c0_52] : memref<9x8x8xbf16, #tpu.memory_space<vmem>>, vector<1x8x8xbf16>
    %36 = vector.shape_cast %35 : vector<1x8x8xbf16> to vector<8x8xbf16>
    %cst_53 = arith.constant dense<0.000000e+00> : vector<256x8xf32>
    %37 = tpu.matmul %34, %36, %cst_53 {dimension_numbers = #tpu.dot_dimension_numbers<[1], [0], [0], [1], [0, 0, 1, 1], [], []>} : vector<256x8xbf16>, vector<8x8xbf16>, vector<256x8xf32> -> vector<256x8xf32>
    %38 = arith.addf %32, %37 : vector<256x8xf32>
    %c0_54 = arith.constant 0 : index
    %c2_55 = arith.constant 2 : index
    %c0_56 = arith.constant 0 : index
    %c0_57 = arith.constant 0 : index
    %39 = vector.load %arg6[%c0_54, %c2_55, %c0_56, %c0_57] : memref<4x10x10x8xbf16, #tpu.memory_space<vmem>>, vector<4x8x8x8xbf16>
    %40 = vector.shape_cast %39 : vector<4x8x8x8xbf16> to vector<256x8xbf16>
    %c6 = arith.constant 6 : index
    %c0_58 = arith.constant 0 : index
    %c0_59 = arith.constant 0 : index
    %41 = vector.load %arg2[%c6, %c0_58, %c0_59] : memref<9x8x8xbf16, #tpu.memory_space<vmem>>, vector<1x8x8xbf16>
    %42 = vector.shape_cast %41 : vector<1x8x8xbf16> to vector<8x8xbf16>
    %cst_60 = arith.constant dense<0.000000e+00> : vector<256x8xf32>
    %43 = tpu.matmul %40, %42, %cst_60 {dimension_numbers = #tpu.dot_dimension_numbers<[1], [0], [0], [1], [0, 0, 1, 1], [], []>} : vector<256x8xbf16>, vector<8x8xbf16>, vector<256x8xf32> -> vector<256x8xf32>
    %44 = arith.addf %38, %43 : vector<256x8xf32>
    %c0_61 = arith.constant 0 : index
    %c2_62 = arith.constant 2 : index
    %c1_63 = arith.constant 1 : index
    %c0_64 = arith.constant 0 : index
    %45 = vector.load %arg6[%c0_61, %c2_62, %c1_63, %c0_64] : memref<4x10x10x8xbf16, #tpu.memory_space<vmem>>, vector<4x8x8x8xbf16>
    %46 = vector.shape_cast %45 : vector<4x8x8x8xbf16> to vector<256x8xbf16>
    %c7 = arith.constant 7 : index
    %c0_65 = arith.constant 0 : index
    %c0_66 = arith.constant 0 : index
    %47 = vector.load %arg2[%c7, %c0_65, %c0_66] : memref<9x8x8xbf16, #tpu.memory_space<vmem>>, vector<1x8x8xbf16>
    %48 = vector.shape_cast %47 : vector<1x8x8xbf16> to vector<8x8xbf16>
    %cst_67 = arith.constant dense<0.000000e+00> : vector<256x8xf32>
    %49 = tpu.matmul %46, %48, %cst_67 {dimension_numbers = #tpu.dot_dimension_numbers<[1], [0], [0], [1], [0, 0, 1, 1], [], []>} : vector<256x8xbf16>, vector<8x8xbf16>, vector<256x8xf32> -> vector<256x8xf32>
    %50 = arith.addf %44, %49 : vector<256x8xf32>
    %c0_68 = arith.constant 0 : index
    %c2_69 = arith.constant 2 : index
    %c2_70 = arith.constant 2 : index
    %c0_71 = arith.constant 0 : index
    %51 = vector.load %arg6[%c0_68, %c2_69, %c2_70, %c0_71] : memref<4x10x10x8xbf16, #tpu.memory_space<vmem>>, vector<4x8x8x8xbf16>
    %52 = vector.shape_cast %51 : vector<4x8x8x8xbf16> to vector<256x8xbf16>
    %c8 = arith.constant 8 : index
    %c0_72 = arith.constant 0 : index
    %c0_73 = arith.constant 0 : index
    %53 = vector.load %arg2[%c8, %c0_72, %c0_73] : memref<9x8x8xbf16, #tpu.memory_space<vmem>>, vector<1x8x8xbf16>
    %54 = vector.shape_cast %53 : vector<1x8x8xbf16> to vector<8x8xbf16>
    %cst_74 = arith.constant dense<0.000000e+00> : vector<256x8xf32>
    %55 = tpu.matmul %52, %54, %cst_74 {dimension_numbers = #tpu.dot_dimension_numbers<[1], [0], [0], [1], [0, 0, 1, 1], [], []>} : vector<256x8xbf16>, vector<8x8xbf16>, vector<256x8xf32> -> vector<256x8xf32>
    %56 = arith.addf %50, %55 : vector<256x8xf32>
    %57 = arith.truncf %56 : vector<256x8xf32> to vector<256x8xbf16>
    %c0_75 = arith.constant 0 : index
    %c0_76 = arith.constant 0 : index
    %58 = vector.load %arg3[%c0_75, %c0_76] : memref<256x8xbf16, #tpu.memory_space<vmem>>, vector<256x8xbf16>
    tpu.vector_store %arg3[%c0_75, %c0_76], %57 {strides = array<i32>} : memref<256x8xbf16, #tpu.memory_space<vmem>>, vector<256x8xbf16>,
    %cst_77 = arith.constant dense<0.000000e+00> : vector<8xf32>
    %59 = vector.multi_reduction <add>, %56, %cst_77 [0] : vector<256x8xf32> to vector<8xf32>
    %60 = vector.shape_cast %59 : vector<8xf32> to vector<1x8xf32>
    %61 = arith.mulf %56, %56 : vector<256x8xf32>
    %cst_78 = arith.constant dense<0.000000e+00> : vector<8xf32>
    %62 = vector.multi_reduction <add>, %61, %cst_78 [0] : vector<256x8xf32> to vector<8xf32>
    %63 = vector.shape_cast %62 : vector<8xf32> to vector<1x8xf32>
    %64 = vector.shape_cast %60 : vector<1x8xf32> to vector<1x8xf32>
    %65 = vector.broadcast %64 : vector<1x8xf32> to vector<8x8xf32>
    %c0_79 = arith.constant 0 : index
    %c0_80 = arith.constant 0 : index
    %c0_81 = arith.constant 0 : index
    %66 = vector.load %arg4[%c0_79, %c0_80, %c0_81] : memref<1x8x8xf32, #tpu.memory_space<vmem>>, vector<1x8x8xf32>
    %67 = vector.shape_cast %66 : vector<1x8x8xf32> to vector<8x8xf32>
    %68 = vector.shape_cast %65 : vector<8x8xf32> to vector<1x8x8xf32>
    tpu.vector_store %arg4[%c0_79, %c0_80, %c0_81], %68 {strides = array<i32>} : memref<1x8x8xf32, #tpu.memory_space<vmem>>, vector<1x8x8xf32>,
    %69 = vector.shape_cast %63 : vector<1x8xf32> to vector<1x8xf32>
    %70 = vector.broadcast %69 : vector<1x8xf32> to vector<8x8xf32>
    %c0_82 = arith.constant 0 : index
    %c0_83 = arith.constant 0 : index
    %c0_84 = arith.constant 0 : index
    %71 = vector.load %arg5[%c0_82, %c0_83, %c0_84] : memref<1x8x8xf32, #tpu.memory_space<vmem>>, vector<1x8x8xf32>
    %72 = vector.shape_cast %71 : vector<1x8x8xf32> to vector<8x8xf32>
    %73 = vector.shape_cast %70 : vector<8x8xf32> to vector<1x8x8xf32>
    tpu.vector_store %arg5[%c0_82, %c0_83, %c0_84], %73 {strides = array<i32>} : memref<1x8x8xf32, #tpu.memory_space<vmem>>, vector<1x8x8xf32>,
    return
  }
  func.func @transform_0(%arg0: i32) -> (i32, i32, i32, i32) {
    %c0_i32 = arith.constant 0 : i32
    %c0_i32_0 = arith.constant 0 : i32
    %c0_i32_1 = arith.constant 0 : i32
    %c0_i32_2 = arith.constant 0 : i32
    return %arg0, %c0_i32, %c0_i32_0, %c0_i32_1 : i32, i32, i32, i32
  }
  func.func @transform_1(%arg0: i32) -> (i32, i32, i32) {
    %c0_i32 = arith.constant 0 : i32
    %c0_i32_0 = arith.constant 0 : i32
    %c0_i32_1 = arith.constant 0 : i32
    %c0_i32_2 = arith.constant 0 : i32
    return %c0_i32, %c0_i32_0, %c0_i32_1 : i32, i32, i32
  }
  func.func @transform_2(%arg0: i32) -> (i32, i32) {
    %c0_i32 = arith.constant 0 : i32
    %c0_i32_0 = arith.constant 0 : i32
    return %arg0, %c0_i32 : i32, i32
  }
  func.func @transform_3(%arg0: i32) -> (i32, i32, i32) {
    %c0_i32 = arith.constant 0 : i32
    %c0_i32_0 = arith.constant 0 : i32
    %c0_i32_1 = arith.constant 0 : i32
    return %arg0, %c0_i32, %c0_i32_0 : i32, i32, i32
  }
  func.func @transform_4(%arg0: i32) -> (i32, i32, i32) {
    %c0_i32 = arith.constant 0 : i32
    %c0_i32_0 = arith.constant 0 : i32
    %c0_i32_1 = arith.constant 0 : i32
    return %arg0, %c0_i32, %c0_i32_0 : i32, i32, i32
  }
}

module attributes {stable_mosaic.version = 11 : i64} {
  func.func @_bn_lif_combine_kernel(%arg0: i32, %arg1: i32, %arg2: memref<1x8x64xbf16, #tpu.memory_space<vmem>>, %arg3: memref<1x8x64xbf16, #tpu.memory_space<vmem>>, %arg4: memref<1x8x64xf32, #tpu.memory_space<vmem>>, %arg5: memref<1x64xf32, #tpu.memory_space<vmem>>, %arg6: memref<1x64xf32, #tpu.memory_space<vmem>>, %arg7: memref<1x64xf32, #tpu.memory_space<vmem>>, %arg8: memref<1x64xf32, #tpu.memory_space<vmem>>, %arg9: memref<1x8x64xf32, #tpu.memory_space<vmem>>, %arg10: memref<8x64xf32, #tpu.memory_space<vmem>>, %arg11: memref<8x64xf32, #tpu.memory_space<vmem>>) attributes {dimension_semantics = [#tpu.dimension_semantics<parallel>, #tpu.dimension_semantics<arbitrary>], iteration_bounds = array<i64: 2, 4>, scalar_prefetch = 0 : i64, scratch_operands = 2 : i64, tpu.core_type = #tpu.core_type<tc>, window_params = [{transform_indices = @transform_0, window_bounds = array<i64: 1, 8, 64>}, {transform_indices = @transform_1, window_bounds = array<i64: 1, 8, 64>}, {transform_indices = @transform_2, window_bounds = array<i64: 1, 8, 64>}, {pipeline_mode = #tpu.pipeline_mode<synchronous>, transform_indices = @transform_3, window_bounds = array<i64: 1, 64>}, {pipeline_mode = #tpu.pipeline_mode<synchronous>, transform_indices = @transform_4, window_bounds = array<i64: 1, 64>}, {pipeline_mode = #tpu.pipeline_mode<synchronous>, transform_indices = @transform_5, window_bounds = array<i64: 1, 64>}, {pipeline_mode = #tpu.pipeline_mode<synchronous>, transform_indices = @transform_6, window_bounds = array<i64: 1, 64>}, {transform_indices = @transform_7, window_bounds = array<i64: 1, 8, 64>}]} {
    %c0_i32 = arith.constant 0 : i32
    %0 = arith.cmpi eq, %arg1, %c0_i32 : i32
    %1 = arith.extui %0 : i1 to i32
    %c0_i32_0 = arith.constant 0 : i32
    %2 = arith.cmpi ne, %1, %c0_i32_0 : i32
    scf.if %2 {
      %cst_37 = arith.constant 0.000000e+00 : f32
      %65 = vector.broadcast %cst_37 : f32 to vector<8x64xf32>
      %c0_38 = arith.constant 0 : index
      %c0_39 = arith.constant 0 : index
      %66 = vector.load %arg10[%c0_38, %c0_39] : memref<8x64xf32, #tpu.memory_space<vmem>>, vector<8x64xf32>
      tpu.vector_store %arg10[%c0_38, %c0_39], %65 {strides = array<i32>} : memref<8x64xf32, #tpu.memory_space<vmem>>, vector<8x64xf32>,
      %cst_40 = arith.constant 0.000000e+00 : f32
      %67 = vector.broadcast %cst_40 : f32 to vector<8x64xf32>
      %c0_41 = arith.constant 0 : index
      %c0_42 = arith.constant 0 : index
      %68 = vector.load %arg11[%c0_41, %c0_42] : memref<8x64xf32, #tpu.memory_space<vmem>>, vector<8x64xf32>
      tpu.vector_store %arg11[%c0_41, %c0_42], %67 {strides = array<i32>} : memref<8x64xf32, #tpu.memory_space<vmem>>, vector<8x64xf32>,
    } else {
    }
    %c0 = arith.constant 0 : index
    %c0_1 = arith.constant 0 : index
    %c0_2 = arith.constant 0 : index
    %3 = vector.load %arg2[%c0, %c0_1, %c0_2] : memref<1x8x64xbf16, #tpu.memory_space<vmem>>, vector<1x8x64xbf16>
    %4 = vector.shape_cast %3 : vector<1x8x64xbf16> to vector<8x64xbf16>
    %5 = arith.extf %4 : vector<8x64xbf16> to vector<8x64xf32>
    %c0_3 = arith.constant 0 : index
    %c0_4 = arith.constant 0 : index
    %6 = vector.load %arg5[%c0_3, %c0_4] : memref<1x64xf32, #tpu.memory_space<vmem>>, vector<1x64xf32>
    %7 = vector.broadcast %6 : vector<1x64xf32> to vector<8x64xf32>
    %8 = arith.mulf %5, %7 : vector<8x64xf32>
    %c0_5 = arith.constant 0 : index
    %c0_6 = arith.constant 0 : index
    %9 = vector.load %arg6[%c0_5, %c0_6] : memref<1x64xf32, #tpu.memory_space<vmem>>, vector<1x64xf32>
    %10 = vector.broadcast %9 : vector<1x64xf32> to vector<8x64xf32>
    %11 = arith.addf %8, %10 : vector<8x64xf32>
    %c0_7 = arith.constant 0 : index
    %c0_8 = arith.constant 0 : index
    %12 = vector.load %arg10[%c0_7, %c0_8] : memref<8x64xf32, #tpu.memory_space<vmem>>, vector<8x64xf32>
    %cst = arith.constant 5.000000e-01 : f32
    %13 = vector.broadcast %cst : f32 to vector<8x64xf32>
    %14 = arith.mulf %12, %13 : vector<8x64xf32>
    %15 = arith.addf %14, %11 : vector<8x64xf32>
    %cst_9 = arith.constant 1.000000e+00 : f32
    %16 = vector.broadcast %cst_9 : f32 to vector<8x64xf32>
    %17 = arith.cmpf oge, %15, %16 : vector<8x64xf32>
    %18 = arith.extui %17 : vector<8x64xi1> to vector<8x64xi32>
    %19 = arith.sitofp %18 : vector<8x64xi32> to vector<8x64xf32>
    %cst_10 = arith.constant 1.000000e+00 : f32
    %20 = vector.broadcast %cst_10 : f32 to vector<8x64xf32>
    %21 = arith.subf %20, %19 : vector<8x64xf32>
    %22 = arith.mulf %15, %21 : vector<8x64xf32>
    %c0_11 = arith.constant 0 : index
    %c0_12 = arith.constant 0 : index
    %23 = vector.load %arg10[%c0_11, %c0_12] : memref<8x64xf32, #tpu.memory_space<vmem>>, vector<8x64xf32>
    tpu.vector_store %arg10[%c0_11, %c0_12], %22 {strides = array<i32>} : memref<8x64xf32, #tpu.memory_space<vmem>>, vector<8x64xf32>,
    %c0_13 = arith.constant 0 : index
    %c0_14 = arith.constant 0 : index
    %c0_15 = arith.constant 0 : index
    %24 = vector.load %arg3[%c0_13, %c0_14, %c0_15] : memref<1x8x64xbf16, #tpu.memory_space<vmem>>, vector<1x8x64xbf16>
    %25 = vector.shape_cast %24 : vector<1x8x64xbf16> to vector<8x64xbf16>
    %26 = arith.extf %25 : vector<8x64xbf16> to vector<8x64xf32>
    %c0_16 = arith.constant 0 : index
    %c0_17 = arith.constant 0 : index
    %27 = vector.load %arg7[%c0_16, %c0_17] : memref<1x64xf32, #tpu.memory_space<vmem>>, vector<1x64xf32>
    %28 = vector.broadcast %27 : vector<1x64xf32> to vector<8x64xf32>
    %29 = arith.mulf %26, %28 : vector<8x64xf32>
    %c0_18 = arith.constant 0 : index
    %c0_19 = arith.constant 0 : index
    %30 = vector.load %arg8[%c0_18, %c0_19] : memref<1x64xf32, #tpu.memory_space<vmem>>, vector<1x64xf32>
    %31 = vector.broadcast %30 : vector<1x64xf32> to vector<8x64xf32>
    %32 = arith.addf %29, %31 : vector<8x64xf32>
    %c0_20 = arith.constant 0 : index
    %c0_21 = arith.constant 0 : index
    %33 = vector.load %arg11[%c0_20, %c0_21] : memref<8x64xf32, #tpu.memory_space<vmem>>, vector<8x64xf32>
    %cst_22 = arith.constant 5.000000e-01 : f32
    %34 = vector.broadcast %cst_22 : f32 to vector<8x64xf32>
    %35 = arith.mulf %33, %34 : vector<8x64xf32>
    %36 = arith.addf %35, %32 : vector<8x64xf32>
    %cst_23 = arith.constant 1.000000e+00 : f32
    %37 = vector.broadcast %cst_23 : f32 to vector<8x64xf32>
    %38 = arith.cmpf oge, %36, %37 : vector<8x64xf32>
    %39 = arith.extui %38 : vector<8x64xi1> to vector<8x64xi32>
    %40 = arith.sitofp %39 : vector<8x64xi32> to vector<8x64xf32>
    %cst_24 = arith.constant 1.000000e+00 : f32
    %41 = vector.broadcast %cst_24 : f32 to vector<8x64xf32>
    %42 = arith.subf %41, %40 : vector<8x64xf32>
    %43 = arith.mulf %36, %42 : vector<8x64xf32>
    %c0_25 = arith.constant 0 : index
    %c0_26 = arith.constant 0 : index
    %44 = vector.load %arg11[%c0_25, %c0_26] : memref<8x64xf32, #tpu.memory_space<vmem>>, vector<8x64xf32>
    tpu.vector_store %arg11[%c0_25, %c0_26], %43 {strides = array<i32>} : memref<8x64xf32, #tpu.memory_space<vmem>>, vector<8x64xf32>,
    %c0_27 = arith.constant 0 : index
    %c0_28 = arith.constant 0 : index
    %c0_29 = arith.constant 0 : index
    %45 = vector.load %arg4[%c0_27, %c0_28, %c0_29] : memref<1x8x64xf32, #tpu.memory_space<vmem>>, vector<1x8x64xf32>
    %46 = vector.shape_cast %45 : vector<1x8x64xf32> to vector<8x64xf32>
    %47 = arith.mulf %46, %19 : vector<8x64xf32>
    %cst_30 = arith.constant 1.000000e+00 : f32
    %48 = vector.broadcast %cst_30 : f32 to vector<8x64xf32>
    %49 = arith.subf %48, %46 : vector<8x64xf32>
    %50 = arith.mulf %49, %19 : vector<8x64xf32>
    %cst_31 = arith.constant 1.000000e+00 : f32
    %51 = vector.broadcast %cst_31 : f32 to vector<8x64xf32>
    %52 = arith.subf %51, %40 : vector<8x64xf32>
    %53 = arith.mulf %50, %52 : vector<8x64xf32>
    %54 = arith.addf %47, %53 : vector<8x64xf32>
    %cst_32 = arith.constant 1.000000e+00 : f32
    %55 = vector.broadcast %cst_32 : f32 to vector<8x64xf32>
    %56 = arith.subf %55, %19 : vector<8x64xf32>
    %57 = arith.mulf %46, %56 : vector<8x64xf32>
    %cst_33 = arith.constant 1.000000e+00 : f32
    %58 = vector.broadcast %cst_33 : f32 to vector<8x64xf32>
    %59 = arith.subf %58, %40 : vector<8x64xf32>
    %60 = arith.mulf %57, %59 : vector<8x64xf32>
    %61 = arith.addf %54, %60 : vector<8x64xf32>
    %c0_34 = arith.constant 0 : index
    %c0_35 = arith.constant 0 : index
    %c0_36 = arith.constant 0 : index
    %62 = vector.load %arg9[%c0_34, %c0_35, %c0_36] : memref<1x8x64xf32, #tpu.memory_space<vmem>>, vector<1x8x64xf32>
    %63 = vector.shape_cast %62 : vector<1x8x64xf32> to vector<8x64xf32>
    %64 = vector.shape_cast %61 : vector<8x64xf32> to vector<1x8x64xf32>
    tpu.vector_store %arg9[%c0_34, %c0_35, %c0_36], %64 {strides = array<i32>} : memref<1x8x64xf32, #tpu.memory_space<vmem>>, vector<1x8x64xf32>,
    return
  }
  func.func @transform_0(%arg0: i32, %arg1: i32) -> (i32, i32, i32) {
    %c0_i32 = arith.constant 0 : i32
    %c0_i32_0 = arith.constant 0 : i32
    return %arg1, %arg0, %c0_i32 : i32, i32, i32
  }
  func.func @transform_1(%arg0: i32, %arg1: i32) -> (i32, i32, i32) {
    %c0_i32 = arith.constant 0 : i32
    %c0_i32_0 = arith.constant 0 : i32
    return %arg1, %arg0, %c0_i32 : i32, i32, i32
  }
  func.func @transform_2(%arg0: i32, %arg1: i32) -> (i32, i32, i32) {
    %c0_i32 = arith.constant 0 : i32
    %c0_i32_0 = arith.constant 0 : i32
    return %arg1, %arg0, %c0_i32 : i32, i32, i32
  }
  func.func @transform_3(%arg0: i32, %arg1: i32) -> (i32, i32) {
    %c0_i32 = arith.constant 0 : i32
    %c0_i32_0 = arith.constant 0 : i32
    %c0_i32_1 = arith.constant 0 : i32
    return %c0_i32, %c0_i32_0 : i32, i32
  }
  func.func @transform_4(%arg0: i32, %arg1: i32) -> (i32, i32) {
    %c0_i32 = arith.constant 0 : i32
    %c0_i32_0 = arith.constant 0 : i32
    %c0_i32_1 = arith.constant 0 : i32
    return %c0_i32, %c0_i32_0 : i32, i32
  }
  func.func @transform_5(%arg0: i32, %arg1: i32) -> (i32, i32) {
    %c0_i32 = arith.constant 0 : i32
    %c0_i32_0 = arith.constant 0 : i32
    %c0_i32_1 = arith.constant 0 : i32
    return %c0_i32, %c0_i32_0 : i32, i32
  }
  func.func @transform_6(%arg0: i32, %arg1: i32) -> (i32, i32) {
    %c0_i32 = arith.constant 0 : i32
    %c0_i32_0 = arith.constant 0 : i32
    %c0_i32_1 = arith.constant 0 : i32
    return %c0_i32, %c0_i32_0 : i32, i32
  }
  func.func @transform_7(%arg0: i32, %arg1: i32) -> (i32, i32, i32) {
    %c0_i32 = arith.constant 0 : i32
    %c0_i32_0 = arith.constant 0 : i32
    return %arg1, %arg0, %c0_i32 : i32, i32, i32
  }
}

</mosaic_0001>

<bundles_post_ra>
// kernel: tile.43
= control target key start
LH: loop header
LB: loop body
LE: loop exit
PB: predicated region body
PF: predicated region fallthrough
CT: control target
= control target key end

     0   :  { %s22_s0 = inlined_call_operand.vmem [shape: f32[8], index: 0, kind: input, shape index: {}]   ;;  %s23_s1 = inlined_call_operand.vmem [shape: f32[8,8], index: 1, kind: output, shape index: {}]  }
   0x1   :  { %v4_v0 = vld [vmem:[%s22_s0] ss:$0 sm:$0xff] }
   0x2   :  { %5 = vst [vmem:[%s23_s1] sm:$0xff] %v4_v0 }

// kernel: tile.56
= control target key start
LH: loop header
LB: loop body
LE: loop exit
PB: predicated region body
PF: predicated region fallthrough
CT: control target
= control target key end

     0   :  { %s69_s10 = smov 56   ;;  %s70_s11 = smov 40   ;;  %vm3_vm0 = vcmask 64512   ;;  %vm9_vm1 = vcmask 523712   ;;  %vm15_vm2 = vcmask 458112   ;;  %vm21_vm3 = vcmask 392512   ;;  %s113_s0 = inlined_call_operand.vmem [shape: f32[8,8], index: 0, kind: input, shape index: {}]   ;;  %s114_s1 = inlined_call_operand.vmem [shape: f32[1,64], index: 1, kind: output, shape index: {}]  }
   0x1   :  { %v55_v0 = vld [vmem:[%s113_s0 + $0x7] sm:$0x1]   ;;  %v57_v1 = vld [vmem:[%s113_s0 + $0x5] sm:$0x1]   ;;  %v56_v2 = vld [vmem:[%s113_s0 + $0x6] sm:$0x1]  }
   0x2   :  { %7 = vrot.lane.b32.xlu0 %v55_v0, %s69_s10  ;;  %19 = vrot.lane.b32.xlu1 %v57_v1, %s70_s11  ;;  %v58_v3 = vld [vmem:[%s113_s0 + $0x4] sm:$0x1]   ;;  %v2_v4 = vld [vmem:[%s113_s0] sm:$0x1]   ;;  %s71_s18 = smov 48   ;;  %s72_s19 = smov 32  }
   0x3   :  { %4 = vst.msk [vmem:[#allocation0] sm:$0x1] %vm3_vm0, %v2_v4   ;;  %v59_v5 = vld [vmem:[%s113_s0 + $0x3] sm:$0x1]   ;;  %v60_v6 = vld [vmem:[%s113_s0 + $0x2] sm:$0x1]  }
   0x4   :  { %s73_s24 = smov 24   ;;  %s74_s25 = smov 16   ;;  %v61_v7 = vld [vmem:[%s113_s0 + $0x1] sm:$0x1]   ;;  %vm27_vm4 = vcmask 326912   ;;  %vm33_vm5 = vcmask 261312  }
   0x5   :  { %s75_s0 = smov 8   ;;  %vm39_vm6 = vcmask 195712   ;;  %vm45_vm7 = vcmask 130112  }
   0x6   :  { %13 = vrot.lane.b32.xlu0 %v56_v2, %s71_s18  ;;  %25 = vrot.lane.b32.xlu1 %v58_v3, %s72_s19 }
   0xa   :  { %31 = vrot.lane.b32.xlu0 %v59_v5, %s73_s24  ;;  %37 = vrot.lane.b32.xlu1 %v60_v6, %s74_s25 }
   0xe   :  { %43 = vrot.lane.b32.xlu0 %v61_v7, %s75_s0 }
  0x74   :  { %v8_v8 = vpop.permute.xlu0 %7   ;;  %v20_v9 = vpop.permute.xlu1 %19  }
  0x75   :  { %10 = vst.msk [vmem:[#allocation0] sm:$0x1] %vm9_vm1, %v8_v8  }
  0x78   :  { %v14_v10 = vpop.permute.xlu0 %13   ;;  %v26_v11 = vpop.permute.xlu1 %25  }
  0x79   :  { %16 = vst.msk [vmem:[#allocation0] sm:$0x1] %vm15_vm2, %v14_v10  }
  0x7a   :  { %22 = vst.msk [vmem:[#allocation0] sm:$0x1] %vm21_vm3, %v20_v9  }
  0x7b   :  { %28 = vst.msk [vmem:[#allocation0] sm:$0x1] %vm27_vm4, %v26_v11  }
  0x7c   :  { %v32_v12 = vpop.permute.xlu0 %31   ;;  %v38_v13 = vpop.permute.xlu1 %37  }
  0x7d   :  { %34 = vst.msk [vmem:[#allocation0] sm:$0x1] %vm33_vm5, %v32_v12  }
  0x7e   :  { %40 = vst.msk [vmem:[#allocation0] sm:$0x1] %vm39_vm6, %v38_v13  }
  0x80   :  { %v44_v14 = vpop.permute.xlu0 %43  }
  0x81   :  { %46 = vst.msk [vmem:[#allocation0] sm:$0x1] %vm45_vm7, %v44_v14  }
  0x88   :  { %v51_v15 = vld [vmem:[#allocation0] sm:$0x1] }
  0x89   :  { %54 = vst [vmem:[%s114_s1] sm:$0x1] %v51_v15 }

// kernel: basic_block_forward.6
= control target key start
LH: loop header
LB: loop body
LE: loop exit
PB: predicated region body
PF: predicated region fallthrough
CT: control target
= control target key end

     0   :  { %s726_s24 = smov 0   ;;  %s728_s25 = smov 0   ;;  %s811_s0 = inlined_call_operand.vmem [shape: bf16[4,16,64], index: 0, kind: input, shape index: {}]   ;;  %s812_s1 = inlined_call_operand.vmem [shape: bf16[4,16,64], index: 1, kind: input, shape index: {}]   ;;  %s813_s2 = inlined_call_operand.vmem [shape: f32[1,64], index: 2, kind: input, shape index: {}]   ;;  %s814_s3 = inlined_call_operand.vmem [shape: f32[1,64], index: 3, kind: input, shape index: {}]   ;;  %s815_s4 = inlined_call_operand.vmem [shape: f32[1,64], index: 4, kind: input, shape index: {}]   ;;  %s816_s5 = inlined_call_operand.vmem [shape: f32[1,64], index: 5, kind: input, shape index: {}]   ;;  %s817_s6 = inlined_call_operand.vmem [shape: bf16[4,16,64], index: 6, kind: output, shape index: {0}]   ;;  %s818_s7 = inlined_call_operand.vmem [shape: bf16[4,16,64], index: 7, kind: output, shape index: {1}]  }
   0x1   :  { %s730_s26 = smov 0   ;;  %s732_s27 = smov 0  }
   0x2   :  { %s734_s28 = smov 0  }
   0x3 LB: > { %s27_s29 = sadd.s32 1, %s674_s26  ;;  %s30_s30 = sadd.s32 1, %s678_s27  ;;  %s682_s28 = sphi %s734_s28, %s18_s28   ;;  %s678_s27 = sphi %s732_s27, %s822_s27   ;;  %s674_s26 = sphi %s730_s26, %s821_s26   ;;  %s670_s25 = sphi %s728_s25, %s820_s25   ;;  %s666_s24 = sphi %s726_s24, %s819_s24  }
   0x4   : > { %p28_p0 = scmp.ge.s32.totalorder %s27_s29, 4  ;;  %p584_p1 = scmp.ge.s32.totalorder %s682_s28, 1 }
   0x5   : > { %p276_p2 = scmp.lt.s32.totalorder %s682_s28, 9 }
   0x6   : > { %s824_s29 = smov (%p28_p0, %s27_s29), 0  ;;  %s826_s30 = smov (!%p28_p0, %s30_s30), %s678_s27 }
   0x7   : > { %p277_p3 = pnand %p584_p1, %p276_p2  ;;  %p32_p4 = scmp.ge.s32.totalorder %s826_s30, 2 }
   0x8   : > { %p330_p5 = scmp.lt.s32.totalorder (!%p277_p3), %s666_s24, 3  ;;  %p332_p6 = scmp.lt.s32.totalorder (!%p277_p3), %s670_s25, 1 }
   0x9   : > { %s828_s30 = smov (%p32_p4, %s826_s30), 0  ;;  %280 = sbr.rel (%p277_p3) target bundleno = 41 (0x29), region = 44 }
   0xa   : > { %p593_p7 = scmp.ne.s32.totalorder (!%p277_p3), %s666_s24, 0 }
   0xe   : > { %s331_s8 = scalar_select %p330_p5, %s666_s24, 3 }
   0xf   : > { %s830_s25 = smov (!%p332_p6, %s670_s25), 1 }
  0x10   : > { %s585_s9 = sshll.u32 %s331_s8, 1  ;;  %365 = sbr.rel (%p593_p7) target bundleno = 23 (0x17), region = 48 }
  0x11   : > { %s335_s10 = sadd.s32 %s585_s9, %s830_s25 }
  0x12   : > { %s756_s11 = sshll.u32 %s335_s10, 2 }
  0x13   : > { %s337_s14 = scalar_lea.vmem %s811_s0, %s756_s11  ;;  %s345_s17 = scalar_lea.vmem %s812_s1, %s756_s11 }
  0x14   : > { %s353_s20 = scalar_lea.vmem %s817_s6, %s756_s11  ;;  %s361_s23 = scalar_lea.vmem %s818_s7, %s756_s11 }
  0x15   : > { %vm366_vm0 = vcmask 523264   ;;  %v684_v0 = vmov 0.0  }
  0x16   : > { %367 = vst.msk [vmem:[#allocation2] sm:$0xff] %vm366_vm0, %v684_v0  ;;  %368 = vst.msk [vmem:[#allocation3] sm:$0xff] %vm366_vm0, %v684_v0 }
  0x17 PF: > { %v369_v1 = vld [vmem:[%s337_s14] sm:$0xf]  ;;  %v685_v19 = vmov 0.0   ;;  %vm398_vm2 = vcmask 519168   ;;  %vm395_vm4 = vcmask 523264  }
  0x18   : > { %v594_v2 = vld [vmem:[%s813_s2] ss:$0 sm:$0xff]  ;;  %v370_v3 = vunpack.c.l.bf16 %v369_v1 }
  0x19   : > { %v400_v5 = vld [vmem:[%s345_s17] sm:$0xf] }
  0x1a   : > { %v595_v6 = vld [vmem:[%s814_s3] ss:$0 sm:$0xff]  ;;  %v401_v7 = vunpack.c.l.bf16 %v400_v5  ;;  %v378_v10 = vmul.f32 %v594_v2, %v370_v3 }
  0x1b   : > { %v597_v8 = vld [vmem:[%s815_s4] ss:$0 sm:$0xff] }
  0x1c   : > { %v598_v12 = vld [vmem:[%s816_s5] ss:$0 sm:$0xff]  ;;  %v409_v13 = vmul.f32 %v597_v8, %v401_v7  ;;  %v386_v15 = vadd.f32 %v595_v6, %v378_v10 }
  0x1d   : > { %v387_v4 = vld [vmem:[#allocation2] sm:$0xff]  ;;  %v418_v9 = vld [vmem:[#allocation3] sm:$0xff] }
  0x1e   : > { %v388_v11 = vmul.f32 0.5, %v387_v4  ;;  %v419_v14 = vmul.f32 0.5, %v418_v9  ;;  %v417_v16 = vadd.f32 %v598_v12, %v409_v13 }
  0x20   : > { %v389_v17 = vadd.f32 %v388_v11, %v386_v15  ;;  %v420_v18 = vadd.f32 %v419_v14, %v417_v16 }
  0x22   : > { %vm390_vm1 = vcmp.ge.f32.partialorder %v389_v17, 1.0  ;;  %vm421_vm3 = vcmp.ge.f32.partialorder %v420_v18, 1.0 }
  0x23   : > { %v596_v20 = vsel %vm390_vm1, 1.0, %v685_v19  ;;  %v599_v23 = vsel %vm421_vm3, 1.0, %v685_v19 }
  0x24   : > { %v393_v21 = vsub.f32 1.0, %v596_v20  ;;  %v397_v22 = vpack.c.bf16 %v596_v20, %v596_v20  ;;  %v424_v24 = vsub.f32 1.0, %v599_v23  ;;  %v427_v25 = vpack.c.bf16 %v599_v23, %v599_v23 }
  0x26   : > { %v394_v26 = vmul.f32 %v393_v21, %v389_v17  ;;  %399 = vst.msk [vmem:[%s353_s20] sm:$0xf] %vm398_vm2, %v397_v22  ;;  %v425_v27 = vmul.f32 %v424_v24, %v420_v18  ;;  %428 = vst.msk [vmem:[%s361_s23] sm:$0xf] %vm398_vm2, %v427_v25 }
  0x28   : > { %396 = vst.msk [vmem:[#allocation2] sm:$0xff] %vm395_vm4, %v394_v26  ;;  %426 = vst.msk [vmem:[#allocation3] sm:$0xff] %vm395_vm4, %v425_v27 }
  0x29 PF: > { %s18_s28 = sadd.s32 1, %s682_s28   ;;  %s819_s24 = smov %s674_s26 }
  0x2a   : > { %p15_p8 = scmp.ge.s32.totalorder %s18_s28, 10   ;;  %s820_s25 = smov %s678_s27 }
  0x2b   : > { %s821_s26 = smov %s824_s29  ;;  %s822_s27 = smov %s828_s30 }
  0x2c   :  { %17 = sbr.rel (!%p15_p8) target bundleno = 3 (0x3), region = 93 }

// kernel: basic_block_forward.9
= control target key start
LH: loop header
LB: loop body
LE: loop exit
PB: predicated region body
PF: predicated region fallthrough
CT: control target
= control target key end

     0   :  { %s712_s24 = smov 0   ;;  %s714_s25 = smov 0   ;;  %s784_s0 = inlined_call_operand.vmem [shape: bf16[4,16,64], index: 0, kind: input, shape index: {}]   ;;  %s785_s1 = inlined_call_operand.vmem [shape: bf16[4,16,64], index: 1, kind: input, shape index: {}]   ;;  %s786_s2 = inlined_call_operand.vmem [shape: f32[4,16,64], index: 2, kind: input, shape index: {}]   ;;  %s787_s3 = inlined_call_operand.vmem [shape: f32[1,64], index: 3, kind: input, shape index: {}]   ;;  %s788_s4 = inlined_call_operand.vmem [shape: f32[1,64], index: 4, kind: input, shape index: {}]   ;;  %s789_s5 = inlined_call_operand.vmem [shape: f32[1,64], index: 5, kind: input, shape index: {}]   ;;  %s790_s6 = inlined_call_operand.vmem [shape: f32[1,64], index: 6, kind: input, shape index: {}]   ;;  %s791_s7 = inlined_call_operand.vmem [shape: f32[4,16,64], index: 7, kind: output, shape index: {}]  }
   0x1   :  { %s716_s26 = smov 0   ;;  %s718_s27 = smov 0  }
   0x2   :  { %s720_s28 = smov 0  }
   0x3 LB: > { %s26_s29 = sadd.s32 1, %s660_s26  ;;  %s29_s30 = sadd.s32 1, %s664_s27  ;;  %s668_s28 = sphi %s720_s28, %s17_s28   ;;  %s664_s27 = sphi %s718_s27, %s797_s27   ;;  %s660_s26 = sphi %s716_s26, %s796_s26   ;;  %s656_s25 = sphi %s714_s25, %s795_s25   ;;  %s652_s24 = sphi %s712_s24, %s794_s24  }
   0x4   : > { %p27_p0 = scmp.ge.s32.totalorder %s26_s29, 4  ;;  %p570_p1 = scmp.ge.s32.totalorder %s668_s28, 1 }
   0x5   : > { %p286_p2 = scmp.lt.s32.totalorder %s668_s28, 9 }
   0x6   : > { %s799_s29 = smov (%p27_p0, %s26_s29), 0  ;;  %s801_s30 = smov (!%p27_p0, %s29_s30), %s664_s27 }
   0x7   : > { %p287_p3 = pnand %p570_p1, %p286_p2  ;;  %p31_p4 = scmp.ge.s32.totalorder %s801_s30, 2 }
   0x8   : > { %p340_p5 = scmp.lt.s32.totalorder (!%p287_p3), %s652_s24, 3  ;;  %p342_p6 = scmp.lt.s32.totalorder (!%p287_p3), %s656_s25, 1 }
   0x9   : > { %s803_s30 = smov (%p31_p4, %s801_s30), 0  ;;  %290 = sbr.rel (%p287_p3) target bundleno = 45 (0x2d), region = 48 }
   0xa   : > { %792 = sst [smem:[#allocation4_spill]] %s803_s30  ;;  %p579_p7 = scmp.ne.s32.totalorder (!%p287_p3), %s652_s24, 0 }
   0xe   : > { %s341_s8 = scalar_select %p340_p5, %s652_s24, 3 }
   0xf   : > { %s805_s25 = smov (!%p342_p6, %s656_s25), 1 }
  0x10   : > { %s571_s9 = sshll.u32 %s341_s8, 1  ;;  %375 = sbr.rel (%p579_p7) target bundleno = 23 (0x17), region = 52 }
  0x11   : > { %s345_s10 = sadd.s32 %s571_s9, %s805_s25 }
  0x12   : > { %s572_s11 = sshll.u32 %s345_s10, 2  ;;  %s576_s12 = sshll.u32 %s345_s10, 3 }
  0x13   : > { %s347_s15 = scalar_lea.vmem %s784_s0, %s572_s11  ;;  %s355_s18 = scalar_lea.vmem %s785_s1, %s572_s11 }
  0x14   : > { %s363_s21 = scalar_lea.vmem %s786_s2, %s576_s12  ;;  %s754_s30 = scalar_lea.vmem %s791_s7, %s576_s12 }
  0x15   : > { %vm376_vm0 = vcmask 523264   ;;  %v670_v0 = vmov 0.0  }
  0x16   : > { %377 = vst.msk [vmem:[#allocation2] sm:$0xff] %vm376_vm0, %v670_v0  ;;  %378 = vst.msk [vmem:[#allocation3] sm:$0xff] %vm376_vm0, %v670_v0 }
  0x17 PF: > { %v379_v1 = vld [vmem:[%s347_s15] sm:$0xf]  ;;  %v671_v21 = vmov 0.0   ;;  %vm405_vm3 = vcmask 523264  }
  0x18   : > { %v580_v2 = vld [vmem:[%s787_s3] ss:$0 sm:$0xff]  ;;  %v380_v3 = vunpack.c.l.bf16 %v379_v1 }
  0x19   : > { %v407_v5 = vld [vmem:[%s355_s18] sm:$0xf] }
  0x1a   : > { %v581_v7 = vld [vmem:[%s788_s4] ss:$0 sm:$0xff]  ;;  %v408_v8 = vunpack.c.l.bf16 %v407_v5  ;;  %v388_v10 = vmul.f32 %v580_v2, %v380_v3 }
  0x1b   : > { %v583_v9 = vld [vmem:[%s789_s5] ss:$0 sm:$0xff] }
  0x1c   : > { %v584_v12 = vld [vmem:[%s790_s6] ss:$0 sm:$0xff]  ;;  %v416_v13 = vmul.f32 %v583_v9, %v408_v8  ;;  %v396_v16 = vadd.f32 %v581_v7, %v388_v10 }
  0x1d   : > { %v397_v4 = vld [vmem:[#allocation2] sm:$0xff]  ;;  %v425_v6 = vld [vmem:[#allocation3] sm:$0xff] }
  0x1e   : > { %v398_v11 = vmul.f32 0.5, %v397_v4  ;;  %v426_v14 = vmul.f32 0.5, %v425_v6  ;;  %v434_v15 = vld [vmem:[%s363_s21] sm:$0xff]  ;;  %v424_v17 = vadd.f32 %v584_v12, %v416_v13 }
  0x1f   : > { %v436_v19 = vsub.f32 1.0, %v434_v15 }
  0x20   : > { %v399_v18 = vadd.f32 %v398_v11, %v396_v16  ;;  %v427_v20 = vadd.f32 %v426_v14, %v424_v17 }
  0x22   : > { %vm400_vm1 = vcmp.ge.f32.partialorder %v399_v18, 1.0  ;;  %vm428_vm2 = vcmp.ge.f32.partialorder %v427_v20, 1.0 }
  0x23   : > { %v582_v22 = vsel %vm400_vm1, 1.0, %v671_v21  ;;  %v585_v24 = vsel %vm428_vm2, 1.0, %v671_v21 }
  0x24   : > { %v403_v23 = vsub.f32 1.0, %v582_v22  ;;  %v437_v25 = vmul.f32 %v582_v22, %v436_v19  ;;  %v431_v26 = vsub.f32 1.0, %v585_v24  ;;  %v435_v27 = vmul.f32 %v582_v22, %v434_v15 }
  0x26   : > { %v404_v28 = vmul.f32 %v403_v23, %v399_v18  ;;  %v440_v29 = vmul.f32 %v434_v15, %v403_v23  ;;  %v432_v30 = vmul.f32 %v431_v26, %v427_v20  ;;  %v438_v31 = vmul.f32 %v437_v25, %v431_v26 }
  0x28   : > { %406 = vst.msk [vmem:[#allocation2] sm:$0xff] %vm405_vm3, %v404_v28  ;;  %v441_v32 = vmul.f32 %v440_v29, %v431_v26  ;;  %433 = vst.msk [vmem:[#allocation3] sm:$0xff] %vm405_vm3, %v432_v30  ;;  %v439_v33 = vadd.f32 %v438_v31, %v435_v27 }
  0x2a   : > { %v442_v34 = vadd.f32 %v441_v32, %v439_v33 }
  0x2c   : > { %443 = vst.msk [vmem:[%s754_s30] sm:$0xff] %vm405_vm3, %v442_v34 }
  0x2d PF: > { %s17_s28 = sadd.s32 1, %s668_s28   ;;  %s793_s14 = sld [smem:[#allocation4_spill]] }
  0x2e   : > { %p14_p8 = scmp.ge.s32.totalorder %s17_s28, 10   ;;  %s794_s24 = smov %s660_s26 }
  0x2f   : > { %s795_s25 = smov %s664_s27  ;;  %s796_s26 = smov %s799_s29 }
  0x30   :  { %16 = sbr.rel (!%p14_p8) target bundleno = 3 (0x3), region = 88 }
  0x33   : > { %s797_s27 = smov %s793_s14 }

// kernel: basic_block_forward.5
= control target key start
LH: loop header
LB: loop body
LE: loop exit
PB: predicated region body
PF: predicated region fallthrough
CT: control target
= control target key end

     0   :  { %s7727_s18 = smov 0   ;;  %s10683_s0 = inlined_call_operand.vmem [shape: f32[8,8,8,8], index: 0, kind: input, shape index: {}]   ;;  %s10684_s1 = inlined_call_operand.vmem [shape: bf16[9,8,16], index: 1, kind: input, shape index: {}]   ;;  %s10685_s2 = inlined_call_operand.vmem [shape: bf16[512,8], index: 2, kind: output, shape index: {0}]   ;;  %s10686_s3 = inlined_call_operand.vmem [shape: bf16[512,8], index: 3, kind: output, shape index: {1}]   ;;  %s10687_s4 = inlined_call_operand.vmem [shape: f32[2,8,16], index: 4, kind: output, shape index: {2}]   ;;  %s10688_s5 = inlined_call_operand.vmem [shape: f32[2,8,16], index: 5, kind: output, shape index: {3}]  }
   0x1 LB: > { %s7733_s19 = sadd.s32 4294967295, %s7693_s18   ;;  %p6602_p0 = scmp.ge.s32.totalorder %s7693_s18, 1  ;;  %s7693_s18 = sphi %s7727_s18, %s16_s18  }
   0x2   : > { %p196_p1 = scmp.lt.s32.totalorder %s7693_s18, 3 }
   0x4   : > { %p197_p2 = pnand %p6602_p0, %p196_p1 }
   0x6   : > { %200 = sbr.rel (%p197_p2) target bundleno = 779 (0x30b), region = 28 }
   0xb   : > { %v6644_v0 = vld [vmem:[%s10684_s1 + $0x4] sm:$0xf]  ;;  %vm1642_vm0 = vcmask 1043456   ;;  %s6603_s22 = sshll.u32 %s7733_s19, 2  ;;  %vm266_vm1 = vcmask 60416   ;;  %v7695_v2 = vmov 0  }
   0xc   : > { %7597 = vmatprep.subr.msk.bf16.mxu1 %vm1642_vm0, %v6644_v0  ;;  %7596 = vmatprep.subr.msk.bf16.mxu0 %vm1642_vm0, %v6644_v0  ;;  %v1644_v1 = vsel %vm1642_vm0, %v6644_v0, 0  ;;  %p7746_p3 = scmp.lt.s32.totalorder %s6603_s22, 7  ;;  %267 = vst.msk [vmem:[#allocation2] sm:$0xf] %vm266_vm1, %v7695_v2  ;;  %vm268_vm2 = vcmask 57344   ;;  %v10719_v27 = vmov 0 }
   0xd   : > { %270 = vst.msk [vmem:[#allocation2 + $0x8] sm:$0xf] %vm266_vm1, %v7695_v2  ;;  %272 = vst.msk [vmem:[#allocation2 + $0x10] sm:$0xf] %vm266_vm1, %v7695_v2  ;;  %7595 = vmatpush3.bf16.msra.mxu1 %v1644_v1  ;;  %7289 = vmatpush3.bf16.msra.mxu0 %v1644_v1  ;;  %v1059_v3 = vld [vmem:[%s10684_s1] sm:$0xf] }
   0xe   : > { %274 = vst.msk [vmem:[#allocation2 + $0x18] sm:$0xf] %vm266_vm1, %v7695_v2  ;;  %276 = vst.msk [vmem:[#allocation2 + $0x20] sm:$0xf] %vm266_vm1, %v7695_v2  ;;  %s10945_s22 = smov (!%p7746_p3, %s6603_s22), 7  ;;  %7598 = vmatprep.subr.msk.bf16.mxu1 %vm1642_vm0, %v1059_v3  ;;  %v7933_v14 = vsel %vm1642_vm0, %v1059_v3, 0 }
   0xf   : > { %278 = vst.msk [vmem:[#allocation2 + $0x28] sm:$0xf] %vm266_vm1, %v7695_v2  ;;  %280 = vst.msk [vmem:[#allocation2 + $0x30] sm:$0xf] %vm266_vm1, %v7695_v2  ;;  %v6741_v4 = vld [vmem:[%s10684_s1 + $0x8] sm:$0xf] }
  0x10   : > { %282 = vst.msk [vmem:[#allocation2 + $0x38] sm:$0xf] %vm266_vm1, %v7695_v2  ;;  %284 = vst.msk [vmem:[#allocation2 + $0x40] sm:$0xf] %vm266_vm1, %v7695_v2  ;;  %7599 = vmatprep.subr.msk.bf16.mxu0 %vm1642_vm0, %v6741_v4  ;;  %s7070_s28 = sshll.u32 %s10945_s22, 6  ;;  %v7936_v15 = vsel %vm1642_vm0, %v6741_v4, 0 }
  0x11   : > { %286 = vst.msk [vmem:[#allocation2 + $0x48] sm:$0xf] %vm266_vm1, %v7695_v2  ;;  %288 = vst.msk [vmem:[#allocation2 + $0x50] sm:$0xf] %vm266_vm1, %v7695_v2  ;;  %s7925_s6 = scalar_lea.vmem %s10683_s0, %s7070_s28  ;;  %vm830_vm3 = vsmask.f32 7938 }
  0x12   : > { %290 = vst.msk [vmem:[#allocation2 + $0x58] sm:$0xf] %vm266_vm1, %v7695_v2  ;;  %292 = vst.msk [vmem:[#allocation2 + $0x60] sm:$0xf] %vm266_vm1, %v7695_v2  ;;  %v348_v5 = vld [vmem:[%s7925_s6] sm:$0xff]  ;;  %v349_v7 = vld [vmem:[%s7925_s6 + $0x8] sm:$0xff] }
  0x13   : > { %294 = vst.msk [vmem:[#allocation2 + $0x68] sm:$0xf] %vm266_vm1, %v7695_v2  ;;  %296 = vst.msk [vmem:[#allocation2 + $0x70] sm:$0xf] %vm266_vm1, %v7695_v2  ;;  %vm836_vm4 = vsmask.f32 256  ;;  %v7071_v8 = vpack.c.bf16 %v348_v5, %v348_v5  ;;  %v7939_v19 = vpack.c.bf16 %v349_v7, %v349_v7 }
  0x14   : > { %298 = vst.msk [vmem:[#allocation2 + $0x78] sm:$0xf] %vm266_vm1, %v7695_v2  ;;  %300 = vst.msk [vmem:[#allocation2 + $0x80] sm:$0xf] %vm266_vm1, %v7695_v2  ;;  %v364_v6 = vld [vmem:[%s7925_s6 + $0x80] sm:$0xff]  ;;  %v10722_v33 = vmov 0 }
  0x15   : > { %302 = vst.msk [vmem:[#allocation2 + $0x88] sm:$0xf] %vm266_vm1, %v7695_v2  ;;  %304 = vst.msk [vmem:[#allocation2 + $0x90] sm:$0xf] %vm266_vm1, %v7695_v2  ;;  %v1027_v9 = vld [vmem:[#allocation2] sm:$0xf]  ;;  %v7087_v10 = vpack.c.bf16 %v364_v6, %v364_v6 }
  0x16   : > { %306 = vst.msk [vmem:[#allocation2 + $0x98] sm:$0xf] %vm266_vm1, %v7695_v2  ;;  %308 = vst.msk [vmem:[#allocation2 + $0xa0] sm:$0xf] %vm266_vm1, %v7695_v2  ;;  %vm1092_vm5 = vsmask.f32 3328 }
  0x17   : > { %310 = vst.msk [vmem:[#allocation2 + $0xa8] sm:$0xf] %vm266_vm1, %v7695_v2  ;;  %312 = vst.msk [vmem:[#allocation2 + $0xb0] sm:$0xf] %vm266_vm1, %v7695_v2  ;;  %vm1093_vm6 = vsmask.f32 7440 }
  0x18   : > { %314 = vst.msk [vmem:[#allocation2 + $0xb8] sm:$0xf] %vm266_vm1, %v7695_v2  ;;  %316 = vst.msk [vmem:[#allocation2 + $0xc0] sm:$0xf] %vm266_vm1, %v7695_v2  ;;  %v1096_v12 = vshrl.u32 %v1027_v9, 16  ;;  %v1099_v13 = vshll.u32 %v1027_v9, 16 }
  0x19   : > { %318 = vst.msk [vmem:[#allocation2 + $0xc8] sm:$0xf] %vm266_vm1, %v7695_v2  ;;  %320 = vst.msk [vmem:[#allocation2 + $0xd0] sm:$0xf] %vm266_vm1, %v7695_v2  ;;  %v509_v16 = vshrl.u32 %v7071_v8, 16  ;;  %v512_v17 = vshll.u32 %v7071_v8, 16 }
  0x1a   : > { %322 = vst.msk [vmem:[#allocation2 + $0xd8] sm:$0xf] %vm266_vm1, %v7695_v2  ;;  %324 = vst.msk [vmem:[#allocation2 + $0xe0] sm:$0xf] %vm266_vm1, %v7695_v2  ;;  %v832_v20 = vld [vmem:[#allocation2 + $0x8] sm:$0xf] }
  0x1b   : > { %326 = vst.msk [vmem:[#allocation2 + $0xe8] sm:$0xf] %vm266_vm1, %v7695_v2  ;;  %328 = vst.msk [vmem:[#allocation2 + $0xf0] sm:$0xf] %vm266_vm1, %v7695_v2  ;;  %v1098_v21 = vrot.slane %v1096_v12, 4  ;;  %v1101_v22 = vrot.slane %v1099_v13, 5 }
  0x1c   : > { %330 = vst.msk [vmem:[#allocation2 + $0xf8] sm:$0xf] %vm266_vm1, %v7695_v2  ;;  %332 = vst.msk [vmem:[#allocation2 + $0x100] sm:$0xf] %vm266_vm1, %v7695_v2  ;;  %v637_v23 = vshrl.u32 %v7087_v10, 16  ;;  %v640_v24 = vshll.u32 %v7087_v10, 16 }
  0x1d   : > { %334 = vst.msk [vmem:[#allocation2 + $0x108] sm:$0xf] %vm266_vm1, %v7695_v2  ;;  %336 = vst.msk [vmem:[#allocation2 + $0x110] sm:$0xf] %vm266_vm1, %v7695_v2  ;;  %v1043_v25 = vld [vmem:[#allocation2 + $0xa0] sm:$0xf]  ;;  %v1102_v35 = vor.u32 %v1101_v22, %v1098_v21 }
  0x1e   : > { %338 = vst.msk [vmem:[#allocation2 + $0x118] sm:$0xf] %vm266_vm1, %v7695_v2  ;;  %340 = vst.msk [vmem:[#allocation2 + $0x120] sm:$0xf] %vm266_vm1, %v7695_v2  ;;  %v511_v26 = vrot.slane %v509_v16, 7  ;;  %v1320_v31 = vshrl.u32 %v1043_v25, 16 }
  0x1f   : > { %342 = vst.msk [vmem:[#allocation2 + $0x128] sm:$0xf] %vm266_vm1, %v7695_v2  ;;  %344 = vst.msk [vmem:[#allocation2 + $0x130] sm:$0xf] %vm266_vm1, %v7695_v2  ;;  %v931_v29 = vld [vmem:[#allocation2 + $0xa8] sm:$0xf] }
  0x20   : > { %346 = vst.msk [vmem:[#allocation2 + $0x138] sm:$0xf] %vm266_vm1, %v7695_v2  ;;  %vm7943_vm7 = vmand %vm266_vm1, %vm830_vm3  ;;  %v1323_v32 = vshll.u32 %v1043_v25, 16  ;;  %v639_v37 = vrot.slane %v637_v23, 7  ;;  %v350_v39 = vld [vmem:[%s7925_s6 + $0x10] sm:$0xff]  ;;  %v514_v40 = vor.u32 %v512_v17, %v511_v26  ;;  %v515_v41 = vrot.slane %v511_v26, 4 }
  0x21   : > { %269 = vst.msk [vmem:[#allocation2 + $0x4] sm:$0x1] %vm268_vm2, %v7695_v2  ;;  %271 = vst.msk [vmem:[#allocation2 + $0xc] sm:$0x1] %vm268_vm2, %v7695_v2  ;;  %v10720_v27 = vsel %vm7943_vm7, 4294967295, %v10719_v27  ;;  %v1322_v43 = vrot.slane %v1320_v31, 4  ;;  %v7073_v53 = vpack.c.bf16 %v350_v39, %v350_v39 }
  0x22   : > { %273 = vst.msk [vmem:[#allocation2 + $0x14] sm:$0x1] %vm268_vm2, %v7695_v2  ;;  %275 = vst.msk [vmem:[#allocation2 + $0x1c] sm:$0x1] %vm268_vm2, %v7695_v2  ;;  %v1325_v44 = vrot.slane %v1323_v32, 5  ;;  %v7960_v45 = vrot.slane %v1102_v35, 4  ;;  %v642_v46 = vor.u32 %v640_v24, %v639_v37  ;;  %v833_v49 = vsel %vm7943_vm7, %v514_v40, %v832_v20 }
  0x23   : > { %277 = vst.msk [vmem:[#allocation2 + $0x24] sm:$0x1] %vm268_vm2, %v7695_v2  ;;  %279 = vst.msk [vmem:[#allocation2 + $0x2c] sm:$0x1] %vm268_vm2, %v7695_v2  ;;  %v643_v47 = vrot.slane %v639_v37, 4  ;;  %v365_v54 = vld [vmem:[%s7925_s6 + $0x88] sm:$0xff] }
  0x24   : > { %281 = vst.msk [vmem:[#allocation2 + $0x34] sm:$0x1] %vm268_vm2, %v7695_v2  ;;  %283 = vst.msk [vmem:[#allocation2 + $0x3c] sm:$0x1] %vm268_vm2, %v7695_v2  ;;  %v1326_v52 = vor.u32 %v1325_v44, %v1322_v43  ;;  %v366_v55 = vld [vmem:[%s7925_s6 + $0x90] sm:$0xff]  ;;  %v932_v56 = vsel %vm7943_vm7, %v642_v46, %v931_v29  ;;  %v517_v59 = vshrl.u32 %v7939_v19, 16  ;;  %v7088_v5 = vpack.c.bf16 %v365_v54, %v365_v54 }
  0x25   : > { %285 = vst.msk [vmem:[#allocation2 + $0x44] sm:$0x1] %vm268_vm2, %v7695_v2  ;;  %287 = vst.msk [vmem:[#allocation2 + $0x4c] sm:$0x1] %vm268_vm2, %v7695_v2  ;;  %v351_v60 = vld [vmem:[%s7925_s6 + $0x18] sm:$0xff]  ;;  %v520_v62 = vshll.u32 %v7939_v19, 16  ;;  %v7089_v6 = vpack.c.bf16 %v366_v55, %v366_v55 }
  0x26   : > { %289 = vst.msk [vmem:[#allocation2 + $0x54] sm:$0x1] %vm268_vm2, %v7695_v2  ;;  %291 = vst.msk [vmem:[#allocation2 + $0x5c] sm:$0x1] %vm268_vm2, %v7695_v2  ;;  %v7983_v61 = vrot.slane %v1326_v52, 4  ;;  %v525_v63 = vshrl.u32 %v7073_v53, 16  ;;  %v7996_v12 = vpack.c.bf16 %v351_v60, %v351_v60 }
  0x27   : > { %293 = vst.msk [vmem:[#allocation2 + $0x64] sm:$0x1] %vm268_vm2, %v7695_v2  ;;  %295 = vst.msk [vmem:[#allocation2 + $0x6c] sm:$0x1] %vm268_vm2, %v7695_v2  ;;  %v528_v0 = vshll.u32 %v7073_v53, 16  ;;  %v352_v1 = vld [vmem:[%s7925_s6 + $0x20] sm:$0xff] }
  0x28   : > { %297 = vst.msk [vmem:[#allocation2 + $0x74] sm:$0x1] %vm268_vm2, %v7695_v2  ;;  %299 = vst.msk [vmem:[#allocation2 + $0x7c] sm:$0x1] %vm268_vm2, %v7695_v2  ;;  %v7930_v11 = vld [vmem:[#allocation2 + $0x4] sm:$0x1]  ;;  %v7998_v13 = vpack.c.bf16 %v352_v1, %v352_v1 }
  0x29   : > { %301 = vst.msk [vmem:[#allocation2 + $0x84] sm:$0x1] %vm268_vm2, %v7695_v2  ;;  %303 = vst.msk [vmem:[#allocation2 + $0x8c] sm:$0x1] %vm268_vm2, %v7695_v2  ;;  %v1105_v18 = vshll.u32 %v7930_v11, 16  ;;  %v519_v4 = vrot.slane %v517_v59, 7 }
  0x2a   : > { %305 = vst.msk [vmem:[#allocation2 + $0x94] sm:$0x1] %vm268_vm2, %v7695_v2  ;;  %307 = vst.msk [vmem:[#allocation2 + $0x9c] sm:$0x1] %vm268_vm2, %v7695_v2  ;;  %v838_v34 = vld [vmem:[#allocation2 + $0xc] sm:$0x1] }
  0x2b   : > { %309 = vst.msk [vmem:[#allocation2 + $0xa4] sm:$0x1] %vm268_vm2, %v7695_v2  ;;  %311 = vst.msk [vmem:[#allocation2 + $0xac] sm:$0x1] %vm268_vm2, %v7695_v2  ;;  %v7956_v36 = vrot.slane %v1105_v18, 5  ;;  %v527_v8 = vrot.slane %v525_v63, 7  ;;  %v522_v16 = vor.u32 %v520_v62, %v519_v4 }
  0x2c   : > { %313 = vst.msk [vmem:[#allocation2 + $0xb4] sm:$0x1] %vm268_vm2, %v7695_v2  ;;  %315 = vst.msk [vmem:[#allocation2 + $0xbc] sm:$0x1] %vm268_vm2, %v7695_v2  ;;  %v841_v9 = vld [vmem:[#allocation2 + $0x10] sm:$0xf] }
  0x2d   : > { %317 = vst.msk [vmem:[#allocation2 + $0xc4] sm:$0x1] %vm268_vm2, %v7695_v2  ;;  %319 = vst.msk [vmem:[#allocation2 + $0xcc] sm:$0x1] %vm268_vm2, %v7695_v2  ;;  %v844_v10 = vld [vmem:[#allocation2 + $0x14] sm:$0x1]  ;;  %v530_v22 = vor.u32 %v528_v0, %v527_v8  ;;  %v842_v26 = vsel %vm7943_vm7, %v522_v16, %v841_v9 }
  0x2e   : > { %321 = vst.msk [vmem:[#allocation2 + $0xd4] sm:$0x1] %vm268_vm2, %v7695_v2  ;;  %323 = vst.msk [vmem:[#allocation2 + $0xdc] sm:$0x1] %vm268_vm2, %v7695_v2  ;;  %v523_v17 = vrot.slane %v519_v4, 4  ;;  %v645_v20 = vshrl.u32 %v7088_v5, 16 }
  0x2f   : > { %325 = vst.msk [vmem:[#allocation2 + $0xe4] sm:$0x1] %vm268_vm2, %v7695_v2  ;;  %327 = vst.msk [vmem:[#allocation2 + $0xec] sm:$0x1] %vm268_vm2, %v7695_v2  ;;  %v847_v18 = vld [vmem:[#allocation2 + $0x18] sm:$0xf] }
  0x30   : > { %329 = vst.msk [vmem:[#allocation2 + $0xf4] sm:$0x1] %vm268_vm2, %v7695_v2  ;;  %331 = vst.msk [vmem:[#allocation2 + $0xfc] sm:$0x1] %vm268_vm2, %v7695_v2  ;;  %v850_v19 = vld [vmem:[#allocation2 + $0x1c] sm:$0x1]  ;;  %v848_v37 = vsel %vm7943_vm7, %v530_v22, %v847_v18 }
  0x31   : > { %333 = vst.msk [vmem:[#allocation2 + $0x104] sm:$0x1] %vm268_vm2, %v7695_v2  ;;  %335 = vst.msk [vmem:[#allocation2 + $0x10c] sm:$0x1] %vm268_vm2, %v7695_v2  ;;  %v531_v23 = vrot.slane %v527_v8, 4  ;;  %v648_v24 = vshll.u32 %v7088_v5, 16 }
  0x32   : > { %337 = vst.msk [vmem:[#allocation2 + $0x114] sm:$0x1] %vm268_vm2, %v7695_v2  ;;  %339 = vst.msk [vmem:[#allocation2 + $0x11c] sm:$0x1] %vm268_vm2, %v7695_v2  ;;  %v7948_v30 = vld [vmem:[#allocation2 + $0xa4] sm:$0x1] }
  0x33   : > { %341 = vst.msk [vmem:[#allocation2 + $0x124] sm:$0x1] %vm268_vm2, %v7695_v2  ;;  %343 = vst.msk [vmem:[#allocation2 + $0x12c] sm:$0x1] %vm268_vm2, %v7695_v2  ;;  %v1329_v38 = vshll.u32 %v7948_v30, 16  ;;  %v653_v25 = vshrl.u32 %v7089_v6, 16 }
  0x34   : > { %345 = vst.msk [vmem:[#allocation2 + $0x134] sm:$0x1] %vm268_vm2, %v7695_v2  ;;  %347 = vst.msk [vmem:[#allocation2 + $0x13c] sm:$0x1] %vm268_vm2, %v7695_v2  ;;  %v934_v42 = vld [vmem:[#allocation2 + $0xac] sm:$0x1] }
  0x35   : > { %10721 = vst [vmem:[#allocation3_spill] sm:$0xff] %v10720_v27  ;;  %vm7952_vm8 = vmand %vm268_vm2, %vm836_vm4  ;;  %v7962_v48 = vrot.slane %v1329_v38, 5  ;;  %v367_v2 = vld [vmem:[%s7925_s6 + $0x98] sm:$0xff]  ;;  %v647_v31 = vrot.slane %v645_v20, 7  ;;  %v656_v32 = vshll.u32 %v7089_v6, 16  ;;  %v655_v39 = vrot.slane %v653_v25, 7 }
  0x36   : > { %v10723_v33 = vsel %vm7952_vm8, 4294967295, %v10722_v33  ;;  %v839_v50 = vsel %vm7952_vm8, %v515_v41, %v838_v34  ;;  %vm7970_vm9 = vmor %vm1092_vm5, %vm1093_vm6  ;;  %834 = vst [vmem:[#allocation2 + $0x8] sm:$0xf] %v833_v49  ;;  %v935_v57 = vsel %vm7952_vm8, %v643_v47, %v934_v42  ;;  %v8000_v21 = vpack.c.bf16 %v367_v2, %v367_v2  ;;  %v937_v40 = vld [vmem:[#allocation2 + $0xb0] sm:$0xf]  ;;  %v368_v5 = vld [vmem:[%s7925_s6 + $0xa0] sm:$0xff] }
  0x37   : > { %10724 = vst [vmem:[#allocation4_spill] sm:$0xff] %v10723_v33  ;;  %840 = vst [vmem:[#allocation2 + $0xc] sm:$0x1] %v839_v50  ;;  %v1108_v3 = vsel %vm7970_vm9, %v7960_v45, %v7956_v36  ;;  %v1332_v7 = vsel %vm7970_vm9, %v7983_v61, %v7962_v48  ;;  %v845_v29 = vsel %vm7952_vm8, %v523_v17, %v844_v10  ;;  %v533_v41 = vshrl.u32 %v7996_v12, 16  ;;  %v940_v47 = vld [vmem:[#allocation2 + $0xb4] sm:$0x1] }
  0x38   : > { %933 = vst [vmem:[#allocation2 + $0xa8] sm:$0xf] %v932_v56  ;;  %936 = vst [vmem:[#allocation2 + $0xac] sm:$0x1] %v935_v57  ;;  %v851_v38 = vsel %vm7952_vm8, %v531_v23, %v850_v19  ;;  %vm1593_vm10 = vcmask 64512   ;;  %v536_v49 = vshll.u32 %v7996_v12, 16  ;;  %v650_v54 = vor.u32 %v648_v24, %v647_v31 }
  0x39   : > { %843 = vst [vmem:[#allocation2 + $0x10] sm:$0xf] %v842_v26  ;;  %846 = vst [vmem:[#allocation2 + $0x14] sm:$0x1] %v845_v29  ;;  %v651_v55 = vrot.slane %v647_v31, 4  ;;  %v658_v2 = vor.u32 %v656_v32, %v655_v39  ;;  %v659_v9 = vrot.slane %v655_v39, 4  ;;  %v8031_v26 = vpack.c.bf16 %v368_v5, %v368_v5 }
  0x3a   : > { %849 = vst [vmem:[#allocation2 + $0x18] sm:$0xf] %v848_v37  ;;  %852 = vst [vmem:[#allocation2 + $0x1c] sm:$0x1] %v851_v38  ;;  %v943_v62 = vld [vmem:[#allocation2 + $0xb8] sm:$0xf]  ;;  %v938_v10 = vsel %vm7943_vm7, %v650_v54, %v937_v40 }
  0x3b   : > { %v946_v4 = vld [vmem:[#allocation2 + $0xbc] sm:$0x1]  ;;  %v353_v12 = vld [vmem:[%s7925_s6 + $0x28] sm:$0xff]  ;;  %939 = vst [vmem:[#allocation2 + $0xb0] sm:$0xf] %v938_v10  ;;  %v941_v17 = vsel %vm7952_vm8, %v651_v55, %v940_v47  ;;  %v944_v18 = vsel %vm7943_vm7, %v658_v2, %v943_v62  ;;  %v8024_v19 = vrot.slane %v533_v41, 7 }
  0x3c   : > { %942 = vst [vmem:[#allocation2 + $0xb4] sm:$0x1] %v941_v17  ;;  %945 = vst [vmem:[#allocation2 + $0xb8] sm:$0xf] %v944_v18  ;;  %v947_v24 = vsel %vm7952_vm8, %v659_v9, %v946_v4  ;;  %v541_v25 = vshrl.u32 %v7998_v13, 16  ;;  %v8034_v37 = vpack.c.bf16 %v353_v12, %v353_v12  ;;  %vm2195_vm11 = vcmask 1042432  }
  0x3d   : > { %v1028_v34 = vld [vmem:[#allocation2 + $0x8] sm:$0xf]  ;;  %948 = vst [vmem:[#allocation2 + $0xbc] sm:$0x1] %v947_v24  ;;  %v853_v54 = vld [vmem:[#allocation2 + $0x20] sm:$0xf] }
  0x3e   : > { %v8006_v35 = vld [vmem:[#allocation2 + $0xc] sm:$0x1]  ;;  %v1110_v42 = vshrl.u32 %v1028_v34, 16  ;;  %v1113_v43 = vshll.u32 %v1028_v34, 16  ;;  %v538_v34 = vor.u32 %v536_v49, %v8024_v19  ;;  %v539_v48 = vrot.slane %v8024_v19, 4  ;;  %s6606_s21 = sshll.u32 %s7733_s19, 5 }
  0x3f   : > { %v1119_v44 = vshll.u32 %v8006_v35, 16  ;;  %v1044_v46 = vld [vmem:[#allocation2 + $0xa8] sm:$0xf]  ;;  %v1077_v50 = vld [vmem:[#allocation2 + $0xac] sm:$0x1]  ;;  %v543_v61 = vrot.slane %v541_v25, 7 }
  0x40   : > { %v1334_v52 = vshrl.u32 %v1044_v46, 16  ;;  %v1337_v53 = vshll.u32 %v1044_v46, 16  ;;  %v1112_v56 = vrot.slane %v1110_v42, 4  ;;  %v1115_v57 = vrot.slane %v1113_v43, 5  ;;  %v1029_v22 = vld [vmem:[#allocation2 + $0x10] sm:$0xf] }
  0x41   : > { %v1343_v60 = vshll.u32 %v1077_v50, 16  ;;  %v1121_v63 = vrot.slane %v1119_v44, 5  ;;  %v8026_v23 = vld [vmem:[#allocation2 + $0x14] sm:$0x1]  ;;  %v1030_v31 = vld [vmem:[#allocation2 + $0x18] sm:$0xf]  ;;  %v854_v2 = vsel %vm7943_vm7, %v538_v34, %v853_v54 }
  0x42   : > { %v1336_v0 = vrot.slane %v1334_v52, 4  ;;  %v1339_v1 = vrot.slane %v1337_v53, 5  ;;  %v1116_v6 = vor.u32 %v1115_v57, %v1112_v56  ;;  %v1124_v32 = vshrl.u32 %v1029_v22, 16  ;;  %v8038_v39 = vld [vmem:[#allocation2 + $0x1c] sm:$0x1]  ;;  %p10216_p4 = scmp.lt.s32.totalorder %s6606_s21, 63 }
  0x43   : > { %v1345_v8 = vrot.slane %v1343_v60, 5  ;;  %v1127_v40 = vshll.u32 %v1029_v22, 16  ;;  %v1133_v41 = vshll.u32 %v8026_v23, 16  ;;  %v1138_v42 = vshrl.u32 %v1030_v31, 16  ;;  %v1045_v57 = vld [vmem:[#allocation2 + $0xb0] sm:$0xf] }
  0x44   : > { %v1340_v16 = vor.u32 %v1339_v1, %v1336_v0  ;;  %v1117_v20 = vrot.slane %v1116_v6, 4  ;;  %v1126_v46 = vrot.slane %v1124_v32, 4  ;;  %v1141_v47 = vshll.u32 %v1030_v31, 16  ;;  %v1078_v0 = vld [vmem:[#allocation2 + $0xb4] sm:$0x1]  ;;  %s10947_s21 = smov (!%p10216_p4, %s6606_s21), 63 }
  0x45   : > { %v1129_v50 = vrot.slane %v1127_v40, 5  ;;  %v1135_v52 = vrot.slane %v1133_v41, 5  ;;  %v1140_v53 = vrot.slane %v1138_v42, 4  ;;  %v1147_v36 = vshll.u32 %v8038_v39, 16  ;;  %v1079_v5 = vld [vmem:[#allocation2 + $0xbc] sm:$0x1] }
  0x46   : > { %v1341_v29 = vrot.slane %v1340_v16, 4  ;;  %v1122_v38 = vsel %vm7970_vm9, %v1117_v20, %v1121_v63  ;;  %v1143_v55 = vrot.slane %v1141_v47, 5  ;;  %v1046_v63 = vld [vmem:[#allocation2 + $0xb8] sm:$0xf]  ;;  %v1348_v1 = vshrl.u32 %v1045_v57, 16  ;;  %s6607_s23 = sshll.u32 %s10947_s21, 2 }
  0x47   : > { %v6645_v43 = vcombine.low %v1108_v3, %v1122_v38  ;;  %v1130_v56 = vor.u32 %v1129_v50, %v1126_v46  ;;  %v1149_v62 = vrot.slane %v1147_v36, 5  ;;  %v1351_v6 = vshll.u32 %v1045_v57, 16  ;;  %855 = vst [vmem:[#allocation2 + $0x20] sm:$0xf] %v854_v2  ;;  %v859_v24 = vld [vmem:[#allocation2 + $0x28] sm:$0xf]  ;;  %s10321_s26 = scalar_lea.vmem %s10685_s2, %s6607_s23  ;;  %s10614_s11 = scalar_lea.vmem %s10686_s3, %s6607_s23 }
  0x48   : > { %v1346_v44 = vsel %vm7970_vm9, %v1341_v29, %v1345_v8  ;;  %v1144_v60 = vor.u32 %v1143_v55, %v1140_v53  ;;  %v1357_v8 = vshll.u32 %v1078_v0, 16  ;;  %v1362_v9 = vshrl.u32 %v1046_v63, 16  ;;  %v862_v34 = vld [vmem:[#allocation2 + $0x2c] sm:$0x1]  ;;  %v949_v55 = vld [vmem:[#allocation2 + $0xc0] sm:$0xf] }
  0x49   : > { %v6653_v49 = vcombine.low %v1332_v7, %v1346_v44  ;;  %7290 = vmatprep.mubr.msk.bf16.mxu0 %vm1593_vm10, %v6645_v43  ;;  %v544_v7 = vshll.u32 %v7998_v13, 16  ;;  %v1131_v4 = vrot.slane %v1130_v56, 4  ;;  %v1350_v12 = vrot.slane %v1348_v1, 4  ;;  %v856_v13 = vld [vmem:[#allocation2 + $0x24] sm:$0x1]  ;;  %v354_v43 = vld [vmem:[%s7925_s6 + $0x30] sm:$0xff] }
  0x4a   : > { %v1145_v10 = vrot.slane %v1144_v60, 4  ;;  %v1365_v16 = vshll.u32 %v1046_v63, 16  ;;  %v1371_v17 = vshll.u32 %v1079_v5, 16  ;;  %v1353_v19 = vrot.slane %v1351_v6, 5  ;;  %v952_v63 = vld [vmem:[#allocation2 + $0xc4] sm:$0x1] }
  0x4b   : > { %7306 = vmatprep.mubr.msk.bf16.mxu1 %vm1593_vm10, %v6653_v49  ;;  %v1136_v18 = vsel %vm7970_vm9, %v1131_v4, %v1135_v52  ;;  %v1359_v20 = vrot.slane %v1357_v8, 5  ;;  %v1364_v22 = vrot.slane %v1362_v9, 4  ;;  %v546_v32 = vor.u32 %v544_v7, %v543_v61  ;;  %v955_v2 = vld [vmem:[#allocation2 + $0xc8] sm:$0xf]  ;;  %v958_v9 = vld [vmem:[#allocation2 + $0xcc] sm:$0x1] }
  0x4c   : > { %v1150_v25 = vsel %vm7970_vm9, %v1145_v10, %v1149_v62  ;;  %v1367_v29 = vrot.slane %v1365_v16, 5  ;;  %v1373_v31 = vrot.slane %v1371_v17, 5  ;;  %v1354_v40 = vor.u32 %v1353_v19, %v1350_v12  ;;  %s7696_s27 = smov 120   ;;  %p257_p5 = scmp.lt.s32.totalorder %s7733_s19, 1 }
  0x4d   : > { %v6646_v38 = vcombine.low %v1136_v18, %v1150_v25  ;;  %v547_v41 = vrot.slane %v543_v61, 4  ;;  %v857_v42 = vsel %vm7952_vm8, %v539_v48, %v856_v13  ;;  %v860_v46 = vsel %vm7943_vm7, %v546_v32, %v859_v24  ;;  %v865_v13 = vld [vmem:[#allocation2 + $0x30] sm:$0xf]  ;;  %v868_v25 = vld [vmem:[#allocation2 + $0x34] sm:$0x1] }
  0x4e   : > { %v1368_v44 = vor.u32 %v1367_v29, %v1364_v22  ;;  %858 = vst [vmem:[#allocation2 + $0x24] sm:$0x1] %v857_v42  ;;  %v661_v47 = vshrl.u32 %v8000_v21, 16  ;;  %v664_v49 = vshll.u32 %v8000_v21, 16  ;;  %v1355_v50 = vrot.slane %v1354_v40, 4  ;;  %v369_v29 = vld [vmem:[%s7925_s6 + $0xa8] sm:$0xff] }
  0x4f   : > { %7291 = vmatmul.mubr.msk.bf16.vlgmr.msra.gmra.mxu0 %vm1593_vm10, %v6646_v38  ;;  %861 = vst [vmem:[#allocation2 + $0x28] sm:$0xf] %v860_v46  ;;  %v863_v52 = vsel %vm7952_vm8, %v547_v41, %v862_v34  ;;  %v669_v53 = vshrl.u32 %v8031_v26, 16  ;;  %v672_v54 = vshll.u32 %v8031_v26, 16  ;;  %v1031_v56 = vld [vmem:[#allocation2 + $0x20] sm:$0xf]  ;;  %v7077_v48 = vpack.c.bf16 %v354_v43, %v354_v43 }
  0x50   : > { %v1369_v36 = vrot.slane %v1368_v44, 4  ;;  %7357 = vmatpush3.bf16.msra.mxu0 %v7936_v15  ;;  %864 = vst [vmem:[#allocation2 + $0x2c] sm:$0x1] %v863_v52  ;;  %v663_v57 = vrot.slane %v661_v47, 7  ;;  %v549_v21 = vshrl.u32 %v8034_v37, 16  ;;  %v1360_v61 = vsel %vm7970_vm9, %v1355_v50, %v1359_v20  ;;  %v370_v40 = vld [vmem:[%s7925_s6 + $0xb0] sm:$0xff] }
  0x51   : > { %v1152_v7 = vshrl.u32 %v1031_v56, 16  ;;  %v1155_v60 = vshll.u32 %v1031_v56, 16  ;;  %v671_v62 = vrot.slane %v669_v53, 7  ;;  %v552_v17 = vshll.u32 %v8034_v37, 16  ;;  %v356_v41 = vld [vmem:[%s7925_s6 + $0x40] sm:$0xff]  ;;  %s10949_s19 = smov (!%p257_p5, %s7733_s19), 1 }
  0x52   : > { %v1374_v26 = vsel %vm7970_vm9, %v1369_v36, %v1373_v31  ;;  %v666_v0 = vor.u32 %v664_v49, %v663_v57  ;;  %v667_v1 = vrot.slane %v663_v57, 4  ;;  %v551_v15 = vrot.slane %v549_v21, 7  ;;  %v871_v53 = vld [vmem:[#allocation2 + $0x38] sm:$0xf]  ;;  %v357_v21 = vld [vmem:[%s7925_s6 + $0x48] sm:$0xff]  ;;  %s6610_s28 = sshll.u32 %s10949_s19, 3 }
  0x53   : > { %v6654_v4 = vcombine.low %v1360_v61, %v1374_v26  ;;  %v1154_v5 = vrot.slane %v1152_v7, 4  ;;  %v1157_v6 = vrot.slane %v1155_v60, 5  ;;  %v674_v8 = vor.u32 %v672_v54, %v671_v62  ;;  %v874_v54 = vld [vmem:[#allocation2 + $0x3c] sm:$0x1]  ;;  %s264_s9 = scalar_lea.vmem %s10688_s5, %s6610_s28 }
  0x54   : > { %v675_v10 = vrot.slane %v671_v62, 4  ;;  %v950_v12 = vsel %vm7943_vm7, %v666_v0, %v949_v55  ;;  %v953_v16 = vsel %vm7952_vm8, %v667_v1, %v952_v63  ;;  %v555_v22 = vrot.slane %v551_v15, 4 }
  0x55   : > { %7307 = vmatmul.mubr.msk.bf16.vlgmr.msra.gmra.mxu1 %vm1593_vm10, %v6654_v4  ;;  %v1064_v18 = vld [vmem:[#allocation2 + $0x24] sm:$0x1]  ;;  %v1158_v19 = vor.u32 %v1157_v6, %v1154_v5  ;;  %951 = vst [vmem:[#allocation2 + $0xc0] sm:$0xf] %v950_v12  ;;  %954 = vst [vmem:[#allocation2 + $0xc4] sm:$0x1] %v953_v16  ;;  %v956_v20 = vsel %vm7943_vm7, %v674_v8, %v955_v2  ;;  %v554_v34 = vor.u32 %v552_v17, %v551_v15 }
  0x56   : > { %v557_v24 = vshrl.u32 %v7077_v48, 16  ;;  %7323 = vmatpush3.bf16.msra.mxu1 %v7933_v14  ;;  %v1032_v31 = vld [vmem:[#allocation2 + $0x28] sm:$0xf]  ;;  %v1161_v37 = vshll.u32 %v1064_v18, 16  ;;  %957 = vst [vmem:[#allocation2 + $0xc8] sm:$0xf] %v956_v20  ;;  %v959_v32 = vsel %vm7952_vm8, %v675_v10, %v958_v9  ;;  %v869_v52 = vsel %vm7952_vm8, %v555_v22, %v868_v25 }
  0x57   : > { %v560_v38 = vshll.u32 %v7077_v48, 16  ;;  %v1065_v42 = vld [vmem:[#allocation2 + $0x2c] sm:$0x1]  ;;  %v1159_v43 = vrot.slane %v1158_v19, 4  ;;  %v1166_v44 = vshrl.u32 %v1032_v31, 16  ;;  %v1169_v46 = vshll.u32 %v1032_v31, 16 }
  0x58   : > { %960 = vst [vmem:[#allocation2 + $0xcc] sm:$0x1] %v959_v32  ;;  %v559_v47 = vrot.slane %v557_v24, 7  ;;  %v1163_v49 = vrot.slane %v1161_v37, 5  ;;  %v1175_v14 = vshll.u32 %v1065_v42, 16  ;;  %v866_v50 = vsel %vm7943_vm7, %v554_v34, %v865_v13  ;;  %v372_v48 = vld [vmem:[%s7925_s6 + $0xc0] sm:$0xff] }
  0x59   : > { %v1168_v55 = vrot.slane %v1166_v44, 4  ;;  %v1171_v36 = vrot.slane %v1169_v46, 5  ;;  %867 = vst [vmem:[#allocation2 + $0x30] sm:$0xf] %v866_v50  ;;  %870 = vst [vmem:[#allocation2 + $0x34] sm:$0x1] %v869_v52  ;;  %v7092_v60 = vpack.c.bf16 %v369_v29, %v369_v29  ;;  %v8106_v62 = vpack.c.bf16 %v370_v40, %v370_v40 }
  0x5a   : > { %v562_v56 = vor.u32 %v560_v38, %v559_v47  ;;  %v563_v57 = vrot.slane %v559_v47, 4  ;;  %v1164_v61 = vsel %vm7970_vm9, %v1159_v43, %v1163_v49  ;;  %v1177_v7 = vrot.slane %v1175_v14, 5  ;;  %v961_v37 = vld [vmem:[#allocation2 + $0xd0] sm:$0xf] }
  0x5b   : > { %v1172_v63 = vor.u32 %v1171_v36, %v1168_v55  ;;  %v8112_v1 = vpack.c.bf16 %v356_v41, %v356_v41  ;;  %v677_v4 = vshrl.u32 %v7092_v60, 16  ;;  %v680_v5 = vshll.u32 %v7092_v60, 16  ;;  %v358_v42 = vld [vmem:[%s7925_s6 + $0x50] sm:$0xff] }
  0x5c   : > { %v872_v26 = vsel %vm7943_vm7, %v562_v56, %v871_v53  ;;  %v875_v0 = vsel %vm7952_vm8, %v563_v57, %v874_v54  ;;  %v1047_v2 = vld [vmem:[#allocation2 + $0xc0] sm:$0xf]  ;;  %v1080_v15 = vld [vmem:[#allocation2 + $0xc4] sm:$0x1]  ;;  %v8114_v6 = vpack.c.bf16 %v372_v48, %v372_v48  ;;  %v8116_v8 = vpack.c.bf16 %v357_v21, %v357_v21 }
  0x5d   : > { %873 = vst [vmem:[#allocation2 + $0x38] sm:$0xf] %v872_v26  ;;  %876 = vst [vmem:[#allocation2 + $0x3c] sm:$0x1] %v875_v0  ;;  %v1173_v9 = vrot.slane %v1172_v63, 4  ;;  %v1376_v12 = vshrl.u32 %v1047_v2, 16  ;;  %v8136_v48 = vpack.c.bf16 %v358_v42, %v358_v42 }
  0x5e   : > { %v1048_v10 = vld [vmem:[#allocation2 + $0xc8] sm:$0xf]  ;;  %v1379_v16 = vshll.u32 %v1047_v2, 16  ;;  %v1385_v17 = vshll.u32 %v1080_v15, 16  ;;  %v679_v20 = vrot.slane %v677_v4, 7  ;;  %v685_v22 = vshrl.u32 %v8106_v62, 16 }
  0x5f   : > { %v1081_v13 = vld [vmem:[#allocation2 + $0xcc] sm:$0x1]  ;;  %v1390_v18 = vshrl.u32 %v1048_v10, 16  ;;  %v1393_v19 = vshll.u32 %v1048_v10, 16  ;;  %v1178_v24 = vsel %vm7970_vm9, %v1173_v9, %v1177_v7  ;;  %v1378_v25 = vrot.slane %v1376_v12, 4 }
  0x60   : > { %v1381_v29 = vrot.slane %v1379_v16, 5  ;;  %v1387_v31 = vrot.slane %v1385_v17, 5  ;;  %v6647_v32 = vcombine.low %v1164_v61, %v1178_v24  ;;  %v1399_v40 = vshll.u32 %v1081_v13, 16  ;;  %v8121_v41 = vld [vmem:[#allocation2 + $0x30] sm:$0xf] }
  0x61   : > { %v1392_v34 = vrot.slane %v1390_v18, 4  ;;  %v1395_v38 = vrot.slane %v1393_v19, 5  ;;  %v8124_v44 = vld [vmem:[#allocation2 + $0x34] sm:$0x1]  ;;  %v1180_v46 = vshrl.u32 %v8121_v41, 16  ;;  %v1183_v47 = vshll.u32 %v8121_v41, 16 }
  0x62   : > { %v1382_v43 = vor.u32 %v1381_v29, %v1378_v25  ;;  %v682_v49 = vor.u32 %v680_v5, %v679_v20  ;;  %7294 = vmatprep.mubr.msk.bf16.mxu0 %vm1593_vm10, %v6647_v32  ;;  %v1401_v50 = vrot.slane %v1399_v40, 5  ;;  %v1189_v52 = vshll.u32 %v8124_v44, 16  ;;  %v964_v63 = vld [vmem:[#allocation2 + $0xd4] sm:$0x1]  ;;  %v970_v4 = vld [vmem:[#allocation2 + $0xdc] sm:$0x1] }
  0x63   : > { %v1396_v14 = vor.u32 %v1395_v38, %v1392_v34  ;;  %v683_v53 = vrot.slane %v679_v20, 4  ;;  %v1182_v56 = vrot.slane %v1180_v46, 4  ;;  %v1185_v61 = vrot.slane %v1183_v47, 5  ;;  %v8146_v16 = vld [vmem:[#allocation2 + $0x50] sm:$0xf] }
  0x64   : > { %v1383_v54 = vrot.slane %v1382_v43, 4  ;;  %v8130_v55 = vld [vmem:[#allocation2 + $0x38] sm:$0xf]  ;;  %v8132_v36 = vld [vmem:[#allocation2 + $0x3c] sm:$0x1]  ;;  %v962_v57 = vsel %vm7943_vm7, %v682_v49, %v961_v37  ;;  %v1191_v7 = vrot.slane %v1189_v52, 5 }
  0x65   : > { %v1397_v21 = vrot.slane %v1396_v14, 4  ;;  %v1194_v60 = vshrl.u32 %v8130_v55, 16  ;;  %963 = vst [vmem:[#allocation2 + $0xd0] sm:$0xf] %v962_v57  ;;  %v1197_v0 = vshll.u32 %v8130_v55, 16  ;;  %v1203_v2 = vshll.u32 %v8132_v36, 16 }
  0x66   : > { %v1388_v26 = vsel %vm7970_vm9, %v1383_v54, %v1387_v31  ;;  %v687_v15 = vrot.slane %v685_v22, 7  ;;  %v1186_v9 = vor.u32 %v1185_v61, %v1182_v56  ;;  %v688_v12 = vshll.u32 %v8106_v62, 16  ;;  %v8151_v17 = vld [vmem:[%s10684_s1 + $0xc] sm:$0xf]  ;;  %v967_v22 = vld [vmem:[#allocation2 + $0xd8] sm:$0xf] }
  0x67   : > { %v1402_v5 = vsel %vm7970_vm9, %v1397_v21, %v1401_v50  ;;  %v1196_v10 = vrot.slane %v1194_v60, 4  ;;  %v1199_v18 = vrot.slane %v1197_v0, 5  ;;  %v1205_v19 = vrot.slane %v1203_v2, 5  ;;  %7600 = vmatprep.subr.msk.bf16.mxu1 %vm1642_vm0, %v8151_v17  ;;  %v8158_v31 = vld [vmem:[#allocation2 + $0x54] sm:$0x1] }
  0x68   : > { %v6655_v13 = vcombine.low %v1388_v26, %v1402_v5  ;;  %v691_v20 = vrot.slane %v687_v15, 4  ;;  %v1187_v24 = vrot.slane %v1186_v9, 4  ;;  %v690_v25 = vor.u32 %v688_v12, %v687_v15  ;;  %v8163_v37 = vld [vmem:[%s10684_s1 + $0x10] sm:$0xf]  ;;  %v883_v47 = vld [vmem:[#allocation2 + $0x58] sm:$0xf] }
  0x69   : > { %v965_v62 = vsel %vm7952_vm8, %v683_v53, %v964_v63  ;;  %v573_v29 = vshrl.u32 %v8112_v1, 16  ;;  %v1200_v32 = vor.u32 %v1199_v18, %v1196_v10  ;;  %v576_v38 = vshll.u32 %v8112_v1, 16  ;;  %7601 = vmatprep.subr.msk.bf16.mxu0 %vm1642_vm0, %v8163_v37  ;;  %v886_v49 = vld [vmem:[#allocation2 + $0x5c] sm:$0x1]  ;;  %v1084_v2 = vld [vmem:[#allocation2 + $0xf4] sm:$0x1] }
  0x6a   : > { %7310 = vmatprep.mubr.msk.bf16.mxu1 %vm1593_vm10, %v6655_v13  ;;  %966 = vst [vmem:[#allocation2 + $0xd4] sm:$0x1] %v965_v62  ;;  %v971_v34 = vsel %vm7952_vm8, %v691_v20, %v970_v4  ;;  %v1208_v40 = vshrl.u32 %v8146_v16, 16  ;;  %v1192_v42 = vsel %vm7970_vm9, %v1187_v24, %v1191_v7  ;;  %v968_v43 = vsel %vm7943_vm7, %v690_v25, %v967_v22  ;;  %v1051_v7 = vld [vmem:[#allocation2 + $0xf0] sm:$0xf] }
  0x6b   : > { %972 = vst [vmem:[#allocation2 + $0xdc] sm:$0x1] %v971_v34  ;;  %v575_v46 = vrot.slane %v573_v29, 7  ;;  %v1211_v14 = vshll.u32 %v8146_v16, 16  ;;  %v1201_v50 = vrot.slane %v1200_v32, 4  ;;  %v1217_v53 = vshll.u32 %v8158_v31, 16 }
  0x6c   : > { %969 = vst [vmem:[#allocation2 + $0xd8] sm:$0xf] %v968_v43  ;;  %v1049_v1 = vld [vmem:[#allocation2 + $0xd0] sm:$0xf]  ;;  %v1210_v52 = vrot.slane %v1208_v40, 4  ;;  %v701_v54 = vshrl.u32 %v8114_v6, 16 }
  0x6d   : > { %v1404_v56 = vshrl.u32 %v1049_v1, 16  ;;  %v1407_v57 = vshll.u32 %v1049_v1, 16  ;;  %v578_v21 = vor.u32 %v576_v38, %v575_v46  ;;  %v579_v61 = vrot.slane %v575_v46, 4  ;;  %v982_v10 = vld [vmem:[#allocation2 + $0xfc] sm:$0x1] }
  0x6e   : > { %v1206_v60 = vsel %vm7970_vm9, %v1201_v50, %v1205_v19  ;;  %v1213_v63 = vrot.slane %v1211_v14, 5  ;;  %v8181_v26 = vrot.slane %v1217_v53, 5  ;;  %v703_v0 = vrot.slane %v701_v54, 7  ;;  %v979_v40 = vld [vmem:[#allocation2 + $0xf8] sm:$0xf] }
  0x6f   : > { %v6648_v15 = vcombine.low %v1192_v42, %v1206_v60  ;;  %v1406_v4 = vrot.slane %v1404_v56, 4  ;;  %v1409_v5 = vrot.slane %v1407_v57, 5  ;;  %v884_v9 = vsel %vm7943_vm7, %v578_v21, %v883_v47 }
  0x70   : > { %885 = vst [vmem:[#allocation2 + $0x58] sm:$0xf] %v884_v9  ;;  %v887_v12 = vsel %vm7952_vm8, %v579_v61, %v886_v49  ;;  %v1214_v13 = vor.u32 %v1213_v63, %v1210_v52  ;;  %v704_v18 = vshll.u32 %v8114_v6, 16  ;;  %v707_v19 = vrot.slane %v703_v0, 4  ;;  %v373_v63 = vld [vmem:[%s7925_s6 + $0xc8] sm:$0xff] }
  0x71   : > { %7295 = vmatmul.mubr.msk.bf16.gmra.mxu0 %vm1593_vm10, %v6648_v15  ;;  %v8189_v20 = vld [vmem:[#allocation2 + $0xd4] sm:$0x1]  ;;  %v1410_v22 = vor.u32 %v1409_v5, %v1406_v4  ;;  %888 = vst [vmem:[#allocation2 + $0x5c] sm:$0x1] %v887_v12  ;;  %v1432_v24 = vshrl.u32 %v1051_v7, 16  ;;  %v1435_v25 = vshll.u32 %v1051_v7, 16 }
  0x72   : > { %v1441_v62 = vshll.u32 %v1084_v2, 16  ;;  %v8191_v29 = vld [vmem:[#allocation2 + $0xdc] sm:$0x1]  ;;  %v1413_v32 = vshll.u32 %v8189_v20, 16  ;;  %v8194_v34 = vrot.slane %v1214_v13, 4  ;;  %v706_v38 = vor.u32 %v704_v18, %v703_v0 }
  0x73   : > { %v983_v6 = vsel %vm7952_vm8, %v707_v19, %v982_v10  ;;  %v8198_v42 = vld [vmem:[#allocation2 + $0xd8] sm:$0xf]  ;;  %v1411_v43 = vrot.slane %v1410_v22, 4  ;;  %v1427_v46 = vshll.u32 %v8191_v29, 16  ;;  %v1434_v47 = vrot.slane %v1432_v24, 4 }
  0x74   : > { %984 = vst [vmem:[#allocation2 + $0xfc] sm:$0x1] %v983_v6  ;;  %v1437_v49 = vrot.slane %v1435_v25, 5  ;;  %v1415_v14 = vrot.slane %v1413_v32, 5  ;;  %v1418_v50 = vshrl.u32 %v8198_v42, 16  ;;  %v1421_v1 = vshll.u32 %v8198_v42, 16 }
  0x75   : > { %v1220_v52 = vsel %vm7970_vm9, %v8194_v34, %v8181_v26  ;;  %v1429_v53 = vrot.slane %v1427_v46, 5  ;;  %v980_v54 = vsel %vm7943_vm7, %v706_v38, %v979_v40  ;;  %v8209_v57 = vrot.slane %v1441_v62, 5  ;;  %v889_v9 = vld [vmem:[#allocation2 + $0x60] sm:$0xf]  ;;  %v892_v22 = vld [vmem:[#allocation2 + $0x64] sm:$0x1] }
  0x76   : > { %v1438_v56 = vor.u32 %v1437_v49, %v1434_v47  ;;  %v1416_v21 = vsel %vm7970_vm9, %v1411_v43, %v1415_v14  ;;  %v1420_v61 = vrot.slane %v1418_v50, 4  ;;  %v1423_v7 = vrot.slane %v1421_v1, 5  ;;  %981 = vst [vmem:[#allocation2 + $0xf8] sm:$0xf] %v980_v54  ;;  %v895_v62 = vld [vmem:[#allocation2 + $0x68] sm:$0xf] }
  0x77   : > { %v581_v60 = vshrl.u32 %v8116_v8, 16  ;;  %v8215_v0 = vld [vmem:[#allocation2 + $0x58] sm:$0xf]  ;;  %v584_v15 = vshll.u32 %v8116_v8, 16  ;;  %v589_v4 = vshrl.u32 %v8136_v48, 16  ;;  %v592_v5 = vshll.u32 %v8136_v48, 16 }
  0x78   : > { %v8217_v2 = vrot.slane %v1438_v56, 4  ;;  %v1424_v10 = vor.u32 %v1423_v7, %v1420_v61  ;;  %v8222_v12 = vld [vmem:[#allocation2 + $0x5c] sm:$0x1]  ;;  %v1222_v13 = vshrl.u32 %v8215_v0, 16  ;;  %v1225_v18 = vshll.u32 %v8215_v0, 16  ;;  %v374_v7 = vld [vmem:[%s7925_s6 + $0xd0] sm:$0xff] }
  0x79   : > { %v583_v19 = vrot.slane %v581_v60, 7  ;;  %v1231_v24 = vshll.u32 %v8222_v12, 16  ;;  %v591_v25 = vrot.slane %v589_v4, 7  ;;  %v7096_v48 = vpack.c.bf16 %v373_v63, %v373_v63  ;;  %v898_v50 = vld [vmem:[#allocation2 + $0x6c] sm:$0x1]  ;;  %v359_v60 = vld [vmem:[%s7925_s6 + $0x58] sm:$0xff] }
  0x7a   : > { %v1444_v8 = vsel %vm7970_vm9, %v8217_v2, %v8209_v57  ;;  %v1425_v32 = vrot.slane %v1424_v10, 4  ;;  %v1224_v38 = vrot.slane %v1222_v13, 4  ;;  %v1227_v40 = vrot.slane %v1225_v18, 5  ;;  %v360_v13 = vld [vmem:[%s7925_s6 + $0x60] sm:$0xff]  ;;  %v904_v2 = vld [vmem:[#allocation2 + $0x74] sm:$0x1] }
  0x7b   : > { %v8231_v6 = vld [vmem:[#allocation2 + $0xfc] sm:$0x1]  ;;  %v586_v43 = vor.u32 %v584_v15, %v583_v19  ;;  %v1233_v46 = vrot.slane %v1231_v24, 5  ;;  %v587_v49 = vrot.slane %v583_v19, 4  ;;  %v594_v14 = vor.u32 %v592_v5, %v591_v25  ;;  %v988_v34 = vld [vmem:[#allocation2 + $0x104] sm:$0x1] }
  0x7c   : > { %10727 = vst [vmem:[#allocation5_spill] sm:$0xff] %v8231_v6  ;;  %v1455_v47 = vshll.u32 %v8231_v6, 16  ;;  %v1430_v1 = vsel %vm7970_vm9, %v1425_v32, %v1429_v53  ;;  %v1228_v54 = vor.u32 %v1227_v40, %v1224_v38  ;;  %v595_v56 = vrot.slane %v591_v25, 4 }
  0x7d   : > { %v890_v61 = vsel %vm7943_vm7, %v586_v43, %v889_v9  ;;  %v6656_v63 = vcombine.low %v1416_v21, %v1430_v1  ;;  %v8240_v4 = vld [vmem:[#allocation2 + $0xf8] sm:$0xf]  ;;  %v893_v10 = vsel %vm7952_vm8, %v587_v49, %v892_v22  ;;  %v896_v5 = vsel %vm7943_vm7, %v594_v14, %v895_v62 }
  0x7e   : > { %v1457_v15 = vrot.slane %v1455_v47, 5  ;;  %891 = vst [vmem:[#allocation2 + $0x60] sm:$0xf] %v890_v61  ;;  %v1229_v53 = vrot.slane %v1228_v54, 4  ;;  %v1446_v18 = vshrl.u32 %v8240_v4, 16  ;;  %v1449_v19 = vshll.u32 %v8240_v4, 16 }
  0x7f   : > { %894 = vst [vmem:[#allocation2 + $0x64] sm:$0x1] %v893_v10  ;;  %897 = vst [vmem:[#allocation2 + $0x68] sm:$0xf] %v896_v5  ;;  %v899_v21 = vsel %vm7952_vm8, %v595_v56, %v898_v50  ;;  %7311 = vmatmul.mubr.msk.bf16.gmra.mxu1 %vm1593_vm10, %v6656_v63  ;;  %v7097_v9 = vpack.c.bf16 %v374_v7, %v374_v7  ;;  %v709_v22 = vshrl.u32 %v7096_v48, 16  ;;  %v712_v24 = vshll.u32 %v7096_v48, 16 }
  0x80   : > { %900 = vst [vmem:[#allocation2 + $0x6c] sm:$0x1] %v899_v21  ;;  %v7082_v25 = vpack.c.bf16 %v359_v60, %v359_v60  ;;  %v1234_v62 = vsel %vm7970_vm9, %v1229_v53, %v1233_v46  ;;  %v1448_v32 = vrot.slane %v1446_v18, 4  ;;  %v1451_v38 = vrot.slane %v1449_v19, 5  ;;  %v375_v50 = vld [vmem:[%s7925_s6 + $0xd8] sm:$0xff] }
  0x81   : > { %v8254_v40 = vpack.c.bf16 %v360_v13, %v360_v13  ;;  %v6649_v43 = vcombine.low %v1220_v52, %v1234_v62  ;;  %v711_v47 = vrot.slane %v709_v22, 7  ;;  %v717_v49 = vshrl.u32 %v7097_v9, 16  ;;  %v985_v48 = vld [vmem:[#allocation2 + $0x100] sm:$0xf]  ;;  %v991_v52 = vld [vmem:[#allocation2 + $0x108] sm:$0xf] }
  0x82   : > { %v720_v14 = vshll.u32 %v7097_v9, 16  ;;  %v1452_v1 = vor.u32 %v1451_v38, %v1448_v32  ;;  %v597_v54 = vshrl.u32 %v7082_v25, 16  ;;  %v600_v56 = vshll.u32 %v7082_v25, 16 }
  0x83   : > { %v605_v46 = vshrl.u32 %v8254_v40, 16  ;;  %7298 = vmatprep.mubr.msk.bf16.mxu0 %vm1593_vm10, %v6649_v43  ;;  %v714_v61 = vor.u32 %v712_v24, %v711_v47  ;;  %v715_v7 = vrot.slane %v711_v47, 4  ;;  %v719_v60 = vrot.slane %v717_v49, 7 }
  0x84   : > { %v608_v63 = vshll.u32 %v8254_v40, 16  ;;  %v1453_v10 = vrot.slane %v1452_v1, 4  ;;  %v599_v5 = vrot.slane %v597_v54, 7  ;;  %v8267_v53 = vpack.c.bf16 %v375_v50, %v375_v50  ;;  %v376_v50 = vld [vmem:[%s7925_s6 + $0xe0] sm:$0xff] }
  0x85   : > { %v8265_v26 = vld [vmem:[#allocation2 + $0x60] sm:$0xf]  ;;  %v607_v13 = vrot.slane %v605_v46, 7  ;;  %v722_v22 = vor.u32 %v720_v14, %v719_v60  ;;  %v986_v24 = vsel %vm7943_vm7, %v714_v61, %v985_v48  ;;  %v723_v46 = vrot.slane %v719_v60, 4  ;;  %v901_v61 = vld [vmem:[#allocation2 + $0x70] sm:$0xf] }
  0x86   : > { %10728 = vst [vmem:[#allocation6_spill] sm:$0xff] %v8265_v26  ;;  %v8269_v18 = vld [vmem:[#allocation2 + $0x68] sm:$0xf]  ;;  %v8271_v19 = vld [vmem:[#allocation2 + $0x64] sm:$0x1]  ;;  %v1236_v21 = vshrl.u32 %v8265_v26, 16  ;;  %v1458_v25 = vsel %vm7970_vm9, %v1453_v10, %v1457_v15  ;;  %v989_v58 = vsel %vm7952_vm8, %v715_v7, %v988_v34  ;;  %v7099_v7 = vpack.c.bf16 %v376_v50, %v376_v50 }
  0x87   : > { %10729 = vst [vmem:[#allocation7_spill] sm:$0xff] %v8269_v18  ;;  %v1239_v9 = vshll.u32 %v8265_v26, 16  ;;  %v8279_v62 = vld [vmem:[#allocation2 + $0x6c] sm:$0x1]  ;;  %v1245_v32 = vshll.u32 %v8271_v19, 16  ;;  %v1250_v38 = vshrl.u32 %v8269_v18, 16  ;;  %v6657_v43 = vcombine.low %v1444_v8, %v1458_v25 }
  0x88   : > { %v1253_v40 = vshll.u32 %v8269_v18, 16  ;;  %987 = vst [vmem:[#allocation2 + $0x100] sm:$0xf] %v986_v24  ;;  %v1238_v47 = vrot.slane %v1236_v21, 4  ;;  %v1259_v14 = vshll.u32 %v8279_v62, 16  ;;  %v992_v57 = vsel %vm7943_vm7, %v722_v22, %v991_v52 }
  0x89   : > { %v1241_v49 = vrot.slane %v1239_v9, 5  ;;  %v994_v15 = vld [vmem:[#allocation2 + $0x10c] sm:$0x1]  ;;  %v1247_v1 = vrot.slane %v1245_v32, 5  ;;  %v1252_v48 = vrot.slane %v1250_v38, 4  ;;  %7314 = vmatprep.mubr.msk.bf16.mxu1 %vm1593_vm10, %v6657_v43  ;;  %v602_v9 = vor.u32 %v600_v56, %v599_v5 }
  0x8a   : > { %v1255_v54 = vrot.slane %v1253_v40, 5  ;;  %v1261_v24 = vrot.slane %v1259_v14, 5  ;;  %v907_v8 = vld [vmem:[#allocation2 + $0x78] sm:$0xf]  ;;  %990 = vst [vmem:[#allocation2 + $0x104] sm:$0x1] %v989_v58  ;;  %v995_v60 = vsel %vm7952_vm8, %v723_v46, %v994_v15  ;;  %v610_v40 = vor.u32 %v608_v63, %v607_v13 }
  0x8b   : > { %v1242_v10 = vor.u32 %v1241_v49, %v1238_v47  ;;  %993 = vst [vmem:[#allocation2 + $0x108] sm:$0xf] %v992_v57  ;;  %v603_v25 = vrot.slane %v599_v5, 4  ;;  %v910_v32 = vld [vmem:[#allocation2 + $0x7c] sm:$0x1]  ;;  %v611_v43 = vrot.slane %v607_v13, 4  ;;  %v902_v52 = vsel %vm7943_vm7, %v602_v9, %v901_v61 }
  0x8c   : > { %v1256_v21 = vor.u32 %v1255_v54, %v1252_v48  ;;  %996 = vst [vmem:[#allocation2 + $0x10c] sm:$0x1] %v995_v60  ;;  %v725_v58 = vshrl.u32 %v8267_v53, 16  ;;  %v361_v47 = vld [vmem:[%s7925_s6 + $0x68] sm:$0xff]  ;;  %903 = vst [vmem:[#allocation2 + $0x70] sm:$0xf] %v902_v52  ;;  %v908_v63 = vsel %vm7943_vm7, %v610_v40, %v907_v8 }
  0x8d   : > { %v1243_v38 = vrot.slane %v1242_v10, 4  ;;  %v905_v22 = vsel %vm7952_vm8, %v603_v25, %v904_v2  ;;  %v911_v13 = vsel %vm7952_vm8, %v611_v43, %v910_v32  ;;  %v728_v49 = vshll.u32 %v8267_v53, 16  ;;  %909 = vst [vmem:[#allocation2 + $0x78] sm:$0xf] %v908_v63  ;;  %v362_v48 = vld [vmem:[%s7925_s6 + $0x70] sm:$0xff]  ;;  %v377_v54 = vld [vmem:[%s7925_s6 + $0xe8] sm:$0xff] }
  0x8e   : > { %v1257_v34 = vrot.slane %v1256_v21, 4  ;;  %906 = vst [vmem:[#allocation2 + $0x74] sm:$0x1] %v905_v22  ;;  %912 = vst [vmem:[#allocation2 + $0x7c] sm:$0x1] %v911_v13  ;;  %v733_v61 = vshrl.u32 %v7099_v7, 16  ;;  %v8319_v2 = vpack.c.bf16 %v361_v47, %v361_v47  ;;  %v8326_v40 = vpack.c.bf16 %v362_v48, %v362_v48 }
  0x8f   : > { %v1248_v56 = vsel %vm7970_vm9, %v1243_v38, %v1247_v1  ;;  %v8306_v5 = vld [vmem:[#allocation2 + $0x100] sm:$0xf]  ;;  %v727_v1 = vrot.slane %v725_v58, 7  ;;  %v736_v10 = vshll.u32 %v7099_v7, 16  ;;  %v997_v57 = vld [vmem:[#allocation2 + $0x110] sm:$0xf]  ;;  %v8329_v7 = vpack.c.bf16 %v377_v54, %v377_v54 }
  0x90   : > { %10730 = vst [vmem:[#allocation8_spill] sm:$0xff] %v8306_v5  ;;  %v1262_v14 = vsel %vm7970_vm9, %v1257_v34, %v1261_v24  ;;  %v1460_v15 = vshrl.u32 %v8306_v5, 16  ;;  %v1463_v50 = vshll.u32 %v8306_v5, 16  ;;  %v1000_v24 = vld [vmem:[#allocation2 + $0x114] sm:$0x1]  ;;  %v735_v38 = vrot.slane %v733_v61, 7 }
  0x91   : > { %v6650_v46 = vcombine.low %v1248_v56, %v1262_v14  ;;  %v730_v21 = vor.u32 %v728_v49, %v727_v1  ;;  %v731_v60 = vrot.slane %v727_v1, 4  ;;  %v1003_v9 = vld [vmem:[#allocation2 + $0x118] sm:$0xf]  ;;  %v8324_v32 = vld [vmem:[#allocation2 + $0x104] sm:$0x1]  ;;  %v613_v43 = vshrl.u32 %v8319_v2, 16 }
  0x92   : > { %v1462_v8 = vrot.slane %v1460_v15, 4  ;;  %v1465_v53 = vrot.slane %v1463_v50, 5  ;;  %v8322_v25 = vld [vmem:[#allocation2 + $0x108] sm:$0xf]  ;;  %10732 = vst [vmem:[#allocation10_spill] sm:$0xff] %v8324_v32  ;;  %v1469_v22 = vshll.u32 %v8324_v32, 16  ;;  %v738_v63 = vor.u32 %v736_v10, %v735_v38 }
  0x93   : > { %7299 = vmatmul.mubr.msk.bf16.gmra.mxu0 %vm1593_vm10, %v6650_v46  ;;  %10731 = vst [vmem:[#allocation9_spill] sm:$0xff] %v8322_v25  ;;  %v8331_v34 = vld [vmem:[#allocation2 + $0x10c] sm:$0x1]  ;;  %v1474_v58 = vshrl.u32 %v8322_v25, 16  ;;  %v1477_v47 = vshll.u32 %v8322_v25, 16  ;;  %v739_v13 = vrot.slane %v735_v38, 4  ;;  %v998_v49 = vsel %vm7943_vm7, %v730_v21, %v997_v57 }
  0x94   : > { %10733 = vst [vmem:[#allocation11_spill] sm:$0xff] %v8331_v34  ;;  %v1466_v52 = vor.u32 %v1465_v53, %v1462_v8  ;;  %v1483_v56 = vshll.u32 %v8331_v34, 16  ;;  %v1006_v14 = vld [vmem:[#allocation2 + $0x11c] sm:$0x1]  ;;  %v1471_v50 = vrot.slane %v1469_v22, 5  ;;  %v1001_v10 = vsel %vm7952_vm8, %v731_v60, %v1000_v24 }
  0x95   : > { %v1476_v1 = vrot.slane %v1474_v58, 4  ;;  %v1479_v48 = vrot.slane %v1477_v47, 5  ;;  %v8339_v54 = vld [vmem:[#allocation2 + $0x70] sm:$0xf]  ;;  %999 = vst [vmem:[#allocation2 + $0x110] sm:$0xf] %v998_v49  ;;  %v1004_v57 = vsel %vm7943_vm7, %v738_v63, %v1003_v9 }
  0x96   : > { %v1467_v15 = vrot.slane %v1466_v52, 4  ;;  %v1485_v46 = vrot.slane %v1483_v56, 5  ;;  %v8341_v61 = vld [vmem:[#allocation2 + $0x78] sm:$0xf]  ;;  %v8343_v8 = vld [vmem:[#allocation2 + $0x74] sm:$0x1] }
  0x97   : > { %v1264_v53 = vshrl.u32 %v8339_v54, 16  ;;  %v1480_v38 = vor.u32 %v1479_v48, %v1476_v1  ;;  %v8352_v52 = vld [vmem:[#allocation2 + $0x7c] sm:$0x1]  ;;  %v1267_v22 = vshll.u32 %v8339_v54, 16  ;;  %v1273_v58 = vshll.u32 %v8343_v8, 16 }
  0x98   : > { %v1472_v21 = vsel %vm7970_vm9, %v1467_v15, %v1471_v50  ;;  %1002 = vst [vmem:[#allocation2 + $0x114] sm:$0x1] %v1001_v10  ;;  %1005 = vst [vmem:[#allocation2 + $0x118] sm:$0xf] %v1004_v57  ;;  %v1278_v56 = vshrl.u32 %v8341_v61, 16  ;;  %v1281_v60 = vshll.u32 %v8341_v61, 16  ;;  %v1007_v15 = vsel %vm7952_vm8, %v739_v13, %v1006_v14 }
  0x99   : > { %v1266_v47 = vrot.slane %v1264_v53, 4  ;;  %v1287_v24 = vshll.u32 %v8352_v52, 16  ;;  %v1481_v9 = vrot.slane %v1480_v38, 4  ;;  %v1269_v63 = vrot.slane %v1267_v22, 5  ;;  %v916_v50 = vld [vmem:[#allocation2 + $0x84] sm:$0x1] }
  0x9a   : > { %v1275_v49 = vrot.slane %v1273_v58, 5  ;;  %v1280_v1 = vrot.slane %v1278_v56, 4  ;;  %v1283_v48 = vrot.slane %v1281_v60, 5  ;;  %1008 = vst [vmem:[#allocation2 + $0x11c] sm:$0x1] %v1007_v15  ;;  %v615_v10 = vrot.slane %v613_v43, 7 }
  0x9b   : > { %v1289_v3 = vrot.slane %v1287_v24, 5  ;;  %v378_v57 = vld [vmem:[%s7925_s6 + $0xf0] sm:$0xff]  ;;  %v1486_v53 = vsel %vm7970_vm9, %v1481_v9, %v1485_v46  ;;  %v1270_v45 = vor.u32 %v1269_v63, %v1266_v47  ;;  %v616_v59 = vshll.u32 %v8319_v2, 16  ;;  %v2106_v34 = vld [vmem:[#allocation2 + $0x38] sm:$0xe] }
  0x9c   : > { %v621_v38 = vshrl.u32 %v8326_v40, 16  ;;  %v6658_v22 = vcombine.low %v1472_v21, %v1486_v53  ;;  %v1284_v58 = vor.u32 %v1283_v48, %v1280_v1  ;;  %v8366_v28 = vld [vmem:[#allocation2 + $0x110] sm:$0xf]  ;;  %v619_v13 = vrot.slane %v615_v10, 4  ;;  %v8499_v32 = vld [vmem:[#allocation2 + $0x20] sm:$0xf] }
  0x9d   : > { %10734 = vst [vmem:[#allocation12_spill] sm:$0xff] %v8366_v28  ;;  %v624_v14 = vshll.u32 %v8326_v40, 16  ;;  %v1271_v56 = vrot.slane %v1270_v45, 4  ;;  %v1488_v60 = vshrl.u32 %v8366_v28, 16  ;;  %v1491_v43 = vshll.u32 %v8366_v28, 16 }
  0x9e   : > { %v618_v24 = vor.u32 %v616_v59, %v615_v10  ;;  %7315 = vmatmul.mubr.msk.bf16.gmra.mxu1 %vm1593_vm10, %v6658_v22  ;;  %v1285_v46 = vrot.slane %v1284_v58, 4  ;;  %v623_v21 = vrot.slane %v621_v38, 7  ;;  %v917_v9 = vsel %vm7952_vm8, %v619_v13, %v916_v50  ;;  %v913_v59 = vld [vmem:[#allocation2 + $0x80] sm:$0xf]  ;;  %v919_v22 = vld [vmem:[#allocation2 + $0x88] sm:$0xf] }
  0x9f   : > { %v8372_v47 = vld [vmem:[#allocation2 + $0x118] sm:$0xf]  ;;  %v8374_v2 = vld [vmem:[#allocation2 + $0x114] sm:$0x1]  ;;  %v7101_v63 = vpack.c.bf16 %v378_v57, %v378_v57  ;;  %v1276_v45 = vsel %vm7970_vm9, %v1271_v56, %v1275_v49  ;;  %v1490_v40 = vrot.slane %v1488_v60, 4  ;;  %v1493_v15 = vrot.slane %v1491_v43, 5 }
  0xa0   : > { %10735 = vst [vmem:[#allocation13_spill] sm:$0xff] %v8372_v47  ;;  %10736 = vst [vmem:[#allocation14_spill] sm:$0xff] %v8374_v2  ;;  %v1497_v1 = vshll.u32 %v8374_v2, 16  ;;  %v1290_v48 = vsel %vm7970_vm9, %v1285_v46, %v1289_v3  ;;  %v1502_v10 = vshrl.u32 %v8372_v47, 16  ;;  %v1505_v53 = vshll.u32 %v8372_v47, 16 }
  0xa1   : > { %918 = vst [vmem:[#allocation2 + $0x84] sm:$0x1] %v917_v9  ;;  %v626_v38 = vor.u32 %v624_v14, %v623_v21  ;;  %v922_v50 = vld [vmem:[#allocation2 + $0x8c] sm:$0x1]  ;;  %v6651_v57 = vcombine.low %v1276_v45, %v1290_v48  ;;  %v8385_v58 = vld [vmem:[#allocation2 + $0x11c] sm:$0x1]  ;;  %v1494_v49 = vor.u32 %v1493_v15, %v1490_v40  ;;  %v914_v3 = vsel %vm7943_vm7, %v618_v24, %v913_v59 }
  0xa2   : > { %10737 = vst [vmem:[#allocation15_spill] sm:$0xff] %v8385_v58  ;;  %v1499_v13 = vrot.slane %v1497_v1, 5  ;;  %v627_v56 = vrot.slane %v623_v21, 4  ;;  %v1504_v60 = vrot.slane %v1502_v10, 4  ;;  %v1507_v43 = vrot.slane %v1505_v53, 5 }
  0xa3   : > { %v1511_v9 = vshll.u32 %v8385_v58, 16  ;;  %7302 = vmatprep.mubr.msk.bf16.mxu0 %vm1593_vm10, %v6651_v57  ;;  %v1495_v46 = vrot.slane %v1494_v49, 4  ;;  %915 = vst [vmem:[#allocation2 + $0x80] sm:$0xf] %v914_v3  ;;  %v920_v14 = vsel %vm7943_vm7, %v626_v38, %v919_v22  ;;  %v741_v40 = vshrl.u32 %v8329_v7, 16 }
  0xa4   : > { %v923_v45 = vsel %vm7952_vm8, %v627_v56, %v922_v50  ;;  %v1508_v21 = vor.u32 %v1507_v43, %v1504_v60  ;;  %921 = vst [vmem:[#allocation2 + $0x88] sm:$0xf] %v920_v14  ;;  %v744_v1 = vshll.u32 %v8329_v7, 16  ;;  %v749_v48 = vshrl.u32 %v7101_v63, 16  ;;  %v1009_v24 = vld [vmem:[#allocation2 + $0x120] sm:$0xf] }
  0xa5   : > { %v1513_v15 = vrot.slane %v1511_v9, 5  ;;  %924 = vst [vmem:[#allocation2 + $0x8c] sm:$0x1] %v923_v45  ;;  %v2099_v59 = vld [vmem:[#allocation2] sm:$0xe]  ;;  %v1500_v10 = vsel %vm7970_vm9, %v1495_v46, %v1499_v13  ;;  %v743_v53 = vrot.slane %v741_v40, 7 }
  0xa6   : > { %v752_v57 = vshll.u32 %v7101_v63, 16  ;;  %v1012_v38 = vld [vmem:[#allocation2 + $0x124] sm:$0x1]  ;;  %v2100_v22 = vld [vmem:[#allocation2 + $0x8] sm:$0xe]  ;;  %v1509_v49 = vrot.slane %v1508_v21, 4 }
  0xa7   : > { %v751_v56 = vrot.slane %v749_v48, 7  ;;  %vm2196_vm12 = vcmask 1046532   ;;  %v746_v60 = vor.u32 %v744_v1, %v743_v53  ;;  %v747_v43 = vrot.slane %v743_v53, 4  ;;  %v1015_v9 = vld [vmem:[#allocation2 + $0x128] sm:$0xf] }
  0xa8   : > { %v8399_v50 = vld [vmem:[#allocation2 + $0x84] sm:$0x1]  ;;  %v1018_v7 = vld [vmem:[#allocation2 + $0x12c] sm:$0x1]  ;;  %vm8401_vm13 = vmor %vm2195_vm11, %vm2196_vm12  ;;  %v6709_v14 = vrot.slane %v2099_v59, 9  ;;  %v1514_v63 = vsel %vm7970_vm9, %v1509_v49, %v1513_v15  ;;  %v6710_v45 = vrot.slane %v2100_v22, 9 }
  0xa9   : > { %v754_v13 = vor.u32 %v752_v57, %v751_v56  ;;  %v755_v46 = vrot.slane %v751_v56, 4  ;;  %v6659_v40 = vcombine.low %v1500_v10, %v1514_v63  ;;  %v1301_v21 = vshll.u32 %v8399_v50, 16  ;;  %v2101_v53 = vld [vmem:[#allocation2 + $0x10] sm:$0xe]  ;;  %v2102_v22 = vld [vmem:[#allocation2 + $0x18] sm:$0xe] }
  0xaa   : > { %v1010_v1 = vsel %vm7943_vm7, %v746_v60, %v1009_v24  ;;  %v1013_v48 = vsel %vm7952_vm8, %v747_v43, %v1012_v38  ;;  %v8412_v6 = vld [vmem:[#allocation2 + $0x80] sm:$0xf]  ;;  %v10740_v10 = vrot.slane %v7930_v11, 5  ;;  %v10741_v24 = vrot.slane %v8006_v35, 5  ;;  %v8442_v63 = vld [vmem:[#allocation2 + $0xac] sm:$0x1] }
  0xab   : > { %1011 = vst [vmem:[#allocation2 + $0x120] sm:$0xf] %v1010_v1  ;;  %1014 = vst [vmem:[#allocation2 + $0x124] sm:$0x1] %v1013_v48  ;;  %v1016_v15 = vsel %vm7943_vm7, %v754_v13, %v1015_v9  ;;  %v1019_v59 = vsel %vm7952_vm8, %v755_v46, %v1018_v7  ;;  %7318 = vmatprep.mubr.msk.bf16.mxu1 %vm1593_vm10, %v6659_v40  ;;  %v8431_v49 = vld [vmem:[#allocation2 + $0x88] sm:$0xf] }
  0xac   : > { %v8422_v57 = vsel %vm8401_vm13, %v6709_v14, %v10740_v10  ;;  %v8428_v38 = vsel %vm8401_vm13, %v6710_v45, %v10741_v24  ;;  %v8433_v56 = vld [vmem:[#allocation2 + $0x8c] sm:$0x1]  ;;  %v1292_v60 = vshrl.u32 %v8412_v6, 16  ;;  %v1295_v11 = vshll.u32 %v8412_v6, 16  ;;  %1017 = vst [vmem:[#allocation2 + $0x128] sm:$0xf] %v1016_v15 }
  0xad   : > { %1020 = vst [vmem:[#allocation2 + $0x12c] sm:$0x1] %v1019_v59  ;;  %v1306_v43 = vshrl.u32 %v8431_v49, 16  ;;  %v1309_v9 = vshll.u32 %v8431_v49, 16  ;;  %v1315_v7 = vshll.u32 %v8433_v56, 16  ;;  %v6711_v14 = vrot.slane %v2101_v53, 9 }
  0xae   : > { %v1294_v46 = vrot.slane %v1292_v60, 4  ;;  %v1297_v45 = vrot.slane %v1295_v11, 5  ;;  %v6712_v40 = vrot.slane %v2102_v22, 9  ;;  %v2103_v1 = vld [vmem:[#allocation2 + $0x20] sm:$0xe]  ;;  %v1303_v48 = vrot.slane %v1301_v21, 5 }
  0xaf   : > { %v1308_v15 = vrot.slane %v1306_v43, 4  ;;  %v1311_v59 = vrot.slane %v1309_v9, 5  ;;  %v10742_v10 = vrot.slane %v8026_v23, 5  ;;  %v1317_v33 = vrot.slane %v1315_v7, 5  ;;  %v2104_v11 = vld [vmem:[#allocation2 + $0x28] sm:$0xe] }
  0xb0   : > { %v1298_v35 = vor.u32 %v1297_v45, %v1294_v46  ;;  %v10743_v53 = vrot.slane %v8038_v39, 5  ;;  %v8459_v22 = vsel %vm1642_vm0, %v8151_v17, 0  ;;  %v8465_v60 = vsel %vm1642_vm0, %v8163_v37, 0  ;;  %v8473_v46 = vld [vmem:[#allocation2 + $0x8] sm:$0xf] }
  0xb1   : > { %v8449_v24 = vsel %vm8401_vm13, %v6711_v14, %v10742_v10  ;;  %v1312_v21 = vor.u32 %v1311_v59, %v1308_v15  ;;  %v6713_v43 = vrot.slane %v2103_v1, 9  ;;  %v8471_v14 = vld [vmem:[#allocation2] sm:$0xf]  ;;  %v7666_v45 = vld [vmem:[#allocation2 + $0x24] sm:$0x1]  ;;  %v2224_v5 = vrot.slane %v8124_v44, 5 }
  0xb2   : > { %v8455_v13 = vsel %vm8401_vm13, %v6712_v40, %v10743_v53  ;;  %v1299_v9 = vrot.slane %v1298_v35, 4  ;;  %v8467_v39 = vld [vmem:[#allocation2 + $0x120] sm:$0xf]  ;;  %v8469_v7 = vld [vmem:[#allocation2 + $0x124] sm:$0x1]  ;;  %v2216_v40 = vrot.slane %v7666_v45, 5 }
  0xb3   : > { %10744 = vst [vmem:[#allocation16_spill] sm:$0xff] %v8467_v39  ;;  %10745 = vst [vmem:[#allocation17_spill] sm:$0xff] %v8469_v7  ;;  %v1313_v15 = vrot.slane %v1312_v21, 4  ;;  %v8477_v59 = vld [vmem:[#allocation2 + $0x128] sm:$0xf]  ;;  %v1516_v35 = vshrl.u32 %v8467_v39, 16 }
  0xb4   : > { %10746 = vst [vmem:[#allocation18_spill] sm:$0xff] %v8477_v59  ;;  %v8479_v37 = vld [vmem:[#allocation2 + $0x12c] sm:$0x1]  ;;  %v8482_v1 = vld [vmem:[#allocation2 + $0x10] sm:$0xf]  ;;  %v1304_v45 = vsel %vm7970_vm9, %v1299_v9, %v1303_v48  ;;  %v1519_v21 = vshll.u32 %v8467_v39, 16 }
  0xb5   : > { %10747 = vst [vmem:[#allocation19_spill] sm:$0xff] %v8479_v37  ;;  %v8484_v10 = vld [vmem:[#allocation2 + $0x18] sm:$0xf]  ;;  %v1525_v17 = vshll.u32 %v8469_v7, 16  ;;  %v1530_v27 = vshrl.u32 %v8477_v59, 16  ;;  %v1318_v2 = vsel %vm7970_vm9, %v1313_v15, %v1317_v33  ;;  %v1518_v28 = vrot.slane %v1516_v35, 4 }
  0xb6   : > { %v2105_v58 = vld [vmem:[#allocation2 + $0x30] sm:$0xe]  ;;  %v1533_v47 = vshll.u32 %v8477_v59, 16  ;;  %v1539_v53 = vshll.u32 %v8479_v37, 16  ;;  %v6652_v23 = vcombine.low %v1304_v45, %v1318_v2  ;;  %v1521_v18 = vrot.slane %v1519_v21, 5 }
  0xb7   : > { %v1532_v26 = vrot.slane %v1530_v27, 4  ;;  %v6714_v48 = vrot.slane %v2104_v11, 9  ;;  %v2107_v9 = vld [vmem:[#allocation2 + $0x50] sm:$0xe]  ;;  %v8501_v7 = vld [vmem:[#allocation2 + $0x28] sm:$0xf]  ;;  %v2217_v33 = vsel %vm8401_vm13, %v6713_v43, %v2216_v40  ;;  %v10748_v21 = vcombine.low %v8422_v57, %v8428_v38 }
  0xb8   : > { %v1535_v39 = vrot.slane %v1533_v47, 5  ;;  %v7671_v15 = vld [vmem:[#allocation2 + $0x2c] sm:$0x1]  ;;  %v2108_v37 = vld [vmem:[#allocation2 + $0x58] sm:$0xe]  ;;  %7303 = vmatmul.mubr.msk.bf16.gmra.mxu0 %vm1593_vm10, %v6652_v23  ;;  %v1522_v27 = vor.u32 %v1521_v18, %v1518_v28  ;;  %v1527_v2 = vrot.slane %v1525_v17, 5 }
  0xb9   : > { %v2220_v35 = vrot.slane %v7671_v15, 5  ;;  %v2109_v59 = vld [vmem:[#allocation2 + $0x60] sm:$0xe]  ;;  %v1541_v11 = vrot.slane %v1539_v53, 5  ;;  %v6715_v47 = vrot.slane %v2105_v58, 9  ;;  %7358 = vmatprep.mubr.msk.bf16.mxu0 %vm1593_vm10, %v10748_v21  ;;  %v6716_v25 = vrot.slane %v2106_v34, 9 }
  0xba   : > { %v1536_v45 = vor.u32 %v1535_v39, %v1532_v26  ;;  %v2228_v43 = vrot.slane %v8132_v36, 5  ;;  %v1523_v40 = vrot.slane %v1522_v27, 4  ;;  %v6717_v23 = vrot.slane %v2107_v9, 9  ;;  %v2110_v18 = vld [vmem:[#allocation2 + $0x68] sm:$0xe] }
  0xbb   : > { %v2221_v15 = vsel %vm8401_vm13, %v6714_v48, %v2220_v35  ;;  %v2232_v28 = vrot.slane %v8158_v31, 5  ;;  %v6718_v38 = vrot.slane %v2108_v37, 9  ;;  %v2111_v44 = vld [vmem:[#allocation2 + $0x70] sm:$0xe]  ;;  %v2112_v34 = vld [vmem:[#allocation2 + $0x78] sm:$0xe]  ;;  %v8530_v37 = vsel %vm8401_vm13, %v6715_v47, %v2224_v5 }
  0xbc   : > { %v1537_v58 = vrot.slane %v1536_v45, 4  ;;  %v1528_v36 = vsel %vm7970_vm9, %v1523_v40, %v1527_v2  ;;  %v2236_v39 = vrot.slane %v8222_v12, 5  ;;  %v6719_v17 = vrot.slane %v2109_v59, 9  ;;  %v2113_v27 = vld [vmem:[#allocation2 + $0x80] sm:$0xe] }
  0xbd   : > { %v2240_v53 = vrot.slane %v8271_v19, 5  ;;  %v6744_v48 = vcombine.low %v2217_v33, %v2221_v15  ;;  %v6720_v9 = vrot.slane %v2110_v18, 9  ;;  %v2244_v35 = vrot.slane %v8279_v62, 5  ;;  %v2114_v19 = vld [vmem:[#allocation2 + $0x88] sm:$0xe]  ;;  %v10770_v26 = vld [vmem:[#allocation19_spill] sm:$0xff] }
  0xbe   : > { %v1542_v31 = vsel %vm7970_vm9, %v1537_v58, %v1541_v11  ;;  %v2229_v2 = vsel %vm8401_vm13, %v6716_v25, %v2228_v43  ;;  %v8536_v12 = vsel %vm8401_vm13, %v6717_v23, %v2232_v28  ;;  %v2115_v59 = vld [vmem:[#allocation2 + $0xa0] sm:$0xe]  ;;  %v2116_v11 = vld [vmem:[#allocation2 + $0xa8] sm:$0xe]  ;;  %v8540_v33 = vsel %vm8401_vm13, %v6718_v38, %v2236_v39  ;;  %v8546_v5 = vld [vmem:[%s10684_s1 + $0x18] sm:$0xf] }
  0xbf   : > { %v6660_v45 = vcombine.low %v1528_v36, %v1542_v31  ;;  %v6721_v62 = vrot.slane %v2111_v44, 9  ;;  %v2248_v21 = vrot.slane %v8343_v8, 5  ;;  %v6722_v40 = vrot.slane %v2112_v34, 9  ;;  %v2117_v58 = vld [vmem:[#allocation2 + $0xb0] sm:$0xe] }
  0xc0   : > { %v10749_v25 = vcombine.low %v8449_v24, %v8455_v13  ;;  %v8555_v47 = vsel %vm8401_vm13, %v6719_v17, %v2240_v53  ;;  %v8559_v8 = vsel %vm8401_vm13, %v6720_v9, %v2244_v35  ;;  %v2252_v43 = vrot.slane %v8352_v52, 5  ;;  %v2118_v44 = vld [vmem:[#allocation2 + $0xb8] sm:$0xe]  ;;  %v2119_v36 = vld [vmem:[#allocation2 + $0xc0] sm:$0xe] }
  0xc1   : > { %7319 = vmatmul.mubr.msk.bf16.gmra.mxu1 %vm1593_vm10, %v6660_v45  ;;  %v6723_v15 = vrot.slane %v2113_v27, 9  ;;  %v10750_v23 = vcombine.low %v8471_v14, %v8473_v46  ;;  %v6745_v13 = vcombine.low %v8530_v37, %v2229_v2  ;;  %v2256_v24 = vrot.slane %v8399_v50, 5  ;;  %v2120_v39 = vld [vmem:[#allocation2 + $0xc8] sm:$0xe]  ;;  %v7672_v45 = vld [vmem:[#allocation2 + $0xb4] sm:$0x1] }
  0xc2   : > { %7359 = vmatmul.mubr.msk.bf16.vlgmr.msra.gmra.mxu0 %vm1593_vm10, %v10749_v25  ;;  %v6724_v28 = vrot.slane %v2114_v19, 9  ;;  %v2260_v18 = vrot.slane %v8433_v56, 5  ;;  %v6746_v52 = vcombine.low %v8536_v12, %v8540_v33  ;;  %v6725_v46 = vrot.slane %v2115_v59, 9  ;;  %v7673_v12 = vld [vmem:[#allocation2 + $0xbc] sm:$0x1] }
  0xc3   : > { %7324 = vmatprep.mubr.msk.bf16.mxu1 %vm1593_vm10, %v10750_v23  ;;  %7425 = vmatpush3.bf16.msra.mxu0 %v8465_v60  ;;  %v6726_v38 = vrot.slane %v2116_v11, 9  ;;  %v8581_v56 = vsel %vm8401_vm13, %v6721_v62, %v2248_v21  ;;  %v8585_v60 = vsel %vm8401_vm13, %v6722_v40, %v2252_v43  ;;  %v8589_v34 = vsel %vm8401_vm13, %v6723_v15, %v2256_v24  ;;  %v7674_v33 = vld [vmem:[#allocation2 + $0xc4] sm:$0x1]  ;;  %v8614_v21 = vld [vmem:[%s10684_s1 + $0x14] sm:$0xf] }
  0xc4   : > { %7362 = vmatprep.mubr.msk.bf16.mxu0 %vm1593_vm10, %v6744_v48  ;;  %7603 = vmatprep.subr.msk.bf16.mxu0 %vm1642_vm0, %v8546_v5  ;;  %v8593_v17 = vsel %vm8401_vm13, %v6724_v28, %v2260_v18  ;;  %v10751_v53 = vrot.slane %v7948_v30, 5  ;;  %v10752_v48 = vrot.slane %v8442_v63, 5  ;;  %v6727_v35 = vrot.slane %v2117_v58, 9  ;;  %v2121_v30 = vld [vmem:[#allocation2 + $0xd0] sm:$0xe] }
  0xc5   : > { %v2272_v37 = vrot.slane %v7672_v45, 5  ;;  %v6728_v2 = vrot.slane %v2118_v44, 9  ;;  %v2276_v19 = vrot.slane %v7673_v12, 5  ;;  %v6729_v11 = vrot.slane %v2119_v36, 9  ;;  %v8616_v40 = vld [vmem:[#allocation2 + $0xa0] sm:$0xf] }
  0xc6   : > { %v8599_v31 = vsel %vm8401_vm13, %v6725_v46, %v10751_v53  ;;  %v8605_v9 = vsel %vm8401_vm13, %v6726_v38, %v10752_v48  ;;  %v2280_v63 = vrot.slane %v7674_v33, 5  ;;  %v6730_v62 = vrot.slane %v2120_v39, 9  ;;  %v8618_v25 = vld [vmem:[#allocation2 + $0xa8] sm:$0xf]  ;;  %v7677_v24 = vld [vmem:[#allocation2 + $0xcc] sm:$0x1] }
  0xc7   : > { %v8624_v15 = vsel %vm8401_vm13, %v6727_v35, %v2272_v37  ;;  %v8628_v23 = vsel %vm8401_vm13, %v6728_v2, %v2276_v19  ;;  %v2284_v28 = vrot.slane %v7677_v24, 5  ;;  %v10753_v18 = vcombine.low %v8482_v1, %v8484_v10  ;;  %v8639_v38 = vld [vmem:[#allocation2 + $0xb0] sm:$0xf]  ;;  %v8641_v44 = vld [vmem:[#allocation2 + $0xb8] sm:$0xf] }
  0xc8   : > { %v6748_v58 = vcombine.low %v8581_v56, %v8585_v60  ;;  %v2122_v39 = vld [vmem:[#allocation2 + $0xd8] sm:$0xe]  ;;  %v10754_v1 = vcombine.low %v8499_v32, %v8501_v7  ;;  %v8650_v10 = vld [vmem:[#allocation2 + $0xc0] sm:$0xf]  ;;  %v8658_v60 = vsel %vm8401_vm13, %v6729_v11, %v2280_v63  ;;  %v8667_v7 = vld [vmem:[#allocation2 + $0xd0] sm:$0xf] }
  0xc9   : > { %7325 = vmatmul.mubr.msk.bf16.vlgmr.msra.gmra.mxu1 %vm1593_vm10, %v10753_v18  ;;  %v8662_v53 = vsel %vm8401_vm13, %v6730_v62, %v2284_v28  ;;  %v2125_v48 = vld [vmem:[#allocation2 + $0x100] sm:$0xe]  ;;  %v6731_v45 = vrot.slane %v2121_v30, 9  ;;  %v2288_v37 = vrot.slane %v8189_v20, 5  ;;  %v2126_v2 = vld [vmem:[#allocation2 + $0x108] sm:$0xe] }
  0xca   : > { %7363 = vmatmul.mubr.msk.bf16.gmra.mxu0 %vm1593_vm10, %v6745_v13  ;;  %7391 = vmatpush3.bf16.msra.mxu1 %v8459_v22  ;;  %v8652_v13 = vld [vmem:[#allocation2 + $0xc8] sm:$0xf]  ;;  %v2123_v22 = vld [vmem:[#allocation2 + $0xf0] sm:$0xe]  ;;  %v6732_v12 = vrot.slane %v2122_v39, 9  ;;  %v2292_v19 = vrot.slane %v8191_v29, 5 }
  0xcb   : > { %7328 = vmatprep.mubr.msk.bf16.mxu1 %vm1593_vm10, %v10754_v1  ;;  %7366 = vmatprep.mubr.msk.bf16.mxu0 %vm1593_vm10, %v6746_v52  ;;  %v8675_v11 = vld [vmem:[#allocation2 + $0xf0] sm:$0xf]  ;;  %v10756_v63 = vld [vmem:[#allocation8_spill] sm:$0xff]  ;;  %v6733_v20 = vrot.slane %v2123_v22, 9  ;;  %v6735_v28 = vrot.slane %v2125_v48, 9  ;;  %v10757_v18 = vld [vmem:[#allocation10_spill] sm:$0xff]  ;;  %v8689_v62 = vsel %vm8401_vm13, %v6731_v45, %v2288_v37 }
  0xcc   : > { %7602 = vmatprep.subr.msk.bf16.mxu1 %vm1642_vm0, %v8614_v21  ;;  %v2127_v24 = vld [vmem:[#allocation2 + $0x110] sm:$0xe]  ;;  %v2304_v1 = vrot.slane %v10757_v18, 5  ;;  %v2128_v35 = vld [vmem:[#allocation2 + $0x118] sm:$0xe]  ;;  %v6736_v43 = vrot.slane %v2126_v2, 9 }
  0xcd   : > { %v2978_v39 = vld [vmem:[#allocation2 + $0x8] sm:$0xf]  ;;  %v2124_v56 = vld [vmem:[#allocation2 + $0xf8] sm:$0xe]  ;;  %v7684_v29 = vld [vmem:[#allocation2 + $0xf4] sm:$0x1] }
  0xce   : > { %v2296_v36 = vrot.slane %v7684_v29, 5  ;;  %v10758_v32 = vld [vmem:[#allocation11_spill] sm:$0xff]  ;;  %v8693_v22 = vsel %vm8401_vm13, %v6735_v28, %v2304_v1  ;;  %v6737_v48 = vrot.slane %v2127_v24, 9  ;;  %v10761_v18 = vld [vmem:[#allocation14_spill] sm:$0xff]  ;;  %v2980_v46 = vld [vmem:[#allocation2 + $0x10] sm:$0xf]  ;;  %v10765_v28 = vcombine.low %v8121_v41, %v8130_v55 }
  0xcf   : > { %v2308_v59 = vrot.slane %v10758_v32, 5  ;;  %v2312_v30 = vrot.slane %v10761_v18, 5  ;;  %v6738_v32 = vrot.slane %v2128_v35, 9  ;;  %v10762_v29 = vld [vmem:[#allocation15_spill] sm:$0xff]  ;;  %v2979_v37 = vld [vmem:[#allocation2 + $0xc] sm:$0x1]  ;;  %v10766_v24 = vcombine.low %v8555_v47, %v8559_v8 }
  0xd0   : > { %v2316_v57 = vrot.slane %v10762_v29, 5  ;;  %v2129_v45 = vld [vmem:[#allocation2 + $0x120] sm:$0xe]  ;;  %v2130_v41 = vld [vmem:[#allocation2 + $0x128] sm:$0xe]  ;;  %v10767_v18 = vcombine.low %v8146_v16, %v8215_v0  ;;  %v8728_v47 = vsel %vm8401_vm13, %v6733_v20, %v2296_v36  ;;  %v10768_v8 = vld [vmem:[#allocation5_spill] sm:$0xff] }
  0xd1   : > { %v8698_v2 = vsel %vm8401_vm13, %v6736_v43, %v2308_v59  ;;  %7329 = vmatmul.mubr.msk.bf16.gmra.mxu1 %vm1593_vm10, %v10765_v28  ;;  %v8713_v59 = vsel %vm8401_vm13, %v6732_v12, %v2292_v19  ;;  %v6734_v43 = vrot.slane %v2124_v56, 9  ;;  %v8719_v1 = vsel %vm8401_vm13, %v6737_v48, %v2312_v30  ;;  %v2981_v55 = vld [vmem:[#allocation2 + $0x14] sm:$0x1]  ;;  %v2982_v30 = vld [vmem:[#allocation2 + $0x18] sm:$0xf] }
  0xd2   : > { %7367 = vmatmul.mubr.msk.bf16.gmra.mxu0 %vm1593_vm10, %v10766_v24  ;;  %7332 = vmatprep.mubr.msk.bf16.mxu1 %vm1593_vm10, %v10767_v18  ;;  %v2300_v56 = vrot.slane %v10768_v8, 5  ;;  %v8733_v12 = vsel %vm8401_vm13, %v6738_v32, %v2316_v57  ;;  %v3043_v19 = vshrl.u32 %v2978_v39, 16  ;;  %v8735_v48 = vld [vmem:[#allocation2 + $0x1c] sm:$0x1]  ;;  %v6739_v0 = vrot.slane %v2129_v45, 9  ;;  %v10769_v29 = vld [vmem:[#allocation17_spill] sm:$0xff] }
  0xd3   : > { %7370 = vmatprep.mubr.msk.bf16.mxu0 %vm1593_vm10, %v6748_v58  ;;  %v2320_v58 = vrot.slane %v10769_v29, 5  ;;  %v3046_v28 = vshll.u32 %v2978_v39, 16  ;;  %v6740_v24 = vrot.slane %v2130_v41, 9  ;;  %v3057_v20 = vshrl.u32 %v2980_v46, 16  ;;  %v2984_v8 = vld [vmem:[#allocation2 + $0x20] sm:$0xf] }
  0xd4   : > { %v3045_v36 = vrot.slane %v3043_v19, 4  ;;  %v3060_v18 = vshll.u32 %v2980_v46, 16  ;;  %v2324_v35 = vrot.slane %v10770_v26, 5  ;;  %v3052_v32 = vshll.u32 %v2979_v37, 16  ;;  %v8745_v39 = vld [vmem:[#allocation2 + $0x24] sm:$0x1] }
  0xd5   : > { %v3048_v57 = vrot.slane %v3046_v28, 5  ;;  %v3066_v14 = vshll.u32 %v2981_v55, 16  ;;  %v3059_v50 = vrot.slane %v3057_v20, 4  ;;  %v3071_v27 = vshrl.u32 %v2982_v30, 16  ;;  %v2986_v37 = vld [vmem:[#allocation2 + $0x28] sm:$0xf] }
  0xd6   : > { %v3062_v52 = vrot.slane %v3060_v18, 5  ;;  %v3074_v33 = vshll.u32 %v2982_v30, 16  ;;  %v8743_v45 = vsel %vm8401_vm13, %v6734_v43, %v2300_v56  ;;  %v3080_v41 = vshll.u32 %v8735_v48, 16  ;;  %v10771_v55 = vld [vmem:[#allocation6_spill] sm:$0xff]  ;;  %v10772_v20 = vld [vmem:[#allocation7_spill] sm:$0xff] }
  0xd7   : > { %v3049_v29 = vor.u32 %v3048_v57, %v3045_v36  ;;  %v3085_v46 = vshrl.u32 %v2984_v8, 16  ;;  %v3073_v16 = vrot.slane %v3071_v27, 4  ;;  %v3088_v28 = vshll.u32 %v2984_v8, 16 }
  0xd8   : > { %v3063_v19 = vor.u32 %v3062_v52, %v3059_v50  ;;  %v3076_v26 = vrot.slane %v3074_v33, 5  ;;  %v10773_v18 = vcombine.low %v10771_v55, %v10772_v20  ;;  %v10774_v43 = vcombine.low %v8589_v34, %v8593_v17  ;;  %v2988_v33 = vld [vmem:[#allocation2 + $0x30] sm:$0xf] }
  0xd9   : > { %v8758_v56 = vsel %vm8401_vm13, %v6739_v0, %v2320_v58  ;;  %v8762_v50 = vsel %vm8401_vm13, %v6740_v24, %v2324_v35  ;;  %v3050_v27 = vrot.slane %v3049_v29, 4  ;;  %v3054_v52 = vrot.slane %v3052_v32, 5  ;;  %v355_v29 = vld [vmem:[%s7925_s6 + $0x38] sm:$0xff] }
  0xda   : > { %7333 = vmatmul.mubr.msk.bf16.gmra.mxu1 %vm1593_vm10, %v10773_v18  ;;  %7371 = vmatmul.mubr.msk.bf16.gmra.mxu0 %vm1593_vm10, %v10774_v43  ;;  %v10775_v30 = vcombine.low %v8339_v54, %v8341_v61  ;;  %v10776_v34 = vcombine.low %v8599_v31, %v8605_v9  ;;  %v6753_v17 = vcombine.low %v8689_v62, %v8713_v59  ;;  %v3064_v0 = vrot.slane %v3063_v19, 4  ;;  %v8781_v9 = vld [vmem:[#allocation2 + $0x2c] sm:$0x1]  ;;  %v8796_v43 = vld [vmem:[#allocation2 + $0x34] sm:$0x1] }
  0xdb   : > { %v3068_v35 = vrot.slane %v3066_v14, 5  ;;  %v3094_v58 = vshll.u32 %v8745_v39, 16  ;;  %v3077_v24 = vor.u32 %v3076_v26, %v3073_v16  ;;  %v3087_v36 = vrot.slane %v3085_v46, 4  ;;  %v2990_v26 = vld [vmem:[#allocation2 + $0x38] sm:$0xf] }
  0xdc   : > { %7336 = vmatprep.mubr.msk.bf16.mxu1 %vm1593_vm10, %v10775_v30  ;;  %7374 = vmatprep.mubr.msk.bf16.mxu0 %vm1593_vm10, %v10776_v34  ;;  %v3090_v8 = vrot.slane %v3088_v28, 5  ;;  %v3099_v57 = vshrl.u32 %v2986_v37, 16  ;;  %v6754_v54 = vcombine.low %v8728_v47, %v8743_v45  ;;  %v8779_v31 = vrot.slane %v3080_v41, 5  ;;  %v2994_v61 = vld [vmem:[#allocation2 + $0x58] sm:$0xf] }
  0xdd   : > { %v3102_v32 = vshll.u32 %v2986_v37, 16  ;;  %v3055_v14 = vsel %vm7970_vm9, %v3050_v27, %v3054_v52  ;;  %v8788_v16 = vsel %vm1642_vm0, %v8614_v21, 0  ;;  %v3113_v19 = vshrl.u32 %v2988_v33, 16 }
  0xde   : > { %v3101_v46 = vrot.slane %v3099_v57, 4  ;;  %v3069_v28 = vsel %vm7970_vm9, %v3064_v0, %v3068_v35  ;;  %v8792_v55 = vrot.slane %v3094_v58, 5  ;;  %v3116_v20 = vshll.u32 %v2988_v33, 16 }
  0xdf   : > { %v3104_v41 = vrot.slane %v3102_v32, 5  ;;  %v8794_v18 = vrot.slane %v3077_v24, 4  ;;  %v3091_v37 = vor.u32 %v3090_v8, %v3087_v36  ;;  %v3115_v27 = vrot.slane %v3113_v19, 4  ;;  %v8813_v8 = vld [vmem:[#allocation2 + $0x3c] sm:$0x1] }
  0xe0   : > { %v7078_v52 = vpack.c.bf16 %v355_v29, %v355_v29  ;;  %v3108_v21 = vshll.u32 %v8781_v9, 16  ;;  %v3118_v34 = vrot.slane %v3116_v20, 5  ;;  %v3127_v57 = vshrl.u32 %v2990_v26, 16  ;;  %v877_v32 = vld [vmem:[#allocation2 + $0x40] sm:$0xf] }
  0xe1   : > { %v3105_v30 = vor.u32 %v3104_v41, %v3101_v46  ;;  %v10777_v0 = vcombine.low %v8412_v6, %v8431_v49  ;;  %v10778_v33 = vcombine.low %v8624_v15, %v8628_v23  ;;  %v8807_v35 = vcombine.low %v3055_v14, %v3069_v28  ;;  %v2996_v46 = vld [vmem:[#allocation2 + $0x60] sm:$0xf]  ;;  %v8824_v41 = vld [vmem:[#allocation2 + $0x5c] sm:$0x1] }
  0xe2   : > { %v8811_v58 = vsel %vm1642_vm0, %v8546_v5, 0  ;;  %v565_v24 = vshrl.u32 %v7078_v52, 16  ;;  %v568_v36 = vshll.u32 %v7078_v52, 16  ;;  %v10779_v6 = vcombine.low %v8616_v40, %v8618_v25  ;;  %v880_v5 = vld [vmem:[#allocation2 + $0x44] sm:$0x1] }
  0xe3   : > { %7337 = vmatmul.mubr.msk.bf16.gmra.mxu1 %vm1593_vm10, %v10777_v0  ;;  %7375 = vmatmul.mubr.msk.bf16.gmra.mxu0 %vm1593_vm10, %v10778_v33  ;;  %v10780_v49 = vcombine.low %v8658_v60, %v8662_v53  ;;  %v3119_v15 = vor.u32 %v3118_v34, %v3115_v27  ;;  %v3122_v23 = vshll.u32 %v8796_v43, 16  ;;  %v3129_v29 = vrot.slane %v3127_v57, 4  ;;  %v2998_v0 = vld [vmem:[#allocation2 + $0x68] sm:$0xf] }
  0xe4   : > { %7340 = vmatprep.mubr.msk.bf16.mxu1 %vm1593_vm10, %v10779_v6  ;;  %v3130_v14 = vshll.u32 %v2990_v26, 16  ;;  %v3092_v19 = vrot.slane %v3091_v37, 4  ;;  %v567_v28 = vrot.slane %v565_v24, 7  ;;  %v3155_v40 = vshrl.u32 %v2994_v61, 16  ;;  %v8831_v26 = vld [vmem:[#allocation2 + $0x64] sm:$0x1] }
  0xe5   : > { %7378 = vmatprep.mubr.msk.bf16.mxu0 %vm1593_vm10, %v10780_v49  ;;  %v3158_v25 = vshll.u32 %v2994_v61, 16  ;;  %v3083_v60 = vsel %vm7970_vm9, %v8794_v18, %v8779_v31  ;;  %v3106_v53 = vrot.slane %v3105_v30, 4  ;;  %v3110_v20 = vrot.slane %v3108_v21, 5 }
  0xe6   : > { %v3132_v27 = vrot.slane %v3130_v14, 5  ;;  %v570_v52 = vor.u32 %v568_v36, %v567_v28  ;;  %v571_v34 = vrot.slane %v567_v28, 4  ;;  %v3136_v57 = vshll.u32 %v8813_v8, 16  ;;  %v8840_v14 = vld [vmem:[#allocation2 + $0x6c] sm:$0x1] }
  0xe7   : > { %v3157_v37 = vrot.slane %v3155_v40, 4  ;;  %v3120_v33 = vrot.slane %v3119_v15, 4  ;;  %v3124_v24 = vrot.slane %v3122_v23, 5  ;;  %v3160_v61 = vrot.slane %v3158_v25, 5  ;;  %v3000_v28 = vld [vmem:[#allocation2 + $0x70] sm:$0xf] }
  0xe8   : > { %v3133_v6 = vor.u32 %v3132_v27, %v3129_v29  ;;  %v3097_v49 = vsel %vm7970_vm9, %v3092_v19, %v8792_v55  ;;  %v878_v18 = vsel %vm7943_vm7, %v570_v52, %v877_v32  ;;  %v881_v21 = vsel %vm7952_vm8, %v571_v34, %v880_v5  ;;  %v8845_v55 = vld [vmem:[#allocation2 + $0x74] sm:$0x1] }
  0xe9   : > { %v3169_v36 = vshrl.u32 %v2996_v46, 16  ;;  %v3111_v15 = vsel %vm7970_vm9, %v3106_v53, %v3110_v20  ;;  %879 = vst [vmem:[#allocation2 + $0x40] sm:$0xf] %v878_v18  ;;  %882 = vst [vmem:[#allocation2 + $0x44] sm:$0x1] %v881_v21  ;;  %v3161_v23 = vor.u32 %v3160_v61, %v3157_v37  ;;  %v3164_v29 = vshll.u32 %v8824_v41, 16 }
  0xea   : > { %v3172_v40 = vshll.u32 %v2996_v46, 16  ;;  %v10783_v32 = vcombine.low %v8639_v38, %v8641_v44  ;;  %v8855_v5 = vrot.slane %v3136_v57, 5  ;;  %v3183_v25 = vshrl.u32 %v2998_v0, 16  ;;  %v8874_v61 = vld [vmem:[#allocation2 + $0x7c] sm:$0x1] }
  0xeb   : > { %7379 = vmatmul.mubr.msk.bf16.gmra.mxu0 %vm1593_vm10, %v6753_v17  ;;  %v3171_v19 = vrot.slane %v3169_v36, 4  ;;  %v3186_v53 = vshll.u32 %v2998_v0, 16  ;;  %v10784_v46 = vcombine.low %v8650_v10, %v8652_v13  ;;  %v3125_v38 = vsel %vm7970_vm9, %v3120_v33, %v3124_v24  ;;  %v3002_v17 = vld [vmem:[#allocation2 + $0x78] sm:$0xf] }
  0xec   : > { %7341 = vmatmul.mubr.msk.bf16.gmra.mxu1 %vm1593_vm10, %v10783_v32  ;;  %7382 = vmatprep.mubr.msk.bf16.mxu0 %vm1593_vm10, %v6754_v54  ;;  %v8867_v44 = vrot.slane %v3133_v6, 4  ;;  %v3174_v62 = vrot.slane %v3172_v40, 5  ;;  %v3178_v59 = vshll.u32 %v8831_v26, 16  ;;  %v3185_v20 = vrot.slane %v3183_v25, 4  ;;  %v363_v21 = vld [vmem:[%s7925_s6 + $0x78] sm:$0xff] }
  0xed   : > { %7344 = vmatprep.mubr.msk.bf16.mxu1 %vm1593_vm10, %v10784_v46  ;;  %v3188_v27 = vrot.slane %v3186_v53, 5  ;;  %v3192_v10 = vshll.u32 %v8840_v14, 16  ;;  %v3197_v13 = vshrl.u32 %v3000_v28, 16  ;;  %v3162_v52 = vrot.slane %v3161_v23, 4  ;;  %v3004_v25 = vld [vmem:[#allocation2 + $0x80] sm:$0xf] }
  0xee   : > { %v3166_v34 = vrot.slane %v3164_v29, 5  ;;  %v3175_v47 = vor.u32 %v3174_v62, %v3171_v19  ;;  %v3200_v45 = vshll.u32 %v3000_v28, 16  ;;  %v3206_v37 = vshll.u32 %v8845_v55, 16  ;;  %v371_v53 = vld [vmem:[%s7925_s6 + $0xb8] sm:$0xff] }
  0xef   : > { %v3189_v54 = vor.u32 %v3188_v27, %v3185_v20  ;;  %v3199_v57 = vrot.slane %v3197_v13, 4  ;;  %v3211_v0 = vshrl.u32 %v3002_v17, 16  ;;  %v8872_v33 = vcombine.low %v3083_v60, %v3097_v49 }
  0xf0   : > { %v3180_v24 = vrot.slane %v3178_v59, 5  ;;  %v3202_v6 = vrot.slane %v3200_v45, 5  ;;  %v3214_v18 = vshll.u32 %v3002_v17, 16  ;;  %v8877_v36 = vcombine.low %v3111_v15, %v3125_v38  ;;  %v2992_v23 = vld [vmem:[#allocation2 + $0x40] sm:$0xf] }
  0xf1   : > { %v3139_v28 = vsel %vm7970_vm9, %v8867_v44, %v8855_v5  ;;  %v3176_v29 = vrot.slane %v3175_v47, 4  ;;  %v3194_v40 = vrot.slane %v3192_v10, 5  ;;  %v3141_v32 = vshrl.u32 %v2992_v23, 16  ;;  %v8894_v38 = vld [vmem:[#allocation2 + $0x44] sm:$0x1] }
  0xf2   : > { %v3144_v60 = vshll.u32 %v2992_v23, 16  ;;  %v3167_v49 = vsel %vm7970_vm9, %v3162_v52, %v3166_v34  ;;  %v3190_v19 = vrot.slane %v3189_v54, 4  ;;  %v10785_v15 = vcombine.low %v8667_v7, %v8198_v42  ;;  %v8907_v34 = vld [vmem:[#allocation2 + $0x84] sm:$0x1] }
  0xf3   : > { %v10786_v46 = vcombine.low %v8693_v22, %v8698_v2  ;;  %v3203_v62 = vor.u32 %v3202_v6, %v3199_v57  ;;  %v3208_v59 = vrot.slane %v3206_v37, 5  ;;  %v3213_v17 = vrot.slane %v3211_v0, 4  ;;  %v3006_v57 = vld [vmem:[#allocation2 + $0x88] sm:$0xf] }
  0xf4   : > { %7345 = vmatmul.mubr.msk.bf16.gmra.mxu1 %vm1593_vm10, %v10785_v15  ;;  %v7086_v20 = vpack.c.bf16 %v363_v21, %v363_v21  ;;  %v10787_v27 = vcombine.low %v8675_v11, %v8240_v4  ;;  %v10788_v42 = vcombine.low %v8719_v1, %v8733_v12  ;;  %v3143_v7 = vrot.slane %v3141_v32, 4  ;;  %v379_v11 = vld [vmem:[%s7925_s6 + $0xf8] sm:$0xff]  ;;  %v928_v32 = vld [vmem:[#allocation2 + $0x94] sm:$0x1]  ;;  %s260_s6 = scalar_lea.vmem %s10687_s4, %s6610_s28 }
  0xf5   : > { %7383 = vmatmul.mubr.msk.bf16.gmra.mxu0 %vm1593_vm10, %v10786_v46  ;;  %v3146_v22 = vrot.slane %v3144_v60, 5  ;;  %v3216_v2 = vrot.slane %v3214_v18, 5  ;;  %v3220_v10 = vshll.u32 %v8874_v61, 16  ;;  %v3181_v13 = vsel %vm7970_vm9, %v3176_v29, %v3180_v24  ;;  %v925_v29 = vld [vmem:[#allocation2 + $0x90] sm:$0xf] }
  0xf6   : > { %7348 = vmatprep.mubr.msk.bf16.mxu1 %vm1593_vm10, %v10787_v27  ;;  %7386 = vmatprep.mubr.msk.bf16.mxu0 %vm1593_vm10, %v10788_v42  ;;  %v3204_v52 = vrot.slane %v3203_v62, 4  ;;  %v3225_v47 = vshrl.u32 %v3004_v25, 16  ;;  %v8909_v4 = vpack.c.bf16 %v371_v53, %v371_v53  ;;  %v3150_v1 = vshll.u32 %v8894_v38, 16  ;;  %v8918_v60 = vld [vmem:[#allocation2 + $0x8c] sm:$0x1] }
  0xf7   : > { %v3147_v45 = vor.u32 %v3146_v22, %v3143_v7  ;;  %v3195_v12 = vsel %vm7970_vm9, %v3190_v19, %v3194_v40  ;;  %v3228_v54 = vshll.u32 %v3004_v25, 16  ;;  %v3217_v0 = vor.u32 %v3216_v2, %v3213_v17  ;;  %v3010_v53 = vld [vmem:[#allocation2 + $0xa8] sm:$0xf]  ;;  %v8924_v62 = vld [vmem:[#allocation2 + $0xac] sm:$0x1]  ;;  %v10789_v7 = vld [vmem:[#allocation9_spill] sm:$0xff] }
  0xf8   : > { %v3209_v37 = vsel %vm7970_vm9, %v3204_v52, %v3208_v59  ;;  %v629_v24 = vshrl.u32 %v7086_v20, 16  ;;  %v632_v6 = vshll.u32 %v7086_v20, 16  ;;  %v3227_v18 = vrot.slane %v3225_v47, 4  ;;  %v3012_v59 = vld [vmem:[#allocation2 + $0xb0] sm:$0xf] }
  0xf9   : > { %v3230_v21 = vrot.slane %v3228_v54, 5  ;;  %v3234_v23 = vshll.u32 %v8907_v34, 16  ;;  %v8920_v15 = vpack.c.bf16 %v379_v11, %v379_v11  ;;  %v8922_v40 = vcombine.low %v3167_v49, %v3181_v13  ;;  %v10792_v11 = vld [vmem:[#allocation12_spill] sm:$0xff] }
  0xfa   : > { %v631_v19 = vrot.slane %v629_v24, 7  ;;  %v3239_v25 = vshrl.u32 %v3006_v57, 16  ;;  %v3242_v46 = vshll.u32 %v3006_v57, 16  ;;  %v8926_v17 = vrot.slane %v3147_v45, 4  ;;  %v10793_v45 = vld [vmem:[#allocation13_spill] sm:$0xff] }
  0xfb   : > { %v8928_v20 = vrot.slane %v3150_v1, 5  ;;  %v8930_v27 = vcombine.low %v3195_v12, %v3209_v37  ;;  %v8932_v42 = vrot.slane %v3220_v10, 5  ;;  %v10790_v22 = vcombine.low %v10756_v63, %v10789_v7  ;;  %v8957_v37 = vld [vmem:[#allocation2 + $0xb4] sm:$0x1]  ;;  %v3014_v24 = vld [vmem:[#allocation2 + $0xb8] sm:$0xf] }
  0xfc   : > { %v10791_v49 = vcombine.low %v8758_v56, %v8762_v50  ;;  %v8942_v2 = vrot.slane %v3217_v0, 4  ;;  %v634_v13 = vor.u32 %v632_v6, %v631_v19  ;;  %v635_v52 = vrot.slane %v631_v19, 4  ;;  %v7631_v6 = vld [vmem:[#allocation2 + $0x8] ss:$8 sps:$4 sm:$0xff]   ;;  %v8960_v19 = vld [vmem:[#allocation2 + $0xbc] sm:$0x1] }
  0xfd   : > { %7349 = vmatmul.mubr.msk.bf16.gmra.mxu1 %vm1593_vm10, %v10790_v22  ;;  %v3241_v47 = vrot.slane %v3239_v25, 4  ;;  %v10794_v1 = vcombine.low %v10792_v11, %v10793_v45  ;;  %v3231_v63 = vor.u32 %v3230_v21, %v3227_v18  ;;  %v8950_v10 = vrot.slane %v3234_v23, 5  ;;  %10795 = vst [vmem:[#allocation8_spill] sm:$0xff] %v8960_v19 }
  0xfe   : > { %7387 = vmatmul.mubr.msk.bf16.gmra.mxu0 %vm1593_vm10, %v10791_v49  ;;  %v3244_v12 = vrot.slane %v3242_v46, 5  ;;  %v3267_v56 = vshrl.u32 %v3010_v53, 16  ;;  %v926_v50 = vsel %vm7943_vm7, %v634_v13, %v925_v29  ;;  %v929_v54 = vsel %vm7952_vm8, %v635_v52, %v928_v32  ;;  %v3016_v46 = vld [vmem:[#allocation2 + $0xc0] sm:$0xf]  ;;  %v8971_v13 = vld [vmem:[#allocation2 + $0xc4] sm:$0x1] }
  0xff   : > { %7352 = vmatprep.mubr.msk.bf16.mxu1 %vm1593_vm10, %v10794_v1  ;;  %7426 = vmatprep.mubr.msk.bf16.mxu0 %vm1593_vm10, %v8807_v35  ;;  %v3248_v57 = vshll.u32 %v8918_v60, 16  ;;  %v3270_v0 = vshll.u32 %v3010_v53, 16  ;;  %927 = vst [vmem:[#allocation2 + $0x90] sm:$0xf] %v926_v50  ;;  %930 = vst [vmem:[#allocation2 + $0x94] sm:$0x1] %v929_v54  ;;  %v3153_v29 = vsel %vm7970_vm9, %v8926_v17, %v8928_v20 }
 0x100   : > { %v3245_v35 = vor.u32 %v3244_v12, %v3241_v47  ;;  %v3269_v18 = vrot.slane %v3267_v56, 4  ;;  %v3276_v21 = vshll.u32 %v8924_v62, 16  ;;  %v3281_v23 = vshrl.u32 %v3012_v59, 16  ;;  %10796 = vst [vmem:[#allocation10_spill] sm:$0xff] %v8971_v13  ;;  %v3018_v20 = vld [vmem:[#allocation2 + $0xc8] sm:$0xf] }
 0x101   : > { %v3223_v32 = vsel %vm7970_vm9, %v8942_v2, %v8932_v42  ;;  %v3272_v53 = vrot.slane %v3270_v0, 5  ;;  %v3284_v25 = vshll.u32 %v3012_v59, 16  ;;  %v3232_v7 = vrot.slane %v3231_v63, 4  ;;  %v8980_v59 = vld [vmem:[%s10684_s1 + $0x20] sm:$0xf]  ;;  %v10797_v63 = vld [vmem:[#allocation16_spill] sm:$0xff] }
 0x102   : > { %v3283_v22 = vrot.slane %v3281_v23, 4  ;;  %v3290_v49 = vshll.u32 %v8957_v37, 16  ;;  %v3295_v52 = vshrl.u32 %v3014_v24, 16  ;;  %v8973_v47 = vrot.slane %v3248_v57, 5  ;;  %v10798_v56 = vld [vmem:[#allocation18_spill] sm:$0xff] }
 0x103   : > { %v3273_v11 = vor.u32 %v3272_v53, %v3269_v18  ;;  %v3286_v45 = vrot.slane %v3284_v25, 5  ;;  %v3298_v17 = vshll.u32 %v3014_v24, 16  ;;  %v8975_v1 = vrot.slane %v3245_v35, 4  ;;  %v7632_v53 = vld [vmem:[#allocation2 + $0x18] ss:$8 sps:$4 sm:$0xff]  }
 0x104   : > { %v3278_v12 = vrot.slane %v3276_v21, 5  ;;  %v3297_v42 = vrot.slane %v3295_v52, 4  ;;  %v3309_v2 = vshrl.u32 %v3016_v46, 16  ;;  %v10799_v50 = vcombine.low %v10797_v63, %v10798_v56 }
 0x105   : > { %v3274_v54 = vrot.slane %v3273_v11, 4  ;;  %v3287_v57 = vor.u32 %v3286_v45, %v3283_v22  ;;  %v3300_v0 = vrot.slane %v3298_v17, 5  ;;  %v3304_v24 = vshll.u32 %v8960_v19, 16  ;;  %v9006_v11 = vld [vmem:[#allocation2 + $0xcc] sm:$0x1] }
 0x106   : > { %7353 = vmatmul.mubr.msk.bf16.gmra.mxu1 %vm1593_vm10, %v10799_v50  ;;  %7427 = vmatmul.mubr.msk.bf16.vlgmr.msra.gmra.mxu0 %vm1593_vm10, %v8872_v33  ;;  %v3237_v35 = vsel %vm7970_vm9, %v3232_v7, %v8950_v10  ;;  %v3292_v18 = vrot.slane %v3290_v49, 5  ;;  %v3311_v21 = vrot.slane %v3309_v2, 4  ;;  %v3312_v23 = vshll.u32 %v3016_v46, 16  ;;  %v7633_v10 = vld [vmem:[#allocation2 + $0x28] ss:$8 sps:$4 sm:$0xff]   ;;  %10800 = vst [vmem:[#allocation11_spill] sm:$0xff] %v9006_v11 }
 0x107   : > { %7392 = vmatprep.mubr.msk.bf16.mxu1 %vm1593_vm10, %v7631_v6  ;;  %7493 = vmatpush3.bf16.msra.mxu0 %v8811_v58  ;;  %v6811_v33 = vcombine.low %v3139_v28, %v3153_v29  ;;  %v3008_v6 = vld [vmem:[#allocation2 + $0x90] sm:$0xf]  ;;  %v3301_v25 = vor.u32 %v3300_v0, %v3297_v42  ;;  %v3318_v58 = vshll.u32 %v8971_v13, 16  ;;  %v3323_v22 = vshrl.u32 %v3018_v20, 16  ;;  %v9004_v46 = vld [vmem:[#allocation2 + $0x94] sm:$0x1] }
 0x108   : > { %7430 = vmatprep.mubr.msk.bf16.mxu0 %vm1593_vm10, %v8877_v36  ;;  %7605 = vmatprep.subr.msk.bf16.mxu0 %vm1642_vm0, %v8980_v59  ;;  %v3253_v7 = vshrl.u32 %v3008_v6, 16  ;;  %v3256_v49 = vshll.u32 %v3008_v6, 16  ;;  %v3288_v36 = vrot.slane %v3287_v57, 4  ;;  %v3314_v52 = vrot.slane %v3312_v23, 5  ;;  %v3020_v29 = vld [vmem:[#allocation2 + $0xd0] sm:$0xf] }
 0x109   : > { %v9008_v45 = vcombine.low %v3223_v32, %v3237_v35  ;;  %v3279_v44 = vsel %vm7970_vm9, %v3274_v54, %v3278_v12  ;;  %v9016_v28 = vrot.slane %v3304_v24, 5  ;;  %v9018_v17 = vld [vmem:[#allocation2 + $0xd4] sm:$0x1]  ;;  %v3262_v63 = vshll.u32 %v9004_v46, 16  ;;  %v3022_v35 = vld [vmem:[#allocation2 + $0xd8] sm:$0xf] }
 0x10a   : > { %10801 = vst [vmem:[#allocation14_spill] sm:$0xff] %v9018_v17  ;;  %v3255_v42 = vrot.slane %v3253_v7, 4  ;;  %v3258_v2 = vrot.slane %v3256_v49, 5  ;;  %v3315_v56 = vor.u32 %v3314_v52, %v3311_v21  ;;  %v3293_v32 = vsel %vm7970_vm9, %v3288_v36, %v3292_v18  ;;  %v9028_v12 = vld [vmem:[%s10684_s1 + $0x1c] sm:$0xf] }
 0x10b   : > { %v9023_v50 = vrot.slane %v3301_v25, 4  ;;  %v3325_v57 = vrot.slane %v3323_v22, 4  ;;  %v3326_v0 = vshll.u32 %v3018_v20, 16  ;;  %v9032_v23 = vrot.slane %v3318_v58, 5  ;;  %v9038_v22 = vld [vmem:[#allocation2 + $0xdc] sm:$0x1] }
 0x10c   : > { %v3259_v54 = vor.u32 %v3258_v2, %v3255_v42  ;;  %v9030_v24 = vrot.slane %v3315_v56, 4  ;;  %v3337_v6 = vshrl.u32 %v3020_v29, 16  ;;  %v3332_v21 = vshll.u32 %v9006_v11, 16  ;;  %v976_v42 = vld [vmem:[#allocation2 + $0xe4] sm:$0x1] }
 0x10d   : > { %v3328_v18 = vrot.slane %v3326_v0, 5  ;;  %v3340_v20 = vshll.u32 %v3020_v29, 16  ;;  %v693_v25 = vshrl.u32 %v8909_v4, 16  ;;  %v9042_v7 = vrot.slane %v3262_v63, 5  ;;  %v7634_v0 = vld [vmem:[#allocation2 + $0x38] ss:$8 sps:$4 sm:$0xff]  }
 0x10e   : > { %7393 = vmatmul.mubr.msk.bf16.vlgmr.msra.gmra.mxu1 %vm1593_vm10, %v7632_v53  ;;  %7431 = vmatmul.mubr.msk.bf16.gmra.mxu0 %vm1593_vm10, %v6811_v33  ;;  %v9044_v58 = vcombine.low %v3279_v44, %v3293_v32  ;;  %v3339_v49 = vrot.slane %v3337_v6, 4  ;;  %v3346_v53 = vshll.u32 %v9018_v17, 16  ;;  %v3026_v33 = vld [vmem:[#allocation2 + $0xf8] sm:$0xf]  ;;  %v3260_v36 = vrot.slane %v3259_v54, 4 }
 0x10f   : > { %7459 = vmatpush3.bf16.msra.mxu1 %v8788_v16  ;;  %7396 = vmatprep.mubr.msk.bf16.mxu1 %vm1593_vm10, %v7633_v10  ;;  %v3329_v16 = vor.u32 %v3328_v18, %v3325_v57  ;;  %v3342_v29 = vrot.slane %v3340_v20, 5  ;;  %v973_v10 = vld [vmem:[#allocation2 + $0xe0] sm:$0xf]  ;;  %v3321_v2 = vsel %vm7970_vm9, %v9030_v24, %v9032_v23  ;;  %v696_v63 = vshll.u32 %v8909_v4, 16  ;;  %v9060_v32 = vld [vmem:[#allocation2 + $0xfc] sm:$0x1] }
 0x110   : > { %7434 = vmatprep.mubr.msk.bf16.mxu0 %vm1593_vm10, %v8922_v40  ;;  %7604 = vmatprep.subr.msk.bf16.mxu1 %vm1642_vm0, %v9028_v12  ;;  %v7635_v44 = vld [vmem:[#allocation2 + $0x58] ss:$8 sps:$4 sm:$0xff]   ;;  %v695_v40 = vrot.slane %v693_v25, 7  ;;  %v3351_v56 = vshrl.u32 %v3022_v35, 16  ;;  %v3334_v54 = vrot.slane %v3332_v21, 5  ;;  %v3354_v18 = vshll.u32 %v3022_v35, 16 }
 0x111   : > { %v3330_v57 = vrot.slane %v3329_v16, 4  ;;  %v3343_v6 = vor.u32 %v3342_v29, %v3339_v49  ;;  %v3028_v20 = vld [vmem:[#allocation2 + $0x100] sm:$0xf]  ;;  %v3360_v11 = vshll.u32 %v9038_v22, 16  ;;  %v9063_v13 = vld [vmem:[#allocation2 + $0x104] sm:$0x1]  ;;  %v3265_v19 = vsel %vm7970_vm9, %v3260_v36, %v9042_v7 }
 0x112   : > { %v698_v52 = vor.u32 %v696_v63, %v695_v40  ;;  %v699_v5 = vrot.slane %v695_v40, 4  ;;  %v3353_v17 = vrot.slane %v3351_v56, 4  ;;  %v3348_v23 = vrot.slane %v3346_v53, 5  ;;  %v3030_v16 = vld [vmem:[#allocation2 + $0x108] sm:$0xf] }
 0x113   : > { %v3344_v24 = vrot.slane %v3343_v6, 4  ;;  %v3356_v25 = vrot.slane %v3354_v18, 5  ;;  %v3379_v4 = vshrl.u32 %v3026_v33, 16  ;;  %v3382_v49 = vshll.u32 %v3026_v33, 16  ;;  %v9072_v29 = vld [vmem:[#allocation2 + $0x10c] sm:$0x1] }
 0x114   : > { %v974_v21 = vsel %vm7943_vm7, %v698_v52, %v973_v10  ;;  %v977_v35 = vsel %vm7952_vm8, %v699_v5, %v976_v42  ;;  %v3335_v53 = vsel %vm7970_vm9, %v3330_v57, %v3334_v54  ;;  %v3388_v52 = vshll.u32 %v9060_v32, 16  ;;  %v3032_v10 = vld [vmem:[#allocation2 + $0x110] sm:$0xf] }
 0x115   : > { %975 = vst [vmem:[#allocation2 + $0xe0] sm:$0xf] %v974_v21  ;;  %978 = vst [vmem:[#allocation2 + $0xe4] sm:$0x1] %v977_v35  ;;  %v3357_v7 = vor.u32 %v3356_v25, %v3353_v17  ;;  %v3381_v36 = vrot.slane %v3379_v4, 4  ;;  %v9083_v5 = vrot.slane %v3360_v11, 5  ;;  %v3349_v63 = vsel %vm7970_vm9, %v3344_v24, %v3348_v23 }
 0x116   : > { %7397 = vmatmul.mubr.msk.bf16.gmra.mxu1 %vm1593_vm10, %v7634_v0  ;;  %7435 = vmatmul.mubr.msk.bf16.gmra.mxu0 %vm1593_vm10, %v8930_v27  ;;  %v3384_v33 = vrot.slane %v3382_v49, 5  ;;  %v3393_v42 = vshrl.u32 %v3028_v20, 16  ;;  %v3396_v27 = vshll.u32 %v3028_v20, 16  ;;  %v7636_v40 = vld [vmem:[#allocation2 + $0x68] ss:$8 sps:$4 sm:$0xff]   ;;  %v3402_v17 = vshll.u32 %v9063_v13, 16 }
 0x117   : > { %7400 = vmatprep.mubr.msk.bf16.mxu1 %vm1593_vm10, %v7635_v44  ;;  %7438 = vmatprep.mubr.msk.bf16.mxu0 %vm1593_vm10, %v9008_v45  ;;  %v9087_v56 = vrot.slane %v3357_v7, 4  ;;  %v9090_v0 = vld [vmem:[#allocation2 + $0x114] sm:$0x1]  ;;  %v3407_v57 = vshrl.u32 %v3030_v16, 16  ;;  %v3410_v45 = vshll.u32 %v3030_v16, 16  ;;  %v10802_v18 = vsel %vm7970_vm9, %v8975_v1, %v8973_v47 }
 0x118   : > { %v3385_v44 = vor.u32 %v3384_v33, %v3381_v36  ;;  %v3395_v54 = vrot.slane %v3393_v42, 4  ;;  %v3398_v6 = vrot.slane %v3396_v27, 5  ;;  %v3034_v11 = vld [vmem:[#allocation2 + $0x118] sm:$0xf]  ;;  %v6815_v20 = vcombine.low %v10802_v18, %v3265_v19 }
 0x119   : > { %v3390_v25 = vrot.slane %v3388_v52, 5  ;;  %v3409_v24 = vrot.slane %v3407_v57, 4  ;;  %v3416_v23 = vshll.u32 %v9072_v29, 16  ;;  %v7637_v4 = vld [vmem:[#allocation2 + $0x78] ss:$8 sps:$4 sm:$0xff]   ;;  %v3412_v49 = vrot.slane %v3410_v45, 5 }
 0x11a   : > { %v3386_v21 = vrot.slane %v3385_v44, 4  ;;  %v3399_v35 = vor.u32 %v3398_v6, %v3395_v54  ;;  %v3421_v7 = vshrl.u32 %v3032_v10, 16  ;;  %v10803_v16 = vsel %vm7970_vm9, %v9023_v50, %v9016_v28  ;;  %v9108_v57 = vld [vmem:[#allocation2 + $0x11c] sm:$0x1]  ;;  %v3036_v44 = vld [vmem:[#allocation2 + $0x120] sm:$0xf] }
 0x11b   : > { %v6817_v36 = vcombine.low %v10803_v16, %v3321_v2  ;;  %v6818_v33 = vcombine.low %v3335_v53, %v3349_v63  ;;  %v3424_v42 = vshll.u32 %v3032_v10, 16  ;;  %v3430_v47 = vshll.u32 %v9090_v0, 16  ;;  %v9122_v45 = vld [vmem:[#allocation2 + $0x124] sm:$0x1]  ;;  %v7638_v16 = vld [vmem:[#allocation2 + $0x88] ss:$8 sps:$4 sm:$0xff]  }
 0x11c   : > { %v3024_v19 = vld [vmem:[#allocation2 + $0xe0] sm:$0xf]  ;;  %v3404_v52 = vrot.slane %v3402_v17, 5  ;;  %v3413_v27 = vor.u32 %v3412_v49, %v3409_v24  ;;  %v3435_v54 = vshrl.u32 %v3034_v11, 16  ;;  %v9112_v28 = vld [vmem:[#allocation2 + $0xe4] sm:$0x1]  ;;  %v3391_v17 = vsel %vm7970_vm9, %v3386_v21, %v3390_v25 }
 0x11d   : > { %v3365_v50 = vshrl.u32 %v3024_v19, 16  ;;  %v3368_v2 = vshll.u32 %v3024_v19, 16  ;;  %v3400_v53 = vrot.slane %v3399_v35, 4  ;;  %v3423_v10 = vrot.slane %v3421_v7, 4 }
 0x11e   : > { %7401 = vmatmul.mubr.msk.bf16.gmra.mxu1 %vm1593_vm10, %v7636_v40  ;;  %7439 = vmatmul.mubr.msk.bf16.gmra.mxu0 %vm1593_vm10, %v6815_v20  ;;  %v3374_v63 = vshll.u32 %v9112_v28, 16  ;;  %v9120_v6 = vrot.slane %v3416_v23, 5  ;;  %v3426_v40 = vrot.slane %v3424_v42, 5  ;;  %v9124_v24 = vrot.slane %v3413_v27, 4  ;;  %v7639_v42 = vld [vmem:[#allocation2 + $0xa8] ss:$8 sps:$4 sm:$0xff]  }
 0x11f   : > { %7404 = vmatprep.mubr.msk.bf16.mxu1 %vm1593_vm10, %v7637_v4  ;;  %7442 = vmatprep.mubr.msk.bf16.mxu0 %vm1593_vm10, %v9044_v58  ;;  %v3367_v18 = vrot.slane %v3365_v50, 4  ;;  %v3370_v20 = vrot.slane %v3368_v2, 5  ;;  %v9126_v35 = vrot.slane %v3430_v47, 5  ;;  %v3405_v58 = vsel %vm7970_vm9, %v3400_v53, %v3404_v52 }
 0x120   : > { %v3376_v4 = vrot.slane %v3374_v63, 5  ;;  %v3427_v49 = vor.u32 %v3426_v40, %v3423_v10  ;;  %v3437_v7 = vrot.slane %v3435_v54, 4  ;;  %v3438_v25 = vshll.u32 %v3034_v11, 16  ;;  %v3038_v54 = vld [vmem:[#allocation2 + $0x128] sm:$0xf] }
 0x121   : > { %v3371_v19 = vor.u32 %v3370_v20, %v3367_v18  ;;  %v3444_v23 = vshll.u32 %v9108_v57, 16  ;;  %v3449_v21 = vshrl.u32 %v3036_v44, 16  ;;  %v3452_v50 = vshll.u32 %v3036_v44, 16  ;;  %v1021_v20 = vld [vmem:[#allocation2 + $0x130] sm:$0xf] }
 0x122   : > { %v9131_v1 = vrot.slane %v3427_v49, 4  ;;  %v3458_v27 = vshll.u32 %v9122_v45, 16  ;;  %v757_v47 = vshrl.u32 %v8920_v15, 16  ;;  %v9135_v63 = vcombine.low %v3391_v17, %v3405_v58 }
 0x123   : > { %v3372_v2 = vrot.slane %v3371_v19, 4  ;;  %v3440_v52 = vrot.slane %v3438_v25, 5  ;;  %v3451_v53 = vrot.slane %v3449_v21, 4  ;;  %v3419_v11 = vsel %vm7970_vm9, %v9124_v24, %v9120_v6  ;;  %v1024_v6 = vld [vmem:[#allocation2 + $0x134] sm:$0x1] }
 0x124   : > { %v3446_v10 = vrot.slane %v3444_v23, 5  ;;  %v3454_v40 = vrot.slane %v3452_v50, 5  ;;  %v759_v18 = vrot.slane %v757_v47, 7  ;;  %v3433_v17 = vsel %vm7970_vm9, %v9131_v1, %v9126_v35  ;;  %v3784_v24 = vld [vmem:[#allocation2 + $0x8] sm:$0xe] }
 0x125   : > { %v3377_v44 = vsel %vm7970_vm9, %v3372_v2, %v3376_v4  ;;  %v3441_v58 = vor.u32 %v3440_v52, %v3437_v7  ;;  %v760_v49 = vshll.u32 %v8920_v15, 16  ;;  %v3460_v19 = vrot.slane %v3458_v27, 5  ;;  %v9152_v25 = vld [vmem:[#allocation2 + $0x12c] sm:$0x1]  ;;  %v3785_v21 = vld [vmem:[#allocation2 + $0x10] sm:$0xe] }
 0x126   : > { %7405 = vmatmul.mubr.msk.bf16.gmra.mxu1 %vm1593_vm10, %v7638_v16  ;;  %7443 = vmatmul.mubr.msk.bf16.gmra.mxu0 %vm1593_vm10, %v6817_v36  ;;  %v3455_v16 = vor.u32 %v3454_v40, %v3451_v53  ;;  %v763_v36 = vrot.slane %v759_v18, 4  ;;  %v3463_v4 = vshrl.u32 %v3038_v54, 16  ;;  %v10804_v1 = vsel %vm7970_vm9, %v9087_v56, %v9083_v5  ;;  %v3786_v47 = vld [vmem:[#allocation2 + $0x18] sm:$0xe]  ;;  %v7641_v40 = vld [vmem:[#allocation2 + $0xc8] ss:$8 sps:$4 sm:$0xff]  }
 0x127   : > { %7408 = vmatprep.mubr.msk.bf16.mxu1 %vm1593_vm10, %v7639_v42  ;;  %7446 = vmatprep.mubr.msk.bf16.mxu0 %vm1593_vm10, %v6818_v33  ;;  %v6819_v35 = vcombine.low %v10804_v1, %v3377_v44  ;;  %v3442_v7 = vrot.slane %v3441_v58, 4  ;;  %v762_v15 = vor.u32 %v760_v49, %v759_v18  ;;  %v3466_v23 = vshll.u32 %v3038_v54, 16  ;;  %v7640_v2 = vld [vmem:[#allocation2 + $0xb8] ss:$8 sps:$4 sm:$0xff]   ;;  %v7685_v18 = vld [vmem:[#allocation2 + $0xc] sm:$0x1] }
 0x128   : > { %v3456_v50 = vrot.slane %v3455_v16, 4  ;;  %v1025_v33 = vsel %vm7952_vm8, %v763_v36, %v1024_v6  ;;  %v3465_v42 = vrot.slane %v3463_v4, 4  ;;  %v6840_v27 = vrot.slane %v3784_v24, 9  ;;  %v3787_v54 = vld [vmem:[#allocation2 + $0x20] sm:$0xe] }
 0x129   : > { %v3447_v52 = vsel %vm7970_vm9, %v3442_v7, %v3446_v10  ;;  %v1022_v53 = vsel %vm7943_vm7, %v762_v15, %v1021_v20  ;;  %1026 = vst [vmem:[#allocation2 + $0x134] sm:$0x1] %v1025_v33  ;;  %v3468_v5 = vrot.slane %v3466_v23, 5  ;;  %v3472_v56 = vshll.u32 %v9152_v25, 16  ;;  %v7686_v49 = vld [vmem:[#allocation2 + $0x14] sm:$0x1] }
 0x12a   : > { %v3461_v30 = vsel %vm7970_vm9, %v3456_v50, %v3460_v19  ;;  %1023 = vst [vmem:[#allocation2 + $0x130] sm:$0xf] %v1022_v53  ;;  %v3882_v44 = vrot.slane %v7685_v18, 5  ;;  %v6841_v58 = vrot.slane %v3785_v21, 9  ;;  %v3886_v6 = vrot.slane %v7686_v49, 5 }
 0x12b   : > { %v3469_v24 = vor.u32 %v3468_v5, %v3465_v42  ;;  %v6842_v10 = vrot.slane %v3786_v47, 9  ;;  %v3890_v31 = vrot.slane %v8735_v48, 5  ;;  %v3788_v20 = vld [vmem:[#allocation2 + $0x28] sm:$0xe]  ;;  %v6843_v19 = vrot.slane %v3787_v54, 9 }
 0x12c   : > { %v9171_v16 = vsel %vm8401_vm13, %v6840_v27, %v3882_v44  ;;  %v9175_v36 = vsel %vm8401_vm13, %v6841_v58, %v3886_v6  ;;  %v3894_v4 = vrot.slane %v8745_v39, 5  ;;  %v3789_v1 = vld [vmem:[#allocation2 + $0x30] sm:$0xe]  ;;  %v6821_v7 = vcombine.low %v3419_v11, %v3433_v17  ;;  %v3790_v21 = vld [vmem:[#allocation2 + $0x38] sm:$0xe] }
 0x12d   : > { %v6822_v15 = vcombine.low %v3447_v52, %v3461_v30  ;;  %v9180_v48 = vrot.slane %v3469_v24, 4  ;;  %v9182_v23 = vrot.slane %v3472_v56, 5  ;;  %v9189_v39 = vsel %vm8401_vm13, %v6842_v10, %v3890_v31  ;;  %v3792_v33 = vld [vmem:[#allocation2 + $0x58] sm:$0xe]  ;;  %v3793_v52 = vld [vmem:[#allocation2 + $0x60] sm:$0xe] }
 0x12e   : > { %7409 = vmatmul.mubr.msk.bf16.gmra.mxu1 %vm1593_vm10, %v7640_v2  ;;  %7447 = vmatmul.mubr.msk.bf16.gmra.mxu0 %vm1593_vm10, %v6819_v35  ;;  %v9193_v50 = vsel %vm8401_vm13, %v6843_v19, %v3894_v4  ;;  %v6844_v11 = vrot.slane %v3788_v20, 9  ;;  %v3898_v17 = vrot.slane %v8781_v9, 5  ;;  %v3791_v35 = vld [vmem:[#allocation2 + $0x40] sm:$0xe]  ;;  %v6873_v27 = vcombine.low %v9171_v16, %v9175_v36  ;;  %v3795_v24 = vld [vmem:[#allocation2 + $0x70] sm:$0xe] }
 0x12f   : > { %7412 = vmatprep.mubr.msk.bf16.mxu1 %vm1593_vm10, %v7641_v40  ;;  %7450 = vmatprep.mubr.msk.bf16.mxu0 %vm1593_vm10, %v9135_v63  ;;  %v7642_v42 = vld [vmem:[#allocation2 + $0xd8] ss:$8 sps:$4 sm:$0xff]   ;;  %v9200_v63 = vsel %vm1642_vm0, %v9028_v12, 0  ;;  %v6845_v47 = vrot.slane %v3789_v1, 9  ;;  %v3902_v2 = vrot.slane %v8796_v43, 5  ;;  %v9207_v9 = vsel %vm1642_vm0, %v8980_v59, 0 }
 0x130   : > { %v7643_v53 = vld [vmem:[#allocation2 + $0xf8] ss:$8 sps:$4 sm:$0xff]   ;;  %v9203_v5 = vld [vmem:[#allocation2 + $0x134] sm:$0x1]  ;;  %v9211_v56 = vsel %vm8401_vm13, %v6844_v11, %v3898_v17  ;;  %v6846_v54 = vrot.slane %v3790_v21, 9  ;;  %v3906_v40 = vrot.slane %v8813_v8, 5  ;;  %v3475_v43 = vsel %vm7970_vm9, %v9180_v48, %v9182_v23 }
 0x131   : > { %v3794_v12 = vld [vmem:[#allocation2 + $0x68] sm:$0xe]  ;;  %v3040_v30 = vld [vmem:[#allocation2 + $0x130] sm:$0xf]  ;;  %v6874_v18 = vcombine.low %v9189_v39, %v9193_v50  ;;  %v9222_v59 = vsel %vm8401_vm13, %v6845_v47, %v3902_v2  ;;  %v6847_v44 = vrot.slane %v3791_v35, 9  ;;  %v3486_v6 = vshll.u32 %v9203_v5, 16 }
 0x132   : > { %v3477_v58 = vshrl.u32 %v3040_v30, 16  ;;  %v3480_v49 = vshll.u32 %v3040_v30, 16  ;;  %v6875_v8 = vcombine.low %v9211_v56, %v9222_v59  ;;  %v9229_v10 = vsel %vm8401_vm13, %v6846_v54, %v3906_v40  ;;  %v3796_v21 = vld [vmem:[#allocation2 + $0x78] sm:$0xe]  ;;  %v3797_v35 = vld [vmem:[#allocation2 + $0x80] sm:$0xe] }
 0x133   : > { %v3910_v31 = vrot.slane %v8894_v38, 5  ;;  %v6848_v20 = vrot.slane %v3792_v33, 9  ;;  %v3914_v19 = vrot.slane %v8824_v41, 5  ;;  %v3488_v48 = vrot.slane %v3486_v6, 5  ;;  %v3798_v2 = vld [vmem:[#allocation2 + $0x88] sm:$0xe] }
 0x134   : > { %v3479_v4 = vrot.slane %v3477_v58, 4  ;;  %v3482_v1 = vrot.slane %v3480_v49, 5  ;;  %v6849_v23 = vrot.slane %v3793_v52, 9  ;;  %v3918_v38 = vrot.slane %v8831_v26, 5  ;;  %v3800_v58 = vld [vmem:[#allocation2 + $0xa8] sm:$0xe] }
 0x135   : > { %v9237_v11 = vsel %vm8401_vm13, %v6847_v44, %v3910_v31  ;;  %v9241_v17 = vsel %vm8401_vm13, %v6848_v20, %v3914_v19  ;;  %v6850_v41 = vrot.slane %v3794_v12, 9  ;;  %v6851_v47 = vrot.slane %v3795_v24, 9  ;;  %v7644_v12 = vld [vmem:[#allocation2 + $0x108] ss:$8 sps:$4 sm:$0xff]   ;;  %v7645_v49 = vld [vmem:[#allocation2 + $0x118] ss:$8 sps:$4 sm:$0xff]  }
 0x136   : > { %7413 = vmatmul.mubr.msk.bf16.gmra.mxu1 %vm1593_vm10, %v7642_v42  ;;  %7451 = vmatmul.mubr.msk.bf16.gmra.mxu0 %vm1593_vm10, %v6821_v7  ;;  %v3483_v33 = vor.u32 %v3482_v1, %v3479_v4  ;;  %v6876_v7 = vcombine.low %v9229_v10, %v9237_v11  ;;  %v3922_v42 = vrot.slane %v8840_v14, 5  ;;  %v9251_v52 = vsel %vm8401_vm13, %v6849_v23, %v3918_v38  ;;  %v3801_v31 = vld [vmem:[#allocation2 + $0xb0] sm:$0xe]  ;;  %v4671_v4 = vld [vmem:[#allocation2 + $0x38] sm:$0xf] }
 0x137   : > { %7416 = vmatprep.mubr.msk.bf16.mxu1 %vm1593_vm10, %v7643_v53  ;;  %7454 = vmatprep.mubr.msk.bf16.mxu0 %vm1593_vm10, %v6822_v15  ;;  %v3926_v26 = vrot.slane %v8845_v55, 5  ;;  %v6852_v54 = vrot.slane %v3796_v21, 9  ;;  %v3930_v40 = vrot.slane %v8874_v61, 5  ;;  %v3799_v53 = vld [vmem:[#allocation2 + $0x90] sm:$0xe]  ;;  %v6877_v30 = vcombine.low %v9241_v17, %v9251_v52 }
 0x138   : > { %v3484_v15 = vrot.slane %v3483_v33, 4  ;;  %v9259_v14 = vsel %vm8401_vm13, %v6850_v41, %v3922_v42  ;;  %v6853_v44 = vrot.slane %v3797_v35, 9  ;;  %v3934_v61 = vrot.slane %v8907_v34, 5  ;;  %v7647_v19 = vld [vmem:[#allocation2 + $0x10] ss:$8 sps:$4 sm:$0xff]  }
 0x139   : > { %v9263_v6 = vsel %vm8401_vm13, %v6851_v47, %v3926_v26  ;;  %v9267_v55 = vsel %vm8401_vm13, %v6852_v54, %v3930_v40  ;;  %v6854_v24 = vrot.slane %v3798_v2, 9  ;;  %v3938_v1 = vrot.slane %v8918_v60, 5  ;;  %v3802_v21 = vld [vmem:[#allocation2 + $0xb8] sm:$0xe]  ;;  %v3803_v33 = vld [vmem:[#allocation2 + $0xc0] sm:$0xe] }
 0x13a   : > { %v3489_v20 = vsel %vm7970_vm9, %v3484_v15, %v3488_v48  ;;  %v6855_v23 = vrot.slane %v3799_v53, 9  ;;  %v9277_v41 = vsel %vm8401_vm13, %v6853_v44, %v3934_v61  ;;  %v3942_v34 = vrot.slane %v9004_v46, 5  ;;  %v3804_v2 = vld [vmem:[#allocation2 + $0xc8] sm:$0xe]  ;;  %v3805_v53 = vld [vmem:[#allocation2 + $0xd0] sm:$0xe] }
 0x13b   : > { %v6823_v38 = vcombine.low %v3475_v43, %v3489_v20  ;;  %v6856_v35 = vrot.slane %v3800_v58, 9  ;;  %v9284_v42 = vsel %vm8401_vm13, %v6854_v24, %v3938_v1  ;;  %v3946_v60 = vrot.slane %v8924_v62, 5  ;;  %v10805_v54 = vld [vmem:[#allocation8_spill] sm:$0xff]  ;;  %v10806_v44 = vld [vmem:[#allocation10_spill] sm:$0xff] }
 0x13c   : > { %v6857_v47 = vrot.slane %v3801_v31, 9  ;;  %v9291_v46 = vsel %vm8401_vm13, %v6855_v23, %v3942_v34  ;;  %v3950_v43 = vrot.slane %v8957_v37, 5  ;;  %v6858_v26 = vrot.slane %v3802_v21, 9  ;;  %v3806_v61 = vld [vmem:[#allocation2 + $0xd8] sm:$0xe]  ;;  %v10807_v31 = vld [vmem:[#allocation11_spill] sm:$0xff] }
 0x13d   : > { %v3954_v40 = vrot.slane %v10805_v54, 5  ;;  %v6859_v15 = vrot.slane %v3803_v33, 9  ;;  %v3958_v58 = vrot.slane %v10806_v44, 5  ;;  %v6860_v24 = vrot.slane %v3804_v2, 9  ;;  %v3808_v1 = vld [vmem:[#allocation2 + $0xf8] sm:$0xe] }
 0x13e   : > { %7417 = vmatmul.mubr.msk.bf16.gmra.mxu1 %vm1593_vm10, %v7644_v12  ;;  %7455 = vmatmul.mubr.msk.bf16.gmra.mxu0 %vm1593_vm10, %v6823_v38  ;;  %v9301_v12 = vsel %vm8401_vm13, %v6856_v35, %v3946_v60  ;;  %v9306_v37 = vsel %vm8401_vm13, %v6857_v47, %v3950_v43  ;;  %v3962_v20 = vrot.slane %v10807_v31, 5  ;;  %v7648_v23 = vld [vmem:[#allocation2 + $0x20] ss:$8 sps:$4 sm:$0xff]   ;;  %v6861_v34 = vrot.slane %v3805_v53, 9  ;;  %v10808_v35 = vld [vmem:[#allocation14_spill] sm:$0xff] }
 0x13f   : > { %7420 = vmatprep.mubr.msk.bf16.mxu1 %vm1593_vm10, %v7645_v49  ;;  %7494 = vmatprep.mubr.msk.bf16.mxu0 %vm1593_vm10, %v7647_v19  ;;  %v9310_v49 = vsel %vm8401_vm13, %v6858_v26, %v3954_v40  ;;  %v3807_v19 = vld [vmem:[#allocation2 + $0xe0] sm:$0xe]  ;;  %v9317_v38 = vsel %vm8401_vm13, %v6859_v15, %v3958_v58  ;;  %v3966_v33 = vrot.slane %v10808_v35, 5  ;;  %v7646_v47 = vld [vmem:[#allocation2 + $0x128] ss:$8 sps:$4 sm:$0xff]   ;;  %v6862_v26 = vrot.slane %v3806_v61, 9 }
 0x140   : > { %v3809_v60 = vld [vmem:[#allocation2 + $0x100] sm:$0xe]  ;;  %v9324_v43 = vsel %vm8401_vm13, %v6860_v24, %v3962_v20  ;;  %v3970_v54 = vrot.slane %v9038_v22, 5  ;;  %v3810_v40 = vld [vmem:[#allocation2 + $0x108] sm:$0xe]  ;;  %v6863_v53 = vrot.slane %v3807_v19, 9 }
 0x141   : > { %v9329_v15 = vsel %vm8401_vm13, %v6861_v34, %v3966_v33  ;;  %v3974_v44 = vrot.slane %v9112_v28, 5  ;;  %v6864_v58 = vrot.slane %v3808_v1, 9  ;;  %v3811_v31 = vld [vmem:[#allocation2 + $0x110] sm:$0xe]  ;;  %v3978_v22 = vrot.slane %v9060_v32, 5 }
 0x142   : > { %v7649_v35 = vld [vmem:[#allocation2 + $0x30] ss:$8 sps:$4 sm:$0xff]   ;;  %v9336_v24 = vsel %vm8401_vm13, %v6862_v26, %v3970_v54  ;;  %v6865_v61 = vrot.slane %v3809_v60, 9  ;;  %v3982_v28 = vrot.slane %v9063_v13, 5  ;;  %v6866_v19 = vrot.slane %v3810_v40, 9 }
 0x143   : > { %v3812_v20 = vld [vmem:[#allocation2 + $0x118] sm:$0xe]  ;;  %v9341_v34 = vsel %vm8401_vm13, %v6863_v53, %v3974_v44  ;;  %v3986_v1 = vrot.slane %v9072_v29, 5  ;;  %v3813_v33 = vld [vmem:[#allocation2 + $0x120] sm:$0xe]  ;;  %v9351_v32 = vsel %vm8401_vm13, %v6864_v58, %v3978_v22  ;;  %v6867_v60 = vrot.slane %v3811_v31, 9 }
 0x144   : > { %v3990_v54 = vrot.slane %v9090_v0, 5  ;;  %v3814_v53 = vld [vmem:[#allocation2 + $0x128] sm:$0xe]  ;;  %v9361_v13 = vsel %vm8401_vm13, %v6865_v61, %v3982_v28  ;;  %v3815_v0 = vld [vmem:[#allocation2 + $0x130] sm:$0xe]  ;;  %v4002_v22 = vrot.slane %v9152_v25, 5 }
 0x145   : > { %v9365_v29 = vsel %vm8401_vm13, %v6866_v19, %v3986_v1  ;;  %v4661_v40 = vld [vmem:[#allocation2 + $0x10] sm:$0xf]  ;;  %v4662_v44 = vld [vmem:[#allocation2 + $0x14] sm:$0x1]  ;;  %v7650_v58 = vld [vmem:[#allocation2 + $0x40] ss:$8 sps:$4 sm:$0xff]  }
 0x146   : > { %7421 = vmatmul.mubr.msk.bf16.gmra.mxu1 %vm1593_vm10, %v7646_v47  ;;  %7495 = vmatmul.mubr.msk.bf16.vlgmr.msra.gmra.mxu0 %vm1593_vm10, %v7648_v23  ;;  %v6868_v23 = vrot.slane %v3812_v20, 9  ;;  %v3994_v47 = vrot.slane %v9108_v57, 5  ;;  %v9373_v36 = vsel %vm8401_vm13, %v6867_v60, %v3990_v54  ;;  %v4663_v61 = vld [vmem:[#allocation2 + $0x18] sm:$0xf]  ;;  %v7651_v20 = vld [vmem:[#allocation2 + $0x60] ss:$8 sps:$4 sm:$0xff]  }
 0x147   : > { %7460 = vmatprep.mubr.msk.bf16.mxu1 %vm1593_vm10, %v6873_v27  ;;  %7561 = vmatpush3.bf16.msra.mxu0 %v9207_v9  ;;  %v6869_v27 = vrot.slane %v3813_v33, 9  ;;  %v3998_v9 = vrot.slane %v9122_v45, 5  ;;  %v6871_v19 = vrot.slane %v3815_v0, 9  ;;  %v4006_v45 = vrot.slane %v9203_v5, 5  ;;  %v4664_v1 = vld [vmem:[#allocation2 + $0x1c] sm:$0x1] }
 0x148   : > { %7498 = vmatprep.mubr.msk.bf16.mxu0 %vm1593_vm10, %v7649_v35  ;;  %v9380_v57 = vsel %vm8401_vm13, %v6868_v23, %v3994_v47  ;;  %v6870_v35 = vrot.slane %v3814_v53, 9  ;;  %v4726_v33 = vshrl.u32 %v4661_v40, 16  ;;  %v4729_v53 = vshll.u32 %v4661_v40, 16  ;;  %v5467_v23 = vld [vmem:[#allocation2 + $0x10] sm:$0xe]  ;;  %v9405_v40 = vpop.f32.mrf.mxu0 }
 0x149   : > { %v9385_v28 = vsel %vm8401_vm13, %v6869_v27, %v3998_v9  ;;  %v4735_v25 = vshll.u32 %v4662_v44, 16  ;;  %v5468_v47 = vld [vmem:[#allocation2 + $0x18] sm:$0xe]  ;;  %v9396_v27 = vsel %vm8401_vm13, %v6871_v19, %v4006_v45  ;;  %v4740_v9 = vshrl.u32 %v4663_v61, 16  ;;  %v4665_v31 = vld [vmem:[#allocation2 + $0x20] sm:$0xf] }
 0x14a   : > { %v9392_v54 = vsel %vm8401_vm13, %v6870_v35, %v4002_v22  ;;  %v4728_v0 = vrot.slane %v4726_v33, 4  ;;  %v4743_v5 = vshll.u32 %v4663_v61, 16  ;;  %v4731_v60 = vrot.slane %v4729_v53, 5  ;;  %v4666_v35 = vld [vmem:[#allocation2 + $0x24] sm:$0x1] }
 0x14b   : > { %v4737_v26 = vrot.slane %v4735_v25, 5  ;;  %v4749_v2 = vshll.u32 %v4664_v1, 16  ;;  %v4742_v22 = vrot.slane %v4740_v9, 4  ;;  %v6971_v61 = vrot.slane %v5467_v23, 9  ;;  %v4667_v33 = vld [vmem:[#allocation2 + $0x28] sm:$0xf] }
 0x14c   : > { %v4745_v19 = vrot.slane %v4743_v5, 5  ;;  %v5565_v45 = vrot.slane %v4662_v44, 5  ;;  %v4732_v53 = vor.u32 %v4731_v60, %v4728_v0  ;;  %v6972_v50 = vrot.slane %v5468_v47, 9  ;;  %v4668_v44 = vld [vmem:[#allocation2 + $0x2c] sm:$0x1] }
 0x14d   : > { %v4751_v39 = vrot.slane %v4749_v2, 5  ;;  %v4754_v9 = vshrl.u32 %v4665_v31, 16  ;;  %v7653_v5 = vld [vmem:[#allocation2 + $0x80] ss:$8 sps:$4 sm:$0xff]   ;;  %v4763_v59 = vshll.u32 %v4666_v35, 16  ;;  %v4777_v21 = vshll.u32 %v4668_v44, 16 }
 0x14e   : > { %7461 = vmatmul.mubr.msk.bf16.vlgmr.msra.gmra.mxu1 %vm1593_vm10, %v6874_v18  ;;  %7499 = vmatmul.mubr.msk.bf16.gmra.mxu0 %vm1593_vm10, %v7650_v58  ;;  %v5569_v18 = vrot.slane %v4664_v1, 5  ;;  %v7652_v58 = vld [vmem:[#allocation2 + $0x70] ss:$8 sps:$4 sm:$0xff]   ;;  %v4746_v25 = vor.u32 %v4745_v19, %v4742_v22  ;;  %v9415_v23 = vsel %vm8401_vm13, %v6971_v61, %v5565_v45  ;;  %v4733_v16 = vrot.slane %v4732_v53, 4  ;;  %v5469_v2 = vld [vmem:[#allocation2 + $0x20] sm:$0xe]  ;;  %v9421_v1 = vpop.f32.mrf.mxu0 }
 0x14f   : > { %7527 = vmatpush3.bf16.msra.mxu1 %v9200_v63  ;;  %7464 = vmatprep.mubr.msk.bf16.mxu1 %vm1593_vm10, %v6875_v8  ;;  %v4757_v63 = vshll.u32 %v4665_v31, 16  ;;  %v4768_v8 = vshrl.u32 %v4667_v33, 16  ;;  %v4756_v47 = vrot.slane %v4754_v9, 4  ;;  %v5470_v22 = vld [vmem:[#allocation2 + $0x28] sm:$0xe]  ;;  %v4765_v19 = vrot.slane %v4763_v59, 5 }
 0x150   : > { %7502 = vmatprep.mubr.msk.bf16.mxu0 %vm1593_vm10, %v7651_v20  ;;  %v9419_v56 = vsel %vm8401_vm13, %v6972_v50, %v5569_v18  ;;  %v4747_v20 = vrot.slane %v4746_v25, 4  ;;  %v4738_v31 = vsel %vm7970_vm9, %v4733_v16, %v4737_v26  ;;  %v4771_v45 = vshll.u32 %v4667_v33, 16  ;;  %v4669_v53 = vld [vmem:[#allocation2 + $0x30] sm:$0xf]  ;;  %v4670_v25 = vld [vmem:[#allocation2 + $0x34] sm:$0x1]  ;;  %v9436_v26 = vpop.f32.mrf.mxu1  ;;  %v9438_v16 = vpop.f32.mrf.mxu0 }
 0x151   : > { %v4759_v0 = vrot.slane %v4757_v63, 5  ;;  %v4770_v61 = vrot.slane %v4768_v8, 4  ;;  %v6973_v62 = vrot.slane %v5469_v2, 9  ;;  %v5573_v9 = vrot.slane %v4666_v35, 5  ;;  %10809 = vst [vmem:[#allocation15_spill] sm:$0xff] %v9436_v26 }
 0x152   : > { %v4752_v50 = vsel %vm7970_vm9, %v4747_v20, %v4751_v39  ;;  %v4773_v60 = vrot.slane %v4771_v45, 5  ;;  %v6974_v63 = vrot.slane %v5470_v22, 9  ;;  %v4779_v39 = vrot.slane %v4777_v21, 5  ;;  %v5471_v2 = vld [vmem:[#allocation2 + $0x30] sm:$0xe]  ;;  %v9457_v22 = vpop.f32.mrf.mxu1 }
 0x153   : > { %v4760_v18 = vor.u32 %v4759_v0, %v4756_v47  ;;  %v9429_v48 = vcombine.low %v4738_v31, %v4752_v50  ;;  %v5577_v59 = vrot.slane %v4668_v44, 5  ;;  %v4782_v8 = vshrl.u32 %v4669_v53, 16  ;;  %v7655_v20 = vld [vmem:[#allocation2 + $0xb0] ss:$8 sps:$4 sm:$0xff]   ;;  %10810 = vst [vmem:[#allocation5_spill] sm:$0xff] %v9457_v22  ;;  %v9459_v31 = vpop.f32.mrf.mxu0 }
 0x154   : > { %v4774_v10 = vor.u32 %v4773_v60, %v4770_v61  ;;  %v9447_v11 = vsel %vm8401_vm13, %v6973_v62, %v5573_v9  ;;  %v4785_v35 = vshll.u32 %v4669_v53, 16  ;;  %v4796_v52 = vshrl.u32 %v4671_v4, 16  ;;  %v4673_v50 = vld [vmem:[#allocation2 + $0x40] sm:$0xf] }
 0x155   : > { %v4761_v33 = vrot.slane %v4760_v18, 4  ;;  %v9453_v44 = vsel %vm8401_vm13, %v6974_v63, %v5577_v59  ;;  %v4784_v17 = vrot.slane %v4782_v8, 4  ;;  %v4799_v61 = vshll.u32 %v4671_v4, 16  ;;  %v4674_v59 = vld [vmem:[#allocation2 + $0x44] sm:$0x1] }
 0x156   : > { %7465 = vmatmul.mubr.msk.bf16.gmra.mxu1 %vm1593_vm10, %v6876_v7  ;;  %7503 = vmatmul.mubr.msk.bf16.gmra.mxu0 %vm1593_vm10, %v7652_v58  ;;  %v4672_v7 = vld [vmem:[#allocation2 + $0x3c] sm:$0x1]  ;;  %v4791_v58 = vshll.u32 %v4670_v25, 16  ;;  %v4775_v60 = vrot.slane %v4774_v10, 4  ;;  %v4787_v47 = vrot.slane %v4785_v35, 5  ;;  %v6975_v53 = vrot.slane %v5471_v2, 9 }
 0x157   : > { %7468 = vmatprep.mubr.msk.bf16.mxu1 %vm1593_vm10, %v6877_v30  ;;  %7506 = vmatprep.mubr.msk.bf16.mxu0 %vm1593_vm10, %v7653_v5  ;;  %v4766_v21 = vsel %vm7970_vm9, %v4761_v33, %v4765_v19  ;;  %v5472_v30 = vld [vmem:[#allocation2 + $0x38] sm:$0xe]  ;;  %v4798_v19 = vrot.slane %v4796_v52, 4  ;;  %v4805_v45 = vshll.u32 %v4672_v7, 16  ;;  %v5581_v63 = vrot.slane %v4670_v25, 5  ;;  %v9474_v25 = vpop.f32.mrf.mxu1 }
 0x158   : > { %v7654_v5 = vld [vmem:[#allocation2 + $0x90] ss:$8 sps:$4 sm:$0xff]   ;;  %v4793_v0 = vrot.slane %v4791_v58, 5  ;;  %v4780_v18 = vsel %vm7970_vm9, %v4775_v60, %v4779_v39  ;;  %v4788_v9 = vor.u32 %v4787_v47, %v4784_v17  ;;  %v6976_v33 = vrot.slane %v5472_v30, 9  ;;  %v4675_v8 = vld [vmem:[#allocation2 + $0x48] sm:$0xf] }
 0x159   : > { %v9463_v10 = vcombine.low %v4766_v21, %v4780_v18  ;;  %v4801_v35 = vrot.slane %v4799_v61, 5  ;;  %v4807_v58 = vrot.slane %v4805_v45, 5  ;;  %v5585_v62 = vrot.slane %v4672_v7, 5  ;;  %10812 = vst [vmem:[#allocation17_spill] sm:$0xff] %v9474_v25  ;;  %v9476_v21 = vpop.f32.mrf.mxu0  ;;  %v4676_v30 = vld [vmem:[#allocation2 + $0x4c] sm:$0x1] }
 0x15a   : > { %v4789_v22 = vrot.slane %v4788_v9, 4  ;;  %v9467_v4 = vsel %vm8401_vm13, %v6975_v53, %v5581_v63  ;;  %v4810_v2 = vshrl.u32 %v4673_v50, 16  ;;  %v4813_v52 = vshll.u32 %v4673_v50, 16  ;;  %v5473_v61 = vld [vmem:[#allocation2 + $0x40] sm:$0xe] }
 0x15b   : > { %v10811_v39 = vcombine.low %v9259_v14, %v9263_v6  ;;  %v4802_v17 = vor.u32 %v4801_v35, %v4798_v19  ;;  %v9480_v7 = vsel %vm8401_vm13, %v6976_v33, %v5585_v62  ;;  %v4819_v60 = vshll.u32 %v4674_v59, 16  ;;  %v5474_v45 = vld [vmem:[#allocation2 + $0x48] sm:$0xe]  ;;  %v4677_v33 = vld [vmem:[#allocation2 + $0x60] sm:$0xf] }
 0x15c   : > { %v4824_v47 = vshrl.u32 %v4675_v8, 16  ;;  %v10813_v14 = vcombine.low %v9267_v55, %v9277_v41  ;;  %v4794_v6 = vsel %vm7970_vm9, %v4789_v22, %v4793_v0  ;;  %v4812_v19 = vrot.slane %v4810_v2, 4  ;;  %v7656_v53 = vld [vmem:[#allocation2 + $0xc0] ss:$8 sps:$4 sm:$0xff]   ;;  %v9493_v0 = vpop.f32.mrf.mxu0 }
 0x15d   : > { %v4815_v62 = vrot.slane %v4813_v52, 5  ;;  %v4803_v50 = vrot.slane %v4802_v17, 4  ;;  %v4821_v18 = vrot.slane %v4819_v60, 5  ;;  %v4827_v63 = vshll.u32 %v4675_v8, 16  ;;  %10815 = vst [vmem:[#allocation6_spill] sm:$0xff] %v9493_v0 }
 0x15e   : > { %7469 = vmatmul.mubr.msk.bf16.gmra.mxu1 %vm1593_vm10, %v10811_v39  ;;  %7507 = vmatmul.mubr.msk.bf16.gmra.mxu0 %vm1593_vm10, %v7654_v5  ;;  %v4826_v9 = vrot.slane %v4824_v47, 4  ;;  %v4833_v41 = vshll.u32 %v4676_v30, 16  ;;  %v6977_v35 = vrot.slane %v5473_v61, 9  ;;  %v5589_v39 = vrot.slane %v4674_v59, 5  ;;  %v4679_v17 = vld [vmem:[#allocation2 + $0x68] sm:$0xf] }
 0x15f   : > { %7472 = vmatprep.mubr.msk.bf16.mxu1 %vm1593_vm10, %v10813_v14  ;;  %7510 = vmatprep.mubr.msk.bf16.mxu0 %vm1593_vm10, %v7655_v20  ;;  %v4816_v55 = vor.u32 %v4815_v62, %v4812_v19  ;;  %v4678_v20 = vld [vmem:[#allocation2 + $0x64] sm:$0x1]  ;;  %v9491_v14 = vpop.f32.mrf.mxu1  ;;  %v4808_v22 = vsel %vm7970_vm9, %v4803_v50, %v4807_v58  ;;  %v4829_v2 = vrot.slane %v4827_v63, 5  ;;  %v6978_v52 = vrot.slane %v5474_v45, 9  ;;  %v7657_v60 = vld [vmem:[#allocation2 + $0xd0] ss:$8 sps:$4 sm:$0xff]  }
 0x160   : > { %10814 = vst [vmem:[#allocation19_spill] sm:$0xff] %v9491_v14  ;;  %v5593_v5 = vrot.slane %v4676_v30, 5  ;;  %v9497_v47 = vcombine.low %v4794_v6, %v4808_v22  ;;  %v4835_v19 = vrot.slane %v4833_v41, 5  ;;  %v9501_v59 = vsel %vm8401_vm13, %v6977_v35, %v5589_v39  ;;  %v4680_v14 = vld [vmem:[#allocation2 + $0x6c] sm:$0x1] }
 0x161   : > { %v4817_v8 = vrot.slane %v4816_v55, 4  ;;  %v4830_v61 = vor.u32 %v4829_v2, %v4826_v9  ;;  %v4838_v58 = vshrl.u32 %v4677_v33, 16  ;;  %v4841_v50 = vshll.u32 %v4677_v33, 16  ;;  %v5475_v45 = vld [vmem:[#allocation2 + $0x60] sm:$0xe]  ;;  %v9518_v9 = vpop.f32.mrf.mxu0 }
 0x162   : > { %v9505_v62 = vsel %vm8401_vm13, %v6978_v52, %v5593_v5  ;;  %v4847_v63 = vshll.u32 %v4678_v20, 16  ;;  %v4852_v55 = vshrl.u32 %v4679_v17, 16  ;;  %v10816_v41 = vcombine.low %v9284_v42, %v9291_v46  ;;  %v9516_v5 = vpop.f32.mrf.mxu1  ;;  %10818 = vst [vmem:[#allocation3_spill] sm:$0xff] %v9518_v9  ;;  %v5476_v22 = vld [vmem:[#allocation2 + $0x68] sm:$0xe] }
 0x163   : > { %v4822_v30 = vsel %vm7970_vm9, %v4817_v8, %v4821_v18  ;;  %10817 = vst [vmem:[#allocation7_spill] sm:$0xff] %v9516_v5  ;;  %v4831_v33 = vrot.slane %v4830_v61, 4  ;;  %v4840_v35 = vrot.slane %v4838_v58, 4  ;;  %v4843_v39 = vrot.slane %v4841_v50, 5  ;;  %v4681_v8 = vld [vmem:[#allocation2 + $0x70] sm:$0xf] }
 0x164   : > { %v4855_v18 = vshll.u32 %v4679_v17, 16  ;;  %v10819_v2 = vcombine.low %v9301_v12, %v9306_v37  ;;  %v4849_v42 = vrot.slane %v4847_v63, 5  ;;  %v4854_v46 = vrot.slane %v4852_v55, 4  ;;  %v4682_v17 = vld [vmem:[#allocation2 + $0x74] sm:$0x1]  ;;  %v9529_v63 = vpop.f32.mrf.mxu1  ;;  %v9531_v55 = vpop.f32.mrf.mxu0 }
 0x165   : > { %v4861_v52 = vshll.u32 %v4680_v14, 16  ;;  %v4844_v61 = vor.u32 %v4843_v39, %v4840_v35  ;;  %v5597_v50 = vrot.slane %v4678_v20, 5  ;;  %v4683_v6 = vld [vmem:[#allocation2 + $0x78] sm:$0xf]  ;;  %v7659_v5 = vld [vmem:[#allocation2 + $0x100] ss:$8 sps:$4 sm:$0xff]  }
 0x166   : > { %7473 = vmatmul.mubr.msk.bf16.gmra.mxu1 %vm1593_vm10, %v10816_v41  ;;  %7511 = vmatmul.mubr.msk.bf16.gmra.mxu0 %vm1593_vm10, %v7656_v53  ;;  %v6979_v53 = vrot.slane %v5475_v45, 9  ;;  %v4836_v41 = vsel %vm7970_vm9, %v4831_v33, %v4835_v19  ;;  %v4857_v58 = vrot.slane %v4855_v18, 5  ;;  %v6980_v37 = vrot.slane %v5476_v22, 9  ;;  %10820 = vst [vmem:[#allocation4_spill] sm:$0xff] %v9529_v63  ;;  %10821 = vst [vmem:[#allocation9_spill] sm:$0xff] %v9531_v55 }
 0x167   : > { %7476 = vmatprep.mubr.msk.bf16.mxu1 %vm1593_vm10, %v10819_v2  ;;  %7514 = vmatprep.mubr.msk.bf16.mxu0 %vm1593_vm10, %v7657_v60  ;;  %v9527_v25 = vcombine.low %v4822_v30, %v4836_v41  ;;  %v4863_v12 = vrot.slane %v4861_v52, 5  ;;  %v5601_v2 = vrot.slane %v4680_v14, 5  ;;  %v7658_v60 = vld [vmem:[#allocation2 + $0xe0] ss:$8 sps:$4 sm:$0xff]   ;;  %v4845_v45 = vrot.slane %v4844_v61, 4 }
 0x168   : > { %v4858_v26 = vor.u32 %v4857_v58, %v4854_v46  ;;  %v9535_v19 = vsel %vm8401_vm13, %v6979_v53, %v5597_v50  ;;  %v4684_v20 = vld [vmem:[#allocation2 + $0x7c] sm:$0x1]  ;;  %v4866_v33 = vshrl.u32 %v4681_v8, 16  ;;  %v4869_v35 = vshll.u32 %v4681_v8, 16  ;;  %v5477_v18 = vld [vmem:[#allocation2 + $0x70] sm:$0xe] }
 0x169   : > { %v9539_v30 = vsel %vm8401_vm13, %v6980_v37, %v5601_v2  ;;  %v4875_v39 = vshll.u32 %v4682_v17, 16  ;;  %v4880_v14 = vshrl.u32 %v4683_v6, 16  ;;  %v4850_v22 = vsel %vm7970_vm9, %v4845_v45, %v4849_v42  ;;  %v5478_v53 = vld [vmem:[#allocation2 + $0x78] sm:$0xe]  ;;  %v4685_v55 = vld [vmem:[#allocation2 + $0x80] sm:$0xf]  ;;  %v9550_v37 = vpop.f32.mrf.mxu1 }
 0x16a   : > { %v4859_v52 = vrot.slane %v4858_v26, 4  ;;  %v4868_v41 = vrot.slane %v4866_v33, 4  ;;  %v4871_v61 = vrot.slane %v4869_v35, 5  ;;  %v4883_v63 = vshll.u32 %v4683_v6, 16  ;;  %10823 = vst [vmem:[#allocation12_spill] sm:$0xff] %v9550_v37  ;;  %v9552_v26 = vpop.f32.mrf.mxu0 }
 0x16b   : > { %v4877_v58 = vrot.slane %v4875_v39, 5  ;;  %v4882_v50 = vrot.slane %v4880_v14, 4  ;;  %v10822_v8 = vcombine.low %v9310_v49, %v9317_v38  ;;  %10824 = vst [vmem:[#allocation13_spill] sm:$0xff] %v9552_v26  ;;  %v4889_v2 = vshll.u32 %v4684_v20, 16  ;;  %v4686_v35 = vld [vmem:[#allocation2 + $0x84] sm:$0x1] }
 0x16c   : > { %v4864_v42 = vsel %vm7970_vm9, %v4859_v52, %v4863_v12  ;;  %v6981_v45 = vrot.slane %v5477_v18, 9  ;;  %v5605_v33 = vrot.slane %v4682_v17, 5  ;;  %v10825_v6 = vcombine.low %v9324_v43, %v9329_v15  ;;  %v4687_v14 = vld [vmem:[#allocation2 + $0x88] sm:$0xf]  ;;  %v4688_v15 = vld [vmem:[#allocation2 + $0x8c] sm:$0x1] }
 0x16d   : > { %v9561_v49 = vcombine.low %v4850_v22, %v4864_v42  ;;  %v4872_v38 = vor.u32 %v4871_v61, %v4868_v41  ;;  %v6982_v39 = vrot.slane %v5478_v53, 9  ;;  %v4891_v46 = vrot.slane %v4889_v2, 5  ;;  %v9569_v22 = vpop.f32.mrf.mxu0  ;;  %v5479_v42 = vld [vmem:[#allocation2 + $0x80] sm:$0xe]  ;;  %v4690_v9 = vld [vmem:[#allocation2 + $0x94] sm:$0x1] }
 0x16e   : > { %7477 = vmatmul.mubr.msk.bf16.gmra.mxu1 %vm1593_vm10, %v10822_v8  ;;  %7515 = vmatmul.mubr.msk.bf16.gmra.mxu0 %vm1593_vm10, %v7658_v60  ;;  %v4885_v60 = vrot.slane %v4883_v63, 5  ;;  %v7660_v8 = vld [vmem:[#allocation2 + $0x110] ss:$8 sps:$4 sm:$0xff]   ;;  %v9565_v12 = vsel %vm8401_vm13, %v6981_v45, %v5605_v33  ;;  %v5609_v17 = vrot.slane %v4684_v20, 5  ;;  %v4894_v18 = vshrl.u32 %v4685_v55, 16  ;;  %10827 = vst [vmem:[#allocation18_spill] sm:$0xff] %v9569_v22 }
 0x16f   : > { %7480 = vmatprep.mubr.msk.bf16.mxu1 %vm1593_vm10, %v10825_v6  ;;  %7518 = vmatprep.mubr.msk.bf16.mxu0 %vm1593_vm10, %v7659_v5  ;;  %v4873_v52 = vrot.slane %v4872_v38, 4  ;;  %v4897_v6 = vshll.u32 %v4685_v55, 16  ;;  %v4903_v37 = vshll.u32 %v4686_v35, 16  ;;  %v9567_v5 = vpop.f32.mrf.mxu1  ;;  %v4908_v53 = vshrl.u32 %v4687_v14, 16  ;;  %v7661_v2 = vld [vmem:[#allocation2 + $0x120] ss:$8 sps:$4 sm:$0xff]  }
 0x170   : > { %v4886_v43 = vor.u32 %v4885_v60, %v4882_v50  ;;  %10826 = vst [vmem:[#allocation16_spill] sm:$0xff] %v9567_v5  ;;  %v9573_v63 = vsel %vm8401_vm13, %v6982_v39, %v5609_v17  ;;  %v4896_v41 = vrot.slane %v4894_v18, 4  ;;  %v4911_v61 = vshll.u32 %v4687_v14, 16  ;;  %v5480_v33 = vld [vmem:[#allocation2 + $0x88] sm:$0xe] }
 0x171   : > { %v4878_v20 = vsel %vm7970_vm9, %v4873_v52, %v4877_v58  ;;  %v4899_v45 = vrot.slane %v4897_v6, 5  ;;  %v4905_v38 = vrot.slane %v4903_v37, 5  ;;  %v4910_v60 = vrot.slane %v4908_v53, 4  ;;  %v4689_v39 = vld [vmem:[#allocation2 + $0x90] sm:$0xf]  ;;  %v9585_v52 = vpop.f32.mrf.mxu1  ;;  %v9588_v37 = vpop.f32.mrf.mxu0 }
 0x172   : > { %v4887_v50 = vrot.slane %v4886_v43, 4  ;;  %v4913_v5 = vrot.slane %v4911_v61, 5  ;;  %v4917_v22 = vshll.u32 %v4688_v15, 16  ;;  %v6983_v18 = vrot.slane %v5479_v42, 9  ;;  %v4691_v0 = vld [vmem:[#allocation2 + $0x98] sm:$0xf] }
 0x173   : > { %v4900_v14 = vor.u32 %v4899_v45, %v4896_v41  ;;  %v5613_v26 = vrot.slane %v4686_v35, 5  ;;  %v10828_v58 = vcombine.low %v9336_v24, %v9341_v34  ;;  %10829 = vst [vmem:[#allocation8_spill] sm:$0xff] %v9585_v52  ;;  %v6984_v41 = vrot.slane %v5480_v33, 9  ;;  %v4692_v42 = vld [vmem:[#allocation2 + $0x9c] sm:$0x1] }
 0x174   : > { %v4892_v17 = vsel %vm7970_vm9, %v4887_v50, %v4891_v46  ;;  %v4914_v6 = vor.u32 %v4913_v5, %v4910_v60  ;;  %v4919_v46 = vrot.slane %v4917_v22, 5  ;;  %v10830_v35 = vcombine.low %v9351_v32, %v9361_v13  ;;  %v5481_v45 = vld [vmem:[#allocation2 + $0x90] sm:$0xe]  ;;  %v5482_v33 = vld [vmem:[#allocation2 + $0x98] sm:$0xe] }
 0x175   : > { %v9590_v43 = vcombine.low %v4878_v20, %v4892_v17  ;;  %v4901_v24 = vrot.slane %v4900_v14, 4  ;;  %v9599_v34 = vsel %vm8401_vm13, %v6983_v18, %v5613_v26  ;;  %v4922_v53 = vshrl.u32 %v4689_v39, 16  ;;  %v9607_v26 = vpop.f32.mrf.mxu1  ;;  %v7662_v60 = vld [vmem:[#allocation2 + $0x130] ss:$8 sps:$4 sm:$0xff]  }
 0x176   : > { %7481 = vmatmul.mubr.msk.bf16.gmra.mxu1 %vm1593_vm10, %v10828_v58  ;;  %7519 = vmatmul.mubr.msk.bf16.gmra.mxu0 %vm1593_vm10, %v7660_v8  ;;  %v5617_v8 = vrot.slane %v4688_v15, 5  ;;  %v4915_v61 = vrot.slane %v4914_v6, 4  ;;  %v4925_v20 = vshll.u32 %v4689_v39, 16  ;;  %v4931_v5 = vshll.u32 %v4690_v9, 16  ;;  %10831 = vst [vmem:[#allocation10_spill] sm:$0xff] %v9607_v26  ;;  %v9609_v15 = vpop.f32.mrf.mxu0 }
 0x177   : > { %7484 = vmatprep.mubr.msk.bf16.mxu1 %vm1593_vm10, %v10830_v35  ;;  %7522 = vmatprep.mubr.msk.bf16.mxu0 %vm1593_vm10, %v7661_v2  ;;  %v4936_v22 = vshrl.u32 %v4691_v0, 16  ;;  %v4906_v50 = vsel %vm7970_vm9, %v4901_v24, %v4905_v38  ;;  %v4924_v13 = vrot.slane %v4922_v53, 4  ;;  %v4939_v2 = vshll.u32 %v4691_v0, 16  ;;  %10832 = vst [vmem:[#allocation11_spill] sm:$0xff] %v9609_v15  ;;  %v4693_v18 = vld [vmem:[#allocation2 + $0xb0] sm:$0xf] }
 0x178   : > { %v9605_v32 = vsel %vm8401_vm13, %v6984_v41, %v5617_v8  ;;  %v4920_v39 = vsel %vm7970_vm9, %v4915_v61, %v4919_v46  ;;  %v4927_v38 = vrot.slane %v4925_v20, 5  ;;  %v4933_v14 = vrot.slane %v4931_v5, 5  ;;  %v4694_v35 = vld [vmem:[#allocation2 + $0xb4] sm:$0x1]  ;;  %v4695_v26 = vld [vmem:[#allocation2 + $0xb8] sm:$0xf]  ;;  %v9621_v5 = vpop.f32.mrf.mxu1 }
 0x179   : > { %v9615_v58 = vcombine.low %v4906_v50, %v4920_v39  ;;  %v4938_v6 = vrot.slane %v4936_v22, 4  ;;  %v4941_v0 = vrot.slane %v4939_v2, 5  ;;  %v4945_v41 = vshll.u32 %v4692_v42, 16  ;;  %v9623_v22 = vpop.f32.mrf.mxu0 }
 0x17a   : > { %v4928_v24 = vor.u32 %v4927_v38, %v4924_v13  ;;  %v6985_v8 = vrot.slane %v5481_v45, 9  ;;  %v5621_v53 = vrot.slane %v4690_v9, 5  ;;  %v6986_v55 = vrot.slane %v5482_v33, 9  ;;  %v4696_v13 = vld [vmem:[#allocation2 + $0xbc] sm:$0x1] }
 0x17b   : > { %v4942_v52 = vor.u32 %v4941_v0, %v4938_v6  ;;  %v4947_v15 = vrot.slane %v4945_v41, 5  ;;  %v5625_v46 = vrot.slane %v4692_v42, 5  ;;  %v4950_v61 = vshrl.u32 %v4693_v18, 16  ;;  %v5483_v38 = vld [vmem:[#allocation2 + $0xb0] sm:$0xe] }
 0x17c   : > { %v10833_v20 = vcombine.low %v9365_v29, %v9373_v36  ;;  %v4929_v50 = vrot.slane %v4928_v24, 4  ;;  %v9628_v9 = vsel %vm8401_vm13, %v6985_v8, %v5621_v53  ;;  %v4953_v2 = vshll.u32 %v4693_v18, 16  ;;  %v9642_v18 = vpop.f32.mrf.mxu0  ;;  %v4697_v24 = vld [vmem:[#allocation2 + $0xc0] sm:$0xf]  ;;  %v9650_v8 = vpop.f32.mrf.mxu1 }
 0x17d   : > { %v4959_v42 = vshll.u32 %v4694_v35, 16  ;;  %v10834_v45 = vcombine.low %v9380_v57, %v9385_v28  ;;  %v10835_v29 = vcombine.low %v9415_v23, %v9419_v56  ;;  %v4943_v36 = vrot.slane %v4942_v52, 4  ;;  %v5484_v56 = vld [vmem:[#allocation2 + $0xb8] sm:$0xe] }
 0x17e   : > { %7485 = vmatmul.mubr.msk.bf16.gmra.mxu1 %vm1593_vm10, %v10833_v20  ;;  %7523 = vmatmul.mubr.msk.bf16.gmra.mxu0 %vm1593_vm10, %v7662_v60  ;;  %v9640_v33 = vsel %vm8401_vm13, %v6986_v55, %v5625_v46  ;;  %v4952_v60 = vrot.slane %v4950_v61, 4  ;;  %v4964_v39 = vshrl.u32 %v4695_v26, 16  ;;  %v4934_v57 = vsel %vm7970_vm9, %v4929_v50, %v4933_v14  ;;  %v9652_v53 = vpop.f32.mrf.mxu0  ;;  %v4698_v50 = vld [vmem:[#allocation2 + $0xc4] sm:$0x1] }
 0x17f   : > { %7488 = vmatprep.mubr.msk.bf16.mxu1 %vm1593_vm10, %v10834_v45  ;;  %7562 = vmatprep.mubr.msk.bf16.mxu0 %vm1593_vm10, %v10835_v29  ;;  %v4955_v6 = vrot.slane %v4953_v2, 5  ;;  %v4961_v23 = vrot.slane %v4959_v42, 5  ;;  %v4948_v52 = vsel %vm7970_vm9, %v4943_v36, %v4947_v15  ;;  %v4967_v55 = vshll.u32 %v4695_v26, 16  ;;  %v4699_v2 = vld [vmem:[#allocation2 + $0xc8] sm:$0xf] }
 0x180   : > { %v4966_v0 = vrot.slane %v4964_v39, 4  ;;  %v4973_v41 = vshll.u32 %v4696_v13, 16  ;;  %v9654_v46 = vcombine.low %v4934_v57, %v4948_v52  ;;  %v6987_v61 = vrot.slane %v5483_v38, 9  ;;  %v9656_v15 = vpop.f32.mrf.mxu0  ;;  %v5485_v52 = vld [vmem:[#allocation2 + $0xc0] sm:$0xe] }
 0x181   : > { %v4956_v14 = vor.u32 %v4955_v6, %v4952_v60  ;;  %v5629_v20 = vrot.slane %v4694_v35, 5  ;;  %v4969_v42 = vrot.slane %v4967_v55, 5  ;;  %v6988_v29 = vrot.slane %v5484_v56, 9  ;;  %v4700_v35 = vld [vmem:[#allocation2 + $0xcc] sm:$0x1]  ;;  %v9666_v56 = vpop.f32.mrf.mxu1 }
 0x182   : > { %v4975_v45 = vrot.slane %v4973_v41, 5  ;;  %v5633_v28 = vrot.slane %v4696_v13, 5  ;;  %v4978_v39 = vshrl.u32 %v4697_v24, 16  ;;  %v4981_v17 = vshll.u32 %v4697_v24, 16  ;;  %v9672_v55 = vpop.f32.mrf.mxu0 }
 0x183   : > { %v4957_v26 = vrot.slane %v4956_v14, 4  ;;  %v9660_v36 = vsel %vm8401_vm13, %v6987_v61, %v5629_v20  ;;  %v4970_v57 = vor.u32 %v4969_v42, %v4966_v0  ;;  %v4987_v38 = vshll.u32 %v4698_v50, 16  ;;  %v5486_v61 = vld [vmem:[#allocation2 + $0xc8] sm:$0xe]  ;;  %v4701_v42 = vld [vmem:[#allocation2 + $0xd0] sm:$0xf] }
 0x184   : > { %v9664_v60 = vsel %vm8401_vm13, %v6988_v29, %v5633_v28  ;;  %v4992_v6 = vshrl.u32 %v4699_v2, 16  ;;  %v10836_v13 = vcombine.low %v9392_v54, %v9396_v27  ;;  %v10837_v0 = vcombine.low %v9447_v11, %v9453_v44  ;;  %v9690_v29 = vpop.f32.mrf.mxu0 }
 0x185   : > { %v4962_v28 = vsel %vm7970_vm9, %v4957_v26, %v4961_v23  ;;  %v4980_v24 = vrot.slane %v4978_v39, 4  ;;  %v4983_v14 = vrot.slane %v4981_v17, 5  ;;  %v10838_v54 = vcombine.low %v9467_v4, %v9480_v7  ;;  %v9688_v23 = vpop.f32.mrf.mxu1 }
 0x186   : > { %7489 = vmatmul.mubr.msk.bf16.gmra.mxu1 %vm1593_vm10, %v10836_v13  ;;  %7563 = vmatmul.mubr.msk.bf16.vlgmr.msra.gmra.mxu0 %vm1593_vm10, %v10837_v0  ;;  %v4971_v27 = vrot.slane %v4970_v57, 4  ;;  %v4989_v11 = vrot.slane %v4987_v38, 5  ;;  %v4994_v44 = vrot.slane %v4992_v6, 4  ;;  %v4995_v20 = vshll.u32 %v4699_v2, 16  ;;  %10839 = vst [vmem:[#allocation14_spill] sm:$0xff] %v9688_v23  ;;  %v9696_v2 = vpop.f32.mrf.mxu0 }
 0x187   : > { %7528 = vmatprep.mubr.msk.bf16.mxu1 %vm1593_vm10, %v9429_v48  ;;  %7566 = vmatprep.mubr.msk.bf16.mxu0 %vm1593_vm10, %v10838_v54  ;;  %v4984_v26 = vor.u32 %v4983_v14, %v4980_v24  ;;  %v5001_v17 = vshll.u32 %v4700_v35, 16  ;;  %v6989_v39 = vrot.slane %v5485_v52, 9  ;;  %v5637_v13 = vrot.slane %v4698_v50, 5  ;;  %v4702_v0 = vld [vmem:[#allocation2 + $0xd4] sm:$0x1]  ;;  %v9694_v38 = vpop.f32.mrf.mxu1 }
 0x188   : > { %v4976_v48 = vsel %vm7970_vm9, %v4971_v27, %v4975_v45  ;;  %v4997_v4 = vrot.slane %v4995_v20, 5  ;;  %v6990_v7 = vrot.slane %v5486_v61, 9  ;;  %v5641_v54 = vrot.slane %v4700_v35, 5  ;;  %v4703_v57 = vld [vmem:[#allocation2 + $0xd8] sm:$0xf]  ;;  %10840 = vst [vmem:[#allocation20_spill] sm:$0xff] %v9694_v38  ;;  %v9710_v20 = vpop.f32.mrf.mxu0 }
 0x189   : > { %v9698_v6 = vcombine.low %v4962_v28, %v4976_v48  ;;  %v4985_v41 = vrot.slane %v4984_v26, 4  ;;  %v5003_v23 = vrot.slane %v5001_v17, 5  ;;  %v9702_v52 = vsel %vm8401_vm13, %v6989_v39, %v5637_v13  ;;  %v4704_v24 = vld [vmem:[#allocation2 + $0xdc] sm:$0x1]  ;;  %v5487_v61 = vld [vmem:[#allocation2 + $0xd0] sm:$0xe]  ;;  %v9708_v27 = vpop.f32.mrf.mxu1 }
 0x18a   : > { %v4998_v50 = vor.u32 %v4997_v4, %v4994_v44  ;;  %v9706_v45 = vsel %vm8401_vm13, %v6990_v7, %v5641_v54  ;;  %v5006_v35 = vshrl.u32 %v4701_v42, 16  ;;  %v5009_v14 = vshll.u32 %v4701_v42, 16  ;;  %10841 = vst [vmem:[#allocation21_spill] sm:$0xff] %v9708_v27  ;;  %v5488_v7 = vld [vmem:[#allocation2 + $0xd8] sm:$0xe]  ;;  %v9718_v42 = vpop.f32.mrf.mxu0 }
 0x18b   : > { %v4990_v28 = vsel %vm7970_vm9, %v4985_v41, %v4989_v11  ;;  %v5015_v17 = vshll.u32 %v4702_v0, 16  ;;  %v5020_v44 = vshrl.u32 %v4703_v57, 16  ;;  %v5023_v4 = vshll.u32 %v4703_v57, 16  ;;  %v7326_v54 = vpop.f32.mrf.mxu1 }
 0x18c   : > { %v4999_v39 = vrot.slane %v4998_v50, 4  ;;  %v5008_v13 = vrot.slane %v5006_v35, 4  ;;  %v5011_v48 = vrot.slane %v5009_v14, 5  ;;  %v10842_v27 = vcombine.low %v9501_v59, %v9505_v62  ;;  %v4705_v35 = vld [vmem:[#allocation2 + $0xe0] sm:$0xf] }
 0x18d   : > { %v5017_v41 = vrot.slane %v5015_v17, 5  ;;  %v5022_v11 = vrot.slane %v5020_v44, 4  ;;  %v5029_v26 = vshll.u32 %v4704_v24, 16  ;;  %v6991_v38 = vrot.slane %v5487_v61, 9  ;;  %v1972_v14 = vpop.f32.mrf.mxu1 }
 0x18e   : > { %7529 = vmatmul.mubr.msk.bf16.vlgmr.msra.gmra.mxu1 %vm1593_vm10, %v9463_v10  ;;  %7567 = vmatmul.mubr.msk.bf16.gmra.mxu0 %vm1593_vm10, %v10842_v27  ;;  %v1981_v50 = vadd.f32 %v7326_v54, %v9405_v40  ;;  %v10843_v57 = vcombine.low %v9535_v19, %v9539_v30  ;;  %v5004_v10 = vsel %vm7970_vm9, %v4999_v39, %v5003_v23  ;;  %v5025_v62 = vrot.slane %v5023_v4, 5  ;;  %v9733_v27 = vpop.f32.mrf.mxu0 }
 0x18f   : > { %7532 = vmatprep.mubr.msk.bf16.mxu1 %vm1593_vm10, %v9497_v47  ;;  %v5012_v59 = vor.u32 %v5011_v48, %v5008_v13  ;;  %v9735_v61 = vcombine.low %v4990_v28, %v5004_v10  ;;  %v5031_v40 = vrot.slane %v5029_v26, 5  ;;  %v5645_v17 = vrot.slane %v4702_v0, 5  ;;  %v7327_v23 = vpop.f32.mrf.mxu1 }
 0x190   : > { %7570 = vmatprep.mubr.msk.bf16.mxu0 %vm1593_vm10, %v10843_v57  ;;  %v6992_v44 = vrot.slane %v5488_v7, 9  ;;  %v9738_v47 = vadd.f32 %v9672_v55, %v1981_v50  ;;  %v1973_v19 = vadd.f32 %v1972_v14, %v9421_v1  ;;  %v5026_v54 = vor.u32 %v5025_v62, %v5022_v11  ;;  %v4706_v57 = vld [vmem:[#allocation2 + $0xe4] sm:$0x1]  ;;  %v9741_v39 = vpop.f32.mrf.mxu0  ;;  %v4707_v7 = vld [vmem:[#allocation2 + $0xe8] sm:$0xf] }
 0x191   : > { %v5013_v30 = vrot.slane %v5012_v59, 4  ;;  %v9745_v13 = vsel %vm8401_vm13, %v6991_v38, %v5645_v17  ;;  %v5649_v28 = vrot.slane %v4704_v24, 5  ;;  %v5034_v48 = vshrl.u32 %v4705_v35, 16  ;;  %v1975_v11 = vpop.f32.mrf.mxu1  ;;  %v4708_v24 = vld [vmem:[#allocation2 + $0xec] sm:$0x1] }
 0x192   : > { %v5037_v26 = vshll.u32 %v4705_v35, 16  ;;  %v9748_v0 = vadd.f32 %v9690_v29, %v1973_v19  ;;  %v1984_v55 = vadd.f32 %v7327_v23, %v9438_v16  ;;  %v5027_v4 = vrot.slane %v5026_v54, 4  ;;  %v9753_v50 = vpop.f32.mrf.mxu0  ;;  %v5489_v14 = vld [vmem:[#allocation2 + $0xe0] sm:$0xe] }
 0x193   : > { %v5018_v1 = vsel %vm7970_vm9, %v5013_v30, %v5017_v41  ;;  %v9757_v38 = vsel %vm8401_vm13, %v6992_v44, %v5649_v28  ;;  %v5036_v10 = vrot.slane %v5034_v48, 4  ;;  %v5043_v62 = vshll.u32 %v4706_v57, 16  ;;  %v7330_v17 = vpop.f32.mrf.mxu1  ;;  %v5490_v28 = vld [vmem:[#allocation2 + $0xe8] sm:$0xe] }
 0x194   : > { %v5039_v59 = vrot.slane %v5037_v26, 5  ;;  %v9760_v29 = vadd.f32 %v9696_v2, %v1984_v55  ;;  %v1976_v16 = vadd.f32 %v1975_v11, %v9459_v31  ;;  %v5032_v41 = vsel %vm7970_vm9, %v5027_v4, %v5031_v40  ;;  %v9769_v44 = vpop.f32.mrf.mxu0  ;;  %v4709_v11 = vld [vmem:[#allocation2 + $0x100] sm:$0xf] }
 0x195   : > { %v7014_v35 = vcombine.low %v9745_v13, %v9757_v38  ;;  %v10844_v19 = vcombine.low %v9565_v12, %v9573_v63  ;;  %v9775_v2 = vcombine.low %v5018_v1, %v5032_v41  ;;  %v5045_v30 = vrot.slane %v5043_v62, 5  ;;  %v1988_v48 = vpop.f32.mrf.mxu1  ;;  %v4711_v62 = vld [vmem:[#allocation2 + $0x108] sm:$0xf] }
 0x196   : > { %7533 = vmatmul.mubr.msk.bf16.gmra.mxu1 %vm1593_vm10, %v9527_v25  ;;  %v5040_v31 = vor.u32 %v5039_v59, %v5036_v10  ;;  %v5048_v40 = vshrl.u32 %v4707_v7, 16  ;;  %v9778_v54 = vadd.f32 %v9710_v20, %v1976_v16  ;;  %v1997_v23 = vadd.f32 %v7330_v17, %v9476_v21  ;;  %v9787_v26 = vpop.f32.mrf.mxu0 }
 0x197   : > { %7571 = vmatmul.mubr.msk.bf16.gmra.mxu0 %vm1593_vm10, %v10844_v19  ;;  %7536 = vmatprep.mubr.msk.bf16.mxu1 %vm1593_vm10, %v9561_v49  ;;  %v10845_v25 = vcombine.low %v9599_v34, %v9605_v32  ;;  %v5051_v12 = vshll.u32 %v4707_v7, 16  ;;  %v5057_v63 = vshll.u32 %v4708_v24, 16  ;;  %v6993_v20 = vrot.slane %v5489_v14, 9  ;;  %v10846_v49 = vld [vmem:[#allocation6_spill] sm:$0xff]  ;;  %v4710_v32 = vld [vmem:[#allocation2 + $0x104] sm:$0x1]  ;;  %v7331_v7 = vpop.f32.mrf.mxu1 }
 0x198   : > { %v5041_v55 = vrot.slane %v5040_v31, 4  ;;  %v5050_v1 = vrot.slane %v5048_v40, 4  ;;  %v5653_v4 = vrot.slane %v4706_v57, 5  ;;  %v9790_v21 = vadd.f32 %v9718_v42, %v1997_v23  ;;  %v9793_v16 = vpop.f32.mrf.mxu0  ;;  %v10847_v19 = vld [vmem:[#allocation3_spill] sm:$0xff] }
 0x199   : > { %7574 = vmatprep.mubr.msk.bf16.mxu0 %vm1593_vm10, %v10845_v25  ;;  %v1989_v10 = vadd.f32 %v1988_v48, %v10846_v49  ;;  %v5053_v59 = vrot.slane %v5051_v12, 5  ;;  %v5059_v34 = vrot.slane %v5057_v63, 5  ;;  %v6994_v57 = vrot.slane %v5490_v28, 9  ;;  %v1991_v25 = vpop.f32.mrf.mxu1  ;;  %v5491_v49 = vld [vmem:[#allocation2 + $0x100] sm:$0xe] }
 0x19a   : > { %v5046_v41 = vsel %vm7970_vm9, %v5041_v55, %v5045_v30  ;;  %v9799_v14 = vsel %vm8401_vm13, %v6993_v20, %v5653_v4  ;;  %v5657_v17 = vrot.slane %v4708_v24, 5  ;;  %v2000_v31 = vadd.f32 %v7331_v7, %v10847_v19  ;;  %v9805_v12 = vpop.f32.mrf.mxu0  ;;  %v10848_v24 = vld [vmem:[#allocation9_spill] sm:$0xff]  ;;  %v4712_v4 = vld [vmem:[#allocation2 + $0x10c] sm:$0x1] }
 0x19b   : > { %v9802_v42 = vadd.f32 %v9733_v27, %v1989_v10  ;;  %v5054_v40 = vor.u32 %v5053_v59, %v5050_v1  ;;  %v5062_v23 = vshrl.u32 %v4709_v11, 16  ;;  %v5065_v30 = vshll.u32 %v4709_v11, 16  ;;  %v7334_v10 = vpop.f32.mrf.mxu1 }
 0x19c   : > { %v9809_v63 = vsel %vm8401_vm13, %v6994_v57, %v5657_v17  ;;  %v5071_v48 = vshll.u32 %v4710_v32, 16  ;;  %v5076_v55 = vshrl.u32 %v4711_v62, 16  ;;  %v9812_v28 = vadd.f32 %v9741_v39, %v2000_v31  ;;  %v9819_v59 = vpop.f32.mrf.mxu0  ;;  %v10850_v31 = vld [vmem:[#allocation13_spill] sm:$0xff] }
 0x19d   : > { %v1992_v27 = vadd.f32 %v1991_v25, %v10848_v24  ;;  %v5055_v20 = vrot.slane %v5054_v40, 4  ;;  %v10849_v11 = vcombine.low %v9628_v9, %v9640_v33  ;;  %v5064_v39 = vrot.slane %v5062_v23, 4  ;;  %v5492_v23 = vld [vmem:[#allocation2 + $0x108] sm:$0xe]  ;;  %v2004_v25 = vpop.f32.mrf.mxu1 }
 0x19e   : > { %7537 = vmatmul.mubr.msk.bf16.gmra.mxu1 %vm1593_vm10, %v9590_v43  ;;  %v5067_v7 = vrot.slane %v5065_v30, 5  ;;  %v5073_v57 = vrot.slane %v5071_v48, 5  ;;  %v5078_v17 = vrot.slane %v5076_v55, 4  ;;  %v2013_v40 = vadd.f32 %v7334_v10, %v10850_v31  ;;  %v9837_v30 = vpop.f32.mrf.mxu0 }
 0x19f   : > { %7575 = vmatmul.mubr.msk.bf16.gmra.mxu0 %vm1593_vm10, %v10849_v11  ;;  %v9826_v19 = vadd.f32 %v9753_v50, %v1992_v27  ;;  %7540 = vmatprep.mubr.msk.bf16.mxu1 %vm1593_vm10, %v9615_v58  ;;  %v10851_v43 = vcombine.low %v9660_v36, %v9664_v60  ;;  %v5060_v9 = vsel %vm7970_vm9, %v5055_v20, %v5059_v34  ;;  %v5079_v33 = vshll.u32 %v4711_v62, 16  ;;  %v10852_v27 = vld [vmem:[#allocation18_spill] sm:$0xff]  ;;  %v4713_v11 = vld [vmem:[#allocation2 + $0x110] sm:$0xf]  ;;  %v7335_v31 = vpop.f32.mrf.mxu1 }
 0x1a0   : > { %v9839_v50 = vcombine.low %v5046_v41, %v5060_v9  ;;  %v5068_v48 = vor.u32 %v5067_v7, %v5064_v39  ;;  %v5085_v55 = vshll.u32 %v4712_v4, 16  ;;  %v6995_v24 = vrot.slane %v5491_v49, 9  ;;  %v9845_v34 = vpop.f32.mrf.mxu0  ;;  %v4714_v7 = vld [vmem:[#allocation2 + $0x114] sm:$0x1] }
 0x1a1   : > { %7578 = vmatprep.mubr.msk.bf16.mxu0 %vm1593_vm10, %v10851_v43  ;;  %v9842_v58 = vadd.f32 %v9769_v44, %v2013_v40  ;;  %v2005_v36 = vadd.f32 %v2004_v25, %v10852_v27  ;;  %v5081_v60 = vrot.slane %v5079_v33, 5  ;;  %v5661_v10 = vrot.slane %v4710_v32, 5  ;;  %v4715_v32 = vld [vmem:[#allocation2 + $0x118] sm:$0xf]  ;;  %v2007_v40 = vpop.f32.mrf.mxu1  ;;  %v4716_v27 = vld [vmem:[#allocation2 + $0x11c] sm:$0x1] }
 0x1a2   : > { %v5069_v62 = vrot.slane %v5068_v48, 4  ;;  %v5087_v20 = vrot.slane %v5085_v55, 5  ;;  %v6996_v43 = vrot.slane %v5492_v23, 9  ;;  %v5665_v1 = vrot.slane %v4712_v4, 5  ;;  %v9855_v9 = vpop.f32.mrf.mxu0 }
 0x1a3   : > { %v9848_v41 = vadd.f32 %v9787_v26, %v2005_v36  ;;  %v2016_v49 = vadd.f32 %v7335_v31, %v9588_v37  ;;  %v5082_v39 = vor.u32 %v5081_v60, %v5078_v17  ;;  %v9853_v44 = vsel %vm8401_vm13, %v6995_v24, %v5661_v10  ;;  %v10853_v17 = vld [vmem:[#allocation11_spill] sm:$0xff]  ;;  %v7338_v24 = vpop.f32.mrf.mxu1 }
 0x1a4   : > { %v5074_v33 = vsel %vm7970_vm9, %v5069_v62, %v5073_v57  ;;  %v9861_v4 = vsel %vm8401_vm13, %v6996_v43, %v5665_v1  ;;  %v5090_v26 = vshrl.u32 %v4713_v11, 16  ;;  %v5093_v23 = vshll.u32 %v4713_v11, 16  ;;  %v9871_v57 = vpop.f32.mrf.mxu0  ;;  %v5494_v62 = vld [vmem:[#allocation2 + $0x118] sm:$0xe] }
 0x1a5   : > { %v9864_v37 = vadd.f32 %v9793_v16, %v2016_v49  ;;  %v2008_v25 = vadd.f32 %v2007_v40, %v10853_v17  ;;  %v5083_v48 = vrot.slane %v5082_v39, 4  ;;  %v7016_v55 = vcombine.low %v9853_v44, %v9861_v4  ;;  %v2020_v43 = vpop.f32.mrf.mxu1  ;;  %v10857_v44 = vld [vmem:[#allocation5_spill] sm:$0xff] }
 0x1a6   : > { %7541 = vmatmul.mubr.msk.bf16.gmra.mxu1 %vm1593_vm10, %v9654_v46  ;;  %v10854_v1 = vcombine.low %v9702_v52, %v9706_v45  ;;  %v5092_v16 = vrot.slane %v5090_v26, 4  ;;  %v5095_v36 = vrot.slane %v5093_v23, 5  ;;  %v5099_v60 = vshll.u32 %v4714_v7, 16  ;;  %v5493_v45 = vld [vmem:[#allocation2 + $0x110] sm:$0xe]  ;;  %v9889_v49 = vpop.f32.mrf.mxu0 }
 0x1a7   : > { %v5104_v10 = vshrl.u32 %v4715_v32, 16  ;;  %v9878_v11 = vadd.f32 %v9805_v12, %v2008_v25  ;;  %v2029_v31 = vadd.f32 %v7338_v24, %v9623_v22  ;;  %7544 = vmatprep.mubr.msk.bf16.mxu1 %vm1593_vm10, %v9698_v6  ;;  %v5088_v46 = vsel %vm7970_vm9, %v5083_v48, %v5087_v20  ;;  %v4717_v26 = vld [vmem:[#allocation2 + $0x120] sm:$0xf]  ;;  %v7339_v20 = vpop.f32.mrf.mxu1 }
 0x1a8   : > { %7579 = vmatmul.mubr.msk.bf16.gmra.mxu0 %vm1593_vm10, %v10854_v1  ;;  %v5107_v52 = vshll.u32 %v4715_v32, 16  ;;  %v9891_v12 = vcombine.low %v5074_v33, %v5088_v46  ;;  %v5096_v22 = vor.u32 %v5095_v36, %v5092_v16  ;;  %v5101_v39 = vrot.slane %v5099_v60, 5  ;;  %v9897_v32 = vpop.f32.mrf.mxu0  ;;  %v4718_v16 = vld [vmem:[#allocation2 + $0x124] sm:$0x1]  ;;  %v4719_v36 = vld [vmem:[#allocation2 + $0x128] sm:$0xf] }
 0x1a9   : > { %7582 = vmatprep.mubr.msk.bf16.mxu0 %vm1593_vm10, %v7014_v35  ;;  %v5106_v40 = vrot.slane %v5104_v10, 4  ;;  %v9894_v6 = vadd.f32 %v9819_v59, %v2029_v31  ;;  %v2021_v13 = vadd.f32 %v2020_v43, %v9642_v18  ;;  %v5113_v35 = vshll.u32 %v4716_v27, 16  ;;  %v2023_v18 = vpop.f32.mrf.mxu1 }
 0x1aa   : > { %v5109_v38 = vrot.slane %v5107_v52, 5  ;;  %v5097_v23 = vrot.slane %v5096_v22, 4  ;;  %v6997_v17 = vrot.slane %v5493_v45, 9  ;;  %v5669_v25 = vrot.slane %v4714_v7, 5  ;;  %v9903_v60 = vpop.f32.mrf.mxu0 }
 0x1ab   : > { %v6998_v48 = vrot.slane %v5494_v62, 9  ;;  %v9900_v33 = vadd.f32 %v9837_v30, %v2021_v13  ;;  %v2032_v24 = vadd.f32 %v7339_v20, %v9652_v53  ;;  %v5115_v59 = vrot.slane %v5113_v35, 5 }
 0x1ac   : > { %v5110_v1 = vor.u32 %v5109_v38, %v5106_v40  ;;  %v5102_v10 = vsel %vm7970_vm9, %v5097_v23, %v5101_v39  ;;  %v5670_v31 = vsel %vm8401_vm13, %v6997_v17, %v5669_v25  ;;  %v5673_v7 = vrot.slane %v4716_v27, 5  ;;  %v7342_v62 = vpop.f32.mrf.mxu1  ;;  %v9915_v43 = vpop.f32.mrf.mxu0  ;;  %v10856_v38 = vld [vmem:[#allocation15_spill] sm:$0xff] }
 0x1ad   : > { %v5118_v46 = vshrl.u32 %v4717_v26, 16  ;;  %v9910_v30 = vadd.f32 %v9845_v34, %v2032_v24  ;;  %v2024_v53 = vadd.f32 %v2023_v18, %v9656_v15  ;;  %v5121_v45 = vshll.u32 %v4717_v26, 16  ;;  %v4720_v34 = vld [vmem:[#allocation2 + $0x12c] sm:$0x1]  ;;  %v5496_v26 = vld [vmem:[#allocation2 + $0x128] sm:$0xe] }
 0x1ae   : > { %v5111_v52 = vrot.slane %v5110_v1, 4  ;;  %7545 = vmatmul.mubr.msk.bf16.gmra.mxu1 %vm1593_vm10, %v9735_v61  ;;  %v10855_v22 = vcombine.low %v9799_v14, %v9809_v63  ;;  %v5674_v27 = vsel %vm8401_vm13, %v6998_v48, %v5673_v7  ;;  %v5127_v40 = vshll.u32 %v4718_v16, 16  ;;  %v5495_v63 = vld [vmem:[#allocation2 + $0x120] sm:$0xe]  ;;  %v2036_v20 = vpop.f32.mrf.mxu1  ;;  %v9935_v23 = vpop.f32.mrf.mxu0  ;;  %v4721_v1 = vld [vmem:[#allocation2 + $0x130] sm:$0xf] }
 0x1af   : > { %v5120_v39 = vrot.slane %v5118_v46, 4  ;;  %v5132_v15 = vshrl.u32 %v4719_v36, 16  ;;  %v9924_v13 = vadd.f32 %v9855_v9, %v2024_v53  ;;  %v2045_v35 = vadd.f32 %v7342_v62, %v10856_v38  ;;  %7548 = vmatprep.mubr.msk.bf16.mxu1 %vm1593_vm10, %v9775_v2 }
 0x1b0   : > { %7583 = vmatmul.mubr.msk.bf16.gmra.mxu0 %vm1593_vm10, %v10855_v22  ;;  %v5116_v61 = vsel %vm7970_vm9, %v5111_v52, %v5115_v59  ;;  %v5123_v14 = vrot.slane %v5121_v45, 5  ;;  %v7017_v17 = vcombine.low %v5670_v31, %v5674_v27  ;;  %v5129_v25 = vrot.slane %v5127_v40, 5  ;;  %v7343_v59 = vpop.f32.mrf.mxu1  ;;  %v9943_v18 = vpop.f32.mrf.mxu0  ;;  %v10858_v31 = vld [vmem:[#allocation17_spill] sm:$0xff] }
 0x1b1   : > { %7586 = vmatprep.mubr.msk.bf16.mxu0 %vm1593_vm10, %v7016_v55  ;;  %v9937_v9 = vcombine.low %v5102_v10, %v5116_v61  ;;  %v5134_v48 = vrot.slane %v5132_v15, 4  ;;  %v9940_v2 = vadd.f32 %v9871_v57, %v2045_v35  ;;  %v2037_v4 = vadd.f32 %v2036_v20, %v10857_v44  ;;  %v9949_v22 = vld [vmem:[#allocation2 + $0x134] sm:$0x1]  ;;  %v10859_v35 = vld [vmem:[#allocation19_spill] sm:$0xff]  ;;  %v4724_v44 = vld [vmem:[#allocation2 + $0x13c] sm:$0x1] }
 0x1b2   : > { %v5124_v55 = vor.u32 %v5123_v14, %v5120_v39  ;;  %v5135_v24 = vshll.u32 %v4719_v36, 16  ;;  %v5141_v7 = vshll.u32 %v4720_v34, 16  ;;  %v6999_v46 = vrot.slane %v5495_v63, 9  ;;  %v2039_v27 = vpop.f32.mrf.mxu1  ;;  %v2544_v39 = vpop.f32.mrf.mxu0  ;;  %v4723_v63 = vld [vmem:[#allocation2 + $0x138] sm:$0xf] }
 0x1b3   : > { %v5677_v53 = vrot.slane %v4718_v16, 5  ;;  %v7000_v52 = vrot.slane %v5496_v26, 9  ;;  %v9946_v10 = vadd.f32 %v9889_v49, %v2037_v4  ;;  %v2048_v45 = vadd.f32 %v7343_v59, %v10858_v31 }
 0x1b4   : > { %v5125_v62 = vrot.slane %v5124_v55, 4  ;;  %v5137_v57 = vrot.slane %v5135_v24, 5  ;;  %v5143_v36 = vrot.slane %v5141_v7, 5  ;;  %v5681_v15 = vrot.slane %v4720_v34, 5  ;;  %v7346_v26 = vpop.f32.mrf.mxu1 }
 0x1b5   : > { %v5678_v40 = vsel %vm8401_vm13, %v6999_v46, %v5677_v53  ;;  %v5146_v38 = vshrl.u32 %v4721_v1, 16  ;;  %v9954_v16 = vadd.f32 %v9897_v32, %v2048_v45  ;;  %v2040_v49 = vadd.f32 %v2039_v27, %v10859_v35  ;;  %v7384_v20 = vpop.f32.mrf.mxu0  ;;  %v5497_v45 = vld [vmem:[#allocation2 + $0x130] sm:$0xe]  ;;  %v5498_v27 = vld [vmem:[#allocation2 + $0x138] sm:$0xe] }
 0x1b6   : > { %v5130_v61 = vsel %vm7970_vm9, %v5125_v62, %v5129_v25  ;;  %v5138_v14 = vor.u32 %v5137_v57, %v5134_v48  ;;  %7549 = vmatmul.mubr.msk.bf16.gmra.mxu1 %vm1593_vm10, %v9839_v50  ;;  %v5682_v34 = vsel %vm8401_vm13, %v7000_v52, %v5681_v15  ;;  %v5149_v4 = vshll.u32 %v4721_v1, 16  ;;  %v10860_v25 = vld [vmem:[#allocation7_spill] sm:$0xff]  ;;  %v2052_v7 = vpop.f32.mrf.mxu1  ;;  %v10861_v62 = vld [vmem:[#allocation4_spill] sm:$0xff] }
 0x1b7   : > { %v5148_v32 = vrot.slane %v5146_v38, 4  ;;  %v5155_v55 = vshll.u32 %v9949_v22, 16  ;;  %v9966_v24 = vadd.f32 %v9903_v60, %v2040_v49  ;;  %v2061_v48 = vadd.f32 %v7346_v26, %v10860_v25  ;;  %7552 = vmatprep.mubr.msk.bf16.mxu1 %vm1593_vm10, %v9891_v12 }
 0x1b8   : > { %7587 = vmatmul.mubr.msk.bf16.gmra.mxu0 %vm1593_vm10, %v7017_v17  ;;  %v5139_v50 = vrot.slane %v5138_v14, 4  ;;  %v7018_v59 = vcombine.low %v5678_v40, %v5682_v34  ;;  %v2557_v17 = vpop.f32.mrf.mxu0  ;;  %v5151_v46 = vrot.slane %v5149_v4, 5  ;;  %v5160_v52 = vshrl.u32 %v4723_v63, 16  ;;  %v7347_v40 = vpop.f32.mrf.mxu1 }
 0x1b9   : > { %v5157_v53 = vrot.slane %v5155_v55, 5  ;;  %v5163_v31 = vshll.u32 %v4723_v63, 16  ;;  %v9972_v1 = vadd.f32 %v9915_v43, %v2061_v48  ;;  %v2053_v60 = vadd.f32 %v2052_v7, %v10861_v62  ;;  %v10862_v43 = vld [vmem:[#allocation12_spill] sm:$0xff] }
 0x1ba   : > { %v5144_v57 = vsel %vm7970_vm9, %v5139_v50, %v5143_v36  ;;  %7590 = vmatprep.mubr.msk.bf16.mxu0 %vm1593_vm10, %v7018_v59  ;;  %v5169_v12 = vshll.u32 %v4724_v44, 16  ;;  %v7385_v15 = vpop.f32.mrf.mxu0  ;;  %v5152_v35 = vor.u32 %v5151_v46, %v5148_v32  ;;  %v5162_v49 = vrot.slane %v5160_v52, 4  ;;  %v2055_v55 = vpop.f32.mrf.mxu1 }
 0x1bb   : > { %v6953_v38 = vcombine.low %v5130_v61, %v5144_v57  ;;  %v5165_v14 = vrot.slane %v5163_v31, 5  ;;  %v9979_v63 = vadd.f32 %v9935_v23, %v2053_v60  ;;  %v2064_v26 = vadd.f32 %v7347_v40, %v10862_v43  ;;  %v10863_v61 = vld [vmem:[#allocation16_spill] sm:$0xff] }
 0x1bc   : > { %v5171_v34 = vrot.slane %v5169_v12, 5  ;;  %v7001_v4 = vrot.slane %v5497_v45, 9  ;;  %v2560_v25 = vpop.f32.mrf.mxu0  ;;  %v5153_v36 = vrot.slane %v5152_v35, 4  ;;  %v5685_v50 = vrot.slane %v9949_v22, 5  ;;  %v10864_v60 = vld [vmem:[#allocation8_spill] sm:$0xff] }
 0x1bd   : > { %v5166_v48 = vor.u32 %v5165_v14, %v5162_v49  ;;  %v7002_v59 = vrot.slane %v5498_v27, 9  ;;  %v9984_v7 = vadd.f32 %v9943_v18, %v2064_v26  ;;  %v2056_v32 = vadd.f32 %v2055_v55, %v10863_v61  ;;  %v7350_v52 = vpop.f32.mrf.mxu1 }
 0x1be   : > { %v5689_v46 = vrot.slane %v4724_v44, 5  ;;  %7553 = vmatmul.mubr.msk.bf16.gmra.mxu1 %vm1593_vm10, %v9937_v9  ;;  %v7388_v23 = vpop.f32.mrf.mxu0  ;;  %v5686_v45 = vsel %vm8401_vm13, %v7001_v4, %v5685_v50  ;;  %v2077_v22 = vadd.f32 %v7350_v52, %v10864_v60  ;;  %v5158_v18 = vsel %vm7970_vm9, %v5153_v36, %v5157_v53 }
 0x1bf   : > { %v5167_v31 = vrot.slane %v5166_v48, 4  ;;  %v9991_v62 = vadd.f32 %v2544_v39, %v2056_v32  ;;  %7556 = vmatprep.mubr.msk.bf16.mxu1 %vm1593_vm10, %v6953_v38  ;;  %v2068_v57 = vpop.f32.mrf.mxu1  ;;  %v10865_v39 = vld [vmem:[#allocation10_spill] sm:$0xff]  ;;  %vm6273_vm14 = vcmask 130048  }
 0x1c0   : > { %v5690_v44 = vsel %vm8401_vm13, %v7002_v59, %v5689_v46  ;;  %v2573_v27 = vpop.f32.mrf.mxu0  ;;  %v10001_v40 = vadd.f32 %v7384_v20, %v2077_v22  ;;  %v2069_v35 = vadd.f32 %v2068_v57, %v10865_v39  ;;  %v10866_v59 = vld [vmem:[#allocation14_spill] sm:$0xff]  ;;  %v10867_v46 = vld [vmem:[#allocation20_spill] sm:$0xff] }
 0x1c1   : > { %v5172_v9 = vsel %vm7970_vm9, %v5167_v31, %v5171_v34  ;;  %v7019_v12 = vcombine.low %v5686_v45, %v5690_v44  ;;  %v7351_v49 = vpop.f32.mrf.mxu1 }
 0x1c2   : > { %v6954_v14 = vcombine.low %v5158_v18, %v5172_v9  ;;  %v7389_v38 = vpop.f32.mrf.mxu0  ;;  %v10005_v43 = vadd.f32 %v2557_v17, %v2069_v35  ;;  %v2080_v3 = vadd.f32 %v7351_v49, %v9621_v5 }
 0x1c3   : > { %7591 = vmatmul.mubr.msk.bf16.gmra.mxu0 %vm1593_vm10, %v7019_v12  ;;  %v2071_v53 = vpop.f32.mrf.mxu1 }
 0x1c4   : > { %v2576_v26 = vpop.f32.mrf.mxu0  ;;  %v10008_v4 = vadd.f32 %v7385_v15, %v2080_v3  ;;  %v2072_v51 = vadd.f32 %v2071_v53, %v9650_v8 }
 0x1c6   : > { %v7354_v34 = vpop.f32.mrf.mxu1  ;;  %7557 = vmatmul.mubr.msk.bf16.gmra.mxu1 %vm1593_vm10, %v6954_v14  ;;  %v7428_v20 = vpop.f32.mrf.mxu0  ;;  %v10012_v55 = vadd.f32 %v2560_v25, %v2072_v51  ;;  %v10868_v25 = vld [vmem:[#allocation21_spill] sm:$0xff] }
 0x1c7   : > { %v2093_v36 = vadd.f32 %v7354_v34, %v9666_v56 }
 0x1c8   : > { %v2084_v48 = vpop.f32.mrf.mxu1  ;;  %v3625_v50 = vpop.f32.mrf.mxu0 }
 0x1c9   : > { %v10015_v17 = vadd.f32 %v7388_v23, %v2093_v36  ;;  %v2085_v5 = vadd.f32 %v2084_v48, %v10866_v59 }
 0x1ca   : > { %v7355_v61 = vpop.f32.mrf.mxu1  ;;  %v7429_v32 = vpop.f32.mrf.mxu0 }
 0x1cb   : > { %v10018_v15 = vadd.f32 %v2573_v27, %v2085_v5  ;;  %v2096_v8 = vadd.f32 %v7355_v61, %v10867_v46 }
 0x1cc   : > { %v2087_v52 = vpop.f32.mrf.mxu1  ;;  %v3628_v31 = vpop.f32.mrf.mxu0 }
 0x1cd   : > { %v10021_v45 = vadd.f32 %v7389_v38, %v2096_v8  ;;  %v2088_v60 = vadd.f32 %v2087_v52, %v10868_v25 }
 0x1ce   : > { %v7394_v22 = vpop.f32.mrf.mxu1  ;;  %v7432_v56 = vpop.f32.mrf.mxu0 }
 0x1cf   : > { %v10024_v18 = vadd.f32 %v2576_v26, %v2088_v60  ;;  %v2948_v23 = vadd.f32 %v7394_v22, %v9738_v47 }
 0x1d0   : > { %v2819_v44 = vpop.f32.mrf.mxu1  ;;  %v3641_v57 = vpop.f32.mrf.mxu0 }
 0x1d1   : > { %v10027_v9 = vadd.f32 %v7428_v20, %v2948_v23  ;;  %v2946_v12 = vadd.f32 %v2819_v44, %v9748_v0 }
 0x1d2   : > { %v7395_v27 = vpop.f32.mrf.mxu1  ;;  %v7433_v39 = vpop.f32.mrf.mxu0 }
 0x1d3   : > { %v10030_v35 = vadd.f32 %v3625_v50, %v2946_v12  ;;  %v2949_v49 = vadd.f32 %v7395_v27, %v9760_v29 }
 0x1d4   : > { %v2822_v14 = vpop.f32.mrf.mxu1  ;;  %v3644_v38 = vpop.f32.mrf.mxu0 }
 0x1d5   : > { %v10033_v3 = vadd.f32 %v7429_v32, %v2949_v49  ;;  %v2947_v53 = vadd.f32 %v2822_v14, %v9778_v54 }
 0x1d6   : > { %v7398_v26 = vpop.f32.mrf.mxu1  ;;  %v7436_v47 = vpop.f32.mrf.mxu0 }
 0x1d7   : > { %v10036_v51 = vadd.f32 %v3628_v31, %v2947_v53  ;;  %v2952_v34 = vadd.f32 %v7398_v26, %v9790_v21 }
 0x1d8   : > { %v2835_v20 = vpop.f32.mrf.mxu1  ;;  %v3657_v0 = vpop.f32.mrf.mxu0 }
 0x1d9   : > { %v10039_v36 = vadd.f32 %v7432_v56, %v2952_v34  ;;  %v2950_v48 = vadd.f32 %v2835_v20, %v9802_v42 }
 0x1da   : > { %v7399_v50 = vpop.f32.mrf.mxu1  ;;  %v7437_v29 = vpop.f32.mrf.mxu0 }
 0x1db   : > { %v10042_v59 = vadd.f32 %v3641_v57, %v2950_v48  ;;  %v2953_v5 = vadd.f32 %v7399_v50, %v9812_v28 }
 0x1dc   : > { %v2838_v61 = vpop.f32.mrf.mxu1  ;;  %v3660_v54 = vpop.f32.mrf.mxu0 }
 0x1dd   : > { %v10045_v32 = vadd.f32 %v7433_v39, %v2953_v5  ;;  %v2951_v46 = vadd.f32 %v2838_v61, %v9826_v19 }
 0x1de   : > { %v7402_v8 = vpop.f32.mrf.mxu1  ;;  %v7440_v21 = vpop.f32.mrf.mxu0 }
 0x1df   : > { %v10048_v52 = vadd.f32 %v3644_v38, %v2951_v46  ;;  %v2956_v31 = vadd.f32 %v7402_v8, %v9842_v58 }
 0x1e0   : > { %v2851_v25 = vpop.f32.mrf.mxu1  ;;  %v3673_v42 = vpop.f32.mrf.mxu0 }
 0x1e1   : > { %v10051_v60 = vadd.f32 %v7436_v47, %v2956_v31  ;;  %v2954_v22 = vadd.f32 %v2851_v25, %v9848_v41 }
 0x1e2   : > { %v7403_v56 = vpop.f32.mrf.mxu1  ;;  %v7441_v28 = vpop.f32.mrf.mxu0 }
 0x1e3   : > { %v10054_v23 = vadd.f32 %v3657_v0, %v2954_v22  ;;  %v2957_v44 = vadd.f32 %v7403_v56, %v9864_v37 }
 0x1e4   : > { %v2854_v57 = vpop.f32.mrf.mxu1  ;;  %v3676_v19 = vpop.f32.mrf.mxu0 }
 0x1e5   : > { %v10057_v12 = vadd.f32 %v7437_v29, %v2957_v44  ;;  %v2955_v27 = vadd.f32 %v2854_v57, %v9878_v11 }
 0x1e6   : > { %v7406_v39 = vpop.f32.mrf.mxu1  ;;  %v7444_v58 = vpop.f32.mrf.mxu0 }
 0x1e7   : > { %v10060_v49 = vadd.f32 %v3660_v54, %v2955_v27  ;;  %v2960_v14 = vadd.f32 %v7406_v39, %v9894_v6 }
 0x1e8   : > { %v2867_v38 = vpop.f32.mrf.mxu1  ;;  %v3689_v41 = vpop.f32.mrf.mxu0 }
 0x1e9   : > { %v10063_v53 = vadd.f32 %v7440_v21, %v2960_v14  ;;  %v2958_v26 = vadd.f32 %v2867_v38, %v9900_v33 }
 0x1ea   : > { %v7407_v47 = vpop.f32.mrf.mxu1  ;;  %v7445_v37 = vpop.f32.mrf.mxu0 }
 0x1eb   : > { %v10066_v34 = vadd.f32 %v3673_v42, %v2958_v26  ;;  %v2961_v20 = vadd.f32 %v7407_v47, %v9910_v30 }
 0x1ec   : > { %v2870_v0 = vpop.f32.mrf.mxu1  ;;  %v3692_v11 = vpop.f32.mrf.mxu0 }
 0x1ed   : > { %v10069_v48 = vadd.f32 %v7441_v28, %v2961_v20  ;;  %v2959_v50 = vadd.f32 %v2870_v0, %v9924_v13 }
 0x1ee   : > { %v7410_v29 = vpop.f32.mrf.mxu1  ;;  %v7448_v6 = vpop.f32.mrf.mxu0 }
 0x1ef   : > { %v10072_v5 = vadd.f32 %v3676_v19, %v2959_v50  ;;  %v2964_v61 = vadd.f32 %v7410_v29, %v9940_v2 }
 0x1f0   : > { %v2883_v54 = vpop.f32.mrf.mxu1  ;;  %v3705_v33 = vpop.f32.mrf.mxu0 }
 0x1f1   : > { %v10075_v46 = vadd.f32 %v7444_v58, %v2964_v61  ;;  %v2962_v8 = vadd.f32 %v2883_v54, %v9946_v10 }
 0x1f2   : > { %v7411_v21 = vpop.f32.mrf.mxu1  ;;  %v7449_v30 = vpop.f32.mrf.mxu0 }
 0x1f3   : > { %v10078_v31 = vadd.f32 %v3689_v41, %v2962_v8  ;;  %v2965_v25 = vadd.f32 %v7411_v21, %v9954_v16 }
 0x1f4   : > { %v2886_v42 = vpop.f32.mrf.mxu1  ;;  %v3708_v13 = vpop.f32.mrf.mxu0 }
 0x1f5   : > { %v10081_v22 = vadd.f32 %v7445_v37, %v2965_v25  ;;  %v2963_v56 = vadd.f32 %v2886_v42, %v9966_v24 }
 0x1f6   : > { %v7414_v28 = vpop.f32.mrf.mxu1  ;;  %v7452_v2 = vpop.f32.mrf.mxu0 }
 0x1f7   : > { %v10084_v44 = vadd.f32 %v3692_v11, %v2963_v56  ;;  %v2968_v57 = vadd.f32 %v7414_v28, %v9972_v1 }
 0x1f8   : > { %v2899_v19 = vpop.f32.mrf.mxu1  ;;  %v3721_v10 = vpop.f32.mrf.mxu0 }
 0x1f9   : > { %10869 = vst [vmem:[#allocation6_spill] sm:$0xff] %v10084_v44  ;;  %v10087_v27 = vadd.f32 %v7448_v6, %v2968_v57  ;;  %v2966_v39 = vadd.f32 %v2899_v19, %v9979_v63 }
 0x1fa   : > { %v7415_v58 = vpop.f32.mrf.mxu1  ;;  %v7453_v16 = vpop.f32.mrf.mxu0 }
 0x1fb   : > { %10870 = vst [vmem:[#allocation3_spill] sm:$0xff] %v10087_v27  ;;  %v10090_v14 = vadd.f32 %v3705_v33, %v2966_v39  ;;  %v2969_v38 = vadd.f32 %v7415_v58, %v9984_v7 }
 0x1fc   : > { %v2902_v41 = vpop.f32.mrf.mxu1  ;;  %v3724_v24 = vpop.f32.mrf.mxu0 }
 0x1fd   : > { %10871 = vst [vmem:[#allocation9_spill] sm:$0xff] %v10090_v14  ;;  %v10093_v26 = vadd.f32 %v7449_v30, %v2969_v38  ;;  %v2967_v47 = vadd.f32 %v2902_v41, %v9991_v62 }
 0x1fe   : > { %v7418_v37 = vpop.f32.mrf.mxu1  ;;  %v7456_v1 = vpop.f32.mrf.mxu0 }
 0x1ff   : > { %10872 = vst [vmem:[#allocation13_spill] sm:$0xff] %v10093_v26  ;;  %v10096_v20 = vadd.f32 %v3708_v13, %v2967_v47  ;;  %v2972_v0 = vadd.f32 %v7418_v37, %v10001_v40 }
 0x200   : > { %v2915_v11 = vpop.f32.mrf.mxu1  ;;  %v3737_v63 = vpop.f32.mrf.mxu0 }
 0x201   : > { %10873 = vst [vmem:[#allocation18_spill] sm:$0xff] %v10096_v20  ;;  %v10099_v50 = vadd.f32 %v7452_v2, %v2972_v0  ;;  %v2970_v29 = vadd.f32 %v2915_v11, %v10005_v43 }
 0x202   : > { %v7419_v6 = vpop.f32.mrf.mxu1  ;;  %v7457_v7 = vpop.f32.mrf.mxu0 }
 0x203   : > { %10874 = vst [vmem:[#allocation11_spill] sm:$0xff] %v10099_v50  ;;  %v10102_v61 = vadd.f32 %v3721_v10, %v2970_v29  ;;  %v2973_v54 = vadd.f32 %v7419_v6, %v10008_v4 }
 0x204   : > { %v2918_v33 = vpop.f32.mrf.mxu1  ;;  %v3740_v62 = vpop.f32.mrf.mxu0 }
 0x205   : > { %10875 = vst [vmem:[#allocation15_spill] sm:$0xff] %v10102_v61  ;;  %v10105_v8 = vadd.f32 %v7453_v16, %v2973_v54  ;;  %v2971_v21 = vadd.f32 %v2918_v33, %v10012_v55 }
 0x206   : > { %v7422_v30 = vpop.f32.mrf.mxu1  ;;  %v10108_v40 = vpop.f32.mrf.mxu0 }
 0x207   : > { %10876 = vst [vmem:[#allocation5_spill] sm:$0xff] %v10105_v8  ;;  %v10110_v25 = vadd.f32 %v3724_v24, %v2971_v21  ;;  %v2976_v42 = vadd.f32 %v7422_v30, %v10015_v17 }
 0x208   : > { %v2931_v43 = vpop.f32.mrf.mxu1  ;;  %v10113_v13 = vpop.f32.mrf.mxu0 }
 0x209   : > { %10877 = vst [vmem:[#allocation17_spill] sm:$0xff] %v10110_v25  ;;  %v10115_v56 = vadd.f32 %v7456_v1, %v2976_v42  ;;  %v2974_v4 = vadd.f32 %v2931_v43, %v10018_v15 }
 0x20a   : > { %v7423_v28 = vpop.f32.mrf.mxu1  ;;  %v10118_v2 = vpop.f32.mrf.mxu0 }
 0x20b   : > { %10878 = vst [vmem:[#allocation19_spill] sm:$0xff] %v10115_v56  ;;  %v10120_v57 = vadd.f32 %v3737_v63, %v2974_v4  ;;  %v2977_v55 = vadd.f32 %v7423_v28, %v10021_v45 }
 0x20c   : > { %v2934_v19 = vpop.f32.mrf.mxu1  ;;  %v10123_v10 = vpop.f32.mrf.mxu0 }
 0x20d   : > { %10879 = vst [vmem:[#allocation7_spill] sm:$0xff] %v10120_v57  ;;  %v10125_v39 = vadd.f32 %v7457_v7, %v2977_v55  ;;  %v2975_v17 = vadd.f32 %v2934_v19, %v10024_v18 }
 0x20e   : > { %v7462_v58 = vpop.f32.mrf.mxu1  ;;  %v10128_v16 = vpop.f32.mrf.mxu0 }
 0x20f   : > { %10880 = vst [vmem:[#allocation4_spill] sm:$0xff] %v10125_v39  ;;  %v10130_v38 = vadd.f32 %v3740_v62, %v2975_v17 }
 0x210   : > { %v4143_v15 = vpop.f32.mrf.mxu1  ;;  %v10132_v41 = vpop.f32.mrf.mxu0 }
 0x211   : > { %10881 = vst [vmem:[#allocation12_spill] sm:$0xff] %v10130_v38 }
 0x212   : > { %v7463_v24 = vpop.f32.mrf.mxu1  ;;  %v10134_v47 = vpop.f32.mrf.mxu0 }
 0x214   : > { %v4146_v37 = vpop.f32.mrf.mxu1  ;;  %v10136_v45 = vpop.f32.mrf.mxu0 }
 0x216   : > { %v7466_v1 = vpop.f32.mrf.mxu1  ;;  %v10138_v0 = vpop.f32.mrf.mxu0 }
 0x218   : > { %v4159_v11 = vpop.f32.mrf.mxu1  ;;  %v10140_v63 = vpop.f32.mrf.mxu0 }
 0x21a   : > { %v7467_v18 = vpop.f32.mrf.mxu1  ;;  %v10142_v29 = vpop.f32.mrf.mxu0 }
 0x21c   : > { %v4162_v6 = vpop.f32.mrf.mxu1  ;;  %v10144_v7 = vpop.f32.mrf.mxu0 }
 0x21e   : > { %v7470_v54 = vpop.f32.mrf.mxu1  ;;  %v10146_v33 = vpop.f32.mrf.mxu0 }
 0x220   : > { %v4175_v62 = vpop.f32.mrf.mxu1  ;;  %v10148_v21 = vpop.f32.mrf.mxu0 }
 0x222   : > { %v7471_v30 = vpop.f32.mrf.mxu1  ;;  %v10150_v42 = vpop.f32.mrf.mxu0 }
 0x223   : > { %10882 = vst [vmem:[#allocation16_spill] sm:$0xff] %v10150_v42 }
 0x224   : > { %v4178_v43 = vpop.f32.mrf.mxu1  ;;  %v10152_v4 = vpop.f32.mrf.mxu0 }
 0x225   : > { %10883 = vst [vmem:[#allocation8_spill] sm:$0xff] %v10152_v4 }
 0x226   : > { %v7474_v28 = vpop.f32.mrf.mxu1  ;;  %v10154_v55 = vpop.f32.mrf.mxu0 }
 0x227   : > { %10884 = vst [vmem:[#allocation10_spill] sm:$0xff] %v10154_v55 }
 0x228   : > { %v4191_v19 = vpop.f32.mrf.mxu1  ;;  %v10156_v17 = vpop.f32.mrf.mxu0 }
 0x229   : > { %10885 = vst [vmem:[#allocation14_spill] sm:$0xff] %v10156_v17 }
 0x22a   : > { %v7475_v38 = vpop.f32.mrf.mxu1  ;;  %v10158_v39 = vpop.f32.mrf.mxu0 }
 0x22b   : > { %10886 = vst [vmem:[#allocation20_spill] sm:$0xff] %v10158_v39 }
 0x22c   : > { %v4194_v57 = vpop.f32.mrf.mxu1  ;;  %v10160_v56 = vpop.f32.mrf.mxu0 }
 0x22d   : > { %10887 = vst [vmem:[#allocation21_spill] sm:$0xff] %v10160_v56 }
 0x22e   : > { %v7478_v25 = vpop.f32.mrf.mxu1  ;;  %v10162_v8 = vpop.f32.mrf.mxu0 }
 0x22f   : > { %10888 = vst [vmem:[#allocation22_spill] sm:$0xff] %v10162_v8 }
 0x230   : > { %v4207_v61 = vpop.f32.mrf.mxu1  ;;  %v10164_v50 = vpop.f32.mrf.mxu0 }
 0x231   : > { %10889 = vst [vmem:[#allocation23_spill] sm:$0xff] %v10164_v50 }
 0x232   : > { %v7479_v20 = vpop.f32.mrf.mxu1  ;;  %v10166_v26 = vpop.f32.mrf.mxu0 }
 0x233   : > { %10890 = vst [vmem:[#allocation24_spill] sm:$0xff] %v10166_v26 }
 0x234   : > { %v4210_v14 = vpop.f32.mrf.mxu1  ;;  %v10168_v55 = vpop.f32.mrf.mxu0 }
 0x235   : > { %10891 = vst [vmem:[#allocation25_spill] sm:$0xff] %v10168_v55 }
 0x236   : > { %v7482_v4 = vpop.f32.mrf.mxu1  ;;  %v10170_v17 = vpop.f32.mrf.mxu0 }
 0x237   : > { %10892 = vst [vmem:[#allocation26_spill] sm:$0xff] %v10170_v17 }
 0x238   : > { %v10172_v42 = vpop.f32.mrf.mxu1  ;;  %v10174_v39 = vpop.f32.mrf.mxu0 }
 0x239   : > { %10893 = vst [vmem:[#allocation27_spill] sm:$0xff] %v10172_v42  ;;  %10894 = vst [vmem:[#allocation28_spill] sm:$0xff] %v10174_v39 }
 0x23a   : > { %v10176_v56 = vpop.f32.mrf.mxu1  ;;  %v10178_v8 = vpop.f32.mrf.mxu0 }
 0x23b   : > { %10895 = vst [vmem:[#allocation29_spill] sm:$0xff] %v10176_v56  ;;  %10896 = vst [vmem:[#allocation30_spill] sm:$0xff] %v10178_v8  ;;  %v4272_v56 = vadd.f32 %v7462_v58, %v10027_v9  ;;  %v4270_v8 = vadd.f32 %v4143_v15, %v10030_v35  ;;  %v4274_v9 = vadd.f32 %v4159_v11, %v10042_v59  ;;  %v10911_v11 = vld [vmem:[#allocation10_spill] sm:$0xff] }
 0x23c   : > { %v10180_v27 = vpop.f32.mrf.mxu1  ;;  %v10182_v50 = vpop.f32.mrf.mxu0  ;;  %v4277_v58 = vadd.f32 %v7467_v18, %v10045_v32  ;;  %v4275_v15 = vadd.f32 %v4162_v6, %v10048_v52  ;;  %v4281_v59 = vadd.f32 %v7471_v30, %v10057_v12  ;;  %v4284_v52 = vadd.f32 %v7474_v28, %v10063_v53 }
 0x23d   : > { %10897 = vst [vmem:[#allocation31_spill] sm:$0xff] %v10180_v27  ;;  %10898 = vst [vmem:[#allocation32_spill] sm:$0xff] %v10182_v50  ;;  %v4273_v27 = vadd.f32 %v7463_v24, %v10033_v3  ;;  %v4629_v35 = vadd.f32 %v10113_v13, %v4270_v8  ;;  %v4279_v8 = vadd.f32 %v4178_v43, %v10060_v49 }
 0x23e   : > { %v10184_v26 = vpop.f32.mrf.mxu1  ;;  %v10186_v44 = vpop.f32.mrf.mxu0  ;;  %v4285_v12 = vadd.f32 %v7475_v38, %v10069_v48  ;;  %v4283_v49 = vadd.f32 %v4194_v57, %v10072_v5  ;;  %v4286_v53 = vadd.f32 %v4207_v61, %v10078_v31  ;;  %v10907_v61 = vld [vmem:[#allocation6_spill] sm:$0xff]  ;;  %v10908_v57 = vld [vmem:[#allocation3_spill] sm:$0xff] }
 0x23f   : > { %10899 = vst [vmem:[#allocation33_spill] sm:$0xff] %v10184_v26  ;;  %10900 = vst [vmem:[#allocation34_spill] sm:$0xff] %v10186_v44  ;;  %v4271_v44 = vadd.f32 %v4146_v37, %v10036_v51  ;;  %v4632_v3 = vadd.f32 %v10118_v2, %v4273_v27  ;;  %v4280_v51 = vadd.f32 %v7470_v54, %v10051_v60  ;;  %v10909_v37 = vld [vmem:[#allocation16_spill] sm:$0xff] }
 0x240   : > { %v10188_v55 = vpop.f32.mrf.mxu1  ;;  %v10190_v17 = vpop.f32.mrf.mxu0  ;;  %v10242_v2 = vadd.f32 %v10136_v45, %v4275_v15  ;;  %v10266_v31 = vadd.f32 %v10144_v7, %v4279_v8  ;;  %v4292_v38 = vadd.f32 %v7482_v4, %v10908_v57  ;;  %v10277_v45 = vadd.f32 %v10909_v37, %v4285_v12  ;;  %v10913_v7 = vld [vmem:[#allocation20_spill] sm:$0xff]  ;;  %v10924_v12 = vld [vmem:[#allocation15_spill] sm:$0xff]  ;;  %v10928_v37 = vld [vmem:[#allocation17_spill] sm:$0xff] }
 0x241   : > { %10901 = vst [vmem:[#allocation35_spill] sm:$0xff] %v10188_v55  ;;  %10902 = vst [vmem:[#allocation36_spill] sm:$0xff] %v10190_v17  ;;  %v4276_v17 = vadd.f32 %v7466_v1, %v10039_v36  ;;  %v4278_v36 = vadd.f32 %v4175_v62, %v10054_v23  ;;  %v10225_v27 = vadd.f32 %v10123_v10, %v4271_v44  ;;  %v10910_v1 = vld [vmem:[#allocation8_spill] sm:$0xff] }
 0x242   : > { %v10192_v42 = vpop.f32.mrf.mxu1  ;;  %v10194_v39 = vpop.f32.mrf.mxu0  ;;  %v10233_v23 = vadd.f32 %v10132_v41, %v4274_v9  ;;  %v4288_v44 = vadd.f32 %v7478_v25, %v10075_v46  ;;  %v10257_v48 = vadd.f32 %v10138_v0, %v4280_v51  ;;  %v10263_v46 = vadd.f32 %v10142_v29, %v4281_v59  ;;  %v10912_v29 = vld [vmem:[#allocation14_spill] sm:$0xff]  ;;  %v10917_v30 = vld [vmem:[#allocation29_spill] sm:$0xff]  ;;  %v10920_v9 = vld [vmem:[#allocation11_spill] sm:$0xff] }
 0x243   : > { %10903 = vst [vmem:[#allocation37_spill] sm:$0xff] %v10192_v42  ;;  %10904 = vst [vmem:[#allocation38_spill] sm:$0xff] %v10194_v39  ;;  %v4631_v39 = vadd.f32 %v10108_v40, %v4272_v56  ;;  %v10228_v32 = vadd.f32 %v10128_v16, %v4276_v17  ;;  %v4282_v40 = vadd.f32 %v4191_v19, %v10066_v34  ;;  %v10918_v19 = vld [vmem:[#allocation18_spill] sm:$0xff]  ;;  %v10922_v59 = vld [vmem:[#allocation21_spill] sm:$0xff] }
 0x244   : > { %v10199_v50 = vpop.f32.mrf.mxu1  ;;  %v10201_v26 = vpop.f32.mrf.mxu0  ;;  %v10239_v56 = vadd.f32 %v10134_v47, %v4277_v58  ;;  %v4289_v34 = vadd.f32 %v7479_v20, %v10081_v22  ;;  %v10260_v5 = vadd.f32 %v10140_v63, %v4278_v36  ;;  %v10269_v22 = vadd.f32 %v10146_v33, %v4284_v52  ;;  %v10915_v33 = vld [vmem:[#allocation27_spill] sm:$0xff]  ;;  %v10923_v52 = vld [vmem:[#allocation22_spill] sm:$0xff] }
 0x245   : > { %10905 = vst [vmem:[#allocation39_spill] sm:$0xff] %v10201_v26  ;;  %v10272_v20 = vadd.f32 %v10148_v21, %v4282_v40  ;;  %v4287_v25 = vadd.f32 %v4210_v14, %v10907_v61  ;;  %v10280_v0 = vadd.f32 %v10910_v1, %v4283_v49  ;;  %v10283_v63 = vadd.f32 %v10911_v11, %v4288_v44  ;;  %v10914_v14 = vld [vmem:[#allocation9_spill] sm:$0xff]  ;;  %v10919_v17 = vld [vmem:[#allocation31_spill] sm:$0xff] }
 0x246   : > { %v10206_v55 = vpop.f32.mrf.mxu1  ;;  %v7564_v42 = vpop.f32.mrf.mxu0  ;;  %v10286_v6 = vadd.f32 %v10912_v29, %v4286_v53  ;;  %v10289_v54 = vadd.f32 %v10913_v7, %v4289_v34  ;;  %v4290_v62 = vadd.f32 %v10915_v33, %v10914_v14  ;;  %v10916_v21 = vld [vmem:[#allocation13_spill] sm:$0xff]  ;;  %v10304_v40 = vadd.f32 %v10923_v52, %v4292_v38  ;;  %v10930_v38 = vld [vmem:[#allocation23_spill] sm:$0xff]  ;;  %v10932_v14 = vld [vmem:[#allocation4_spill] sm:$0xff] }
 0x247   : > { %v4293_v43 = vadd.f32 %v10917_v30, %v10916_v21  ;;  %v10921_v58 = vld [vmem:[#allocation33_spill] sm:$0xff]  ;;  %v10301_v8 = vadd.f32 %v10922_v59, %v4287_v25  ;;  %v4295_v1 = vadd.f32 %v10199_v50, %v10928_v37  ;;  %v10931_v29 = vld [vmem:[#allocation7_spill] sm:$0xff]  ;;  %v10939_v52 = vld [vmem:[#allocation34_spill] sm:$0xff] }
 0x248   : > { %v4255_v24 = vpop.f32.mrf.mxu1  ;;  %v5826_v26 = vpop.f32.mrf.mxu0  ;;  %v4296_v15 = vadd.f32 %v10921_v58, %v10920_v9  ;;  %v10925_v49 = vld [vmem:[#allocation35_spill] sm:$0xff]  ;;  %v10926_v53 = vld [vmem:[#allocation5_spill] sm:$0xff] }
 0x249   : > { %v4294_v44 = vadd.f32 %v10925_v49, %v10924_v12  ;;  %v4298_v7 = vadd.f32 %v4255_v24, %v10931_v29  ;;  %v10937_v24 = vld [vmem:[#allocation30_spill] sm:$0xff] }
 0x24a   : > { %v7491_v13 = vpop.f32.mrf.mxu1  ;;  %v7565_v60 = vpop.f32.mrf.mxu0  ;;  %v10927_v34 = vld [vmem:[#allocation37_spill] sm:$0xff] }
 0x24b   : > { %v4297_v61 = vadd.f32 %v10927_v34, %v10926_v53  ;;  %v4301_v33 = vadd.f32 %v7491_v13, %v10932_v14  ;;  %v10940_v53 = vld [vmem:[#allocation36_spill] sm:$0xff]  ;;  %v10941_v34 = vld [vmem:[#allocation38_spill] sm:$0xff] }
 0x24c   : > { %v10246_v10 = vpop.f32.mrf.mxu1  ;;  %v10248_v16 = vpop.f32.mrf.mxu0 }
 0x24e   : > { %v7530_v41 = vpop.f32.mrf.mxu1  ;;  %v7568_v47 = vpop.f32.mrf.mxu0 }
 0x24f   : > { %v5437_v18 = vadd.f32 %v7530_v41, %v4631_v39  ;;  %v4291_v39 = vadd.f32 %v10919_v17, %v10918_v19  ;;  %v10935_v19 = vld [vmem:[#allocation26_spill] sm:$0xff] }
 0x250   : > { %v5308_v4 = vpop.f32.mrf.mxu1  ;;  %v5842_v28 = vpop.f32.mrf.mxu0  ;;  %v10337_v17 = vadd.f32 %v10935_v19, %v4296_v15  ;;  %v10938_v15 = vld [vmem:[#allocation32_spill] sm:$0xff] }
 0x251   : > { %v5955_v51 = vadd.f32 %v7564_v42, %v5437_v18  ;;  %v5435_v36 = vadd.f32 %v5308_v4, %v4629_v35  ;;  %v10929_v42 = vld [vmem:[#allocation19_spill] sm:$0xff]  ;;  %v10324_v18 = vadd.f32 %v10930_v38, %v4290_v62  ;;  %v10936_v62 = vld [vmem:[#allocation28_spill] sm:$0xff] }
 0x252   : > { %v7531_v57 = vpop.f32.mrf.mxu1  ;;  %v10310_v41 = vpop.f32.mrf.mxu0  ;;  %v4300_v35 = vadd.f32 %v10206_v55, %v10929_v42  ;;  %v10340_v58 = vadd.f32 %v10936_v62, %v4294_v44 }
 0x253   : > { %v5953_v25 = vadd.f32 %v5826_v26, %v5435_v36  ;;  %v5438_v11 = vadd.f32 %v7531_v57, %v4632_v3  ;;  %v7105_v21 = vpack.c.bf16 %v5955_v51, %v5955_v51  ;;  %v10933_v26 = vld [vmem:[#allocation24_spill] sm:$0xff]  ;;  %v10934_v3 = vld [vmem:[#allocation25_spill] sm:$0xff]  ;;  %v10343_v36 = vadd.f32 %v10937_v24, %v4297_v61 }
 0x254   : > { %v5311_v50 = vpop.f32.mrf.mxu1  ;;  %v10328_v30 = vpop.f32.mrf.mxu0  ;;  %v10331_v55 = vadd.f32 %v10933_v26, %v4293_v43  ;;  %v10334_v4 = vadd.f32 %v10934_v3, %v4291_v39  ;;  %v10355_v12 = vadd.f32 %v10939_v52, %v4300_v35  ;;  %v10362_v61 = vadd.f32 %v10941_v34, %v4301_v33  ;;  %v10942_v35 = vld [vmem:[#allocation12_spill] sm:$0xff] }
 0x255   : > { %v5956_v9 = vadd.f32 %v7565_v60, %v5438_v11  ;;  %v5436_v13 = vadd.f32 %v5311_v50, %v10225_v27  ;;  %6149 = vrot.lane.b32.xlu1 %v7105_v21, %s7696_s27  ;;  %6115 = vst.msk [vmem:[%s10321_s26 + $0x8] sm:$0xf] %vm266_vm1, %v7105_v21  ;;  %v7103_v39 = vpack.c.bf16 %v5953_v25, %v5953_v25 }
 0x256   : > { %v7534_v43 = vpop.f32.mrf.mxu1  ;;  %v10352_v60 = vadd.f32 %v10938_v15, %v4295_v1  ;;  %v6343_v49 = vmul.f32 %v5953_v25, %v5953_v25  ;;  %v10359_v27 = vadd.f32 %v10940_v53, %v4298_v7  ;;  %v6345_v11 = vmul.f32 %v5955_v51, %v5955_v51 }
 0x257   : > { %v10349_v59 = vpop.f32.mrf.mxu0  ;;  %v5441_v44 = vadd.f32 %v7534_v43, %v10228_v32  ;;  %v5954_v57 = vadd.f32 %v10248_v16, %v5436_v13  ;;  %6145 = vrot.lane.b32.xlu0 %v7103_v39, %s7696_s27  ;;  %6113 = vst.msk [vmem:[%s10321_s26] sm:$0xf] %vm266_vm1, %v7103_v39  ;;  %v7106_v1 = vpack.c.bf16 %v5956_v9, %v5956_v9  ;;  %v6274_v7 = vsel %vm6273_vm14, %v5953_v25, 0.0 }
 0x258   : > { %v5324_v37 = vpop.f32.mrf.mxu1  ;;  %v10372_v32 = vadd.f32 %v10246_v10, %v10942_v35  ;;  %v6277_v10 = vsel %vm6273_vm14, %v5955_v51, 0.0  ;;  %v6346_v3 = vmul.f32 %v5956_v9, %v5956_v9  ;;  %v6378_v43 = vsel %vm6273_vm14, %v6345_v11, 0.0 }
 0x259   : > { %v10368_v42 = vpop.f32.mrf.mxu0  ;;  %v5959_v38 = vadd.f32 %v7568_v47, %v5441_v44  ;;  %v5439_v29 = vadd.f32 %v5324_v37, %v10233_v23  ;;  %v6275_v16 = vsel %vm6273_vm14, %v5954_v57, 0.0  ;;  %v6344_v14 = vmul.f32 %v5954_v57, %v5954_v57  ;;  %6151 = vrot.lane.b32.xlu1 %v7106_v1, %s7696_s27  ;;  %6116 = vst.msk [vmem:[%s10321_s26 + $0xc] sm:$0xf] %vm266_vm1, %v7106_v1 }
 0x25a   : > { %v7535_v33 = vpop.f32.mrf.mxu1  ;;  %v7104_v50 = vpack.c.bf16 %v5954_v57, %v5954_v57  ;;  %v6375_v47 = vsel %vm6273_vm14, %v6343_v49, 0.0  ;;  %v6276_v26 = vadd.f32 %v6275_v16, %v6274_v7  ;;  %v6279_v51 = vsel %vm6273_vm14, %v5956_v9, 0.0 }
 0x25b   : > { %v10380_v21 = vpop.f32.mrf.mxu0  ;;  %v5957_v23 = vadd.f32 %v5842_v28, %v5439_v29  ;;  %v6376_v25 = vsel %vm6273_vm14, %v6344_v14, 0.0  ;;  %v5442_v19 = vadd.f32 %v7535_v33, %v10239_v56  ;;  %v7109_v24 = vpack.c.bf16 %v5959_v38, %v5959_v38 }
 0x25c   : > { %6147 = vrot.lane.b32.xlu0 %v7104_v50, %s7696_s27  ;;  %6114 = vst.msk [vmem:[%s10321_s26 + $0x4] sm:$0xf] %vm266_vm1, %v7104_v50  ;;  %v5327_v62 = vpop.f32.mrf.mxu1  ;;  %v6278_v39 = vadd.f32 %v6277_v10, %v6276_v26  ;;  %v6377_v15 = vadd.f32 %v6376_v25, %v6375_v47  ;;  %v6349_v57 = vmul.f32 %v5959_v38, %v5959_v38  ;;  %v6380_v9 = vsel %vm6273_vm14, %v6346_v3, 0.0 }
 0x25d   : > { %v5861_v13 = vpop.f32.mrf.mxu0  ;;  %v6347_v28 = vmul.f32 %v5957_v23, %v5957_v23  ;;  %v5960_v52 = vadd.f32 %v10310_v41, %v5442_v19  ;;  %v5440_v49 = vadd.f32 %v5327_v62, %v10242_v2  ;;  %6119 = vst.msk [vmem:[%s10321_s26 + $0x18] sm:$0xf] %vm266_vm1, %v7109_v24  ;;  %v7107_v44 = vpack.c.bf16 %v5957_v23, %v5957_v23 }
 0x25e   : > { %v7538_v56 = vpop.f32.mrf.mxu1  ;;  %v6379_v34 = vadd.f32 %v6378_v43, %v6377_v15  ;;  %v6280_v37 = vadd.f32 %v6279_v51, %v6278_v39  ;;  %v6281_v35 = vsel %vm6273_vm14, %v5957_v23, 0.0  ;;  %v6285_v23 = vsel %vm6273_vm14, %v5959_v38, 0.0 }
 0x25f   : > { %v10395_v53 = vpop.f32.mrf.mxu0  ;;  %v5445_v1 = vadd.f32 %v7538_v56, %v10257_v48  ;;  %v6382_v41 = vsel %vm6273_vm14, %v6347_v28, 0.0  ;;  %v5958_v11 = vadd.f32 %v10328_v30, %v5440_v49  ;;  %6117 = vst.msk [vmem:[%s10321_s26 + $0x10] sm:$0xf] %vm266_vm1, %v7107_v44  ;;  %v6350_v14 = vmul.f32 %v5960_v52, %v5960_v52 }
 0x260   : > { %6157 = vrot.lane.b32.xlu0 %v7109_v24, %s7696_s27  ;;  %v5340_v2 = vpop.f32.mrf.mxu1  ;;  %v6282_v7 = vadd.f32 %v6281_v35, %v6280_v37  ;;  %v6381_v16 = vadd.f32 %v6380_v9, %v6379_v34  ;;  %v7110_v47 = vpack.c.bf16 %v5960_v52, %v5960_v52  ;;  %v6386_v3 = vsel %vm6273_vm14, %v6349_v57, 0.0 }
 0x261   : > { %v10405_v29 = vpop.f32.mrf.mxu0  ;;  %v5443_v48 = vadd.f32 %v5340_v2, %v10260_v5  ;;  %v6283_v33 = vsel %vm6273_vm14, %v5958_v11, 0.0  ;;  %v6348_v50 = vmul.f32 %v5958_v11, %v5958_v11  ;;  %v5963_v10 = vadd.f32 %v10349_v59, %v5445_v1 }
 0x262   : > { %v7539_v30 = vpop.f32.mrf.mxu1  ;;  %v6383_v25 = vadd.f32 %v6382_v41, %v6381_v16  ;;  %v6284_v19 = vadd.f32 %v6283_v33, %v6282_v7  ;;  %6159 = vrot.lane.b32.xlu1 %v7110_v47, %s7696_s27  ;;  %6120 = vst.msk [vmem:[%s10321_s26 + $0x1c] sm:$0xf] %vm266_vm1, %v7110_v47  ;;  %v7108_v43 = vpack.c.bf16 %v5958_v11, %v5958_v11  ;;  %v6287_v51 = vsel %vm6273_vm14, %v5960_v52, 0.0 }
 0x263   : > { %v10410_v26 = vpop.f32.mrf.mxu0  ;;  %v6384_v62 = vsel %vm6273_vm14, %v6348_v50, 0.0  ;;  %v5961_v5 = vadd.f32 %v10368_v42, %v5443_v48  ;;  %v5446_v59 = vadd.f32 %v7539_v30, %v10263_v46  ;;  %v6388_v42 = vsel %vm6273_vm14, %v6350_v14, 0.0 }
 0x264   : > { %6153 = vrot.lane.b32.xlu0 %v7107_v44, %s7696_s27  ;;  %v5343_v24 = vpop.f32.mrf.mxu1  ;;  %v6286_v39 = vadd.f32 %v6285_v23, %v6284_v19  ;;  %v6385_v15 = vadd.f32 %v6384_v62, %v6383_v25  ;;  %6118 = vst.msk [vmem:[%s10321_s26 + $0x14] sm:$0xf] %vm266_vm1, %v7108_v43  ;;  %v7113_v44 = vpack.c.bf16 %v5963_v10, %v5963_v10  ;;  %v6293_v19 = vsel %vm6273_vm14, %v5963_v10, 0.0 }
 0x265   : > { %v10421_v38 = vpop.f32.mrf.mxu0  ;;  %v5444_v28 = vadd.f32 %v5343_v24, %v10266_v31  ;;  %v6351_v49 = vmul.f32 %v5961_v5, %v5961_v5  ;;  %v5964_v56 = vadd.f32 %v10380_v21, %v5446_v59  ;;  %v6353_v9 = vmul.f32 %v5963_v10, %v5963_v10 }
 0x266   : > { %v7542_v46 = vpop.f32.mrf.mxu1  ;;  %v6387_v57 = vadd.f32 %v6386_v3, %v6385_v15  ;;  %v6288_v37 = vadd.f32 %v6287_v51, %v6286_v39  ;;  %v6289_v31 = vsel %vm6273_vm14, %v5961_v5, 0.0  ;;  %6155 = vrot.lane.b32.xlu1 %v7108_v43, %s7696_s27  ;;  %6123 = vst.msk [vmem:[%s10321_s26 + $0x28] sm:$0xf] %vm266_vm1, %v7113_v44  ;;  %v7111_v50 = vpack.c.bf16 %v5961_v5, %v5961_v5 }
 0x267   : > { %v5962_v1 = vadd.f32 %v5861_v13, %v5444_v28  ;;  %v5449_v52 = vadd.f32 %v7542_v46, %v10269_v22  ;;  %v6390_v35 = vsel %vm6273_vm14, %v6351_v49, 0.0  ;;  %v7114_v41 = vpack.c.bf16 %v5964_v56, %v5964_v56 }
 0x268   : > { %v10429_v34 = vpop.f32.mrf.mxu0  ;;  %6165 = vrot.lane.b32.xlu0 %v7113_v44, %s7696_s27  ;;  %v5356_v21 = vpop.f32.mrf.mxu1  ;;  %v6290_v2 = vadd.f32 %v6289_v31, %v6288_v37  ;;  %v6389_v7 = vadd.f32 %v6388_v42, %v6387_v57  ;;  %v6354_v16 = vmul.f32 %v5964_v56, %v5964_v56  ;;  %v6394_v62 = vsel %vm6273_vm14, %v6353_v9, 0.0  ;;  %6121 = vst.msk [vmem:[%s10321_s26 + $0x20] sm:$0xf] %vm266_vm1, %v7111_v50 }
 0x269   : > { %v6291_v13 = vsel %vm6273_vm14, %v5962_v1, 0.0  ;;  %v6352_v22 = vmul.f32 %v5962_v1, %v5962_v1  ;;  %v5967_v14 = vadd.f32 %v10395_v53, %v5449_v52  ;;  %v5447_v48 = vadd.f32 %v5356_v21, %v10272_v20  ;;  %6124 = vst.msk [vmem:[%s10321_s26 + $0x2c] sm:$0xf] %vm266_vm1, %v7114_v41 }
 0x26a   : > { %v5890_v11 = vpop.f32.mrf.mxu0  ;;  %v7543_v33 = vpop.f32.mrf.mxu1  ;;  %v6391_v30 = vadd.f32 %v6390_v35, %v6389_v7  ;;  %v6292_v23 = vadd.f32 %v6291_v13, %v6290_v2  ;;  %6167 = vrot.lane.b32.xlu1 %v7114_v41, %s7696_s27  ;;  %v7112_v5 = vpack.c.bf16 %v5962_v1, %v5962_v1  ;;  %v6295_v51 = vsel %vm6273_vm14, %v5964_v56, 0.0 }
 0x26b   : > { %v6392_v3 = vsel %vm6273_vm14, %v6352_v22, 0.0  ;;  %v5450_v25 = vadd.f32 %v7543_v33, %v10277_v45  ;;  %v5965_v53 = vadd.f32 %v10405_v29, %v5447_v48  ;;  %v6396_v29 = vsel %vm6273_vm14, %v6354_v16, 0.0 }
 0x26c   : > { %v10443_v47 = vpop.f32.mrf.mxu0  ;;  %6161 = vrot.lane.b32.xlu0 %v7111_v50, %s7696_s27  ;;  %v5359_v20 = vpop.f32.mrf.mxu1  ;;  %v6294_v24 = vadd.f32 %v6293_v19, %v6292_v23  ;;  %v6393_v43 = vadd.f32 %v6392_v3, %v6391_v30  ;;  %6122 = vst.msk [vmem:[%s10321_s26 + $0x24] sm:$0xf] %vm266_vm1, %v7112_v5  ;;  %v7117_v28 = vpack.c.bf16 %v5967_v14, %v5967_v14  ;;  %v6301_v50 = vsel %vm6273_vm14, %v5967_v14, 0.0 }
 0x26d   : > { %v5968_v45 = vadd.f32 %v10410_v26, %v5450_v25  ;;  %v5448_v10 = vadd.f32 %v5359_v20, %v10280_v0  ;;  %v6355_v39 = vmul.f32 %v5965_v53, %v5965_v53  ;;  %v6357_v46 = vmul.f32 %v5967_v14, %v5967_v14 }
 0x26e   : > { %v10454_v59 = vpop.f32.mrf.mxu0  ;;  %v7546_v15 = vpop.f32.mrf.mxu1  ;;  %v6395_v49 = vadd.f32 %v6394_v62, %v6393_v43  ;;  %v6296_v44 = vadd.f32 %v6295_v51, %v6294_v24  ;;  %v6297_v26 = vsel %vm6273_vm14, %v5965_v53, 0.0  ;;  %6163 = vrot.lane.b32.xlu1 %v7112_v5, %s7696_s27  ;;  %6127 = vst.msk [vmem:[%s10321_s26 + $0x38] sm:$0xf] %vm266_vm1, %v7117_v28  ;;  %v7115_v7 = vpack.c.bf16 %v5965_v53, %v5965_v53 }
 0x26f   : > { %v6358_v57 = vmul.f32 %v5968_v45, %v5968_v45  ;;  %v5966_v0 = vadd.f32 %v10421_v38, %v5448_v10  ;;  %v5453_v56 = vadd.f32 %v7546_v15, %v10283_v63  ;;  %v7118_v1 = vpack.c.bf16 %v5968_v45, %v5968_v45 }
 0x270   : > { %v10462_v42 = vpop.f32.mrf.mxu0  ;;  %6173 = vrot.lane.b32.xlu0 %v7117_v28, %s7696_s27  ;;  %v5372_v37 = vpop.f32.mrf.mxu1  ;;  %v6298_v9 = vadd.f32 %v6297_v26, %v6296_v44  ;;  %v6397_v31 = vadd.f32 %v6396_v29, %v6395_v49  ;;  %v6398_v35 = vsel %vm6273_vm14, %v6355_v39, 0.0  ;;  %6125 = vst.msk [vmem:[%s10321_s26 + $0x30] sm:$0xf] %vm266_vm1, %v7115_v7 }
 0x271   : > { %v5451_v21 = vadd.f32 %v5372_v37, %v10286_v6  ;;  %v6299_v38 = vsel %vm6273_vm14, %v5966_v0, 0.0  ;;  %v6356_v41 = vmul.f32 %v5966_v0, %v5966_v0  ;;  %v5971_v63 = vadd.f32 %v10429_v34, %v5453_v56  ;;  %6128 = vst.msk [vmem:[%s10321_s26 + $0x3c] sm:$0xf] %vm266_vm1, %v7118_v1 }
 0x272   : > { %v10471_v52 = vpop.f32.mrf.mxu0  ;;  %v7547_v2 = vpop.f32.mrf.mxu1  ;;  %v6399_v22 = vadd.f32 %v6398_v35, %v6397_v31  ;;  %v6300_v16 = vadd.f32 %v6299_v38, %v6298_v9  ;;  %v6402_v6 = vsel %vm6273_vm14, %v6357_v46, 0.0  ;;  %6175 = vrot.lane.b32.xlu1 %v7118_v1, %s7696_s27  ;;  %v7116_v23 = vpack.c.bf16 %v5966_v0, %v5966_v0 }
 0x273   : > { %v5969_v48 = vadd.f32 %v5890_v11, %v5451_v21  ;;  %v5454_v33 = vadd.f32 %v7547_v2, %v10289_v54  ;;  %v6400_v30 = vsel %vm6273_vm14, %v6356_v41, 0.0  ;;  %v6303_v11 = vsel %vm6273_vm14, %v5968_v45, 0.0 }
 0x274   : > { %v10479_v13 = vpop.f32.mrf.mxu0  ;;  %6169 = vrot.lane.b32.xlu0 %v7115_v7, %s7696_s27  ;;  %v5375_v34 = vpop.f32.mrf.mxu1  ;;  %v6302_v25 = vadd.f32 %v6301_v50, %v6300_v16  ;;  %v6401_v54 = vadd.f32 %v6400_v30, %v6399_v22  ;;  %v6404_v14 = vsel %vm6273_vm14, %v6358_v57, 0.0  ;;  %6126 = vst.msk [vmem:[%s10321_s26 + $0x34] sm:$0xf] %vm266_vm1, %v7116_v23  ;;  %v7121_v5 = vpack.c.bf16 %v5971_v63, %v5971_v63 }
 0x275   : > { %v6359_v19 = vmul.f32 %v5969_v48, %v5969_v48  ;;  %v5972_v62 = vadd.f32 %v10443_v47, %v5454_v33  ;;  %v5452_v53 = vadd.f32 %v5375_v34, %v10301_v8  ;;  %v6361_v10 = vmul.f32 %v5971_v63, %v5971_v63 }
 0x276   : > { %v5909_v3 = vpop.f32.mrf.mxu0  ;;  %v7550_v20 = vpop.f32.mrf.mxu1  ;;  %v6403_v43 = vadd.f32 %v6402_v6, %v6401_v54  ;;  %v6304_v51 = vadd.f32 %v6303_v11, %v6302_v25  ;;  %v6305_v29 = vsel %vm6273_vm14, %v5969_v48, 0.0  ;;  %6171 = vrot.lane.b32.xlu1 %v7116_v23, %s7696_s27  ;;  %6131 = vst.msk [vmem:[%s10321_s26 + $0x48] sm:$0xf] %vm266_vm1, %v7121_v5  ;;  %v7119_v56 = vpack.c.bf16 %v5969_v48, %v5969_v48 }
 0x277   : > { %v5457_v45 = vadd.f32 %v7550_v20, %v10304_v40  ;;  %v6406_v39 = vsel %vm6273_vm14, %v6359_v19, 0.0  ;;  %v5970_v47 = vadd.f32 %v10454_v59, %v5452_v53  ;;  %v7122_v15 = vpack.c.bf16 %v5972_v62, %v5972_v62 }
 0x278   : > { %v10495_v24 = vpop.f32.mrf.mxu0  ;;  %6181 = vrot.lane.b32.xlu0 %v7121_v5, %s7696_s27  ;;  %v5388_v8 = vpop.f32.mrf.mxu1  ;;  %v6306_v49 = vadd.f32 %v6305_v29, %v6304_v51  ;;  %v6405_v46 = vadd.f32 %v6404_v14, %v6403_v43  ;;  %v6362_v40 = vmul.f32 %v5972_v62, %v5972_v62  ;;  %v6309_v37 = vsel %vm6273_vm14, %v5971_v63, 0.0  ;;  %6129 = vst.msk [vmem:[%s10321_s26 + $0x40] sm:$0xf] %vm266_vm1, %v7119_v56 }
 0x279   : > { %v5455_v44 = vadd.f32 %v5388_v8, %v10324_v18  ;;  %v6307_v57 = vsel %vm6273_vm14, %v5970_v47, 0.0  ;;  %v6360_v26 = vmul.f32 %v5970_v47, %v5970_v47  ;;  %v5975_v59 = vadd.f32 %v10462_v42, %v5457_v45  ;;  %6132 = vst.msk [vmem:[%s10321_s26 + $0x4c] sm:$0xf] %vm266_vm1, %v7122_v15 }
 0x27a   : > { %v10505_v28 = vpop.f32.mrf.mxu0  ;;  %v7551_v0 = vpop.f32.mrf.mxu1  ;;  %v6410_v1 = vsel %vm6273_vm14, %v6361_v10, 0.0  ;;  %v6407_v9 = vadd.f32 %v6406_v39, %v6405_v46  ;;  %v6308_v31 = vadd.f32 %v6307_v57, %v6306_v49  ;;  %6183 = vrot.lane.b32.xlu1 %v7122_v15, %s7696_s27  ;;  %v7120_v41 = vpack.c.bf16 %v5970_v47, %v5970_v47  ;;  %v10943_v47 = vld [vmem:[#allocation39_spill] sm:$0xff] }
 0x27b   : > { %v6408_v18 = vsel %vm6273_vm14, %v6360_v26, 0.0  ;;  %v5973_v21 = vadd.f32 %v10471_v52, %v5455_v44  ;;  %v5458_v42 = vadd.f32 %v7551_v0, %v10331_v55  ;;  %v6311_v63 = vsel %vm6273_vm14, %v5972_v62, 0.0 }
 0x27c   : > { %v7589_v35 = vpop.f32.mrf.mxu0  ;;  %6177 = vrot.lane.b32.xlu0 %v7119_v56, %s7696_s27  ;;  %v5391_v38 = vpop.f32.mrf.mxu1  ;;  %v6310_v2 = vadd.f32 %v6309_v37, %v6308_v31  ;;  %v6409_v7 = vadd.f32 %v6408_v18, %v6407_v9  ;;  %v6412_v16 = vsel %vm6273_vm14, %v6362_v40, 0.0  ;;  %6130 = vst.msk [vmem:[%s10321_s26 + $0x44] sm:$0xf] %vm266_vm1, %v7120_v41  ;;  %v7125_v33 = vpack.c.bf16 %v5975_v59, %v5975_v59 }
 0x27d   : > { %v5456_v22 = vadd.f32 %v5391_v38, %v10334_v4  ;;  %v6363_v52 = vmul.f32 %v5973_v21, %v5973_v21  ;;  %v5976_v48 = vadd.f32 %v10479_v13, %v5458_v42  ;;  %v6365_v11 = vmul.f32 %v5975_v59, %v5975_v59 }
 0x27e   : > { %v7554_v55 = vpop.f32.mrf.mxu1  ;;  %v6411_v50 = vadd.f32 %v6410_v1, %v6409_v7  ;;  %v6312_v6 = vadd.f32 %v6311_v63, %v6310_v2  ;;  %v5925_v23 = vpop.f32.mrf.mxu0  ;;  %v6313_v4 = vsel %vm6273_vm14, %v5973_v21, 0.0  ;;  %6179 = vrot.lane.b32.xlu1 %v7120_v41, %s7696_s27  ;;  %6135 = vst.msk [vmem:[%s10321_s26 + $0x58] sm:$0xf] %vm266_vm1, %v7125_v33  ;;  %v7123_v43 = vpack.c.bf16 %v5973_v21, %v5973_v21 }
 0x27f   : > { %v5974_v30 = vadd.f32 %v5909_v3, %v5456_v22  ;;  %v5461_v34 = vadd.f32 %v7554_v55, %v10337_v17  ;;  %v6414_v25 = vsel %vm6273_vm14, %v6363_v52, 0.0  ;;  %v7126_v54 = vpack.c.bf16 %v5976_v48, %v5976_v48 }
 0x280   : > { %6189 = vrot.lane.b32.xlu0 %v7125_v33, %s7696_s27  ;;  %v5404_v13 = vpop.f32.mrf.mxu1  ;;  %v6314_v19 = vadd.f32 %v6313_v4, %v6312_v6  ;;  %v6413_v14 = vadd.f32 %v6412_v16, %v6411_v50  ;;  %v6366_v62 = vmul.f32 %v5976_v48, %v5976_v48  ;;  %v4658_v8 = vadd.f32 %v10943_v47, %v10372_v32 }
 0x281   : > { %v6315_v3 = vsel %vm6273_vm14, %v5974_v30, 0.0  ;;  %v6364_v17 = vmul.f32 %v5974_v30, %v5974_v30  ;;  %v5979_v53 = vadd.f32 %v10495_v24, %v5461_v34  ;;  %v5459_v20 = vadd.f32 %v5404_v13, %v10340_v58  ;;  %6136 = vst.msk [vmem:[%s10321_s26 + $0x5c] sm:$0xf] %vm266_vm1, %v7126_v54  ;;  %6133 = vst.msk [vmem:[%s10321_s26 + $0x50] sm:$0xf] %vm266_vm1, %v7123_v43 }
 0x282   : > { %v7555_v5 = vpop.f32.mrf.mxu1  ;;  %v6415_v10 = vadd.f32 %v6414_v25, %v6413_v14  ;;  %v6316_v51 = vadd.f32 %v6315_v3, %v6314_v19  ;;  %v6317_v15 = vsel %vm6273_vm14, %v5975_v59, 0.0  ;;  %6191 = vrot.lane.b32.xlu1 %v7126_v54, %s7696_s27  ;;  %v7124_v49 = vpack.c.bf16 %v5974_v30, %v5974_v30 }
 0x283   : > { %v6416_v45 = vsel %vm6273_vm14, %v6364_v17, 0.0  ;;  %v5462_v29 = vadd.f32 %v7555_v5, %v10343_v36  ;;  %v7592_v39 = vpop.f32.mrf.mxu0  ;;  %v5977_v24 = vadd.f32 %v10505_v28, %v5459_v20  ;;  %v6418_v57 = vsel %vm6273_vm14, %v6365_v11, 0.0 }
 0x284   : > { %6185 = vrot.lane.b32.xlu0 %v7123_v43, %s7696_s27  ;;  %v5407_v58 = vpop.f32.mrf.mxu1  ;;  %v6318_v46 = vadd.f32 %v6317_v15, %v6316_v51  ;;  %v6417_v40 = vadd.f32 %v6416_v45, %v6415_v10  ;;  %v6319_v32 = vsel %vm6273_vm14, %v5976_v48, 0.0  ;;  %6134 = vst.msk [vmem:[%s10321_s26 + $0x54] sm:$0xf] %vm266_vm1, %v7124_v49  ;;  %v7129_v59 = vpack.c.bf16 %v5979_v53, %v5979_v53 }
 0x285   : > { %v5980_v36 = vadd.f32 %v7589_v35, %v5462_v29  ;;  %v5460_v44 = vadd.f32 %v5407_v58, %v10352_v60  ;;  %v6367_v26 = vmul.f32 %v5977_v24, %v5977_v24  ;;  %v6420_v0 = vsel %vm6273_vm14, %v6366_v62, 0.0  ;;  %v5938_v9 = vpop.f32.mrf.mxu0 }
 0x286   : > { %v7558_v28 = vpop.f32.mrf.mxu1  ;;  %v6419_v56 = vadd.f32 %v6418_v57, %v6417_v40  ;;  %v6369_v37 = vmul.f32 %v5979_v53, %v5979_v53  ;;  %v6320_v1 = vadd.f32 %v6319_v32, %v6318_v46  ;;  %v6321_v31 = vsel %vm6273_vm14, %v5977_v24, 0.0  ;;  %6187 = vrot.lane.b32.xlu1 %v7124_v49, %s7696_s27  ;;  %6139 = vst.msk [vmem:[%s10321_s26 + $0x68] sm:$0xf] %vm266_vm1, %v7129_v59 }
 0x287   : > { %v5978_v60 = vadd.f32 %v5925_v23, %v5460_v44  ;;  %v5465_v35 = vadd.f32 %v7558_v28, %v10355_v12  ;;  %v7130_v21 = vpack.c.bf16 %v5980_v36, %v5980_v36  ;;  %v6422_v41 = vsel %vm6273_vm14, %v6367_v26, 0.0  ;;  %v7593_v50 = vpop.f32.mrf.mxu0 }
 0x288   : > { %6197 = vrot.lane.b32.xlu0 %v7129_v59, %s7696_s27  ;;  %v5420_v18 = vpop.f32.mrf.mxu1  ;;  %v6322_v42 = vadd.f32 %v6321_v31, %v6320_v1  ;;  %v6421_v38 = vadd.f32 %v6420_v0, %v6419_v56  ;;  %v7127_v16 = vpack.c.bf16 %v5977_v24, %v5977_v24  ;;  %v6325_v6 = vsel %vm6273_vm14, %v5979_v53, 0.0 }
 0x289   : > { %v5463_v63 = vadd.f32 %v5420_v18, %v10359_v27  ;;  %v6323_v2 = vsel %vm6273_vm14, %v5978_v60, 0.0  ;;  %v6368_v7 = vmul.f32 %v5978_v60, %v5978_v60  ;;  %v5983_v22 = vadd.f32 %v7592_v39, %v5465_v35  ;;  %6140 = vst.msk [vmem:[%s10321_s26 + $0x6c] sm:$0xf] %vm266_vm1, %v7130_v21  ;;  %v5941_v62 = vpop.f32.mrf.mxu0 }
 0x28a   : > { %v7559_v12 = vpop.f32.mrf.mxu1  ;;  %v6423_v52 = vadd.f32 %v6422_v41, %v6421_v38  ;;  %v6324_v48 = vadd.f32 %v6323_v2, %v6322_v42  ;;  %v6370_v30 = vmul.f32 %v5980_v36, %v5980_v36  ;;  %6199 = vrot.lane.b32.xlu1 %v7130_v21, %s7696_s27  ;;  %6137 = vst.msk [vmem:[%s10321_s26 + $0x60] sm:$0xf] %vm266_vm1, %v7127_v16  ;;  %v6426_v11 = vsel %vm6273_vm14, %v6369_v37, 0.0 }
 0x28b   : > { %v5981_v55 = vadd.f32 %v5938_v9, %v5463_v63  ;;  %v5466_v33 = vadd.f32 %v7559_v12, %v10362_v61  ;;  %v6424_v27 = vsel %vm6273_vm14, %v6368_v7, 0.0  ;;  %v7128_v23 = vpack.c.bf16 %v5978_v60, %v5978_v60 }
 0x28c   : > { %6193 = vrot.lane.b32.xlu0 %v7127_v16, %s7696_s27  ;;  %v5423_v34 = vpop.f32.mrf.mxu1  ;;  %v6327_v4 = vsel %vm6273_vm14, %v5980_v36, 0.0  ;;  %v6326_v61 = vadd.f32 %v6325_v6, %v6324_v48  ;;  %v6425_v25 = vadd.f32 %v6424_v27, %v6423_v52  ;;  %v7133_v53 = vpack.c.bf16 %v5983_v22, %v5983_v22 }
 0x28d   : > { %v6371_v13 = vmul.f32 %v5981_v55, %v5981_v55  ;;  %v5984_v54 = vadd.f32 %v7593_v50, %v5466_v33  ;;  %v5464_v19 = vadd.f32 %v5423_v34, %v4658_v8  ;;  %6138 = vst.msk [vmem:[%s10321_s26 + $0x64] sm:$0xf] %vm266_vm1, %v7128_v23  ;;  %v7131_v14 = vpack.c.bf16 %v5981_v55, %v5981_v55 }
 0x28e   : > { %v6427_v3 = vadd.f32 %v6426_v11, %v6425_v25  ;;  %v6328_v17 = vadd.f32 %v6327_v4, %v6326_v61  ;;  %v6428_v20 = vsel %vm6273_vm14, %v6370_v30, 0.0  ;;  %v6329_v5 = vsel %vm6273_vm14, %v5981_v55, 0.0  ;;  %6195 = vrot.lane.b32.xlu1 %v7128_v23, %s7696_s27  ;;  %6143 = vst.msk [vmem:[%s10321_s26 + $0x78] sm:$0xf] %vm266_vm1, %v7133_v53 }
 0x28f   : > { %v5982_v43 = vadd.f32 %v5941_v62, %v5464_v19  ;;  %6141 = vst.msk [vmem:[%s10321_s26 + $0x70] sm:$0xf] %vm266_vm1, %v7131_v14  ;;  %v7134_v10 = vpack.c.bf16 %v5984_v54, %v5984_v54  ;;  %v6373_v51 = vmul.f32 %v5983_v22, %v5983_v22  ;;  %v6430_v39 = vsel %vm6273_vm14, %v6371_v13, 0.0 }
 0x290   : > { %6201 = vrot.lane.b32.xlu0 %v7131_v14, %s7696_s27  ;;  %v6330_v45 = vadd.f32 %v6329_v5, %v6328_v17  ;;  %v6429_v29 = vadd.f32 %v6428_v20, %v6427_v3  ;;  %v6333_v49 = vsel %vm6273_vm14, %v5983_v22, 0.0  ;;  %v6374_v46 = vmul.f32 %v5984_v54, %v5984_v54 }
 0x291   : > { %v6331_v47 = vsel %vm6273_vm14, %v5982_v43, 0.0  ;;  %v6372_v8 = vmul.f32 %v5982_v43, %v5982_v43  ;;  %v7132_v15 = vpack.c.bf16 %v5982_v43, %v5982_v43  ;;  %6144 = vst.msk [vmem:[%s10321_s26 + $0x7c] sm:$0xf] %vm266_vm1, %v7134_v10  ;;  %v6434_v57 = vsel %vm6273_vm14, %v6373_v51, 0.0 }
 0x292   : > { %v6431_v24 = vadd.f32 %v6430_v39, %v6429_v29  ;;  %v6332_v58 = vadd.f32 %v6331_v47, %v6330_v45  ;;  %v6335_v32 = vsel %vm6273_vm14, %v5984_v54, 0.0  ;;  %v6436_v59 = vsel %vm6273_vm14, %v6374_v46, 0.0 }
 0x293   : > { %v6432_v40 = vsel %vm6273_vm14, %v6372_v8, 0.0  ;;  %6142 = vst.msk [vmem:[%s10321_s26 + $0x74] sm:$0xf] %vm266_vm1, %v7132_v15  ;;  %6203 = vrot.lane.b32.xlu1 %v7132_v15, %s7696_s27 }
 0x294   : > { %6205 = vrot.lane.b32.xlu0 %v7133_v53, %s7696_s27  ;;  %v6334_v36 = vadd.f32 %v6333_v49, %v6332_v58  ;;  %v6433_v44 = vadd.f32 %v6432_v40, %v6431_v24 }
 0x296   : > { %v6336_v26 = vadd.f32 %v6335_v32, %v6334_v36  ;;  %v6435_v28 = vadd.f32 %v6434_v57, %v6433_v44 }
 0x297   : > { %6207 = vrot.lane.b32.xlu1 %v7134_v10, %s7696_s27 }
 0x298   : > { %v6337_v0 = vrot.slane %v6336_v26, 4  ;;  %v6437_v56 = vadd.f32 %v6436_v59, %v6435_v28 }
 0x29a   : > { %v6338_v37 = vadd.f32 %v6337_v0, %v6336_v26  ;;  %v6438_v1 = vrot.slane %v6437_v56, 4 }
 0x29c   : > { %v6339_v9 = vrot.slane %v6338_v37, 2  ;;  %v6439_v31 = vadd.f32 %v6438_v1, %v6437_v56 }
 0x29e   : > { %v6340_v60 = vadd.f32 %v6339_v9, %v6338_v37  ;;  %v6440_v35 = vrot.slane %v6439_v31, 2 }
 0x2a0   : > { %v6341_v18 = vrot.slane %v6340_v60, 1  ;;  %v6441_v21 = vadd.f32 %v6440_v35, %v6439_v31 }
 0x2a2   : > { %v6342_v42 = vadd.f32 %v6341_v18, %v6340_v60  ;;  %v6442_v38 = vrot.slane %v6441_v21, 1 }
 0x2a4   : > { %v6443_v41 = vadd.f32 %v6442_v38, %v6441_v21  ;;  %6444 = vst.msk [vmem:[%s260_s6] sm:$0xff] %vm6273_vm14, %v6342_v42 }
 0x2a6   : > { %6445 = vst.msk [vmem:[%s264_s9] sm:$0xff] %vm6273_vm14, %v6443_v41 }
 0x2c7   : > { %v6150_v63 = vpop.permute.xlu1 %6149 }
 0x2c8   : > { %6243 = vst.msk [vmem:[%s10614_s11 + $0x8] sm:$0xf] %vm266_vm1, %v6150_v63 }
 0x2c9   : > { %v6146_v2 = vpop.permute.xlu0 %6145 }
 0x2ca   : > { %6241 = vst.msk [vmem:[%s10614_s11] sm:$0xf] %vm266_vm1, %v6146_v2 }
 0x2cb   : > { %v6152_v7 = vpop.permute.xlu1 %6151 }
 0x2cc   : > { %6244 = vst.msk [vmem:[%s10614_s11 + $0xc] sm:$0xf] %vm266_vm1, %v6152_v7 }
 0x2ce   : > { %v6148_v22 = vpop.permute.xlu0 %6147 }
 0x2cf   : > { %6242 = vst.msk [vmem:[%s10614_s11 + $0x4] sm:$0xf] %vm266_vm1, %v6148_v22 }
 0x2d2   : > { %v6158_v12 = vpop.permute.xlu0 %6157 }
 0x2d3   : > { %6247 = vst.msk [vmem:[%s10614_s11 + $0x18] sm:$0xf] %vm266_vm1, %v6158_v12 }
 0x2d4   : > { %v6160_v16 = vpop.permute.xlu1 %6159 }
 0x2d5   : > { %6248 = vst.msk [vmem:[%s10614_s11 + $0x1c] sm:$0xf] %vm266_vm1, %v6160_v16 }
 0x2d6   : > { %v6154_v52 = vpop.permute.xlu0 %6153 }
 0x2d7   : > { %6245 = vst.msk [vmem:[%s10614_s11 + $0x10] sm:$0xf] %vm266_vm1, %v6154_v52 }
 0x2d8   : > { %v6156_v48 = vpop.permute.xlu1 %6155 }
 0x2d9   : > { %6246 = vst.msk [vmem:[%s10614_s11 + $0x14] sm:$0xf] %vm266_vm1, %v6156_v48 }
 0x2da   : > { %v6166_v55 = vpop.permute.xlu0 %6165 }
 0x2db   : > { %6251 = vst.msk [vmem:[%s10614_s11 + $0x28] sm:$0xf] %vm266_vm1, %v6166_v55 }
 0x2dc   : > { %v6168_v33 = vpop.permute.xlu1 %6167 }
 0x2dd   : > { %6252 = vst.msk [vmem:[%s10614_s11 + $0x2c] sm:$0xf] %vm266_vm1, %v6168_v33 }
 0x2de   : > { %v6162_v50 = vpop.permute.xlu0 %6161 }
 0x2df   : > { %6249 = vst.msk [vmem:[%s10614_s11 + $0x20] sm:$0xf] %vm266_vm1, %v6162_v50 }
 0x2e0   : > { %v6164_v6 = vpop.permute.xlu1 %6163 }
 0x2e1   : > { %6250 = vst.msk [vmem:[%s10614_s11 + $0x24] sm:$0xf] %vm266_vm1, %v6164_v6 }
 0x2e2   : > { %v6174_v30 = vpop.permute.xlu0 %6173 }
 0x2e3   : > { %6255 = vst.msk [vmem:[%s10614_s11 + $0x38] sm:$0xf] %vm266_vm1, %v6174_v30 }
 0x2e4   : > { %v6176_v27 = vpop.permute.xlu1 %6175 }
 0x2e5   : > { %6256 = vst.msk [vmem:[%s10614_s11 + $0x3c] sm:$0xf] %vm266_vm1, %v6176_v27 }
 0x2e6   : > { %v6170_v34 = vpop.permute.xlu0 %6169 }
 0x2e7   : > { %6253 = vst.msk [vmem:[%s10614_s11 + $0x30] sm:$0xf] %vm266_vm1, %v6170_v34 }
 0x2e8   : > { %v6172_v23 = vpop.permute.xlu1 %6171 }
 0x2e9   : > { %6254 = vst.msk [vmem:[%s10614_s11 + $0x34] sm:$0xf] %vm266_vm1, %v6172_v23 }
 0x2ea   : > { %v6182_v11 = vpop.permute.xlu0 %6181 }
 0x2eb   : > { %6259 = vst.msk [vmem:[%s10614_s11 + $0x48] sm:$0xf] %vm266_vm1, %v6182_v11 }
 0x2ec   : > { %v6184_v4 = vpop.permute.xlu1 %6183 }
 0x2ed   : > { %6260 = vst.msk [vmem:[%s10614_s11 + $0x4c] sm:$0xf] %vm266_vm1, %v6184_v4 }
 0x2ee   : > { %v6178_v61 = vpop.permute.xlu0 %6177 }
 0x2ef   : > { %6257 = vst.msk [vmem:[%s10614_s11 + $0x40] sm:$0xf] %vm266_vm1, %v6178_v61 }
 0x2f0   : > { %v6180_v25 = vpop.permute.xlu1 %6179 }
 0x2f1   : > { %6258 = vst.msk [vmem:[%s10614_s11 + $0x44] sm:$0xf] %vm266_vm1, %v6180_v25 }
 0x2f2   : > { %v6190_v13 = vpop.permute.xlu0 %6189 }
 0x2f3   : > { %6263 = vst.msk [vmem:[%s10614_s11 + $0x58] sm:$0xf] %vm266_vm1, %v6190_v13 }
 0x2f4   : > { %v6192_v54 = vpop.permute.xlu1 %6191 }
 0x2f5   : > { %6264 = vst.msk [vmem:[%s10614_s11 + $0x5c] sm:$0xf] %vm266_vm1, %v6192_v54 }
 0x2f6   : > { %v6186_v19 = vpop.permute.xlu0 %6185 }
 0x2f7   : > { %6261 = vst.msk [vmem:[%s10614_s11 + $0x50] sm:$0xf] %vm266_vm1, %v6186_v19 }
 0x2f8   : > { %v6188_v14 = vpop.permute.xlu1 %6187 }
 0x2f9   : > { %6262 = vst.msk [vmem:[%s10614_s11 + $0x54] sm:$0xf] %vm266_vm1, %v6188_v14 }
 0x2fa   : > { %v6198_v3 = vpop.permute.xlu0 %6197 }
 0x2fb   : > { %6267 = vst.msk [vmem:[%s10614_s11 + $0x68] sm:$0xf] %vm266_vm1, %v6198_v3 }
 0x2fc   : > { %v6200_v17 = vpop.permute.xlu1 %6199 }
 0x2fd   : > { %6268 = vst.msk [vmem:[%s10614_s11 + $0x6c] sm:$0xf] %vm266_vm1, %v6200_v17 }
 0x2fe   : > { %v6194_v62 = vpop.permute.xlu0 %6193 }
 0x2ff   : > { %6265 = vst.msk [vmem:[%s10614_s11 + $0x60] sm:$0xf] %vm266_vm1, %v6194_v62 }
 0x300   : > { %v6196_v53 = vpop.permute.xlu1 %6195 }
 0x301   : > { %6266 = vst.msk [vmem:[%s10614_s11 + $0x64] sm:$0xf] %vm266_vm1, %v6196_v53 }
 0x302   : > { %v6202_v20 = vpop.permute.xlu0 %6201 }
 0x303   : > { %6269 = vst.msk [vmem:[%s10614_s11 + $0x70] sm:$0xf] %vm266_vm1, %v6202_v20 }
 0x305   : > { %v6204_v43 = vpop.permute.xlu1 %6203 }
 0x306   : > { %v6206_v5 = vpop.permute.xlu0 %6205  ;;  %6270 = vst.msk [vmem:[%s10614_s11 + $0x74] sm:$0xf] %vm266_vm1, %v6204_v43 }
 0x307   : > { %6271 = vst.msk [vmem:[%s10614_s11 + $0x78] sm:$0xf] %vm266_vm1, %v6206_v5 }
 0x309   : > { %v6208_v10 = vpop.permute.xlu1 %6207 }
 0x30a   : > { %6272 = vst.msk [vmem:[%s10614_s11 + $0x7c] sm:$0xf] %vm266_vm1, %v6208_v10 }
 0x30b PF: > { %s16_s18 = sadd.s32 1, %s7693_s18  }
 0x30c   : > { %p13_p6 = scmp.ge.s32.totalorder %s16_s18, 4  }
 0x30e   :  { %15 = sbr.rel (!%p13_p6) target bundleno = 1 (0x1), region = 104 }

// kernel: basic_block_forward.7
= control target key start
LH: loop header
LB: loop body
LE: loop exit
PB: predicated region body
PF: predicated region fallthrough
CT: control target
= control target key end

     0   :  { %s7314_s15 = smov 0   ;;  %s10185_s0 = inlined_call_operand.vmem [shape: bf16[8,8,8,8], index: 0, kind: input, shape index: {}]   ;;  %s10186_s1 = inlined_call_operand.vmem [shape: bf16[9,8,8], index: 1, kind: input, shape index: {}]   ;;  %s10187_s2 = inlined_call_operand.vmem [shape: bf16[512,8], index: 2, kind: output, shape index: {0}]   ;;  %s10188_s3 = inlined_call_operand.vmem [shape: f32[2,8,8], index: 3, kind: output, shape index: {1}]   ;;  %s10189_s4 = inlined_call_operand.vmem [shape: f32[2,8,8], index: 4, kind: output, shape index: {2}]  }
   0x1 LB: > { %s7320_s16 = sadd.s32 4294967295, %s7286_s15   ;;  %p6271_p0 = scmp.ge.s32.totalorder %s7286_s15, 1  ;;  %s7286_s15 = sphi %s7314_s15, %s15_s15  }
   0x2   : > { %p169_p1 = scmp.lt.s32.totalorder %s7286_s15, 3 }
   0x4   : > { %p170_p2 = pnand %p6271_p0, %p169_p1 }
   0x6   : > { %173 = sbr.rel (%p170_p2) target bundleno = 682 (0x2aa), region = 28 }
   0xb   : > { %v6279_v0 = vld [vmem:[%s10186_s1 + $0x4] sm:$0xf]  ;;  %vm1474_vm0 = vcmask 1043456   ;;  %s6272_s19 = sshll.u32 %s7320_s16, 2  ;;  %vm226_vm1 = vcmask 60416   ;;  %v7288_v2 = vmov 0  }
   0xc   : > { %7200 = vmatprep.subr.msk.bf16.mxu1 %vm1474_vm0, %v6279_v0  ;;  %7199 = vmatprep.subr.msk.bf16.mxu0 %vm1474_vm0, %v6279_v0  ;;  %v1476_v1 = vsel %vm1474_vm0, %v6279_v0, 0  ;;  %p7333_p3 = scmp.lt.s32.totalorder %s6272_s19, 7  ;;  %227 = vst.msk [vmem:[#allocation2] sm:$0xf] %vm226_vm1, %v7288_v2  ;;  %vm228_vm2 = vcmask 57344   ;;  %v10230_v15 = vmov 0 }
   0xd   : > { %230 = vst.msk [vmem:[#allocation2 + $0x8] sm:$0xf] %vm226_vm1, %v7288_v2  ;;  %232 = vst.msk [vmem:[#allocation2 + $0x10] sm:$0xf] %vm226_vm1, %v7288_v2  ;;  %7198 = vmatpush3.bf16.msra.mxu1 %v1476_v1  ;;  %6892 = vmatpush3.bf16.msra.mxu0 %v1476_v1  ;;  %v891_v3 = vld [vmem:[%s10186_s1] sm:$0xf] }
   0xe   : > { %234 = vst.msk [vmem:[#allocation2 + $0x18] sm:$0xf] %vm226_vm1, %v7288_v2  ;;  %236 = vst.msk [vmem:[#allocation2 + $0x20] sm:$0xf] %vm226_vm1, %v7288_v2  ;;  %s10487_s19 = smov (!%p7333_p3, %s6272_s19), 7  ;;  %7201 = vmatprep.subr.msk.bf16.mxu1 %vm1474_vm0, %v891_v3  ;;  %v10233_v18 = vmov 0 }
   0xf   : > { %238 = vst.msk [vmem:[#allocation2 + $0x28] sm:$0xf] %vm226_vm1, %v7288_v2  ;;  %240 = vst.msk [vmem:[#allocation2 + $0x30] sm:$0xf] %vm226_vm1, %v7288_v2  ;;  %v6376_v4 = vld [vmem:[%s10186_s1 + $0x8] sm:$0xf] }
  0x10   : > { %242 = vst.msk [vmem:[#allocation2 + $0x38] sm:$0xf] %vm226_vm1, %v7288_v2  ;;  %244 = vst.msk [vmem:[#allocation2 + $0x40] sm:$0xf] %vm226_vm1, %v7288_v2  ;;  %7202 = vmatprep.subr.msk.bf16.mxu0 %vm1474_vm0, %v6376_v4  ;;  %s6705_s25 = sshll.u32 %s10487_s19, 5  ;;  %v7541_v42 = vsel %vm1474_vm0, %v891_v3, 0 }
  0x11   : > { %246 = vst.msk [vmem:[#allocation2 + $0x48] sm:$0xf] %vm226_vm1, %v7288_v2  ;;  %248 = vst.msk [vmem:[#allocation2 + $0x50] sm:$0xf] %vm226_vm1, %v7288_v2  ;;  %s7512_s28 = scalar_lea.vmem %s10185_s0, %s6705_s25  ;;  %vm662_vm3 = vsmask.f32 7938 }
  0x12   : > { %250 = vst.msk [vmem:[#allocation2 + $0x58] sm:$0xf] %vm226_vm1, %v7288_v2  ;;  %252 = vst.msk [vmem:[#allocation2 + $0x60] sm:$0xf] %vm226_vm1, %v7288_v2  ;;  %v308_v5 = vld [vmem:[%s7512_s28] sm:$0xf] }
  0x13   : > { %254 = vst.msk [vmem:[#allocation2 + $0x68] sm:$0xf] %vm226_vm1, %v7288_v2  ;;  %256 = vst.msk [vmem:[#allocation2 + $0x70] sm:$0xf] %vm226_vm1, %v7288_v2  ;;  %vm668_vm4 = vsmask.f32 256 }
  0x14   : > { %258 = vst.msk [vmem:[#allocation2 + $0x78] sm:$0xf] %vm226_vm1, %v7288_v2  ;;  %260 = vst.msk [vmem:[#allocation2 + $0x80] sm:$0xf] %vm226_vm1, %v7288_v2  ;;  %v324_v6 = vld [vmem:[%s7512_s28 + $0x40] sm:$0xf] }
  0x15   : > { %262 = vst.msk [vmem:[#allocation2 + $0x88] sm:$0xf] %vm226_vm1, %v7288_v2  ;;  %264 = vst.msk [vmem:[#allocation2 + $0x90] sm:$0xf] %vm226_vm1, %v7288_v2  ;;  %v341_v7 = vshrl.u32 %v308_v5, 16  ;;  %v344_v8 = vshll.u32 %v308_v5, 16 }
  0x16   : > { %266 = vst.msk [vmem:[#allocation2 + $0x98] sm:$0xf] %vm226_vm1, %v7288_v2  ;;  %268 = vst.msk [vmem:[#allocation2 + $0xa0] sm:$0xf] %vm226_vm1, %v7288_v2  ;;  %v7516_v9 = vld [vmem:[#allocation2] sm:$0xf] }
  0x17   : > { %270 = vst.msk [vmem:[#allocation2 + $0xa8] sm:$0xf] %vm226_vm1, %v7288_v2  ;;  %272 = vst.msk [vmem:[#allocation2 + $0xb0] sm:$0xf] %vm226_vm1, %v7288_v2  ;;  %vm924_vm5 = vsmask.f32 3328 }
  0x18   : > { %274 = vst.msk [vmem:[#allocation2 + $0xb8] sm:$0xf] %vm226_vm1, %v7288_v2  ;;  %276 = vst.msk [vmem:[#allocation2 + $0xc0] sm:$0xf] %vm226_vm1, %v7288_v2  ;;  %v928_v11 = vshrl.u32 %v7516_v9, 16  ;;  %v931_v12 = vshll.u32 %v7516_v9, 16 }
  0x19   : > { %278 = vst.msk [vmem:[#allocation2 + $0xc8] sm:$0xf] %vm226_vm1, %v7288_v2  ;;  %280 = vst.msk [vmem:[#allocation2 + $0xd0] sm:$0xf] %vm226_vm1, %v7288_v2  ;;  %v309_v13 = vld [vmem:[%s7512_s28 + $0x4] sm:$0xf] }
  0x1a   : > { %282 = vst.msk [vmem:[#allocation2 + $0xd8] sm:$0xf] %vm226_vm1, %v7288_v2  ;;  %284 = vst.msk [vmem:[#allocation2 + $0xe0] sm:$0xf] %vm226_vm1, %v7288_v2  ;;  %v343_v14 = vrot.slane %v341_v7, 7  ;;  %v469_v17 = vshrl.u32 %v324_v6, 16 }
  0x1b   : > { %286 = vst.msk [vmem:[#allocation2 + $0xe8] sm:$0xf] %vm226_vm1, %v7288_v2  ;;  %288 = vst.msk [vmem:[#allocation2 + $0xf0] sm:$0xf] %vm226_vm1, %v7288_v2  ;;  %v664_v16 = vld [vmem:[#allocation2 + $0x8] sm:$0xf] }
  0x1c   : > { %290 = vst.msk [vmem:[#allocation2 + $0xf8] sm:$0xf] %vm226_vm1, %v7288_v2  ;;  %292 = vst.msk [vmem:[#allocation2 + $0x100] sm:$0xf] %vm226_vm1, %v7288_v2  ;;  %vm925_vm7 = vsmask.f32 7440  ;;  %v346_v24 = vor.u32 %v344_v8, %v343_v14 }
  0x1d   : > { %294 = vst.msk [vmem:[#allocation2 + $0x108] sm:$0xf] %vm226_vm1, %v7288_v2  ;;  %296 = vst.msk [vmem:[#allocation2 + $0x110] sm:$0xf] %vm226_vm1, %v7288_v2  ;;  %v930_v20 = vrot.slane %v928_v11, 4  ;;  %v933_v21 = vrot.slane %v931_v12, 5 }
  0x1e   : > { %298 = vst.msk [vmem:[#allocation2 + $0x118] sm:$0xf] %vm226_vm1, %v7288_v2  ;;  %300 = vst.msk [vmem:[#allocation2 + $0x120] sm:$0xf] %vm226_vm1, %v7288_v2  ;;  %v472_v23 = vshll.u32 %v324_v6, 16  ;;  %v347_v25 = vrot.slane %v343_v14, 4 }
  0x1f   : > { %302 = vst.msk [vmem:[#allocation2 + $0x128] sm:$0xf] %vm226_vm1, %v7288_v2  ;;  %304 = vst.msk [vmem:[#allocation2 + $0x130] sm:$0xf] %vm226_vm1, %v7288_v2  ;;  %v471_v26 = vrot.slane %v469_v17, 7  ;;  %v349_v28 = vshrl.u32 %v309_v13, 16  ;;  %v934_v29 = vor.u32 %v933_v21, %v930_v20 }
  0x20   : > { %306 = vst.msk [vmem:[#allocation2 + $0x138] sm:$0xf] %vm226_vm1, %v7288_v2  ;;  %vm7524_vm6 = vmand %vm226_vm1, %vm662_vm3  ;;  %v875_v27 = vld [vmem:[#allocation2 + $0xa0] sm:$0xf]  ;;  %v763_v30 = vld [vmem:[#allocation2 + $0xa8] sm:$0xf] }
  0x21   : > { %229 = vst.msk [vmem:[#allocation2 + $0x4] sm:$0x1] %vm228_vm2, %v7288_v2  ;;  %231 = vst.msk [vmem:[#allocation2 + $0xc] sm:$0x1] %vm228_vm2, %v7288_v2  ;;  %v10231_v15 = vsel %vm7524_vm6, 4294967295, %v10230_v15  ;;  %v1152_v32 = vshrl.u32 %v875_v27, 16  ;;  %v665_v34 = vsel %vm7524_vm6, %v346_v24, %v664_v16  ;;  %v474_v36 = vor.u32 %v472_v23, %v471_v26 }
  0x22   : > { %233 = vst.msk [vmem:[#allocation2 + $0x14] sm:$0x1] %vm228_vm2, %v7288_v2  ;;  %235 = vst.msk [vmem:[#allocation2 + $0x1c] sm:$0x1] %vm228_vm2, %v7288_v2  ;;  %v1155_v33 = vshll.u32 %v875_v27, 16  ;;  %v475_v37 = vrot.slane %v471_v26, 4 }
  0x23   : > { %237 = vst.msk [vmem:[#allocation2 + $0x24] sm:$0x1] %vm228_vm2, %v7288_v2  ;;  %239 = vst.msk [vmem:[#allocation2 + $0x2c] sm:$0x1] %vm228_vm2, %v7288_v2  ;;  %v1154_v39 = vrot.slane %v1152_v32, 4  ;;  %v7544_v43 = vsel %vm1474_vm0, %v6376_v4, 0  ;;  %v764_v45 = vsel %vm7524_vm6, %v474_v36, %v763_v30 }
  0x24   : > { %241 = vst.msk [vmem:[#allocation2 + $0x34] sm:$0x1] %vm228_vm2, %v7288_v2  ;;  %243 = vst.msk [vmem:[#allocation2 + $0x3c] sm:$0x1] %vm228_vm2, %v7288_v2  ;;  %v1157_v40 = vrot.slane %v1155_v33, 5  ;;  %v351_v47 = vrot.slane %v349_v28, 7 }
  0x25   : > { %245 = vst.msk [vmem:[#allocation2 + $0x44] sm:$0x1] %vm228_vm2, %v7288_v2  ;;  %247 = vst.msk [vmem:[#allocation2 + $0x4c] sm:$0x1] %vm228_vm2, %v7288_v2  ;;  %v310_v41 = vld [vmem:[%s7512_s28 + $0x8] sm:$0xf] }
  0x26   : > { %249 = vst.msk [vmem:[#allocation2 + $0x54] sm:$0x1] %vm228_vm2, %v7288_v2  ;;  %251 = vst.msk [vmem:[#allocation2 + $0x5c] sm:$0x1] %vm228_vm2, %v7288_v2  ;;  %v325_v49 = vld [vmem:[%s7512_s28 + $0x44] sm:$0xf]  ;;  %v1158_v51 = vor.u32 %v1157_v40, %v1154_v39 }
  0x27   : > { %253 = vst.msk [vmem:[#allocation2 + $0x64] sm:$0x1] %vm228_vm2, %v7288_v2  ;;  %255 = vst.msk [vmem:[#allocation2 + $0x6c] sm:$0x1] %vm228_vm2, %v7288_v2  ;;  %v7553_v50 = vrot.slane %v934_v29, 4  ;;  %v352_v53 = vshll.u32 %v309_v13, 16 }
  0x28   : > { %257 = vst.msk [vmem:[#allocation2 + $0x74] sm:$0x1] %vm228_vm2, %v7288_v2  ;;  %259 = vst.msk [vmem:[#allocation2 + $0x7c] sm:$0x1] %vm228_vm2, %v7288_v2  ;;  %v7518_v10 = vld [vmem:[#allocation2 + $0x4] sm:$0x1] }
  0x29   : > { %261 = vst.msk [vmem:[#allocation2 + $0x84] sm:$0x1] %vm228_vm2, %v7288_v2  ;;  %263 = vst.msk [vmem:[#allocation2 + $0x8c] sm:$0x1] %vm228_vm2, %v7288_v2  ;;  %v670_v19 = vld [vmem:[#allocation2 + $0xc] sm:$0x1]  ;;  %v354_v62 = vor.u32 %v352_v53, %v351_v47 }
  0x2a   : > { %265 = vst.msk [vmem:[#allocation2 + $0x94] sm:$0x1] %vm228_vm2, %v7288_v2  ;;  %267 = vst.msk [vmem:[#allocation2 + $0x9c] sm:$0x1] %vm228_vm2, %v7288_v2  ;;  %v937_v22 = vshll.u32 %v7518_v10, 16  ;;  %v355_v56 = vrot.slane %v351_v47, 4 }
  0x2b   : > { %269 = vst.msk [vmem:[#allocation2 + $0xa4] sm:$0x1] %vm228_vm2, %v7288_v2  ;;  %271 = vst.msk [vmem:[#allocation2 + $0xac] sm:$0x1] %vm228_vm2, %v7288_v2  ;;  %v676_v48 = vld [vmem:[#allocation2 + $0x14] sm:$0x1] }
  0x2c   : > { %273 = vst.msk [vmem:[#allocation2 + $0xb4] sm:$0x1] %vm228_vm2, %v7288_v2  ;;  %275 = vst.msk [vmem:[#allocation2 + $0xbc] sm:$0x1] %vm228_vm2, %v7288_v2  ;;  %v7546_v44 = vrot.slane %v937_v22, 5  ;;  %v357_v57 = vshrl.u32 %v310_v41, 16 }
  0x2d   : > { %277 = vst.msk [vmem:[#allocation2 + $0xc4] sm:$0x1] %vm228_vm2, %v7288_v2  ;;  %279 = vst.msk [vmem:[#allocation2 + $0xcc] sm:$0x1] %vm228_vm2, %v7288_v2  ;;  %v326_v54 = vld [vmem:[%s7512_s28 + $0x48] sm:$0xf] }
  0x2e   : > { %281 = vst.msk [vmem:[#allocation2 + $0xd4] sm:$0x1] %vm228_vm2, %v7288_v2  ;;  %283 = vst.msk [vmem:[#allocation2 + $0xdc] sm:$0x1] %vm228_vm2, %v7288_v2  ;;  %v360_v58 = vshll.u32 %v310_v41, 16  ;;  %v477_v60 = vshrl.u32 %v325_v49, 16 }
  0x2f   : > { %285 = vst.msk [vmem:[#allocation2 + $0xe4] sm:$0x1] %vm228_vm2, %v7288_v2  ;;  %287 = vst.msk [vmem:[#allocation2 + $0xec] sm:$0x1] %vm228_vm2, %v7288_v2  ;;  %v673_v59 = vld [vmem:[#allocation2 + $0x10] sm:$0xf] }
  0x30   : > { %289 = vst.msk [vmem:[#allocation2 + $0xf4] sm:$0x1] %vm228_vm2, %v7288_v2  ;;  %291 = vst.msk [vmem:[#allocation2 + $0xfc] sm:$0x1] %vm228_vm2, %v7288_v2  ;;  %v480_v63 = vshll.u32 %v325_v49, 16  ;;  %v485_v0 = vshrl.u32 %v326_v54, 16  ;;  %v674_v8 = vsel %vm7524_vm6, %v354_v62, %v673_v59 }
  0x31   : > { %293 = vst.msk [vmem:[#allocation2 + $0x104] sm:$0x1] %vm228_vm2, %v7288_v2  ;;  %295 = vst.msk [vmem:[#allocation2 + $0x10c] sm:$0x1] %vm228_vm2, %v7288_v2  ;;  %v359_v1 = vrot.slane %v357_v57, 7  ;;  %v479_v4 = vrot.slane %v477_v60, 7 }
  0x32   : > { %297 = vst.msk [vmem:[#allocation2 + $0x114] sm:$0x1] %vm228_vm2, %v7288_v2  ;;  %299 = vst.msk [vmem:[#allocation2 + $0x11c] sm:$0x1] %vm228_vm2, %v7288_v2  ;;  %v766_v31 = vld [vmem:[#allocation2 + $0xac] sm:$0x1] }
  0x33   : > { %301 = vst.msk [vmem:[#allocation2 + $0x124] sm:$0x1] %vm228_vm2, %v7288_v2  ;;  %303 = vst.msk [vmem:[#allocation2 + $0x12c] sm:$0x1] %vm228_vm2, %v7288_v2  ;;  %v908_v38 = vld [vmem:[#allocation2 + $0xa4] sm:$0x1]  ;;  %v482_v21 = vor.u32 %v480_v63, %v479_v4 }
  0x34   : > { %305 = vst.msk [vmem:[#allocation2 + $0x134] sm:$0x1] %vm228_vm2, %v7288_v2  ;;  %307 = vst.msk [vmem:[#allocation2 + $0x13c] sm:$0x1] %vm228_vm2, %v7288_v2  ;;  %v1161_v52 = vshll.u32 %v908_v38, 16  ;;  %v488_v5 = vshll.u32 %v326_v54, 16 }
  0x35   : > { %10232 = vst [vmem:[#allocation3_spill] sm:$0xff] %v10231_v15  ;;  %vm7530_vm8 = vmand %vm228_vm2, %vm668_vm4  ;;  %v679_v3 = vld [vmem:[#allocation2 + $0x18] sm:$0xf]  ;;  %v682_v11 = vld [vmem:[#allocation2 + $0x1c] sm:$0x1]  ;;  %v487_v12 = vrot.slane %v485_v0, 7 }
  0x36   : > { %v10234_v18 = vsel %vm7530_vm8, 4294967295, %v10233_v18  ;;  %v671_v35 = vsel %vm7530_vm8, %v347_v25, %v670_v19  ;;  %666 = vst [vmem:[#allocation2 + $0x8] sm:$0xf] %v665_v34  ;;  %v767_v46 = vsel %vm7530_vm8, %v475_v37, %v766_v31  ;;  %765 = vst [vmem:[#allocation2 + $0xa8] sm:$0xf] %v764_v45  ;;  %v677_v2 = vsel %vm7530_vm8, %v355_v56, %v676_v48  ;;  %s6275_s17 = sshll.u32 %s7320_s16, 5 }
  0x37   : > { %10235 = vst [vmem:[#allocation4_spill] sm:$0xff] %v10234_v18  ;;  %672 = vst [vmem:[#allocation2 + $0xc] sm:$0x1] %v671_v35  ;;  %v7569_v7 = vrot.slane %v1161_v52, 5  ;;  %v769_v13 = vld [vmem:[#allocation2 + $0xb0] sm:$0xf]  ;;  %v362_v19 = vor.u32 %v360_v58, %v359_v1  ;;  %v490_v33 = vor.u32 %v488_v5, %v487_v12 }
  0x38   : > { %768 = vst [vmem:[#allocation2 + $0xac] sm:$0x1] %v767_v46  ;;  %vm7558_vm9 = vmor %vm924_vm5, %vm925_vm7  ;;  %v7577_v17 = vrot.slane %v1158_v51, 4  ;;  %v363_v20 = vrot.slane %v359_v1, 4  ;;  %v772_v22 = vld [vmem:[#allocation2 + $0xb4] sm:$0x1]  ;;  %v770_v46 = vsel %vm7524_vm6, %v482_v21, %v769_v13 }
  0x39   : > { %v940_v6 = vsel %vm7558_vm9, %v7553_v50, %v7546_v44  ;;  %678 = vst [vmem:[#allocation2 + $0x14] sm:$0x1] %v677_v2  ;;  %675 = vst [vmem:[#allocation2 + $0x10] sm:$0xf] %v674_v8  ;;  %v775_v23 = vld [vmem:[#allocation2 + $0xb8] sm:$0xf]  ;;  %v680_v31 = vsel %vm7524_vm6, %v362_v19, %v679_v3 }
  0x3a   : > { %vm1425_vm10 = vcmask 64512   ;;  %v483_v27 = vrot.slane %v479_v4, 4  ;;  %v778_v28 = vld [vmem:[#allocation2 + $0xbc] sm:$0x1]  ;;  %v683_v32 = vsel %vm7530_vm8, %v363_v20, %v682_v11  ;;  %v491_v34 = vrot.slane %v487_v12, 4  ;;  %p9851_p4 = scmp.lt.s32.totalorder %s6275_s17, 63 }
  0x3b   : > { %681 = vst [vmem:[#allocation2 + $0x18] sm:$0xf] %v680_v31  ;;  %684 = vst [vmem:[#allocation2 + $0x1c] sm:$0x1] %v683_v32  ;;  %v311_v39 = vld [vmem:[%s7512_s28 + $0xc] sm:$0xf]  ;;  %v776_v51 = vsel %vm7524_vm6, %v490_v33, %v775_v23  ;;  %v1164_v19 = vsel %vm7558_vm9, %v7577_v17, %v7569_v7 }
  0x3c   : > { %771 = vst [vmem:[#allocation2 + $0xb0] sm:$0xf] %v770_v46  ;;  %v773_v49 = vsel %vm7530_vm8, %v483_v27, %v772_v22  ;;  %v7595_v52 = vld [vmem:[%s7512_s28 + $0x10] sm:$0xf]  ;;  %777 = vst [vmem:[#allocation2 + $0xb8] sm:$0xf] %v776_v51  ;;  %v779_v57 = vsel %vm7530_vm8, %v491_v34, %v778_v28 }
  0x3d   : > { %v7573_v14 = vld [vmem:[#allocation2 + $0x8] sm:$0xf]  ;;  %774 = vst [vmem:[#allocation2 + $0xb4] sm:$0x1] %v773_v49  ;;  %v365_v58 = vshrl.u32 %v311_v39, 16  ;;  %v368_v0 = vshll.u32 %v311_v39, 16 }
  0x3e   : > { %v7575_v16 = vld [vmem:[#allocation2 + $0xc] sm:$0x1]  ;;  %v942_v24 = vshrl.u32 %v7573_v14, 16  ;;  %v945_v25 = vshll.u32 %v7573_v14, 16  ;;  %v876_v29 = vld [vmem:[#allocation2 + $0xa8] sm:$0xf] }
  0x3f   : > { %v951_v26 = vshll.u32 %v7575_v16, 16  ;;  %v909_v30 = vld [vmem:[#allocation2 + $0xac] sm:$0x1]  ;;  %v1166_v38 = vshrl.u32 %v876_v29, 16  ;;  %v1169_v41 = vshll.u32 %v876_v29, 16  ;;  %v367_v4 = vrot.slane %v365_v58, 7 }
  0x40   : > { %v944_v35 = vrot.slane %v942_v24, 4  ;;  %v947_v36 = vrot.slane %v945_v25, 5  ;;  %v1175_v45 = vshll.u32 %v909_v30, 16  ;;  %v7597_v56 = vld [vmem:[#allocation2 + $0x14] sm:$0x1]  ;;  %v373_v11 = vshrl.u32 %v7595_v52, 16 }
  0x41   : > { %v953_v40 = vrot.slane %v951_v26, 5  ;;  %v1168_v48 = vrot.slane %v1166_v38, 4  ;;  %v1171_v53 = vrot.slane %v1169_v41, 5  ;;  %v7601_v60 = vld [vmem:[#allocation2 + $0x10] sm:$0xf]  ;;  %v965_v62 = vshll.u32 %v7597_v56, 16 }
  0x42   : > { %v948_v47 = vor.u32 %v947_v36, %v944_v35  ;;  %v1177_v54 = vrot.slane %v1175_v45, 5  ;;  %780 = vst [vmem:[#allocation2 + $0xbc] sm:$0x1] %v779_v57  ;;  %v956_v2 = vshrl.u32 %v7601_v60, 16  ;;  %v959_v3 = vshll.u32 %v7601_v60, 16  ;;  %s10489_s17 = smov (!%p9851_p4, %s6275_s17), 63 }
  0x43   : > { %v1172_v1 = vor.u32 %v1171_v53, %v1168_v48  ;;  %v967_v8 = vrot.slane %v965_v62, 5  ;;  %v376_v12 = vshll.u32 %v7595_v52, 16  ;;  %v7620_v21 = vld [vmem:[#allocation2 + $0x18] sm:$0xf]  ;;  %v7622_v22 = vld [vmem:[#allocation2 + $0x1c] sm:$0x1] }
  0x44   : > { %v949_v59 = vrot.slane %v948_v47, 4  ;;  %v958_v23 = vrot.slane %v956_v2, 4  ;;  %v961_v24 = vrot.slane %v959_v3, 5  ;;  %v970_v25 = vshrl.u32 %v7620_v21, 16  ;;  %v877_v50 = vld [vmem:[#allocation2 + $0xb0] sm:$0xf] }
  0x45   : > { %v1173_v20 = vrot.slane %v1172_v1, 4  ;;  %v973_v26 = vshll.u32 %v7620_v21, 16  ;;  %v979_v27 = vshll.u32 %v7622_v22, 16  ;;  %v371_v7 = vrot.slane %v367_v4, 4  ;;  %v878_v32 = vld [vmem:[#allocation2 + $0xb8] sm:$0xf] }
  0x46   : > { %v954_v5 = vsel %vm7558_vm9, %v949_v59, %v953_v40  ;;  %v375_v17 = vrot.slane %v373_v11, 7  ;;  %v962_v29 = vor.u32 %v961_v24, %v958_v23  ;;  %v972_v30 = vrot.slane %v970_v25, 4  ;;  %v910_v33 = vld [vmem:[#allocation2 + $0xb4] sm:$0x1]  ;;  %v685_v40 = vld [vmem:[#allocation2 + $0x20] sm:$0xf] }
  0x47   : > { %v6280_v13 = vcombine.low %v940_v6, %v954_v5  ;;  %v1178_v44 = vsel %vm7558_vm9, %v1173_v20, %v1177_v54  ;;  %v370_v6 = vor.u32 %v368_v0, %v367_v4  ;;  %v975_v31 = vrot.slane %v973_v26, 5  ;;  %v688_v48 = vld [vmem:[#allocation2 + $0x24] sm:$0x1]  ;;  %v691_v54 = vld [vmem:[#allocation2 + $0x28] sm:$0xf]  ;;  %s6276_s19 = sshll.u32 %s10489_s17, 2 }
  0x48   : > { %v6288_v28 = vcombine.low %v1164_v19, %v1178_v44  ;;  %v981_v34 = vrot.slane %v979_v27, 5  ;;  %v1180_v36 = vshrl.u32 %v877_v50, 16  ;;  %v1183_v38 = vshll.u32 %v877_v50, 16  ;;  %v694_v0 = vld [vmem:[#allocation2 + $0x2c] sm:$0x1]  ;;  %s9948_s22 = scalar_lea.vmem %s10187_s2, %s6276_s19  ;;  %p217_p5 = scmp.lt.s32.totalorder %s7320_s16, 1 }
  0x49   : > { %6893 = vmatprep.mubr.msk.bf16.mxu0 %vm1425_vm10, %v6280_v13  ;;  %v911_v35 = vld [vmem:[#allocation2 + $0xbc] sm:$0x1]  ;;  %v1189_v39 = vshll.u32 %v910_v33, 16  ;;  %v963_v41 = vrot.slane %v962_v29, 4  ;;  %v976_v45 = vor.u32 %v975_v31, %v972_v30  ;;  %v1194_v46 = vshrl.u32 %v878_v32, 16 }
  0x4a   : > { %6909 = vmatprep.mubr.msk.bf16.mxu1 %vm1425_vm10, %v6288_v28  ;;  %v1197_v47 = vshll.u32 %v878_v32, 16  ;;  %v1182_v49 = vrot.slane %v1180_v36, 4  ;;  %v1185_v51 = vrot.slane %v1183_v38, 5  ;;  %v1203_v53 = vshll.u32 %v911_v35, 16  ;;  %v327_v5 = vld [vmem:[%s7512_s28 + $0x4c] sm:$0xf] }
  0x4b   : > { %v1191_v52 = vrot.slane %v1189_v39, 5  ;;  %v968_v57 = vsel %vm7558_vm9, %v963_v41, %v967_v8  ;;  %v977_v58 = vrot.slane %v976_v45, 4  ;;  %v1196_v59 = vrot.slane %v1194_v46, 4  ;;  %v328_v11 = vld [vmem:[%s7512_s28 + $0x50] sm:$0xf]  ;;  %s10491_s16 = smov (!%p217_p5, %s7320_s16), 1 }
  0x4c   : > { %v1199_v62 = vrot.slane %v1197_v47, 5  ;;  %v1186_v1 = vor.u32 %v1185_v51, %v1182_v49  ;;  %v1205_v2 = vrot.slane %v1203_v53, 5  ;;  %v378_v3 = vor.u32 %v376_v12, %v375_v17  ;;  %v313_v23 = vld [vmem:[%s7512_s28 + $0x14] sm:$0xf]  ;;  %v314_v27 = vld [vmem:[%s7512_s28 + $0x18] sm:$0xf] }
  0x4d   : > { %v379_v4 = vrot.slane %v375_v17, 4  ;;  %v982_v13 = vsel %vm7558_vm9, %v977_v58, %v981_v34  ;;  %v686_v20 = vsel %vm7524_vm6, %v370_v6, %v685_v40  ;;  %v689_v8 = vsel %vm7530_vm8, %v371_v7, %v688_v48  ;;  %v7648_v28 = vld [vmem:[%s7512_s28 + $0x54] sm:$0xf]  ;;  %v781_v30 = vld [vmem:[#allocation2 + $0xc0] sm:$0xf]  ;;  %s6277_s23 = sshll.u32 %s10491_s16, 3 }
  0x4e   : > { %v1200_v19 = vor.u32 %v1199_v62, %v1196_v59  ;;  %v6281_v24 = vcombine.low %v968_v57, %v982_v13  ;;  %v1187_v25 = vrot.slane %v1186_v1, 4  ;;  %687 = vst [vmem:[#allocation2 + $0x20] sm:$0xf] %v686_v20  ;;  %690 = vst [vmem:[#allocation2 + $0x24] sm:$0x1] %v689_v8  ;;  %v692_v12 = vsel %vm7524_vm6, %v378_v3, %v691_v54  ;;  %s220_s26 = scalar_lea.vmem %s10188_s3, %s6277_s23  ;;  %s224_s29 = scalar_lea.vmem %s10189_s4, %s6277_s23 }
  0x4f   : > { %v695_v26 = vsel %vm7530_vm8, %v379_v4, %v694_v0  ;;  %693 = vst [vmem:[#allocation2 + $0x28] sm:$0xf] %v692_v12  ;;  %v493_v50 = vshrl.u32 %v327_v5, 16  ;;  %v496_v6 = vshll.u32 %v327_v5, 16  ;;  %v501_v17 = vshrl.u32 %v328_v11, 16 }
  0x50   : > { %v1201_v44 = vrot.slane %v1200_v19, 4  ;;  %696 = vst [vmem:[#allocation2 + $0x2c] sm:$0x1] %v695_v26  ;;  %6894 = vmatmul.mubr.msk.bf16.vlgmr.msra.gmra.mxu0 %vm1425_vm10, %v6281_v24  ;;  %v1192_v7 = vsel %vm7558_vm9, %v1187_v25, %v1191_v52  ;;  %v504_v29 = vshll.u32 %v328_v11, 16  ;;  %v784_v31 = vld [vmem:[#allocation2 + $0xc4] sm:$0x1] }
  0x51   : > { %v381_v32 = vshrl.u32 %v313_v23, 16  ;;  %v384_v33 = vshll.u32 %v313_v23, 16  ;;  %6960 = vmatpush3.bf16.msra.mxu0 %v7544_v43  ;;  %v495_v35 = vrot.slane %v493_v50, 7  ;;  %v503_v36 = vrot.slane %v501_v17, 7  ;;  %v787_v38 = vld [vmem:[#allocation2 + $0xc8] sm:$0xf] }
  0x52   : > { %v1206_v34 = vsel %vm7558_vm9, %v1201_v44, %v1205_v2  ;;  %v389_v39 = vshrl.u32 %v314_v27, 16  ;;  %v790_v41 = vld [vmem:[#allocation2 + $0xcc] sm:$0x1]  ;;  %v392_v46 = vshll.u32 %v314_v27, 16  ;;  %v509_v47 = vshrl.u32 %v7648_v28, 16 }
  0x53   : > { %v6289_v40 = vcombine.low %v1192_v7, %v1206_v34  ;;  %v383_v45 = vrot.slane %v381_v32, 7  ;;  %v498_v48 = vor.u32 %v496_v6, %v495_v35  ;;  %v499_v49 = vrot.slane %v495_v35, 4  ;;  %v697_v53 = vld [vmem:[#allocation2 + $0x30] sm:$0xf]  ;;  %v700_v58 = vld [vmem:[#allocation2 + $0x34] sm:$0x1] }
  0x54   : > { %v506_v51 = vor.u32 %v504_v29, %v503_v36  ;;  %v507_v52 = vrot.slane %v503_v36, 4  ;;  %v391_v43 = vrot.slane %v389_v39, 7  ;;  %v511_v59 = vrot.slane %v509_v47, 7  ;;  %v703_v5 = vld [vmem:[#allocation2 + $0x38] sm:$0xf] }
  0x55   : > { %6910 = vmatmul.mubr.msk.bf16.vlgmr.msra.gmra.mxu1 %vm1425_vm10, %v6289_v40  ;;  %v386_v54 = vor.u32 %v384_v33, %v383_v45  ;;  %v387_v57 = vrot.slane %v383_v45, 4  ;;  %v7659_v62 = vld [vmem:[#allocation2 + $0x20] sm:$0xf]  ;;  %v7661_v0 = vld [vmem:[#allocation2 + $0x24] sm:$0x1]  ;;  %v782_v1 = vsel %vm7524_vm6, %v498_v48, %v781_v30  ;;  %v785_v2 = vsel %vm7530_vm8, %v499_v49, %v784_v31 }
  0x56   : > { %6926 = vmatpush3.bf16.msra.mxu1 %v7541_v42  ;;  %v788_v3 = vsel %vm7524_vm6, %v506_v51, %v787_v38  ;;  %v791_v4 = vsel %vm7530_vm8, %v507_v52, %v790_v41  ;;  %v7671_v11 = vld [vmem:[#allocation2 + $0x28] sm:$0xf]  ;;  %v984_v13 = vshrl.u32 %v7659_v62, 16  ;;  %v987_v19 = vshll.u32 %v7659_v62, 16  ;;  %783 = vst [vmem:[#allocation2 + $0xc0] sm:$0xf] %v782_v1 }
  0x57   : > { %v7673_v42 = vld [vmem:[#allocation2 + $0x2c] sm:$0x1]  ;;  %786 = vst [vmem:[#allocation2 + $0xc4] sm:$0x1] %v785_v2  ;;  %789 = vst [vmem:[#allocation2 + $0xc8] sm:$0xf] %v788_v3  ;;  %v394_v20 = vor.u32 %v392_v46, %v391_v43  ;;  %v698_v8 = vsel %vm7524_vm6, %v386_v54, %v697_v53  ;;  %v701_v6 = vsel %vm7530_vm8, %v387_v57, %v700_v58 }
  0x58   : > { %792 = vst [vmem:[#allocation2 + $0xcc] sm:$0x1] %v791_v4  ;;  %v993_v23 = vshll.u32 %v7661_v0, 16  ;;  %v998_v24 = vshrl.u32 %v7671_v11, 16  ;;  %v1001_v25 = vshll.u32 %v7671_v11, 16  ;;  %v1007_v12 = vshll.u32 %v7673_v42, 16 }
  0x59   : > { %699 = vst [vmem:[#allocation2 + $0x30] sm:$0xf] %v698_v8  ;;  %v706_v26 = vld [vmem:[#allocation2 + $0x3c] sm:$0x1]  ;;  %v986_v27 = vrot.slane %v984_v13, 4  ;;  %v989_v44 = vrot.slane %v987_v19, 5  ;;  %v704_v34 = vsel %vm7524_vm6, %v394_v20, %v703_v5 }
  0x5a   : > { %v395_v50 = vrot.slane %v391_v43, 4  ;;  %v330_v17 = vld [vmem:[%s7512_s28 + $0x58] sm:$0xf]  ;;  %v995_v7 = vrot.slane %v993_v23, 5  ;;  %v1000_v29 = vrot.slane %v998_v24, 4  ;;  %v1003_v30 = vrot.slane %v1001_v25, 5 }
  0x5b   : > { %v1009_v31 = vrot.slane %v1007_v12, 5  ;;  %702 = vst [vmem:[#allocation2 + $0x34] sm:$0x1] %v701_v6  ;;  %v7687_v32 = vld [vmem:[%s7512_s28 + $0x20] sm:$0xf]  ;;  %v990_v33 = vor.u32 %v989_v44, %v986_v27  ;;  %v512_v36 = vshll.u32 %v7648_v28, 16 }
  0x5c   : > { %v707_v35 = vsel %vm7530_vm8, %v395_v50, %v706_v26  ;;  %v796_v38 = vld [vmem:[#allocation2 + $0xd4] sm:$0x1]  ;;  %v1004_v39 = vor.u32 %v1003_v30, %v1000_v29  ;;  %705 = vst [vmem:[#allocation2 + $0x38] sm:$0xf] %v704_v34  ;;  %v515_v40 = vrot.slane %v511_v59, 4  ;;  %v517_v41 = vshrl.u32 %v330_v17, 16 }
  0x5d   : > { %708 = vst [vmem:[#allocation2 + $0x3c] sm:$0x1] %v707_v35  ;;  %v520_v45 = vshll.u32 %v330_v17, 16  ;;  %v793_v46 = vld [vmem:[#allocation2 + $0xd0] sm:$0xf]  ;;  %v991_v47 = vrot.slane %v990_v33, 4  ;;  %v514_v48 = vor.u32 %v512_v36, %v511_v59 }
  0x5e   : > { %v405_v49 = vshrl.u32 %v7687_v32, 16  ;;  %v408_v51 = vshll.u32 %v7687_v32, 16  ;;  %v1005_v52 = vrot.slane %v1004_v39, 4  ;;  %v7696_v53 = vld [vmem:[#allocation2 + $0xc0] sm:$0xf]  ;;  %v519_v28 = vrot.slane %v517_v41, 7 }
  0x5f   : > { %10238 = vst [vmem:[#allocation5_spill] sm:$0xff] %v7696_v53  ;;  %v7698_v54 = vld [vmem:[#allocation2 + $0xc8] sm:$0xf]  ;;  %v797_v57 = vsel %vm7530_vm8, %v515_v40, %v796_v38  ;;  %v996_v58 = vsel %vm7558_vm9, %v991_v47, %v995_v7  ;;  %v912_v59 = vld [vmem:[#allocation2 + $0xc4] sm:$0x1]  ;;  %v1208_v2 = vshrl.u32 %v7696_v53, 16  ;;  %v794_v4 = vsel %vm7524_vm6, %v514_v48, %v793_v46 }
  0x60   : > { %10239 = vst [vmem:[#allocation6_spill] sm:$0xff] %v7698_v54  ;;  %v913_v1 = vld [vmem:[#allocation2 + $0xcc] sm:$0x1]  ;;  %v1211_v3 = vshll.u32 %v7696_v53, 16  ;;  %798 = vst [vmem:[#allocation2 + $0xd4] sm:$0x1] %v797_v57  ;;  %v1010_v5 = vsel %vm7558_vm9, %v1005_v52, %v1009_v31  ;;  %v522_v33 = vor.u32 %v520_v45, %v519_v28 }
  0x61   : > { %v1217_v13 = vshll.u32 %v912_v59, 16  ;;  %v1222_v19 = vshrl.u32 %v7698_v54, 16  ;;  %v1225_v20 = vshll.u32 %v7698_v54, 16  ;;  %v7714_v8 = vld [vmem:[#allocation2 + $0x30] sm:$0xf]  ;;  %v6282_v23 = vcombine.low %v996_v58, %v1010_v5 }
  0x62   : > { %10240 = vst [vmem:[#allocation7_spill] sm:$0xff] %v7714_v8  ;;  %795 = vst [vmem:[#allocation2 + $0xd0] sm:$0xf] %v794_v4  ;;  %v1210_v24 = vrot.slane %v1208_v2, 4  ;;  %v1213_v25 = vrot.slane %v1211_v3, 5  ;;  %v1231_v12 = vshll.u32 %v913_v1, 16 }
  0x63   : > { %v7716_v26 = vld [vmem:[#allocation2 + $0x34] sm:$0x1]  ;;  %v1219_v27 = vrot.slane %v1217_v13, 5  ;;  %v1224_v44 = vrot.slane %v1222_v19, 4  ;;  %v1227_v50 = vrot.slane %v1225_v20, 5  ;;  %v1012_v6 = vshrl.u32 %v7714_v8, 16  ;;  %6897 = vmatprep.mubr.msk.bf16.mxu0 %vm1425_vm10, %v6282_v23 }
  0x64   : > { %v1214_v17 = vor.u32 %v1213_v25, %v1210_v24  ;;  %v1233_v7 = vrot.slane %v1231_v12, 5  ;;  %v7720_v29 = vld [vmem:[#allocation2 + $0x38] sm:$0xf]  ;;  %v7722_v30 = vld [vmem:[#allocation2 + $0x3c] sm:$0x1]  ;;  %v1015_v31 = vshll.u32 %v7714_v8, 16 }
  0x65   : > { %10241 = vst [vmem:[#allocation8_spill] sm:$0xff] %v7720_v29  ;;  %v1228_v34 = vor.u32 %v1227_v50, %v1224_v44  ;;  %v1014_v35 = vrot.slane %v1012_v6, 4  ;;  %v1021_v36 = vshll.u32 %v7716_v26, 16  ;;  %v1026_v38 = vshrl.u32 %v7720_v29, 16  ;;  %v799_v39 = vld [vmem:[#allocation2 + $0xd8] sm:$0xf] }
  0x66   : > { %v1215_v40 = vrot.slane %v1214_v17, 4  ;;  %v1017_v41 = vrot.slane %v1015_v31, 5  ;;  %v1029_v46 = vshll.u32 %v7720_v29, 16  ;;  %v1035_v47 = vshll.u32 %v7722_v30, 16  ;;  %v802_v48 = vld [vmem:[#allocation2 + $0xdc] sm:$0x1] }
  0x67   : > { %v1229_v52 = vrot.slane %v1228_v34, 4  ;;  %v1023_v57 = vrot.slane %v1021_v36, 5  ;;  %v1028_v58 = vrot.slane %v1026_v38, 4  ;;  %v523_v59 = vrot.slane %v519_v28, 4  ;;  %v7729_v1 = vld [vmem:[#allocation2 + $0x50] sm:$0xf] }
  0x68   : > { %10242 = vst [vmem:[#allocation9_spill] sm:$0xff] %v7729_v1  ;;  %v1220_v45 = vsel %vm7558_vm9, %v1215_v40, %v1219_v27  ;;  %v1018_v2 = vor.u32 %v1017_v41, %v1014_v35  ;;  %v1031_v3 = vrot.slane %v1029_v46, 5  ;;  %v1037_v4 = vrot.slane %v1035_v47, 5  ;;  %v914_v13 = vld [vmem:[#allocation2 + $0xd4] sm:$0x1] }
  0x69   : > { %v881_v5 = vld [vmem:[#allocation2 + $0xd0] sm:$0xf]  ;;  %v1234_v19 = vsel %vm7558_vm9, %v1229_v52, %v1233_v7  ;;  %v800_v20 = vsel %vm7524_vm6, %v522_v33, %v799_v39  ;;  %v803_v23 = vsel %vm7530_vm8, %v523_v59, %v802_v48  ;;  %v715_v44 = vld [vmem:[#allocation2 + $0x58] sm:$0xf]  ;;  %v718_v50 = vld [vmem:[#allocation2 + $0x5c] sm:$0x1] }
  0x6a   : > { %v1236_v28 = vshrl.u32 %v881_v5, 16  ;;  %v6290_v24 = vcombine.low %v1220_v45, %v1234_v19  ;;  %v1019_v25 = vrot.slane %v1018_v2, 4  ;;  %v1032_v12 = vor.u32 %v1031_v3, %v1028_v58  ;;  %801 = vst [vmem:[#allocation2 + $0xd8] sm:$0xf] %v800_v20  ;;  %804 = vst [vmem:[#allocation2 + $0xdc] sm:$0x1] %v803_v23 }
  0x6b   : > { %v1239_v27 = vshll.u32 %v881_v5, 16  ;;  %v1245_v17 = vshll.u32 %v914_v13, 16  ;;  %v407_v7 = vrot.slane %v405_v49, 7  ;;  %v7741_v31 = vld [vmem:[#allocation2 + $0x54] sm:$0x1]  ;;  %v1040_v33 = vshrl.u32 %v7729_v1, 16 }
  0x6c   : > { %v1238_v6 = vrot.slane %v1236_v28, 4  ;;  %6913 = vmatprep.mubr.msk.bf16.mxu1 %vm1425_vm10, %v6290_v24  ;;  %v1024_v34 = vsel %vm7558_vm9, %v1019_v25, %v1023_v57  ;;  %v1033_v35 = vrot.slane %v1032_v12, 4  ;;  %v1043_v38 = vshll.u32 %v7729_v1, 16  ;;  %v332_v39 = vld [vmem:[%s7512_s28 + $0x60] sm:$0xf] }
  0x6d   : > { %v1241_v36 = vrot.slane %v1239_v27, 5  ;;  %v7749_v40 = vrot.slane %v1245_v17, 5  ;;  %v410_v41 = vor.u32 %v408_v51, %v407_v7  ;;  %v411_v49 = vrot.slane %v407_v7, 4  ;;  %v883_v57 = vld [vmem:[#allocation2 + $0xf0] sm:$0xf] }
  0x6e   : > { %v1042_v46 = vrot.slane %v1040_v33, 4  ;;  %v1038_v47 = vsel %vm7558_vm9, %v1033_v35, %v1037_v4  ;;  %v1045_v52 = vrot.slane %v1043_v38, 5  ;;  %v1049_v58 = vshll.u32 %v7741_v31, 16  ;;  %v811_v13 = vld [vmem:[#allocation2 + $0xf8] sm:$0xf] }
  0x6f   : > { %v1242_v48 = vor.u32 %v1241_v36, %v1238_v6  ;;  %v6283_v59 = vcombine.low %v1024_v34, %v1038_v47  ;;  %v716_v45 = vsel %vm7524_vm6, %v410_v41, %v715_v44  ;;  %v719_v2 = vsel %vm7530_vm8, %v411_v49, %v718_v50  ;;  %v814_v4 = vld [vmem:[#allocation2 + $0xfc] sm:$0x1]  ;;  %v916_v6 = vld [vmem:[#allocation2 + $0xf4] sm:$0x1]  ;;  %v317_v35 = vld [vmem:[%s7512_s28 + $0x24] sm:$0xf] }
  0x70   : > { %v533_v3 = vshrl.u32 %v332_v39, 16  ;;  %717 = vst [vmem:[#allocation2 + $0x58] sm:$0xf] %v716_v45  ;;  %720 = vst [vmem:[#allocation2 + $0x5c] sm:$0x1] %v719_v2  ;;  %v1046_v51 = vor.u32 %v1045_v52, %v1042_v46  ;;  %v536_v5 = vshll.u32 %v332_v39, 16 }
  0x71   : > { %v1243_v32 = vrot.slane %v1242_v48, 4  ;;  %6898 = vmatmul.mubr.msk.bf16.gmra.mxu0 %vm1425_vm10, %v6283_v59  ;;  %v7761_v19 = vld [vmem:[#allocation2 + $0xd8] sm:$0xf]  ;;  %v915_v20 = vld [vmem:[#allocation2 + $0xdc] sm:$0x1]  ;;  %v1264_v28 = vshrl.u32 %v883_v57, 16 }
  0x72   : > { %v535_v23 = vrot.slane %v533_v3, 7  ;;  %v1250_v12 = vshrl.u32 %v7761_v19, 16  ;;  %v1253_v27 = vshll.u32 %v7761_v19, 16  ;;  %v1259_v44 = vshll.u32 %v915_v20, 16  ;;  %v318_v49 = vld [vmem:[%s7512_s28 + $0x28] sm:$0xf] }
  0x73   : > { %v7769_v50 = vrot.slane %v1049_v58, 5  ;;  %v1248_v17 = vsel %vm7558_vm9, %v1243_v32, %v7749_v40  ;;  %v7774_v7 = vrot.slane %v1046_v51, 4  ;;  %v1266_v39 = vrot.slane %v1264_v28, 4  ;;  %v721_v28 = vld [vmem:[#allocation2 + $0x60] sm:$0xf] }
  0x74   : > { %v538_v33 = vor.u32 %v536_v5, %v535_v23  ;;  %v539_v34 = vrot.slane %v535_v23, 4  ;;  %v1252_v36 = vrot.slane %v1250_v12, 4  ;;  %v1255_v38 = vrot.slane %v1253_v27, 5  ;;  %v826_v25 = vld [vmem:[#allocation2 + $0x10c] sm:$0x1] }
  0x75   : > { %v1267_v41 = vshll.u32 %v883_v57, 16  ;;  %v1261_v46 = vrot.slane %v1259_v44, 5  ;;  %v1273_v52 = vshll.u32 %v916_v6, 16  ;;  %v413_v59 = vshrl.u32 %v317_v35, 16  ;;  %v7828_v43 = vld [vmem:[%s7512_s28 + $0x6c] sm:$0xf] }
  0x76   : > { %v812_v47 = vsel %vm7524_vm6, %v538_v33, %v811_v13  ;;  %v815_v48 = vsel %vm7530_vm8, %v539_v34, %v814_v4  ;;  %v1256_v58 = vor.u32 %v1255_v38, %v1252_v36  ;;  %v416_v45 = vshll.u32 %v317_v35, 16  ;;  %v724_v36 = vld [vmem:[#allocation2 + $0x64] sm:$0x1]  ;;  %v832_v37 = vld [vmem:[#allocation2 + $0x114] sm:$0x1] }
  0x77   : > { %813 = vst [vmem:[#allocation2 + $0xf8] sm:$0xf] %v812_v47  ;;  %816 = vst [vmem:[#allocation2 + $0xfc] sm:$0x1] %v815_v48  ;;  %v1269_v40 = vrot.slane %v1267_v41, 5  ;;  %v1052_v57 = vsel %vm7558_vm9, %v7774_v7, %v7769_v50  ;;  %v7790_v32 = vrot.slane %v1273_v52, 5 }
  0x78   : > { %v7782_v2 = vld [vmem:[#allocation2 + $0x58] sm:$0xf]  ;;  %v7784_v3 = vld [vmem:[#allocation2 + $0x5c] sm:$0x1]  ;;  %v421_v51 = vshrl.u32 %v318_v49, 16  ;;  %v1257_v13 = vrot.slane %v1256_v58, 4 }
  0x79   : > { %10243 = vst [vmem:[#allocation10_spill] sm:$0xff] %v7782_v2  ;;  %v1054_v4 = vshrl.u32 %v7782_v2, 16  ;;  %v1057_v20 = vshll.u32 %v7782_v2, 16  ;;  %v1063_v23 = vshll.u32 %v7784_v3, 16  ;;  %v1270_v12 = vor.u32 %v1269_v40, %v1266_v39  ;;  %v333_v50 = vld [vmem:[%s7512_s28 + $0x64] sm:$0xf] }
  0x7a   : > { %v415_v27 = vrot.slane %v413_v59, 7  ;;  %v423_v44 = vrot.slane %v421_v51, 7  ;;  %v424_v6 = vshll.u32 %v318_v49, 16  ;;  %v1262_v7 = vsel %vm7558_vm9, %v1257_v13, %v1261_v46  ;;  %v727_v52 = vld [vmem:[#allocation2 + $0x68] sm:$0xf] }
  0x7b   : > { %v1056_v33 = vrot.slane %v1054_v4, 4  ;;  %v1059_v34 = vrot.slane %v1057_v20, 5  ;;  %v1065_v35 = vrot.slane %v1063_v23, 5  ;;  %v6291_v38 = vcombine.low %v1248_v17, %v1262_v7  ;;  %v730_v59 = vld [vmem:[#allocation2 + $0x6c] sm:$0x1] }
  0x7c   : > { %v7800_v41 = vrot.slane %v1270_v12, 4  ;;  %v418_v47 = vor.u32 %v416_v45, %v415_v27  ;;  %v419_v48 = vrot.slane %v415_v27, 4  ;;  %v426_v39 = vor.u32 %v424_v6, %v423_v44  ;;  %v334_v49 = vld [vmem:[%s7512_s28 + $0x68] sm:$0xf]  ;;  %v754_v8 = vld [vmem:[#allocation2 + $0x8c] sm:$0x1] }
  0x7d   : > { %v1060_v58 = vor.u32 %v1059_v34, %v1056_v33  ;;  %v427_v40 = vrot.slane %v423_v44, 4  ;;  %v541_v51 = vshrl.u32 %v333_v50, 16  ;;  %6914 = vmatmul.mubr.msk.bf16.gmra.mxu1 %vm1425_vm10, %v6291_v38  ;;  %v544_v4 = vshll.u32 %v333_v50, 16  ;;  %v817_v44 = vld [vmem:[#allocation2 + $0x100] sm:$0xf] }
  0x7e   : > { %v7804_v5 = vld [vmem:[#allocation2 + $0xf8] sm:$0xf]  ;;  %v7806_v46 = vld [vmem:[#allocation2 + $0xfc] sm:$0x1]  ;;  %v1276_v17 = vsel %vm7558_vm9, %v7800_v41, %v7790_v32  ;;  %v722_v45 = vsel %vm7524_vm6, %v418_v47, %v721_v28  ;;  %v725_v13 = vsel %vm7530_vm8, %v419_v48, %v724_v36  ;;  %v728_v6 = vsel %vm7524_vm6, %v426_v39, %v727_v52  ;;  %v820_v50 = vld [vmem:[#allocation2 + $0x104] sm:$0x1] }
  0x7f   : > { %10244 = vst [vmem:[#allocation11_spill] sm:$0xff] %v7804_v5  ;;  %10245 = vst [vmem:[#allocation12_spill] sm:$0xff] %v7806_v46  ;;  %v1061_v20 = vrot.slane %v1060_v58, 4  ;;  %v1278_v23 = vshrl.u32 %v7804_v5, 16  ;;  %v1281_v12 = vshll.u32 %v7804_v5, 16  ;;  %v1287_v27 = vshll.u32 %v7806_v46, 16 }
  0x80   : > { %723 = vst [vmem:[#allocation2 + $0x60] sm:$0xf] %v722_v45  ;;  %726 = vst [vmem:[#allocation2 + $0x64] sm:$0x1] %v725_v13  ;;  %v731_v28 = vsel %vm7530_vm8, %v427_v40, %v730_v59  ;;  %v543_v7 = vrot.slane %v541_v51, 7  ;;  %v549_v33 = vshrl.u32 %v334_v49, 16 }
  0x81   : > { %v319_v34 = vld [vmem:[%s7512_s28 + $0x2c] sm:$0xf]  ;;  %v1066_v36 = vsel %vm7558_vm9, %v1061_v20, %v1065_v35  ;;  %v1280_v38 = vrot.slane %v1278_v23, 4  ;;  %v1283_v47 = vrot.slane %v1281_v12, 5  ;;  %v1289_v48 = vrot.slane %v1287_v27, 5 }
  0x82   : > { %729 = vst [vmem:[#allocation2 + $0x68] sm:$0xf] %v728_v6  ;;  %732 = vst [vmem:[#allocation2 + $0x6c] sm:$0x1] %v731_v28  ;;  %v320_v58 = vld [vmem:[%s7512_s28 + $0x30] sm:$0xf]  ;;  %v6284_v45 = vcombine.low %v1052_v57, %v1066_v36  ;;  %v546_v13 = vor.u32 %v544_v4, %v543_v7 }
  0x83   : > { %v547_v52 = vrot.slane %v543_v7, 4  ;;  %v551_v39 = vrot.slane %v549_v33, 7  ;;  %v1284_v40 = vor.u32 %v1283_v47, %v1280_v38  ;;  %v552_v59 = vshll.u32 %v334_v49, 16  ;;  %v7838_v4 = vld [vmem:[%s10186_s1 + $0xc] sm:$0xf] }
  0x84   : > { %v429_v51 = vshrl.u32 %v319_v34, 16  ;;  %v432_v24 = vshll.u32 %v319_v34, 16  ;;  %6901 = vmatprep.mubr.msk.bf16.mxu0 %vm1425_vm10, %v6284_v45  ;;  %v818_v20 = vsel %vm7524_vm6, %v546_v13, %v817_v44  ;;  %v437_v57 = vshrl.u32 %v320_v58, 16  ;;  %v823_v27 = vld [vmem:[#allocation2 + $0x108] sm:$0xf]  ;;  %7203 = vmatprep.subr.msk.bf16.mxu1 %vm1474_vm0, %v7838_v4 }
  0x85   : > { %v555_v35 = vrot.slane %v551_v39, 4  ;;  %v821_v23 = vsel %vm7530_vm8, %v547_v52, %v820_v50  ;;  %v1285_v49 = vrot.slane %v1284_v40, 4  ;;  %v554_v12 = vor.u32 %v552_v59, %v551_v39  ;;  %819 = vst [vmem:[#allocation2 + $0x100] sm:$0xf] %v818_v20  ;;  %v733_v34 = vld [vmem:[#allocation2 + $0x70] sm:$0xf] }
  0x86   : > { %822 = vst [vmem:[#allocation2 + $0x104] sm:$0x1] %v821_v23  ;;  %v431_v6 = vrot.slane %v429_v51, 7  ;;  %v440_v28 = vshll.u32 %v320_v58, 16  ;;  %v439_v50 = vrot.slane %v437_v57, 7  ;;  %v557_v38 = vshrl.u32 %v7828_v43, 16 }
  0x87   : > { %v7842_v44 = vld [vmem:[#allocation2 + $0x60] sm:$0xf]  ;;  %v7844_v7 = vld [vmem:[#allocation2 + $0x64] sm:$0x1]  ;;  %v827_v33 = vsel %vm7530_vm8, %v555_v35, %v826_v25  ;;  %v736_v36 = vld [vmem:[#allocation2 + $0x74] sm:$0x1]  ;;  %v1290_v58 = vsel %vm7558_vm9, %v1285_v49, %v1289_v48  ;;  %v824_v48 = vsel %vm7524_vm6, %v554_v12, %v823_v27 }
  0x88   : > { %10246 = vst [vmem:[#allocation13_spill] sm:$0xff] %v7842_v44  ;;  %v1068_v45 = vshrl.u32 %v7842_v44, 16  ;;  %v1071_v13 = vshll.u32 %v7842_v44, 16  ;;  %v1077_v52 = vshll.u32 %v7844_v7, 16  ;;  %828 = vst [vmem:[#allocation2 + $0x10c] sm:$0x1] %v827_v33  ;;  %v6292_v40 = vcombine.low %v1276_v17, %v1290_v58 }
  0x89   : > { %v739_v39 = vld [vmem:[#allocation2 + $0x78] sm:$0xf]  ;;  %v742_v25 = vld [vmem:[#allocation2 + $0x7c] sm:$0x1]  ;;  %v7861_v59 = vld [vmem:[#allocation2 + $0x68] sm:$0xf]  ;;  %v434_v35 = vor.u32 %v432_v24, %v431_v6  ;;  %v442_v24 = vor.u32 %v440_v28, %v439_v50 }
  0x8a   : > { %10247 = vst [vmem:[#allocation14_spill] sm:$0xff] %v7861_v59  ;;  %v7863_v51 = vld [vmem:[#allocation2 + $0x6c] sm:$0x1]  ;;  %v435_v20 = vrot.slane %v431_v6, 4  ;;  %v1070_v23 = vrot.slane %v1068_v45, 4  ;;  %v1073_v57 = vrot.slane %v1071_v13, 5  ;;  %6917 = vmatprep.mubr.msk.bf16.mxu1 %vm1425_vm10, %v6292_v40 }
  0x8b   : > { %v1079_v49 = vrot.slane %v1077_v52, 5  ;;  %v1082_v33 = vshrl.u32 %v7861_v59, 16  ;;  %825 = vst [vmem:[#allocation2 + $0x108] sm:$0xf] %v824_v48  ;;  %v7871_v32 = vld [vmem:[%s10186_s1 + $0x10] sm:$0xf]  ;;  %v734_v58 = vsel %vm7524_vm6, %v434_v35, %v733_v34  ;;  %v740_v28 = vsel %vm7524_vm6, %v442_v24, %v739_v39 }
  0x8c   : > { %v1085_v41 = vshll.u32 %v7861_v59, 16  ;;  %v1091_v17 = vshll.u32 %v7863_v51, 16  ;;  %v443_v12 = vrot.slane %v439_v50, 4  ;;  %7204 = vmatprep.subr.msk.bf16.mxu0 %vm1474_vm0, %v7871_v32  ;;  %v1074_v27 = vor.u32 %v1073_v57, %v1070_v23  ;;  %v336_v13 = vld [vmem:[%s7512_s28 + $0x70] sm:$0xf] }
  0x8d   : > { %v1084_v6 = vrot.slane %v1082_v33, 4  ;;  %v737_v45 = vsel %vm7530_vm8, %v435_v20, %v736_v36  ;;  %v7883_v48 = vld [vmem:[#allocation2 + $0x100] sm:$0xf]  ;;  %v7885_v47 = vld [vmem:[#allocation2 + $0x104] sm:$0x1]  ;;  %v559_v33 = vrot.slane %v557_v38, 7 }
  0x8e   : > { %v1087_v52 = vrot.slane %v1085_v41, 5  ;;  %v1093_v40 = vrot.slane %v1091_v17, 5  ;;  %735 = vst [vmem:[#allocation2 + $0x70] sm:$0xf] %v734_v58  ;;  %738 = vst [vmem:[#allocation2 + $0x74] sm:$0x1] %v737_v45  ;;  %v743_v50 = vsel %vm7530_vm8, %v443_v12, %v742_v25 }
  0x8f   : > { %v1075_v23 = vrot.slane %v1074_v27, 4  ;;  %v1292_v34 = vshrl.u32 %v7883_v48, 16  ;;  %v1295_v36 = vshll.u32 %v7883_v48, 16  ;;  %v1301_v35 = vshll.u32 %v7885_v47, 16  ;;  %741 = vst [vmem:[#allocation2 + $0x78] sm:$0xf] %v740_v28 }
  0x90   : > { %744 = vst [vmem:[#allocation2 + $0x7c] sm:$0x1] %v743_v50  ;;  %v1088_v20 = vor.u32 %v1087_v52, %v1084_v6  ;;  %v7894_v57 = vld [vmem:[#allocation2 + $0x10c] sm:$0x1]  ;;  %v560_v41 = vshll.u32 %v7828_v43, 16  ;;  %v565_v17 = vshrl.u32 %v336_v13, 16 }
  0x91   : > { %v1080_v39 = vsel %vm7558_vm9, %v1075_v23, %v1079_v49  ;;  %v1294_v25 = vrot.slane %v1292_v34, 4  ;;  %v1297_v24 = vrot.slane %v1295_v36, 5  ;;  %v1303_v12 = vrot.slane %v1301_v35, 5  ;;  %v829_v27 = vld [vmem:[#allocation2 + $0x110] sm:$0xf] }
  0x92   : > { %v1089_v58 = vrot.slane %v1088_v20, 4  ;;  %v7899_v45 = vld [vmem:[#allocation2 + $0x108] sm:$0xf]  ;;  %v1315_v28 = vshll.u32 %v7894_v57, 16  ;;  %v562_v50 = vor.u32 %v560_v41, %v559_v33  ;;  %v563_v6 = vrot.slane %v559_v33, 4 }
  0x93   : > { %v1298_v52 = vor.u32 %v1297_v24, %v1294_v25  ;;  %v1306_v38 = vshrl.u32 %v7899_v45, 16  ;;  %v1309_v43 = vshll.u32 %v7899_v45, 16  ;;  %v567_v63 = vrot.slane %v565_v17, 7  ;;  %v338_v5 = vld [vmem:[%s7512_s28 + $0x78] sm:$0xf] }
  0x94   : > { %v1094_v49 = vsel %vm7558_vm9, %v1089_v58, %v1093_v40  ;;  %v1317_v23 = vrot.slane %v1315_v28, 5  ;;  %v568_v34 = vshll.u32 %v336_v13, 16  ;;  %v830_v36 = vsel %vm7524_vm6, %v562_v50, %v829_v27  ;;  %v835_v50 = vld [vmem:[#allocation2 + $0x118] sm:$0xf] }
  0x95   : > { %v6285_v35 = vcombine.low %v1080_v39, %v1094_v49  ;;  %v1299_v20 = vrot.slane %v1298_v52, 4  ;;  %v1308_v61 = vrot.slane %v1306_v38, 4  ;;  %v1311_v41 = vrot.slane %v1309_v43, 5  ;;  %v7908_v33 = vld [vmem:[#allocation2 + $0x70] sm:$0xf] }
  0x96   : > { %831 = vst [vmem:[#allocation2 + $0x110] sm:$0xf] %v830_v36  ;;  %v7910_v25 = vld [vmem:[#allocation2 + $0x78] sm:$0xf]  ;;  %v7912_v24 = vld [vmem:[#allocation2 + $0x74] sm:$0x1]  ;;  %v570_v2 = vor.u32 %v568_v34, %v567_v63  ;;  %v833_v13 = vsel %vm7530_vm8, %v563_v6, %v832_v37 }
  0x97   : > { %v7914_v17 = vld [vmem:[#allocation2 + $0x7c] sm:$0x1]  ;;  %6902 = vmatmul.mubr.msk.bf16.gmra.mxu0 %vm1425_vm10, %v6285_v35  ;;  %v1304_v39 = vsel %vm7558_vm9, %v1299_v20, %v1303_v12  ;;  %v1312_v27 = vor.u32 %v1311_v41, %v1308_v61  ;;  %v1096_v58 = vshrl.u32 %v7908_v33, 16  ;;  %v1099_v28 = vshll.u32 %v7908_v33, 16  ;;  %834 = vst [vmem:[#allocation2 + $0x114] sm:$0x1] %v833_v13 }
  0x98   : > { %v1105_v52 = vshll.u32 %v7912_v24, 16  ;;  %v1110_v37 = vshrl.u32 %v7910_v25, 16  ;;  %v1113_v6 = vshll.u32 %v7910_v25, 16  ;;  %v1119_v38 = vshll.u32 %v7914_v17, 16  ;;  %v838_v43 = vld [vmem:[#allocation2 + $0x11c] sm:$0x1] }
  0x99   : > { %v1313_v49 = vrot.slane %v1312_v27, 4  ;;  %v1098_v12 = vrot.slane %v1096_v58, 4  ;;  %v1101_v61 = vrot.slane %v1099_v28, 5  ;;  %v571_v34 = vrot.slane %v567_v63, 4  ;;  %v321_v36 = vld [vmem:[%s7512_s28 + $0x34] sm:$0xf] }
  0x9a   : > { %v1107_v35 = vrot.slane %v1105_v52, 5  ;;  %v1112_v20 = vrot.slane %v1110_v37, 4  ;;  %v1115_v41 = vrot.slane %v1113_v6, 5  ;;  %v1121_v13 = vrot.slane %v1119_v38, 5  ;;  %v322_v40 = vld [vmem:[%s7512_s28 + $0x38] sm:$0xf] }
  0x9b   : > { %v1318_v59 = vsel %vm7558_vm9, %v1313_v49, %v1317_v23  ;;  %v1102_v44 = vor.u32 %v1101_v61, %v1098_v12  ;;  %v836_v1 = vsel %vm7524_vm6, %v570_v2, %v835_v50  ;;  %v839_v46 = vsel %vm7530_vm8, %v571_v34, %v838_v43  ;;  %v337_v27 = vld [vmem:[%s7512_s28 + $0x74] sm:$0xf]  ;;  %v745_v12 = vld [vmem:[#allocation2 + $0x80] sm:$0xf]  ;;  %v748_v34 = vld [vmem:[#allocation2 + $0x84] sm:$0x1] }
  0x9c   : > { %v6293_v58 = vcombine.low %v1304_v39, %v1318_v59  ;;  %v1116_v28 = vor.u32 %v1115_v41, %v1112_v20  ;;  %837 = vst [vmem:[#allocation2 + $0x118] sm:$0xf] %v836_v1  ;;  %840 = vst [vmem:[#allocation2 + $0x11c] sm:$0x1] %v839_v46  ;;  %v445_v52 = vshrl.u32 %v321_v36, 16  ;;  %v448_v37 = vshll.u32 %v321_v36, 16 }
  0x9d   : > { %v7938_v63 = vld [vmem:[#allocation2 + $0x110] sm:$0xf]  ;;  %v1103_v6 = vrot.slane %v1102_v44, 4  ;;  %v453_v49 = vshrl.u32 %v322_v40, 16  ;;  %v456_v39 = vshll.u32 %v322_v40, 16  ;;  %v573_v1 = vshrl.u32 %v337_v27, 16 }
  0x9e   : > { %10248 = vst [vmem:[#allocation15_spill] sm:$0xff] %v7938_v63  ;;  %v1320_v38 = vshrl.u32 %v7938_v63, 16  ;;  %v1323_v23 = vshll.u32 %v7938_v63, 16  ;;  %6918 = vmatmul.mubr.msk.bf16.gmra.mxu1 %vm1425_vm10, %v6293_v58  ;;  %v1117_v2 = vrot.slane %v1116_v28, 4  ;;  %v7943_v50 = vld [vmem:[#allocation2 + $0x114] sm:$0x1] }
  0x9f   : > { %v447_v59 = vrot.slane %v445_v52, 7  ;;  %v1108_v46 = vsel %vm7558_vm9, %v1103_v6, %v1107_v35  ;;  %v1329_v61 = vshll.u32 %v7943_v50, 16  ;;  %v455_v58 = vrot.slane %v453_v49, 7  ;;  %v751_v28 = vld [vmem:[#allocation2 + $0x88] sm:$0xf] }
  0xa0   : > { %v1322_v43 = vrot.slane %v1320_v38, 4  ;;  %v1325_v44 = vrot.slane %v1323_v23, 5  ;;  %v1122_v36 = vsel %vm7558_vm9, %v1117_v2, %v1121_v13  ;;  %v575_v63 = vrot.slane %v573_v1, 7  ;;  %v841_v13 = vld [vmem:[#allocation2 + $0x120] sm:$0xf] }
  0xa1   : > { %v450_v20 = vor.u32 %v448_v37, %v447_v59  ;;  %v451_v41 = vrot.slane %v447_v59, 4  ;;  %v6286_v40 = vcombine.low %v1108_v46, %v1122_v36  ;;  %v458_v35 = vor.u32 %v456_v39, %v455_v58  ;;  %v844_v37 = vld [vmem:[#allocation2 + $0x124] sm:$0x1]  ;;  %v1934_v52 = vld [vmem:[#allocation2 + $0x18] sm:$0xe] }
  0xa2   : > { %v1326_v29 = vor.u32 %v1325_v44, %v1322_v43  ;;  %v459_v6 = vrot.slane %v455_v58, 4  ;;  %v1331_v59 = vrot.slane %v1329_v61, 5  ;;  %v576_v1 = vshll.u32 %v337_v27, 16  ;;  %v1933_v58 = vld [vmem:[#allocation2 + $0x10] sm:$0xe] }
  0xa3   : > { %v746_v38 = vsel %vm7524_vm6, %v450_v20, %v745_v12  ;;  %v749_v23 = vsel %vm7530_vm8, %v451_v41, %v748_v34  ;;  %6905 = vmatprep.mubr.msk.bf16.mxu0 %vm1425_vm10, %v6286_v40  ;;  %v7957_v49 = vld [vmem:[#allocation2 + $0x118] sm:$0xf]  ;;  %v7959_v2 = vld [vmem:[#allocation2 + $0x11c] sm:$0x1]  ;;  %v752_v44 = vsel %vm7524_vm6, %v458_v35, %v751_v28  ;;  %v1931_v34 = vld [vmem:[#allocation2] sm:$0xe] }
  0xa4   : > { %10249 = vst [vmem:[#allocation16_spill] sm:$0xff] %v7957_v49  ;;  %747 = vst [vmem:[#allocation2 + $0x80] sm:$0xf] %v746_v38  ;;  %v1334_v12 = vshrl.u32 %v7957_v49, 16  ;;  %v1337_v46 = vshll.u32 %v7957_v49, 16  ;;  %v1343_v43 = vshll.u32 %v7959_v2, 16  ;;  %v755_v61 = vsel %vm7530_vm8, %v459_v6, %v754_v8 }
  0xa5   : > { %750 = vst [vmem:[#allocation2 + $0x84] sm:$0x1] %v749_v23  ;;  %v1327_v36 = vrot.slane %v1326_v29, 4  ;;  %753 = vst [vmem:[#allocation2 + $0x88] sm:$0xf] %v752_v44  ;;  %v578_v20 = vor.u32 %v576_v1, %v575_v63  ;;  %v579_v27 = vrot.slane %v575_v63, 4 }
  0xa6   : > { %v1932_v41 = vld [vmem:[#allocation2 + $0x8] sm:$0xe]  ;;  %v1336_v40 = vrot.slane %v1334_v12, 4  ;;  %v1339_v38 = vrot.slane %v1337_v46, 5  ;;  %v1345_v23 = vrot.slane %v1343_v43, 5  ;;  %v581_v39 = vshrl.u32 %v338_v5, 16 }
  0xa7   : > { %756 = vst [vmem:[#allocation2 + $0x8c] sm:$0x1] %v755_v61  ;;  %v584_v54 = vshll.u32 %v338_v5, 16  ;;  %v842_v28 = vsel %vm7524_vm6, %v578_v20, %v841_v13  ;;  %v845_v29 = vsel %vm7530_vm8, %v579_v27, %v844_v37  ;;  %v847_v35 = vld [vmem:[#allocation2 + $0x128] sm:$0xf]  ;;  %vm2027_vm11 = vcmask 1042432  }
  0xa8   : > { %v1340_v8 = vor.u32 %v1339_v38, %v1336_v40  ;;  %v583_v6 = vrot.slane %v581_v39, 7  ;;  %843 = vst [vmem:[#allocation2 + $0x120] sm:$0xf] %v842_v28  ;;  %846 = vst [vmem:[#allocation2 + $0x124] sm:$0x1] %v845_v29  ;;  %vm2028_vm12 = vcmask 1046532   ;;  %v1332_v12 = vsel %vm7558_vm9, %v1327_v36, %v1331_v59 }
  0xa9   : > { %v850_v63 = vld [vmem:[#allocation2 + $0x12c] sm:$0x1]  ;;  %v6344_v1 = vrot.slane %v1931_v34, 9  ;;  %vm7976_vm13 = vmor %vm2027_vm11, %vm2028_vm12  ;;  %v10250_v5 = vmov 0  ;;  %v6345_v13 = vrot.slane %v1932_v41, 9  ;;  %v6346_v46 = vrot.slane %v1933_v58, 9 }
  0xaa   : > { %v10251_v5 = vsel %vm7976_vm13, 4294967295, %v10250_v5  ;;  %v6347_v43 = vrot.slane %v1934_v52, 9  ;;  %v1341_v37 = vrot.slane %v1340_v8, 4  ;;  %v586_v39 = vor.u32 %v584_v54, %v583_v6 }
  0xab   : > { %10252 = vst [vmem:[#allocation17_spill] sm:$0xff] %v10251_v5  ;;  %v7980_v44 = vld [vmem:[#allocation2 + $0x80] sm:$0xf]  ;;  %v587_v20 = vrot.slane %v583_v6, 4  ;;  %v10253_v27 = vrot.slane %v7518_v10, 5  ;;  %v10254_v52 = vrot.slane %v7575_v16, 5 }
  0xac   : > { %v7982_v61 = vld [vmem:[#allocation2 + $0x84] sm:$0x1]  ;;  %v1124_v59 = vshrl.u32 %v7980_v44, 16  ;;  %v1127_v36 = vshll.u32 %v7980_v44, 16  ;;  %v1346_v54 = vsel %vm7558_vm9, %v1341_v37, %v1345_v23  ;;  %v8001_v10 = vld [vmem:[#allocation2 + $0x88] sm:$0xf]  ;;  %v848_v40 = vsel %vm7524_vm6, %v586_v39, %v847_v35 }
  0xad   : > { %v7988_v34 = vsel %vm7976_vm13, %v6344_v1, %v10253_v27  ;;  %v1133_v41 = vshll.u32 %v7982_v61, 16  ;;  %v7997_v58 = vsel %vm7976_vm13, %v6345_v13, %v10254_v52  ;;  %v851_v38 = vsel %vm7530_vm8, %v587_v20, %v850_v63  ;;  %849 = vst [vmem:[#allocation2 + $0x128] sm:$0xf] %v848_v40 }
  0xae   : > { %v6294_v29 = vcombine.low %v1332_v12, %v1346_v54  ;;  %v8009_v16 = vld [vmem:[#allocation2 + $0x8c] sm:$0x1]  ;;  %v1126_v8 = vrot.slane %v1124_v59, 4  ;;  %v1129_v6 = vrot.slane %v1127_v36, 5  ;;  %852 = vst [vmem:[#allocation2 + $0x12c] sm:$0x1] %v851_v38 }
  0xaf   : > { %v1138_v23 = vshrl.u32 %v8001_v10, 16  ;;  %v1141_v1 = vshll.u32 %v8001_v10, 16  ;;  %v1147_v13 = vshll.u32 %v8009_v16, 16  ;;  %v10255_v35 = vrot.slane %v7597_v56, 5  ;;  %v8021_v37 = vld [vmem:[#allocation2 + $0x120] sm:$0xf] }
  0xb0   : > { %6921 = vmatprep.mubr.msk.bf16.mxu1 %vm1425_vm10, %v6294_v29  ;;  %v1130_v12 = vor.u32 %v1129_v6, %v1126_v8  ;;  %10256 = vst [vmem:[#allocation18_spill] sm:$0xff] %v8021_v37  ;;  %v8023_v39 = vld [vmem:[#allocation2 + $0x124] sm:$0x1]  ;;  %v10258_v20 = vrot.slane %v7622_v22, 5  ;;  %v1935_v59 = vld [vmem:[#allocation2 + $0x20] sm:$0xe] }
  0xb1   : > { %v8018_v63 = vsel %vm7976_vm13, %v6346_v46, %v10255_v35  ;;  %10257 = vst [vmem:[#allocation19_spill] sm:$0xff] %v8023_v39  ;;  %v1135_v36 = vrot.slane %v1133_v41, 5  ;;  %v1140_v56 = vrot.slane %v1138_v23, 4  ;;  %v1143_v52 = vrot.slane %v1141_v1, 5  ;;  %v1936_v54 = vld [vmem:[#allocation2 + $0x28] sm:$0xe] }
  0xb2   : > { %v8029_v27 = vsel %vm7976_vm13, %v6347_v43, %v10258_v20  ;;  %v1348_v46 = vshrl.u32 %v8021_v37, 16  ;;  %v1131_v40 = vrot.slane %v1130_v12, 4  ;;  %v1351_v38 = vshll.u32 %v8021_v37, 16  ;;  %v1939_v37 = vld [vmem:[#allocation2 + $0x50] sm:$0xe] }
  0xb3   : > { %v1144_v8 = vor.u32 %v1143_v52, %v1140_v56  ;;  %v1149_v6 = vrot.slane %v1147_v13, 5  ;;  %v1357_v35 = vshll.u32 %v8023_v39, 16  ;;  %v6348_v20 = vrot.slane %v1935_v59, 9 }
  0xb4   : > { %v1350_v22 = vrot.slane %v1348_v46, 4  ;;  %v1353_v43 = vrot.slane %v1351_v38, 5  ;;  %v2048_v41 = vrot.slane %v7661_v0, 5  ;;  %v6349_v23 = vrot.slane %v1936_v54, 9  ;;  %v8039_v12 = vld [vmem:[#allocation2 + $0x128] sm:$0xf] }
  0xb5   : > { %v1136_v1 = vsel %vm7558_vm9, %v1131_v40, %v1135_v36  ;;  %v1145_v28 = vrot.slane %v1144_v8, 4  ;;  %10259 = vst [vmem:[#allocation20_spill] sm:$0xff] %v8039_v12  ;;  %v8041_v53 = vld [vmem:[#allocation2 + $0x12c] sm:$0x1]  ;;  %v2052_v29 = vrot.slane %v7673_v42, 5  ;;  %v1362_v13 = vshrl.u32 %v8039_v12, 16 }
  0xb6   : > { %10260 = vst [vmem:[#allocation21_spill] sm:$0xff] %v8041_v53  ;;  %v1354_v56 = vor.u32 %v1353_v43, %v1350_v22  ;;  %v1365_v52 = vshll.u32 %v8039_v12, 16  ;;  %v1371_v59 = vshll.u32 %v8041_v53, 16  ;;  %v1937_v46 = vld [vmem:[#allocation2 + $0x30] sm:$0xe]  ;;  %v1359_v42 = vrot.slane %v1357_v35, 5 }
  0xb7   : > { %v8047_v0 = vld [vmem:[#allocation2 + $0xa4] sm:$0x1]  ;;  %v8050_v36 = vld [vmem:[#allocation2 + $0xac] sm:$0x1]  ;;  %v1150_v38 = vsel %vm7558_vm9, %v1145_v28, %v1149_v6  ;;  %v1938_v8 = vld [vmem:[#allocation2 + $0x38] sm:$0xe]  ;;  %v2049_v40 = vsel %vm7976_vm13, %v6348_v20, %v2048_v41  ;;  %v2053_v28 = vsel %vm7976_vm13, %v6349_v23, %v2052_v29 }
  0xb8   : > { %v6287_v22 = vcombine.low %v1136_v1, %v1150_v38  ;;  %v1355_v43 = vrot.slane %v1354_v56, 4  ;;  %v1364_v18 = vrot.slane %v1362_v13, 4  ;;  %v1367_v15 = vrot.slane %v1365_v52, 5  ;;  %v1940_v6 = vld [vmem:[#allocation2 + $0x58] sm:$0xe] }
  0xb9   : > { %v6350_v39 = vrot.slane %v1937_v46, 9  ;;  %v2056_v53 = vrot.slane %v7716_v26, 5  ;;  %v1373_v12 = vrot.slane %v1371_v59, 5  ;;  %v1941_v35 = vld [vmem:[#allocation2 + $0x60] sm:$0xe]  ;;  %v10261_v1 = vcombine.low %v7988_v34, %v7997_v58 }
  0xba   : > { %6906 = vmatmul.mubr.msk.bf16.gmra.mxu0 %vm1425_vm10, %v6287_v22  ;;  %v1368_v54 = vor.u32 %v1367_v15, %v1364_v18  ;;  %v6351_v56 = vrot.slane %v1938_v8, 9  ;;  %v2060_v26 = vrot.slane %v7722_v30, 5  ;;  %v8066_v13 = vld [vmem:[#allocation2 + $0x68] sm:$0xe]  ;;  %v8068_v15 = vld [vmem:[#allocation2 + $0x70] sm:$0xe]  ;;  %v1360_v30 = vsel %vm7558_vm9, %v1355_v43, %v1359_v42 }
  0xbb   : > { %6961 = vmatprep.mubr.msk.bf16.mxu0 %vm1425_vm10, %v10261_v1  ;;  %v8070_v18 = vld [vmem:[#allocation2 + $0xa0] sm:$0xf]  ;;  %v8072_v20 = vld [vmem:[#allocation2 + $0xa8] sm:$0xf]  ;;  %v8076_v41 = vld [vmem:[#allocation2 + $0xb0] sm:$0xf]  ;;  %v6379_v22 = vcombine.low %v2049_v40, %v2053_v28  ;;  %v8089_v1 = vsel %vm7976_vm13, %v6350_v39, %v2056_v53 }
  0xbc   : > { %10262 = vst [vmem:[#allocation22_spill] sm:$0xff] %v8076_v41  ;;  %v8078_v23 = vld [vmem:[#allocation2 + $0xb8] sm:$0xf]  ;;  %v1369_v58 = vrot.slane %v1368_v54, 4  ;;  %v6352_v52 = vrot.slane %v1939_v37, 9  ;;  %v2064_v59 = vrot.slane %v7741_v31, 5  ;;  %v8101_v34 = vsel %vm7976_vm13, %v6351_v56, %v2060_v26 }
  0xbd   : > { %10263 = vst [vmem:[#allocation23_spill] sm:$0xff] %v8078_v23  ;;  %v1944_v46 = vld [vmem:[#allocation2 + $0x78] sm:$0xe]  ;;  %v1947_v38 = vld [vmem:[#allocation2 + $0xa0] sm:$0xe]  ;;  %v3421_v8 = vsel %vm1474_vm0, %v7871_v32, 0  ;;  %v10264_v26 = vcombine.low %v7516_v9, %v7573_v14 }
  0xbe   : > { %v1945_v29 = vld [vmem:[#allocation2 + $0x80] sm:$0xe]  ;;  %v1948_v23 = vld [vmem:[#allocation2 + $0xa8] sm:$0xe]  ;;  %v1374_v37 = vsel %vm7558_vm9, %v1369_v58, %v1373_v12  ;;  %v6353_v54 = vrot.slane %v1940_v6, 9  ;;  %v2068_v31 = vrot.slane %v7784_v3, 5  ;;  %v8105_v12 = vsel %vm7976_vm13, %v6352_v52, %v2064_v59 }
  0xbf   : > { %v6354_v42 = vrot.slane %v1941_v35, 9  ;;  %v1949_v43 = vld [vmem:[#allocation2 + $0xb0] sm:$0xe]  ;;  %v1950_v41 = vld [vmem:[#allocation2 + $0xb8] sm:$0xe]  ;;  %v6295_v32 = vcombine.low %v1360_v30, %v1374_v37  ;;  %v2072_v40 = vrot.slane %v7844_v7, 5 }
  0xc0   : > { %v6355_v53 = vrot.slane %v8066_v13, 9  ;;  %v2076_v39 = vrot.slane %v7863_v51, 5  ;;  %v1946_v28 = vld [vmem:[#allocation2 + $0x88] sm:$0xe]  ;;  %v6356_v3 = vrot.slane %v8068_v15, 9  ;;  %v2080_v6 = vrot.slane %v7912_v24, 5 }
  0xc1   : > { %6922 = vmatmul.mubr.msk.bf16.gmra.mxu1 %vm1425_vm10, %v6295_v32  ;;  %v6357_v7 = vrot.slane %v1944_v46, 9  ;;  %v2084_v35 = vrot.slane %v7914_v17, 5  ;;  %v6358_v13 = vrot.slane %v1945_v29, 9  ;;  %v6360_v51 = vrot.slane %v1947_v38, 9  ;;  %v8114_v56 = vld [vmem:[%s10186_s1 + $0x18] sm:$0xf] }
  0xc2   : > { %6927 = vmatprep.mubr.msk.bf16.mxu1 %vm1425_vm10, %v10264_v26  ;;  %v10265_v24 = vcombine.low %v8018_v63, %v8029_v27  ;;  %v2088_v15 = vrot.slane %v7982_v61, 5  ;;  %v6359_v17 = vrot.slane %v1946_v28, 9  ;;  %v2092_v29 = vrot.slane %v8009_v16, 5  ;;  %v7271_v52 = vld [vmem:[#allocation2 + $0xb4] sm:$0x1] }
  0xc3   : > { %v6361_v30 = vrot.slane %v1948_v23, 9  ;;  %v10266_v58 = vrot.slane %v8047_v0, 5  ;;  %v6362_v14 = vrot.slane %v1949_v43, 9  ;;  %v2104_v63 = vrot.slane %v7271_v52, 5  ;;  %v1951_v59 = vld [vmem:[#allocation2 + $0xc0] sm:$0xe] }
  0xc4   : > { %6962 = vmatmul.mubr.msk.bf16.vlgmr.msra.gmra.mxu0 %vm1425_vm10, %v10265_v24  ;;  %v6363_v27 = vrot.slane %v1950_v41, 9  ;;  %v2069_v61 = vsel %vm7976_vm13, %v6353_v54, %v2068_v31  ;;  %v8137_v16 = vsel %vm7976_vm13, %v6354_v42, %v2072_v40  ;;  %v10267_v23 = vrot.slane %v8050_v36, 5  ;;  %v7272_v46 = vld [vmem:[#allocation2 + $0xbc] sm:$0x1]  ;;  %v1952_v43 = vld [vmem:[#allocation2 + $0xc8] sm:$0xe] }
  0xc5   : > { %7028 = vmatpush3.bf16.msra.mxu0 %v3421_v8  ;;  %6965 = vmatprep.mubr.msk.bf16.mxu0 %vm1425_vm10, %v6379_v22  ;;  %v8131_v9 = vsel %vm7976_vm13, %v6360_v51, %v10266_v58  ;;  %v2108_v38 = vrot.slane %v7272_v46, 5  ;;  %v8149_v41 = vsel %vm7976_vm13, %v6355_v53, %v2076_v39  ;;  %v8153_v8 = vsel %vm7976_vm13, %v6356_v3, %v2080_v6  ;;  %v8173_v32 = vld [vmem:[#allocation2 + $0xd0] sm:$0xe]  ;;  %v1957_v39 = vld [vmem:[#allocation2 + $0x100] sm:$0xe]  ;;  %v10280_v6 = vld [vmem:[#allocation10_spill] sm:$0xff] }
  0xc6   : > { %v8143_v0 = vsel %vm7976_vm13, %v6361_v30, %v10267_v23  ;;  %7206 = vmatprep.subr.msk.bf16.mxu0 %vm1474_vm0, %v8114_v56  ;;  %v8157_v36 = vsel %vm7976_vm13, %v6357_v7, %v2084_v35  ;;  %v2615_v37 = vsel %vm1474_vm0, %v7838_v4, 0  ;;  %v6380_v54 = vcombine.low %v8089_v1, %v8101_v34  ;;  %v7273_v1 = vld [vmem:[#allocation2 + $0xc4] sm:$0x1]  ;;  %v1958_v35 = vld [vmem:[#allocation2 + $0x108] sm:$0xe] }
  0xc7   : > { %v8167_v31 = vsel %vm7976_vm13, %v6358_v13, %v2088_v15  ;;  %v8171_v42 = vsel %vm7976_vm13, %v6359_v17, %v2092_v29  ;;  %v8177_v40 = vsel %vm7976_vm13, %v6362_v14, %v2104_v63  ;;  %v8181_v4 = vsel %vm7976_vm13, %v6363_v27, %v2108_v38  ;;  %v8193_v13 = vld [vmem:[%s10186_s1 + $0x14] sm:$0xf]  ;;  %v7274_v24 = vld [vmem:[#allocation2 + $0xcc] sm:$0x1]  ;;  %v8201_v17 = vld [vmem:[#allocation2 + $0xd0] sm:$0xf] }
  0xc8   : > { %v6364_v34 = vrot.slane %v1951_v59, 9  ;;  %v2112_v53 = vrot.slane %v7273_v1, 5  ;;  %v6381_v28 = vcombine.low %v8105_v12, %v2069_v61  ;;  %v10268_v51 = vcombine.low %v7601_v60, %v7620_v21  ;;  %v8205_v30 = vld [vmem:[#allocation2 + $0xd8] sm:$0xe]  ;;  %v1959_v58 = vld [vmem:[#allocation2 + $0x110] sm:$0xe] }
  0xc9   : > { %v6365_v26 = vrot.slane %v1952_v43, 9  ;;  %v2116_v15 = vrot.slane %v7274_v24, 5  ;;  %v10269_v60 = vcombine.low %v7659_v62, %v7671_v11  ;;  %v6366_v14 = vrot.slane %v8173_v32, 9  ;;  %v1960_v27 = vld [vmem:[#allocation2 + $0x118] sm:$0xe]  ;;  %v10277_v7 = vld [vmem:[#allocation12_spill] sm:$0xff] }
  0xca   : > { %6928 = vmatmul.mubr.msk.bf16.vlgmr.msra.gmra.mxu1 %vm1425_vm10, %v10268_v51  ;;  %v6370_v63 = vrot.slane %v1957_v39, 9  ;;  %v8219_v59 = vsel %vm7976_vm13, %v6364_v34, %v2112_v53  ;;  %v7276_v61 = vld [vmem:[#allocation2 + $0xd4] sm:$0x1]  ;;  %v8221_v11 = vld [vmem:[#allocation2 + $0xf0] sm:$0xe]  ;;  %v2136_v23 = vrot.slane %v7885_v47, 5 }
  0xcb   : > { %6994 = vmatpush3.bf16.msra.mxu1 %v2615_v37  ;;  %6931 = vmatprep.mubr.msk.bf16.mxu1 %vm1425_vm10, %v10269_v60  ;;  %v2120_v62 = vrot.slane %v7276_v61, 5  ;;  %v6371_v46 = vrot.slane %v1958_v35, 9  ;;  %v6367_v38 = vrot.slane %v8205_v30, 9  ;;  %v2140_v37 = vrot.slane %v7894_v57, 5  ;;  %v1956_v1 = vld [vmem:[#allocation2 + $0xf8] sm:$0xe] }
  0xcc   : > { %6966 = vmatmul.mubr.msk.bf16.gmra.mxu0 %vm1425_vm10, %v6380_v54  ;;  %7205 = vmatprep.subr.msk.bf16.mxu1 %vm1474_vm0, %v8193_v13  ;;  %v10270_v54 = vld [vmem:[#allocation15_spill] sm:$0xff]  ;;  %v6372_v32 = vrot.slane %v1959_v58, 9  ;;  %v8233_v34 = vsel %vm7976_vm13, %v6365_v26, %v2116_v15  ;;  %v8237_v47 = vsel %vm7976_vm13, %v6370_v63, %v2136_v23  ;;  %v2144_v53 = vrot.slane %v7943_v50, 5  ;;  %v7277_v35 = vld [vmem:[#allocation2 + $0xdc] sm:$0x1]  ;;  %v10275_v63 = vld [vmem:[#allocation8_spill] sm:$0xff] }
  0xcd   : > { %6969 = vmatprep.mubr.msk.bf16.mxu0 %vm1425_vm10, %v6381_v28  ;;  %v6373_v39 = vrot.slane %v1960_v27, 9  ;;  %v2810_v28 = vld [vmem:[#allocation2 + $0x8] sm:$0xf]  ;;  %v2124_v51 = vrot.slane %v7277_v35, 5  ;;  %v8242_v57 = vsel %vm7976_vm13, %v6371_v46, %v2140_v37  ;;  %v2148_v24 = vrot.slane %v7959_v2, 5  ;;  %v10273_v60 = vld [vmem:[#allocation11_spill] sm:$0xff] }
  0xce   : > { %v8247_v58 = vld [vmem:[#allocation2 + $0xf0] sm:$0xf]  ;;  %v6368_v50 = vrot.slane %v8221_v11, 9  ;;  %v8256_v61 = vsel %vm7976_vm13, %v6372_v32, %v2144_v53  ;;  %v1961_v23 = vld [vmem:[#allocation2 + $0x120] sm:$0xe]  ;;  %v2875_v11 = vshrl.u32 %v2810_v28, 16 }
  0xcf   : > { %v8258_v46 = vld [vmem:[#allocation2 + $0xc] sm:$0x1]  ;;  %v2812_v2 = vld [vmem:[#allocation2 + $0x10] sm:$0xf]  ;;  %v8264_v35 = vsel %vm7976_vm13, %v6373_v39, %v2148_v24  ;;  %v1962_v15 = vld [vmem:[#allocation2 + $0x128] sm:$0xe] }
  0xd0   : > { %v2878_v43 = vshll.u32 %v2810_v28, 16  ;;  %v2814_v52 = vld [vmem:[#allocation2 + $0x18] sm:$0xf]  ;;  %v10274_v27 = vld [vmem:[#allocation7_spill] sm:$0xff]  ;;  %v7279_v32 = vld [vmem:[#allocation2 + $0xf4] sm:$0x1] }
  0xd1   : > { %v10276_v29 = vcombine.low %v10274_v27, %v10275_v63  ;;  %v2128_v53 = vrot.slane %v7279_v32, 5  ;;  %v6369_v21 = vrot.slane %v1956_v1, 9  ;;  %v2132_v22 = vrot.slane %v10277_v7, 5  ;;  %v8273_v12 = vld [vmem:[#allocation2 + $0x14] sm:$0x1]  ;;  %v10282_v63 = vld [vmem:[#allocation19_spill] sm:$0xff] }
  0xd2   : > { %10278 = vst [vmem:[#allocation15_spill] sm:$0xff] %v8273_v12  ;;  %v2816_v39 = vld [vmem:[#allocation2 + $0x20] sm:$0xf]  ;;  %v10279_v24 = vld [vmem:[#allocation9_spill] sm:$0xff]  ;;  %v6374_v3 = vrot.slane %v1961_v23, 9  ;;  %v2152_v27 = vrot.slane %v10282_v63, 5  ;;  %v10283_v1 = vcombine.low %v8137_v16, %v8149_v41  ;;  %v8291_v23 = vsel %vm7976_vm13, %v6366_v14, %v2120_v62 }
  0xd3   : > { %6932 = vmatmul.mubr.msk.bf16.gmra.mxu1 %vm1425_vm10, %v10276_v29  ;;  %v10281_v28 = vcombine.low %v10279_v24, %v10280_v6  ;;  %v2877_v29 = vrot.slane %v2875_v11, 4  ;;  %v2880_v30 = vrot.slane %v2878_v43, 5  ;;  %v6375_v7 = vrot.slane %v1962_v15, 9  ;;  %v10284_v32 = vld [vmem:[#allocation21_spill] sm:$0xff]  ;;  %v8294_v16 = vld [vmem:[#allocation2 + $0x1c] sm:$0x1] }
  0xd4   : > { %6970 = vmatmul.mubr.msk.bf16.gmra.mxu0 %vm1425_vm10, %v10283_v1  ;;  %v2156_v37 = vrot.slane %v10284_v32, 5  ;;  %v2889_v26 = vshrl.u32 %v2812_v2, 16  ;;  %v2892_v49 = vshll.u32 %v2812_v2, 16  ;;  %v10285_v6 = vcombine.low %v8153_v8, %v8157_v36  ;;  %10286 = vst [vmem:[#allocation11_spill] sm:$0xff] %v8294_v16 }
  0xd5   : > { %6935 = vmatprep.mubr.msk.bf16.mxu1 %vm1425_vm10, %v10281_v28  ;;  %v2881_v43 = vor.u32 %v2880_v30, %v2877_v29  ;;  %v2884_v11 = vshll.u32 %v8258_v46, 16  ;;  %v2903_v41 = vshrl.u32 %v2814_v52, 16  ;;  %v8298_v15 = vsel %vm7976_vm13, %v6367_v38, %v2124_v51  ;;  %v2818_v30 = vld [vmem:[#allocation2 + $0x28] sm:$0xf]  ;;  %v10289_v29 = vld [vmem:[#allocation14_spill] sm:$0xff] }
  0xd6   : > { %6973 = vmatprep.mubr.msk.bf16.mxu0 %vm1425_vm10, %v10285_v6  ;;  %v2906_v2 = vshll.u32 %v2814_v52, 16  ;;  %v2917_v24 = vshrl.u32 %v2816_v39, 16  ;;  %v2920_v28 = vshll.u32 %v2816_v39, 16  ;;  %v8302_v8 = vsel %vm7976_vm13, %v6368_v50, %v2128_v53  ;;  %v8317_v39 = vld [vmem:[#allocation2 + $0x24] sm:$0x1] }
  0xd7   : > { %v8306_v36 = vsel %vm7976_vm13, %v6369_v21, %v2132_v22  ;;  %v8310_v14 = vsel %vm7976_vm13, %v6374_v3, %v2152_v27  ;;  %v2898_v62 = vshll.u32 %v8273_v12, 16  ;;  %v8315_v52 = vsel %vm7976_vm13, %v6375_v7, %v2156_v37  ;;  %10287 = vst [vmem:[#allocation7_spill] sm:$0xff] %v8317_v39  ;;  %v2820_v53 = vld [vmem:[#allocation2 + $0x30] sm:$0xf]  ;;  %v709_v22 = vld [vmem:[#allocation2 + $0x40] sm:$0xf] }
  0xd8   : > { %v2891_v38 = vrot.slane %v2889_v26, 4  ;;  %v2894_v51 = vrot.slane %v2892_v49, 5  ;;  %v2912_v50 = vshll.u32 %v8294_v16, 16  ;;  %v8322_v3 = vrot.slane %v2881_v43, 4  ;;  %v10288_v27 = vld [vmem:[#allocation13_spill] sm:$0xff] }
  0xd9   : > { %v8324_v21 = vrot.slane %v2884_v11, 5  ;;  %v2905_v63 = vrot.slane %v2903_v41, 4  ;;  %v10290_v37 = vcombine.low %v10288_v27, %v10289_v29  ;;  %v2908_v49 = vrot.slane %v2906_v2, 5  ;;  %v8340_v41 = vld [vmem:[#allocation2 + $0x2c] sm:$0x1] }
  0xda   : > { %v2919_v26 = vrot.slane %v2917_v24, 4  ;;  %v2922_v1 = vrot.slane %v2920_v28, 5  ;;  %v2931_v7 = vshrl.u32 %v2818_v30, 16  ;;  %v10291_v32 = vcombine.low %v7908_v33, %v7910_v25  ;;  %10292 = vst [vmem:[#allocation8_spill] sm:$0xff] %v8340_v41  ;;  %v315_v2 = vld [vmem:[%s7512_s28 + $0x1c] sm:$0xf] }
  0xdb   : > { %6936 = vmatmul.mubr.msk.bf16.gmra.mxu1 %vm1425_vm10, %v10290_v37  ;;  %v8338_v11 = vrot.slane %v2898_v62, 5  ;;  %v2934_v27 = vshll.u32 %v2818_v30, 16  ;;  %v10293_v24 = vcombine.low %v8167_v31, %v8171_v42  ;;  %v2895_v33 = vor.u32 %v2894_v51, %v2891_v38  ;;  %v8349_v28 = vld [vmem:[#allocation2 + $0x34] sm:$0x1]  ;;  %v2822_v51 = vld [vmem:[#allocation2 + $0x38] sm:$0xf] }
  0xdc   : > { %6939 = vmatprep.mubr.msk.bf16.mxu1 %vm1425_vm10, %v10291_v32  ;;  %v8347_v25 = vrot.slane %v2912_v50, 5  ;;  %10294 = vst [vmem:[#allocation12_spill] sm:$0xff] %v8349_v28  ;;  %v2933_v29 = vrot.slane %v2931_v7, 4  ;;  %v2945_v37 = vshrl.u32 %v2820_v53, 16  ;;  %v10295_v62 = vcombine.low %v8131_v9, %v8143_v0  ;;  %v2826_v43 = vld [vmem:[#allocation2 + $0x58] sm:$0xf] }
  0xdd   : > { %6974 = vmatmul.mubr.msk.bf16.gmra.mxu0 %vm1425_vm10, %v10293_v24  ;;  %v2926_v31 = vshll.u32 %v8317_v39, 16  ;;  %v2936_v42 = vrot.slane %v2934_v27, 5  ;;  %v2948_v38 = vshll.u32 %v2820_v53, 16  ;;  %v2909_v50 = vor.u32 %v2908_v49, %v2905_v63  ;;  %v712_v16 = vld [vmem:[#allocation2 + $0x44] sm:$0x1] }
  0xde   : > { %6977 = vmatprep.mubr.msk.bf16.mxu0 %vm1425_vm10, %v10295_v62  ;;  %v2923_v32 = vor.u32 %v2922_v1, %v2919_v26  ;;  %v2947_v24 = vrot.slane %v2945_v37, 4  ;;  %v397_v7 = vshrl.u32 %v315_v2, 16  ;;  %v2940_v6 = vshll.u32 %v8340_v41, 16  ;;  %v8362_v12 = vld [vmem:[#allocation2 + $0x3c] sm:$0x1] }
  0xdf   : > { %v2950_v9 = vrot.slane %v2948_v38, 5  ;;  %v2954_v0 = vshll.u32 %v8349_v28, 16  ;;  %v400_v62 = vshll.u32 %v315_v2, 16  ;;  %v2937_v5 = vor.u32 %v2936_v42, %v2933_v29  ;;  %v2828_v41 = vld [vmem:[#allocation2 + $0x60] sm:$0xf] }
  0xe0   : > { %v399_v30 = vrot.slane %v397_v7, 7  ;;  %v2959_v27 = vshrl.u32 %v2822_v51, 16  ;;  %v2962_v53 = vshll.u32 %v2822_v51, 16  ;;  %v2896_v39 = vrot.slane %v2895_v33, 4 }
  0xe1   : > { %v2928_v63 = vrot.slane %v2926_v31, 5  ;;  %v2951_v49 = vor.u32 %v2950_v9, %v2947_v24  ;;  %v2987_v26 = vshrl.u32 %v2826_v43, 16  ;;  %v10296_v1 = vcombine.low %v7980_v44, %v8001_v10 }
  0xe2   : > { %v402_v37 = vor.u32 %v400_v62, %v399_v30  ;;  %v403_v38 = vrot.slane %v399_v30, 4  ;;  %v2961_v2 = vrot.slane %v2959_v27, 4  ;;  %v2964_v28 = vrot.slane %v2962_v53, 5 }
  0xe3   : > { %6940 = vmatmul.mubr.msk.bf16.gmra.mxu1 %vm1425_vm10, %v10296_v1  ;;  %v10297_v29 = vcombine.low %v8070_v18, %v8072_v20  ;;  %v2910_v42 = vrot.slane %v2909_v50, 4  ;;  %v2924_v33 = vrot.slane %v2923_v32, 4  ;;  %v2942_v31 = vrot.slane %v2940_v6, 5  ;;  %v2830_v18 = vld [vmem:[#allocation2 + $0x68] sm:$0xf] }
  0xe4   : > { %v2956_v51 = vrot.slane %v2954_v0, 5  ;;  %v10298_v24 = vcombine.low %v8177_v40, %v8181_v4  ;;  %v2938_v44 = vrot.slane %v2937_v5, 4  ;;  %v710_v30 = vsel %vm7524_vm6, %v402_v37, %v709_v22  ;;  %v2832_v32 = vld [vmem:[#allocation2 + $0x70] sm:$0xf]  ;;  %v10302_v37 = vld [vmem:[#allocation22_spill] sm:$0xff] }
  0xe5   : > { %6943 = vmatprep.mubr.msk.bf16.mxu1 %vm1425_vm10, %v10297_v29  ;;  %v713_v9 = vsel %vm7530_vm8, %v403_v38, %v712_v16  ;;  %v2990_v62 = vshll.u32 %v2826_v43, 16  ;;  %v10301_v20 = vcombine.low %v8219_v59, %v8233_v34  ;;  %v2952_v6 = vrot.slane %v2951_v49, 4  ;;  %711 = vst [vmem:[#allocation2 + $0x40] sm:$0xf] %v710_v30  ;;  %v10303_v38 = vld [vmem:[#allocation23_spill] sm:$0xff] }
  0xe6   : > { %6978 = vmatmul.mubr.msk.bf16.gmra.mxu0 %vm1425_vm10, %v10298_v24  ;;  %714 = vst [vmem:[#allocation2 + $0x44] sm:$0x1] %v713_v9  ;;  %v2968_v40 = vshll.u32 %v8362_v12, 16  ;;  %v3001_v4 = vshrl.u32 %v2828_v41, 16  ;;  %v3004_v5 = vshll.u32 %v2828_v41, 16  ;;  %v8387_v22 = vsel %vm1474_vm0, %v8193_v13, 0 }
  0xe7   : > { %6981 = vmatprep.mubr.msk.bf16.mxu0 %vm1425_vm10, %v10301_v20  ;;  %v2965_v50 = vor.u32 %v2964_v28, %v2961_v2  ;;  %v2989_v16 = vrot.slane %v2987_v26, 4  ;;  %v2992_v43 = vrot.slane %v2990_v62, 5  ;;  %v2901_v59 = vsel %vm7558_vm9, %v2896_v39, %v8338_v11  ;;  %v8399_v41 = vld [vmem:[#allocation2 + $0x5c] sm:$0x1]  ;;  %v8409_v26 = vld [vmem:[#allocation2 + $0x64] sm:$0x1] }
  0xe8   : > { %v2915_v34 = vsel %vm7558_vm9, %v2910_v42, %v8347_v25  ;;  %v8397_v0 = vsel %vm1474_vm0, %v8114_v56, 0  ;;  %v3015_v13 = vshrl.u32 %v2830_v18, 16  ;;  %v2929_v28 = vsel %vm7558_vm9, %v2924_v33, %v2928_v63  ;;  %v8411_v56 = vld [vmem:[#allocation2 + $0x6c] sm:$0x1]  ;;  %v8420_v33 = vld [vmem:[#allocation2 + $0x74] sm:$0x1] }
  0xe9   : > { %v3003_v27 = vrot.slane %v3001_v4, 4  ;;  %v3006_v53 = vrot.slane %v3004_v5, 5  ;;  %v3018_v49 = vshll.u32 %v2830_v18, 16  ;;  %v2943_v39 = vsel %vm7558_vm9, %v2938_v44, %v2942_v31  ;;  %v10306_v24 = vld [vmem:[#allocation6_spill] sm:$0xff] }
  0xea   : > { %v2957_v11 = vsel %vm7558_vm9, %v2952_v6, %v2956_v51  ;;  %v8407_v25 = vrot.slane %v2968_v40, 5  ;;  %v3029_v1 = vshrl.u32 %v2832_v32, 16  ;;  %v10304_v2 = vcombine.low %v10302_v37, %v10303_v38  ;;  %v10305_v51 = vld [vmem:[#allocation5_spill] sm:$0xff]  ;;  %v2834_v6 = vld [vmem:[#allocation2 + $0x78] sm:$0xf] }
  0xeb   : > { %v8417_v63 = vrot.slane %v2965_v50, 4  ;;  %v2993_v29 = vor.u32 %v2992_v43, %v2989_v16  ;;  %v2996_v42 = vshll.u32 %v8399_v41, 16  ;;  %v3032_v31 = vshll.u32 %v2832_v32, 16 }
  0xec   : > { %6944 = vmatmul.mubr.msk.bf16.gmra.mxu1 %vm1425_vm10, %v10304_v2  ;;  %v10307_v44 = vcombine.low %v10305_v51, %v10306_v24  ;;  %v10308_v30 = vsel %vm7558_vm9, %v8322_v3, %v8324_v21  ;;  %v8433_v62 = vcombine.low %v2915_v34, %v2929_v28  ;;  %v3017_v18 = vrot.slane %v3015_v13, 4  ;;  %v2824_v5 = vld [vmem:[#allocation2 + $0x40] sm:$0xf]  ;;  %v8462_v2 = vld [vmem:[#allocation2 + $0x7c] sm:$0x1] }
  0xed   : > { %v8431_v9 = vcombine.low %v10308_v30, %v2901_v59  ;;  %v3020_v20 = vrot.slane %v3018_v49, 5  ;;  %v10309_v40 = vcombine.low %v8291_v23, %v8298_v15  ;;  %v8439_v4 = vcombine.low %v2943_v39, %v2957_v11  ;;  %v8446_v21 = vld [vmem:[#allocation2 + $0x44] sm:$0x1]  ;;  %v323_v11 = vld [vmem:[%s7512_s28 + $0x3c] sm:$0xf] }
  0xee   : > { %6947 = vmatprep.mubr.msk.bf16.mxu1 %vm1425_vm10, %v10307_v44  ;;  %v3007_v50 = vor.u32 %v3006_v53, %v3003_v27  ;;  %v3010_v16 = vshll.u32 %v8409_v26, 16  ;;  %v3031_v43 = vrot.slane %v3029_v1, 4  ;;  %v10310_v3 = vcombine.low %v8302_v8, %v8306_v36  ;;  %v2836_v8 = vld [vmem:[#allocation2 + $0x80] sm:$0xf]  ;;  %v8468_v51 = vld [vmem:[#allocation2 + $0x84] sm:$0x1] }
  0xef   : > { %6982 = vmatmul.mubr.msk.bf16.gmra.mxu0 %vm1425_vm10, %v10309_v40  ;;  %v2973_v32 = vshrl.u32 %v2824_v5, 16  ;;  %v2976_v59 = vshll.u32 %v2824_v5, 16  ;;  %v3024_v23 = vshll.u32 %v8411_v56, 16  ;;  %v3034_v15 = vrot.slane %v3032_v31, 5 }
  0xf0   : > { %6985 = vmatprep.mubr.msk.bf16.mxu0 %vm1425_vm10, %v10310_v3  ;;  %v2971_v34 = vsel %vm7558_vm9, %v8417_v63, %v8407_v25  ;;  %v8453_v13 = vrot.slane %v2993_v29, 4  ;;  %v8455_v28 = vrot.slane %v2996_v42, 5  ;;  %v3043_v36 = vshrl.u32 %v2834_v6, 16  ;;  %v760_v3 = vld [vmem:[#allocation2 + $0x94] sm:$0x1]  ;;  %v10319_v63 = vld [vmem:[#allocation18_spill] sm:$0xff] }
  0xf1   : > { %v2975_v27 = vrot.slane %v2973_v32, 4  ;;  %v2978_v53 = vrot.slane %v2976_v59, 5  ;;  %v3021_v49 = vor.u32 %v3020_v20, %v3017_v18  ;;  %v3038_v39 = vshll.u32 %v8420_v33, 16 }
  0xf2   : > { %v2982_v1 = vshll.u32 %v8446_v21, 16  ;;  %v8460_v37 = vrot.slane %v3010_v16, 5  ;;  %v3035_v38 = vor.u32 %v3034_v15, %v3031_v43  ;;  %v3046_v31 = vshll.u32 %v2834_v6, 16  ;;  %v2838_v16 = vld [vmem:[#allocation2 + $0x88] sm:$0xf] }
  0xf3   : > { %v8464_v29 = vrot.slane %v3007_v50, 4  ;;  %v8466_v42 = vrot.slane %v3024_v23, 5  ;;  %v3057_v24 = vshrl.u32 %v2836_v8, 16  ;;  %v3060_v44 = vshll.u32 %v2836_v8, 16 }
  0xf4   : > { %v10311_v30 = vcombine.low %v8201_v17, %v7761_v19  ;;  %v2979_v18 = vor.u32 %v2978_v53, %v2975_v27  ;;  %v3045_v20 = vrot.slane %v3043_v36, 4  ;;  %v3048_v40 = vrot.slane %v3046_v31, 5  ;;  %v2842_v27 = vld [vmem:[#allocation2 + $0xa8] sm:$0xf]  ;;  %v8508_v31 = vld [vmem:[#allocation2 + $0xac] sm:$0x1] }
  0xf5   : > { %v461_v5 = vshrl.u32 %v323_v11, 16  ;;  %v10312_v6 = vcombine.low %v8247_v58, %v10273_v60  ;;  %v2999_v50 = vsel %vm7558_vm9, %v8453_v13, %v8455_v28  ;;  %v8482_v43 = vrot.slane %v3021_v49, 4  ;;  %v757_v49 = vld [vmem:[#allocation2 + $0x90] sm:$0xf] }
  0xf6   : > { %6948 = vmatmul.mubr.msk.bf16.gmra.mxu1 %vm1425_vm10, %v10311_v30  ;;  %v3040_v19 = vrot.slane %v3038_v39, 5  ;;  %v3052_v17 = vshll.u32 %v8462_v2, 16  ;;  %v10313_v32 = vcombine.low %v8237_v47, %v8242_v57  ;;  %v8489_v59 = vrot.slane %v2982_v1, 5 }
  0xf7   : > { %6951 = vmatprep.mubr.msk.bf16.mxu1 %vm1425_vm10, %v10312_v6  ;;  %v3036_v58 = vrot.slane %v3035_v38, 4  ;;  %v3066_v60 = vshll.u32 %v8468_v51, 16  ;;  %v463_v23 = vrot.slane %v461_v5, 7  ;;  %v10314_v15 = vcombine.low %v8256_v61, %v8264_v35  ;;  %v8506_v38 = vld [vmem:[#allocation2 + $0x8c] sm:$0x1] }
  0xf8   : > { %6986 = vmatmul.mubr.msk.bf16.gmra.mxu0 %vm1425_vm10, %v10313_v32  ;;  %v3059_v13 = vrot.slane %v3057_v24, 4  ;;  %v3062_v28 = vrot.slane %v3060_v44, 5  ;;  %v464_v8 = vshll.u32 %v323_v11, 16  ;;  %v3071_v36 = vshrl.u32 %v2838_v16, 16  ;;  %v2846_v5 = vld [vmem:[#allocation2 + $0xb8] sm:$0xf] }
  0xf9   : > { %6989 = vmatprep.mubr.msk.bf16.mxu0 %vm1425_vm10, %v10314_v15  ;;  %v2980_v53 = vrot.slane %v2979_v18, 4  ;;  %v3049_v47 = vor.u32 %v3048_v40, %v3045_v20  ;;  %v467_v57 = vrot.slane %v463_v23, 4  ;;  %v3074_v39 = vshll.u32 %v2838_v16, 16  ;;  %v2844_v18 = vld [vmem:[#allocation2 + $0xb0] sm:$0xf] }
  0xfa   : > { %v3013_v1 = vsel %vm7558_vm9, %v8464_v29, %v8460_v37  ;;  %v3027_v61 = vsel %vm7558_vm9, %v8482_v43, %v8466_v42  ;;  %v8504_v35 = vrot.slane %v3052_v17, 5  ;;  %v466_v11 = vor.u32 %v464_v8, %v463_v23  ;;  %v8528_v23 = vld [vmem:[#allocation2 + $0xb4] sm:$0x1] }
  0xfb   : > { %v761_v24 = vsel %vm7530_vm8, %v467_v57, %v760_v3  ;;  %v3073_v44 = vrot.slane %v3071_v36, 4  ;;  %v3076_v30 = vrot.slane %v3074_v39, 5  ;;  %v3099_v20 = vshrl.u32 %v2842_v27, 16  ;;  %v10316_v3 = vld [vmem:[#allocation16_spill] sm:$0xff] }
  0xfc   : > { %v3041_v37 = vsel %vm7558_vm9, %v3036_v58, %v3040_v19  ;;  %v3063_v29 = vor.u32 %v3062_v28, %v3059_v13  ;;  %v758_v42 = vsel %vm7524_vm6, %v466_v11, %v757_v49  ;;  %762 = vst [vmem:[#allocation2 + $0x94] sm:$0x1] %v761_v24  ;;  %v3102_v40 = vshll.u32 %v2842_v27, 16  ;;  %v2848_v28 = vld [vmem:[#allocation2 + $0xc0] sm:$0xf] }
  0xfd   : > { %v10315_v16 = vcombine.low %v7883_v48, %v7899_v45  ;;  %v2985_v6 = vsel %vm7558_vm9, %v2980_v53, %v8489_v59  ;;  %v3050_v43 = vrot.slane %v3049_v47, 4  ;;  %v3068_v17 = vrot.slane %v3066_v60, 5  ;;  %759 = vst [vmem:[#allocation2 + $0x90] sm:$0xf] %v758_v42  ;;  %v7233_v36 = vld [vmem:[#allocation2 + $0x8] ss:$8 sps:$4 sm:$0xff]  }
  0xfe   : > { %v3101_v19 = vrot.slane %v3099_v20, 4  ;;  %v10317_v32 = vcombine.low %v10270_v54, %v10316_v3  ;;  %v3080_v58 = vshll.u32 %v8506_v38, 16  ;;  %v3104_v48 = vrot.slane %v3102_v40, 5  ;;  %v2850_v20 = vld [vmem:[#allocation2 + $0xc8] sm:$0xf] }
  0xff   : > { %6952 = vmatmul.mubr.msk.bf16.gmra.mxu1 %vm1425_vm10, %v10315_v16  ;;  %v3113_v45 = vshrl.u32 %v2844_v18, 16  ;;  %v3116_v15 = vshll.u32 %v2844_v18, 16  ;;  %v10318_v13 = vcombine.low %v8310_v14, %v8315_v52  ;;  %v3077_v59 = vor.u32 %v3076_v30, %v3073_v44  ;;  %v8542_v52 = vld [vmem:[#allocation2 + $0xbc] sm:$0x1] }
 0x100   : > { %6955 = vmatprep.mubr.msk.bf16.mxu1 %vm1425_vm10, %v10317_v32  ;;  %v3108_v60 = vshll.u32 %v8508_v31, 16  ;;  %v3127_v8 = vshrl.u32 %v2846_v5, 16  ;;  %v3130_v54 = vshll.u32 %v2846_v5, 16  ;;  %v3064_v27 = vrot.slane %v3063_v29, 4 }
 0x101   : > { %6990 = vmatmul.mubr.msk.bf16.gmra.mxu0 %vm1425_vm10, %v10318_v13  ;;  %v3105_v53 = vor.u32 %v3104_v48, %v3101_v19  ;;  %v3115_v47 = vrot.slane %v3113_v45, 4  ;;  %v3118_v57 = vrot.slane %v3116_v15, 5  ;;  %v8537_v49 = vcombine.low %v2999_v50, %v3013_v1  ;;  %v2852_v45 = vld [vmem:[#allocation2 + $0xd0] sm:$0xf]  ;;  %v7234_v15 = vld [vmem:[#allocation2 + $0x18] ss:$8 sps:$4 sm:$0xff]  }
 0x102   : > { %7029 = vmatprep.mubr.msk.bf16.mxu0 %vm1425_vm10, %v8431_v9  ;;  %v8539_v39 = vcombine.low %v3027_v61, %v3041_v37  ;;  %v3122_v14 = vshll.u32 %v8528_v23, 16  ;;  %v3129_v11 = vrot.slane %v3127_v8, 4  ;;  %v3132_v44 = vrot.slane %v3130_v54, 5  ;;  %v8555_v37 = vld [vmem:[#allocation2 + $0xc4] sm:$0x1] }
 0x103   : > { %v3119_v24 = vor.u32 %v3118_v57, %v3115_v47  ;;  %v3141_v30 = vshrl.u32 %v2848_v28, 16  ;;  %v3144_v18 = vshll.u32 %v2848_v28, 16  ;;  %v8549_v9 = vcombine.low %v2971_v34, %v2985_v6  ;;  %v10320_v34 = vld [vmem:[#allocation20_spill] sm:$0xff]  ;;  %v8567_v6 = vld [vmem:[#allocation2 + $0x94] sm:$0x1] }
 0x104   : > { %v8551_v50 = vrot.slane %v3077_v59, 4  ;;  %v8553_v1 = vrot.slane %v3080_v58, 5  ;;  %v3110_v61 = vrot.slane %v3108_v60, 5  ;;  %v3055_v29 = vsel %vm7558_vm9, %v3050_v43, %v8504_v35  ;;  %v2840_v40 = vld [vmem:[#allocation2 + $0x90] sm:$0xf] }
 0x105   : > { %v3069_v42 = vsel %vm7558_vm9, %v3064_v27, %v3068_v17  ;;  %v3106_v5 = vrot.slane %v3105_v53, 4  ;;  %v3136_v25 = vshll.u32 %v8542_v52, 16  ;;  %v10321_v16 = vcombine.low %v10319_v63, %v10320_v34  ;;  %v8575_v8 = vld [vmem:[#allocation2 + $0xcc] sm:$0x1]  ;;  %v331_v54 = vld [vmem:[%s7512_s28 + $0x5c] sm:$0xf] }
 0x106   : > { %v3085_v19 = vshrl.u32 %v2840_v40, 16  ;;  %v3088_v3 = vshll.u32 %v2840_v40, 16  ;;  %v3124_v32 = vrot.slane %v3122_v14, 5  ;;  %v3155_v58 = vshrl.u32 %v2850_v20, 16  ;;  %v8590_v14 = vld [vmem:[#allocation2 + $0xd4] sm:$0x1] }
 0x107   : > { %6956 = vmatmul.mubr.msk.bf16.gmra.mxu1 %vm1425_vm10, %v10321_v16  ;;  %v3120_v35 = vrot.slane %v3119_v24, 4  ;;  %v3133_v43 = vor.u32 %v3132_v44, %v3129_v11  ;;  %v3143_v17 = vrot.slane %v3141_v30, 4  ;;  %v3146_v48 = vrot.slane %v3144_v18, 5  ;;  %v2854_v44 = vld [vmem:[#allocation2 + $0xd8] sm:$0xf] }
 0x108   : > { %6995 = vmatprep.mubr.msk.bf16.mxu1 %vm1425_vm10, %v7233_v36  ;;  %v8572_v13 = vcombine.low %v3055_v29, %v3069_v42  ;;  %v3087_v59 = vrot.slane %v3085_v19, 4  ;;  %v3090_v60 = vrot.slane %v3088_v3, 5  ;;  %v3150_v28 = vshll.u32 %v8555_v37, 16  ;;  %v7235_v36 = vld [vmem:[#allocation2 + $0x28] ss:$8 sps:$4 sm:$0xff]  }
 0x109   : > { %7030 = vmatmul.mubr.msk.bf16.vlgmr.msra.gmra.mxu0 %vm1425_vm10, %v8433_v62  ;;  %v3083_v62 = vsel %vm7558_vm9, %v8551_v50, %v8553_v1  ;;  %v3094_v27 = vshll.u32 %v8567_v6, 16  ;;  %v3111_v53 = vsel %vm7558_vm9, %v3106_v5, %v3110_v61  ;;  %v8588_v47 = vrot.slane %v3136_v25, 5  ;;  %v8599_v61 = vld [vmem:[%s10186_s1 + $0x20] sm:$0xf]  ;;  %v2858_v63 = vld [vmem:[#allocation2 + $0xf8] sm:$0xf] }
 0x10a   : > { %7096 = vmatpush3.bf16.msra.mxu0 %v8397_v0  ;;  %7033 = vmatprep.mubr.msk.bf16.mxu0 %vm1425_vm10, %v8439_v4  ;;  %v3147_v57 = vor.u32 %v3146_v48, %v3143_v17  ;;  %v3157_v0 = vrot.slane %v3155_v58, 4  ;;  %v3158_v11 = vshll.u32 %v2850_v20, 16  ;;  %v3169_v24 = vshrl.u32 %v2852_v45, 16  ;;  %v808_v20 = vld [vmem:[#allocation2 + $0xe4] sm:$0x1] }
 0x10b   : > { %v3125_v4 = vsel %vm7558_vm9, %v3120_v35, %v3124_v32  ;;  %v8594_v30 = vrot.slane %v3133_v43, 4  ;;  %v3172_v18 = vshll.u32 %v2852_v45, 16  ;;  %v525_v29 = vshrl.u32 %v331_v54, 16  ;;  %7208 = vmatprep.subr.msk.bf16.mxu0 %vm1474_vm0, %v8599_v61  ;;  %v805_v32 = vld [vmem:[#allocation2 + $0xe0] sm:$0xf] }
 0x10c   : > { %v3091_v42 = vor.u32 %v3090_v60, %v3087_v59  ;;  %v8601_v40 = vrot.slane %v3150_v28, 5  ;;  %v3160_v5 = vrot.slane %v3158_v11, 5  ;;  %v3171_v25 = vrot.slane %v3169_v24, 4  ;;  %v8611_v58 = vld [vmem:[%s10186_s1 + $0x1c] sm:$0xf] }
 0x10d   : > { %v8605_v34 = vrot.slane %v3094_v27, 5  ;;  %v3164_v16 = vshll.u32 %v8575_v8, 16  ;;  %v3174_v19 = vrot.slane %v3172_v18, 5  ;;  %v527_v3 = vrot.slane %v525_v29, 7  ;;  %v8621_v28 = vld [vmem:[#allocation2 + $0xdc] sm:$0x1] }
 0x10e   : > { %v8614_v35 = vcombine.low %v3111_v53, %v3125_v4  ;;  %v8616_v43 = vrot.slane %v3147_v57, 4  ;;  %v3161_v17 = vor.u32 %v3160_v5, %v3157_v0  ;;  %v528_v48 = vshll.u32 %v331_v54, 16  ;;  %v7236_v11 = vld [vmem:[#allocation2 + $0x38] ss:$8 sps:$4 sm:$0xff]  }
 0x10f   : > { %6996 = vmatmul.mubr.msk.bf16.vlgmr.msra.gmra.mxu1 %vm1425_vm10, %v7234_v15  ;;  %v3175_v45 = vor.u32 %v3174_v19, %v3171_v25  ;;  %v3178_v59 = vshll.u32 %v8590_v14, 16  ;;  %v531_v60 = vrot.slane %v527_v3, 4  ;;  %v3183_v27 = vshrl.u32 %v2854_v44, 16  ;;  %v2860_v57 = vld [vmem:[#allocation2 + $0x100] sm:$0xf] }
 0x110   : > { %7062 = vmatpush3.bf16.msra.mxu1 %v8387_v22  ;;  %6999 = vmatprep.mubr.msk.bf16.mxu1 %vm1425_vm10, %v7235_v36  ;;  %v3092_v15 = vrot.slane %v3091_v42, 4  ;;  %v3139_v54 = vsel %vm7558_vm9, %v8594_v30, %v8588_v47  ;;  %v530_v22 = vor.u32 %v528_v48, %v527_v3  ;;  %v3186_v53 = vshll.u32 %v2854_v44, 16  ;;  %v8629_v36 = vld [vmem:[#allocation2 + $0xfc] sm:$0x1]  ;;  %v7237_v0 = vld [vmem:[#allocation2 + $0x58] ss:$8 sps:$4 sm:$0xff]  }
 0x111   : > { %7034 = vmatmul.mubr.msk.bf16.gmra.mxu0 %vm1425_vm10, %v8549_v9  ;;  %7207 = vmatprep.subr.msk.bf16.mxu1 %vm1474_vm0, %v8611_v58  ;;  %v3166_v24 = vrot.slane %v3164_v16, 5  ;;  %v809_v9 = vsel %vm7530_vm8, %v531_v60, %v808_v20  ;;  %v3185_v4 = vrot.slane %v3183_v27, 4  ;;  %v3211_v18 = vshrl.u32 %v2858_v63, 16  ;;  %v8643_v42 = vld [vmem:[#allocation2 + $0x104] sm:$0x1] }
 0x112   : > { %7037 = vmatprep.mubr.msk.bf16.mxu0 %vm1425_vm10, %v8537_v49  ;;  %v3153_v47 = vsel %vm7558_vm9, %v8616_v43, %v8601_v40  ;;  %v3162_v44 = vrot.slane %v3161_v17, 4  ;;  %v806_v30 = vsel %vm7524_vm6, %v530_v22, %v805_v32  ;;  %810 = vst [vmem:[#allocation2 + $0xe4] sm:$0x1] %v809_v9  ;;  %v3188_v29 = vrot.slane %v3186_v53, 5  ;;  %10322 = vst [vmem:[#allocation9_spill] sm:$0xff] %v8643_v42 }
 0x113   : > { %v2862_v49 = vld [vmem:[#allocation2 + $0x108] sm:$0xf]  ;;  %v3176_v5 = vrot.slane %v3175_v45, 4  ;;  %v3180_v25 = vrot.slane %v3178_v59, 5  ;;  %807 = vst [vmem:[#allocation2 + $0xe0] sm:$0xf] %v806_v30  ;;  %v3097_v32 = vsel %vm7558_vm9, %v3092_v15, %v8605_v34 }
 0x114   : > { %v3192_v20 = vshll.u32 %v8621_v28, 16  ;;  %v3214_v16 = vshll.u32 %v2858_v63, 16  ;;  %v2864_v19 = vld [vmem:[#allocation2 + $0x110] sm:$0xf]  ;;  %v3189_v3 = vor.u32 %v3188_v29, %v3185_v4  ;;  %v3213_v48 = vrot.slane %v3211_v18, 4 }
 0x115   : > { %v3225_v60 = vshrl.u32 %v2860_v57, 16  ;;  %v3228_v40 = vshll.u32 %v2860_v57, 16  ;;  %v3220_v17 = vshll.u32 %v8629_v36, 16  ;;  %v3239_v27 = vshrl.u32 %v2862_v49, 16  ;;  %v8653_v22 = vld [vmem:[#allocation2 + $0x10c] sm:$0x1] }
 0x116   : > { %v3216_v43 = vrot.slane %v3214_v16, 5  ;;  %v3167_v45 = vsel %vm7558_vm9, %v3162_v44, %v3166_v24  ;;  %10323 = vst [vmem:[#allocation10_spill] sm:$0xff] %v8653_v22  ;;  %v3242_v53 = vshll.u32 %v2862_v49, 16  ;;  %v3181_v57 = vsel %vm7558_vm9, %v3176_v5, %v3180_v25  ;;  %v8661_v9 = vld [vmem:[#allocation2 + $0x114] sm:$0x1] }
 0x117   : > { %7000 = vmatmul.mubr.msk.bf16.gmra.mxu1 %vm1425_vm10, %v7236_v11  ;;  %v3227_v59 = vrot.slane %v3225_v60, 4  ;;  %v3230_v63 = vrot.slane %v3228_v40, 5  ;;  %v8658_v34 = vrot.slane %v3192_v20, 5  ;;  %v3234_v15 = vshll.u32 %v8643_v42, 16  ;;  %10324 = vst [vmem:[#allocation19_spill] sm:$0xff] %v8661_v9 }
 0x118   : > { %7003 = vmatprep.mubr.msk.bf16.mxu1 %vm1425_vm10, %v7237_v0  ;;  %v3241_v11 = vrot.slane %v3239_v27, 4  ;;  %v7238_v4 = vld [vmem:[#allocation2 + $0x68] ss:$8 sps:$4 sm:$0xff]   ;;  %v8665_v24 = vrot.slane %v3189_v3, 4  ;;  %v3217_v18 = vor.u32 %v3216_v43, %v3213_v48  ;;  %v3244_v44 = vrot.slane %v3242_v53, 5 }
 0x119   : > { %7038 = vmatmul.mubr.msk.bf16.gmra.mxu0 %vm1425_vm10, %v8539_v39  ;;  %v3253_v30 = vshrl.u32 %v2864_v19, 16  ;;  %v7239_v0 = vld [vmem:[#allocation2 + $0x78] ss:$8 sps:$4 sm:$0xff]   ;;  %v8669_v29 = vcombine.low %v3139_v54, %v3153_v47  ;;  %v8671_v49 = vrot.slane %v3220_v17, 5  ;;  %v3248_v5 = vshll.u32 %v8653_v22, 16 }
 0x11a   : > { %7041 = vmatprep.mubr.msk.bf16.mxu0 %vm1425_vm10, %v8572_v13  ;;  %v3256_v25 = vshll.u32 %v2864_v19, 16  ;;  %v2866_v20 = vld [vmem:[#allocation2 + $0x118] sm:$0xf]  ;;  %v6450_v39 = vcombine.low %v3083_v62, %v3097_v32  ;;  %v8679_v16 = vcombine.low %v3167_v45, %v3181_v57  ;;  %v2856_v3 = vld [vmem:[#allocation2 + $0xe0] sm:$0xf]  ;;  %v3231_v13 = vor.u32 %v3230_v63, %v3227_v59 }
 0x11b   : > { %v8681_v48 = vld [vmem:[#allocation2 + $0xe4] sm:$0x1]  ;;  %v3245_v54 = vor.u32 %v3244_v44, %v3241_v11  ;;  %v8683_v47 = vld [vmem:[#allocation2 + $0x11c] sm:$0x1]  ;;  %v3197_v60 = vshrl.u32 %v2856_v3, 16  ;;  %v3200_v40 = vshll.u32 %v2856_v3, 16  ;;  %v10328_v7 = vsel %vm7558_vm9, %v8665_v24, %v8658_v34 }
 0x11c   : > { %10325 = vst [vmem:[#allocation21_spill] sm:$0xff] %v8683_v47  ;;  %v8685_v19 = vrot.slane %v3234_v15, 5  ;;  %v3262_v43 = vshll.u32 %v8661_v9, 16  ;;  %v2868_v17 = vld [vmem:[#allocation2 + $0x120] sm:$0xf]  ;;  %v8692_v1 = vrot.slane %v3217_v18, 4 }
 0x11d   : > { %v3255_v62 = vrot.slane %v3253_v30, 4  ;;  %v3258_v32 = vrot.slane %v3256_v25, 5  ;;  %v8694_v27 = vld [vmem:[#allocation2 + $0x124] sm:$0x1]  ;;  %v3199_v45 = vrot.slane %v3197_v60, 4  ;;  %v3202_v59 = vrot.slane %v3200_v40, 5 }
 0x11e   : > { %10326 = vst [vmem:[#allocation13_spill] sm:$0xff] %v8694_v27  ;;  %v3206_v63 = vshll.u32 %v8681_v48, 16  ;;  %v8697_v53 = vrot.slane %v3248_v5, 5  ;;  %v339_v57 = vld [vmem:[%s7512_s28 + $0x7c] sm:$0xf]  ;;  %v3232_v15 = vrot.slane %v3231_v13, 4 }
 0x11f   : > { %7004 = vmatmul.mubr.msk.bf16.gmra.mxu1 %vm1425_vm10, %v7238_v4  ;;  %v8701_v11 = vrot.slane %v3245_v54, 4  ;;  %v3259_v44 = vor.u32 %v3258_v32, %v3255_v62  ;;  %v3267_v3 = vshrl.u32 %v2866_v20, 16  ;;  %v3203_v18 = vor.u32 %v3202_v59, %v3199_v45  ;;  %v2870_v22 = vld [vmem:[#allocation2 + $0x128] sm:$0xf]  ;;  %v10330_v24 = vld [vmem:[#allocation11_spill] sm:$0xff] }
 0x120   : > { %7007 = vmatprep.mubr.msk.bf16.mxu1 %vm1425_vm10, %v7239_v0  ;;  %v3264_v30 = vrot.slane %v3262_v43, 5  ;;  %v3270_v25 = vshll.u32 %v2866_v20, 16  ;;  %v3276_v60 = vshll.u32 %v8683_v47, 16  ;;  %v3281_v50 = vshrl.u32 %v2868_v17, 16  ;;  %v7240_v4 = vld [vmem:[#allocation2 + $0x88] ss:$8 sps:$4 sm:$0xff]  }
 0x121   : > { %7042 = vmatmul.mubr.msk.bf16.gmra.mxu0 %vm1425_vm10, %v6450_v39  ;;  %v3260_v40 = vrot.slane %v3259_v44, 4  ;;  %v3269_v5 = vrot.slane %v3267_v3, 4  ;;  %v3284_v9 = vshll.u32 %v2868_v17, 16  ;;  %v7241_v13 = vld [vmem:[#allocation2 + $0xa8] ss:$8 sps:$4 sm:$0xff]   ;;  %v3208_v54 = vrot.slane %v3206_v63, 5 }
 0x122   : > { %7045 = vmatprep.mubr.msk.bf16.mxu0 %vm1425_vm10, %v8614_v35  ;;  %v3223_v0 = vsel %vm7558_vm9, %v8692_v1, %v8671_v49  ;;  %v3272_v20 = vrot.slane %v3270_v25, 5  ;;  %v3290_v43 = vshll.u32 %v8694_v27, 16  ;;  %v3237_v39 = vsel %vm7558_vm9, %v3232_v15, %v8685_v19  ;;  %v853_v44 = vld [vmem:[#allocation2 + $0x130] sm:$0xf]  ;;  %v856_v49 = vld [vmem:[#allocation2 + $0x134] sm:$0x1] }
 0x123   : > { %v3283_v17 = vrot.slane %v3281_v50, 4  ;;  %v3286_v62 = vrot.slane %v3284_v9, 5  ;;  %v589_v32 = vshrl.u32 %v339_v57, 16  ;;  %v3204_v45 = vrot.slane %v3203_v18, 4  ;;  %v8720_v1 = vld [vmem:[#allocation2 + $0x12c] sm:$0x1] }
 0x124   : > { %v3251_v35 = vsel %vm7558_vm9, %v8701_v11, %v8697_v53  ;;  %v3273_v59 = vor.u32 %v3272_v20, %v3269_v5  ;;  %v3278_v63 = vrot.slane %v3276_v60, 5  ;;  %v3265_v3 = vsel %vm7558_vm9, %v3260_v40, %v3264_v30  ;;  %v3616_v9 = vld [vmem:[#allocation2 + $0x8] sm:$0xe]  ;;  %v3617_v15 = vld [vmem:[#allocation2 + $0x10] sm:$0xe] }
 0x125   : > { %v3287_v25 = vor.u32 %v3286_v62, %v3283_v17  ;;  %v591_v19 = vrot.slane %v589_v32, 7  ;;  %v592_v50 = vshll.u32 %v339_v57, 16  ;;  %v3292_v27 = vrot.slane %v3290_v43, 5  ;;  %v3618_v17 = vld [vmem:[#allocation2 + $0x18] sm:$0xe] }
 0x126   : > { %v3274_v18 = vrot.slane %v3273_v59, 4  ;;  %v3295_v47 = vshrl.u32 %v2870_v22, 16  ;;  %v3298_v42 = vshll.u32 %v2870_v22, 16  ;;  %v3304_v5 = vshll.u32 %v8720_v1, 16  ;;  %v7242_v62 = vld [vmem:[#allocation2 + $0xb8] ss:$8 sps:$4 sm:$0xff]  }
 0x127   : > { %7008 = vmatmul.mubr.msk.bf16.gmra.mxu1 %vm1425_vm10, %v7240_v4  ;;  %v3288_v53 = vrot.slane %v3287_v25, 4  ;;  %v594_v11 = vor.u32 %v592_v50, %v591_v19  ;;  %v595_v60 = vrot.slane %v591_v19, 4  ;;  %v3209_v30 = vsel %vm7558_vm9, %v3204_v45, %v3208_v54  ;;  %v3619_v32 = vld [vmem:[#allocation2 + $0x20] sm:$0xe]  ;;  %v3620_v59 = vld [vmem:[#allocation2 + $0x28] sm:$0xe] }
 0x128   : > { %7011 = vmatprep.mubr.msk.bf16.mxu1 %vm1425_vm10, %v7241_v13  ;;  %v3297_v40 = vrot.slane %v3295_v47, 4  ;;  %v3300_v57 = vrot.slane %v3298_v42, 5  ;;  %v6475_v20 = vrot.slane %v3616_v9, 9  ;;  %v6455_v22 = vcombine.low %v3223_v0, %v3237_v39  ;;  %v7243_v54 = vld [vmem:[#allocation2 + $0xc8] ss:$8 sps:$4 sm:$0xff]   ;;  %v10327_v0 = vld [vmem:[#allocation15_spill] sm:$0xff] }
 0x129   : > { %7046 = vmatmul.mubr.msk.bf16.gmra.mxu0 %vm1425_vm10, %v8669_v29  ;;  %v854_v4 = vsel %vm7524_vm6, %v594_v11, %v853_v44  ;;  %v857_v43 = vsel %vm7530_vm8, %v595_v60, %v856_v49  ;;  %v3714_v13 = vrot.slane %v8258_v46, 5  ;;  %v8738_v42 = vcombine.low %v3251_v35, %v3265_v3  ;;  %v3621_v35 = vld [vmem:[#allocation2 + $0x30] sm:$0xe]  ;;  %v3622_v44 = vld [vmem:[#allocation2 + $0x38] sm:$0xe] }
 0x12a   : > { %7049 = vmatprep.mubr.msk.bf16.mxu0 %vm1425_vm10, %v8679_v16  ;;  %855 = vst [vmem:[#allocation2 + $0x130] sm:$0xf] %v854_v4  ;;  %858 = vst [vmem:[#allocation2 + $0x134] sm:$0x1] %v857_v43  ;;  %v3301_v29 = vor.u32 %v3300_v57, %v3297_v40  ;;  %v6476_v47 = vrot.slane %v3617_v15, 9  ;;  %v3718_v10 = vrot.slane %v10327_v0, 5  ;;  %v6454_v46 = vcombine.low %v10328_v7, %v3209_v30 }
 0x12b   : > { %v3279_v39 = vsel %vm7558_vm9, %v3274_v18, %v3278_v63  ;;  %v3293_v16 = vsel %vm7558_vm9, %v3288_v53, %v3292_v27  ;;  %v8750_v45 = vrot.slane %v3304_v5, 5  ;;  %v8754_v3 = vsel %vm7976_vm13, %v6475_v20, %v3714_v13  ;;  %v3623_v50 = vld [vmem:[#allocation2 + $0x40] sm:$0xe]  ;;  %v3624_v63 = vld [vmem:[#allocation2 + $0x58] sm:$0xe]  ;;  %v10332_v5 = vld [vmem:[#allocation8_spill] sm:$0xff] }
 0x12c   : > { %v8758_v25 = vsel %vm7976_vm13, %v6476_v47, %v3718_v10  ;;  %v6477_v34 = vrot.slane %v3618_v17, 9  ;;  %v3722_v19 = vrot.slane %v10330_v24, 5  ;;  %v8761_v9 = vrot.slane %v3301_v29, 4  ;;  %v10331_v15 = vld [vmem:[#allocation7_spill] sm:$0xff]  ;;  %v10333_v17 = vld [vmem:[#allocation12_spill] sm:$0xff] }
 0x12d   : > { %v6478_v27 = vrot.slane %v3619_v32, 9  ;;  %v3726_v18 = vrot.slane %v10331_v15, 5  ;;  %v6479_v53 = vrot.slane %v3620_v59, 9  ;;  %v8764_v11 = vcombine.low %v3279_v39, %v3293_v16  ;;  %v3625_v57 = vld [vmem:[#allocation2 + $0x60] sm:$0xe] }
 0x12e   : > { %v8768_v60 = vsel %vm1474_vm0, %v8611_v58, 0  ;;  %v3730_v30 = vrot.slane %v10332_v5, 5  ;;  %v6480_v40 = vrot.slane %v3621_v35, 9  ;;  %v6508_v20 = vcombine.low %v8754_v3, %v8758_v25  ;;  %v3626_v32 = vld [vmem:[#allocation2 + $0x68] sm:$0xe] }
 0x12f   : > { %7012 = vmatmul.mubr.msk.bf16.gmra.mxu1 %vm1425_vm10, %v7242_v62  ;;  %v3734_v4 = vrot.slane %v10333_v17, 5  ;;  %v6481_v43 = vrot.slane %v3622_v44, 9  ;;  %v3738_v13 = vrot.slane %v8362_v12, 5  ;;  %v8779_v58 = vsel %vm7976_vm13, %v6477_v34, %v3722_v19  ;;  %v3627_v47 = vld [vmem:[#allocation2 + $0x70] sm:$0xe] }
 0x130   : > { %7015 = vmatprep.mubr.msk.bf16.mxu1 %vm1425_vm10, %v7243_v54  ;;  %v8783_v59 = vsel %vm1474_vm0, %v8599_v61, 0  ;;  %v6482_v62 = vrot.slane %v3623_v50, 9  ;;  %v3742_v29 = vrot.slane %v8446_v21, 5  ;;  %v7244_v0 = vld [vmem:[#allocation2 + $0xd8] ss:$8 sps:$4 sm:$0xff]   ;;  %v3307_v12 = vsel %vm7558_vm9, %v8761_v9, %v8750_v45 }
 0x131   : > { %7050 = vmatmul.mubr.msk.bf16.gmra.mxu0 %vm1425_vm10, %v6454_v46  ;;  %v2872_v10 = vld [vmem:[#allocation2 + $0x130] sm:$0xf]  ;;  %v8793_v54 = vsel %vm7976_vm13, %v6478_v27, %v3726_v18  ;;  %v8797_v61 = vsel %vm7976_vm13, %v6479_v53, %v3730_v30  ;;  %v6483_v7 = vrot.slane %v3624_v63, 9  ;;  %v7245_v21 = vld [vmem:[#allocation2 + $0xf8] ss:$8 sps:$4 sm:$0xff]   ;;  %v8804_v35 = vsel %vm7976_vm13, %v6480_v40, %v3734_v4 }
 0x132   : > { %7053 = vmatprep.mubr.msk.bf16.mxu0 %vm1425_vm10, %v6455_v22  ;;  %v8800_v39 = vld [vmem:[#allocation2 + $0x134] sm:$0x1]  ;;  %v3309_v46 = vshrl.u32 %v2872_v10, 16  ;;  %v3312_v16 = vshll.u32 %v2872_v10, 16  ;;  %v8808_v45 = vsel %vm7976_vm13, %v6481_v43, %v3738_v13  ;;  %v8810_v44 = vld [vmem:[#allocation2 + $0x78] sm:$0xe]  ;;  %v8815_v24 = vsel %vm7976_vm13, %v6482_v62, %v3742_v29 }
 0x133   : > { %v3318_v34 = vshll.u32 %v8800_v39, 16  ;;  %v3746_v22 = vrot.slane %v8399_v41, 5  ;;  %v6484_v19 = vrot.slane %v3625_v57, 9  ;;  %v3750_v9 = vrot.slane %v8409_v26, 5  ;;  %v8819_v15 = vld [vmem:[#allocation2 + $0x80] sm:$0xe] }
 0x134   : > { %v3311_v50 = vrot.slane %v3309_v46, 4  ;;  %v3314_v63 = vrot.slane %v3312_v16, 5  ;;  %v6485_v27 = vrot.slane %v3626_v32, 9  ;;  %v3754_v5 = vrot.slane %v8411_v56, 5  ;;  %v3630_v40 = vld [vmem:[#allocation2 + $0x88] sm:$0xe] }
 0x135   : > { %v8825_v53 = vsel %vm7976_vm13, %v6483_v7, %v3746_v22  ;;  %v6486_v30 = vrot.slane %v3627_v47, 9  ;;  %v3631_v41 = vld [vmem:[#allocation2 + $0x90] sm:$0xe]  ;;  %v3320_v17 = vrot.slane %v3318_v34, 5  ;;  %v8830_v26 = vsel %vm7976_vm13, %v6484_v19, %v3750_v9  ;;  %v3632_v43 = vld [vmem:[#allocation2 + $0xa8] sm:$0xe] }
 0x136   : > { %v3315_v57 = vor.u32 %v3314_v63, %v3311_v50  ;;  %v3758_v4 = vrot.slane %v8420_v33, 5  ;;  %v3633_v29 = vld [vmem:[#allocation2 + $0xb0] sm:$0xe]  ;;  %v8844_v33 = vsel %vm7976_vm13, %v6485_v27, %v3754_v5  ;;  %v6489_v10 = vrot.slane %v3630_v40, 9  ;;  %v3634_v7 = vld [vmem:[#allocation2 + $0xb8] sm:$0xe] }
 0x137   : > { %7016 = vmatmul.mubr.msk.bf16.gmra.mxu1 %vm1425_vm10, %v7244_v0  ;;  %v3635_v46 = vld [vmem:[#allocation2 + $0xc0] sm:$0xe]  ;;  %v7246_v16 = vld [vmem:[#allocation2 + $0x108] ss:$8 sps:$4 sm:$0xff]   ;;  %v3770_v22 = vrot.slane %v8506_v38, 5  ;;  %v6490_v19 = vrot.slane %v3631_v41, 9 }
 0x138   : > { %7019 = vmatprep.mubr.msk.bf16.mxu1 %vm1425_vm10, %v7245_v21  ;;  %v3316_v47 = vrot.slane %v3315_v57, 4  ;;  %v8848_v0 = vsel %vm7976_vm13, %v6486_v30, %v3758_v4  ;;  %v3636_v50 = vld [vmem:[#allocation2 + $0xc8] sm:$0xe]  ;;  %v7247_v63 = vld [vmem:[#allocation2 + $0x118] ss:$8 sps:$4 sm:$0xff]   ;;  %v3774_v5 = vrot.slane %v8567_v6, 5 }
 0x139   : > { %7054 = vmatmul.mubr.msk.bf16.gmra.mxu0 %vm1425_vm10, %v8738_v42  ;;  %v6491_v42 = vrot.slane %v3632_v43, 9  ;;  %v8865_v38 = vsel %vm7976_vm13, %v6489_v10, %v3770_v22  ;;  %v3778_v41 = vrot.slane %v8508_v31, 5  ;;  %v3637_v57 = vld [vmem:[#allocation2 + $0xd0] sm:$0xe]  ;;  %v3782_v6 = vrot.slane %v8528_v23, 5 }
 0x13a   : > { %7057 = vmatprep.mubr.msk.bf16.mxu0 %vm1425_vm10, %v8764_v11  ;;  %v3321_v9 = vsel %vm7558_vm9, %v3316_v47, %v3320_v17  ;;  %v3638_v11 = vld [vmem:[#allocation2 + $0xd8] sm:$0xe]  ;;  %v8870_v17 = vsel %vm7976_vm13, %v6490_v19, %v3774_v5  ;;  %v6492_v47 = vrot.slane %v3633_v29, 9  ;;  %v3786_v31 = vrot.slane %v8542_v52, 5  ;;  %v3647_v43 = vld [vmem:[#allocation2 + $0x130] sm:$0xe] }
 0x13b   : > { %v6458_v30 = vcombine.low %v3307_v12, %v3321_v9  ;;  %v7249_v4 = vld [vmem:[#allocation2 + $0x10] ss:$8 sps:$4 sm:$0xff]   ;;  %v6493_v12 = vrot.slane %v3634_v7, 9  ;;  %v8877_v10 = vsel %vm7976_vm13, %v6491_v42, %v3778_v41  ;;  %v6494_v22 = vrot.slane %v3635_v46, 9  ;;  %v3639_v9 = vld [vmem:[#allocation2 + $0xe0] sm:$0xe] }
 0x13c   : > { %v8882_v40 = vsel %vm7976_vm13, %v6492_v47, %v3782_v6  ;;  %v3790_v29 = vrot.slane %v8555_v37, 5  ;;  %v6495_v19 = vrot.slane %v3636_v50, 9  ;;  %v3794_v23 = vrot.slane %v8575_v8, 5  ;;  %v3640_v7 = vld [vmem:[#allocation2 + $0xf8] sm:$0xe] }
 0x13d   : > { %v8891_v52 = vsel %vm7976_vm13, %v6493_v12, %v3786_v31  ;;  %v6496_v46 = vrot.slane %v3637_v57, 9  ;;  %v3798_v42 = vrot.slane %v8590_v14, 5  ;;  %v3641_v41 = vld [vmem:[#allocation2 + $0x100] sm:$0xe]  ;;  %v3802_v50 = vrot.slane %v8621_v28, 5 }
 0x13e   : > { %v8897_v37 = vsel %vm7976_vm13, %v6494_v22, %v3790_v29  ;;  %v8901_v8 = vsel %vm7976_vm13, %v6495_v19, %v3794_v23  ;;  %v3642_v47 = vld [vmem:[#allocation2 + $0x108] sm:$0xe]  ;;  %v6498_v57 = vrot.slane %v3639_v9, 9  ;;  %v3806_v6 = vrot.slane %v8681_v48, 5  ;;  %v3643_v12 = vld [vmem:[#allocation2 + $0x110] sm:$0xe] }
 0x13f   : > { %7020 = vmatmul.mubr.msk.bf16.gmra.mxu1 %vm1425_vm10, %v7246_v16  ;;  %v6497_v16 = vrot.slane %v3638_v11, 9  ;;  %v7248_v31 = vld [vmem:[#allocation2 + $0x128] ss:$8 sps:$4 sm:$0xff]   ;;  %v6499_v11 = vrot.slane %v3640_v7, 9  ;;  %v3810_v22 = vrot.slane %v8629_v36, 5  ;;  %v6500_v48 = vrot.slane %v3641_v41, 9 }
 0x140   : > { %7023 = vmatprep.mubr.msk.bf16.mxu1 %vm1425_vm10, %v7247_v63  ;;  %v8909_v63 = vsel %vm7976_vm13, %v6496_v46, %v3798_v42  ;;  %v3644_v29 = vld [vmem:[#allocation2 + $0x118] sm:$0xe]  ;;  %v8922_v9 = vsel %vm7976_vm13, %v6498_v57, %v3806_v6  ;;  %v10334_v19 = vld [vmem:[#allocation9_spill] sm:$0xff]  ;;  %v6501_v46 = vrot.slane %v3642_v47, 9  ;;  %v7250_v42 = vld [vmem:[#allocation2 + $0x20] ss:$8 sps:$4 sm:$0xff]  }
 0x141   : > { %7058 = vmatmul.mubr.msk.bf16.gmra.mxu0 %vm1425_vm10, %v6458_v30  ;;  %v8917_v30 = vsel %vm7976_vm13, %v6497_v16, %v3802_v50  ;;  %v3814_v23 = vrot.slane %v10334_v19, 5  ;;  %v8929_v16 = vsel %vm7976_vm13, %v6499_v11, %v3810_v22  ;;  %v10335_v7 = vld [vmem:[#allocation10_spill] sm:$0xff]  ;;  %v6502_v50 = vrot.slane %v3643_v12, 9  ;;  %v3646_v14 = vld [vmem:[#allocation2 + $0x128] sm:$0xe]  ;;  %v10336_v41 = vld [vmem:[#allocation19_spill] sm:$0xff] }
 0x142   : > { %7097 = vmatprep.mubr.msk.bf16.mxu0 %vm1425_vm10, %v7249_v4  ;;  %v3645_v4 = vld [vmem:[#allocation2 + $0x120] sm:$0xe]  ;;  %v3818_v36 = vrot.slane %v10335_v7, 5  ;;  %v3822_v6 = vrot.slane %v10336_v41, 5  ;;  %v6503_v47 = vrot.slane %v3644_v29, 9  ;;  %v10337_v19 = vld [vmem:[#allocation21_spill] sm:$0xff] }
 0x143   : > { %v8934_v57 = vsel %vm7976_vm13, %v6500_v48, %v3814_v23  ;;  %v3826_v5 = vrot.slane %v10337_v19, 5  ;;  %v7251_v32 = vld [vmem:[#allocation2 + $0x30] ss:$8 sps:$4 sm:$0xff]   ;;  %v6504_v12 = vrot.slane %v3645_v4, 9  ;;  %v6505_v23 = vrot.slane %v3646_v14, 9 }
 0x144   : > { %v8942_v11 = vsel %vm7976_vm13, %v6501_v46, %v3818_v36  ;;  %v10338_v22 = vld [vmem:[#allocation13_spill] sm:$0xff]  ;;  %v8948_v29 = vsel %vm7976_vm13, %v6502_v50, %v3822_v6  ;;  %v3834_v41 = vrot.slane %v8720_v1, 5  ;;  %v4495_v46 = vld [vmem:[#allocation2 + $0x18] sm:$0xf]  ;;  %v6506_v36 = vrot.slane %v3647_v43, 9 }
 0x145   : > { %v3830_v7 = vrot.slane %v10338_v22, 5  ;;  %v4493_v56 = vld [vmem:[#allocation2 + $0x10] sm:$0xf]  ;;  %v8952_v48 = vsel %vm7976_vm13, %v6503_v47, %v3826_v5  ;;  %v4494_v19 = vld [vmem:[#allocation2 + $0x14] sm:$0x1]  ;;  %v3838_v5 = vrot.slane %v8800_v39, 5 }
 0x146   : > { %v4496_v14 = vld [vmem:[#allocation2 + $0x1c] sm:$0x1]  ;;  %v8971_v3 = vsel %vm7976_vm13, %v6505_v23, %v3834_v41  ;;  %v4558_v25 = vshrl.u32 %v4493_v56, 16  ;;  %v5299_v50 = vld [vmem:[#allocation2 + $0x10] sm:$0xe]  ;;  %v4567_v43 = vshll.u32 %v4494_v19, 16 }
 0x147   : > { %7024 = vmatmul.mubr.msk.bf16.gmra.mxu1 %vm1425_vm10, %v7248_v31  ;;  %v8963_v4 = vsel %vm7976_vm13, %v6504_v12, %v3830_v7  ;;  %v8977_v39 = vsel %vm7976_vm13, %v6506_v36, %v3838_v5  ;;  %v4575_v6 = vshll.u32 %v4495_v46, 16  ;;  %v5300_v47 = vld [vmem:[#allocation2 + $0x18] sm:$0xe]  ;;  %v7252_v12 = vld [vmem:[#allocation2 + $0x40] ss:$8 sps:$4 sm:$0xff]   ;;  %v5397_v5 = vrot.slane %v4494_v19, 5 }
 0x148   : > { %7063 = vmatprep.mubr.msk.bf16.mxu1 %vm1425_vm10, %v6508_v20  ;;  %10339 = vst [vmem:[#allocation14_spill] sm:$0xff] %v8963_v4  ;;  %v4561_v20 = vshll.u32 %v4493_v56, 16  ;;  %v4560_v7 = vrot.slane %v4558_v25, 4  ;;  %v4581_v56 = vshll.u32 %v4496_v14, 16  ;;  %v4497_v41 = vld [vmem:[#allocation2 + $0x20] sm:$0xf]  ;;  %v10340_v25 = vcombine.low %v8779_v58, %v8793_v54 }
 0x149   : > { %7098 = vmatmul.mubr.msk.bf16.vlgmr.msra.gmra.mxu0 %vm1425_vm10, %v7250_v42  ;;  %v4572_v42 = vshrl.u32 %v4495_v46, 16  ;;  %v4569_v1 = vrot.slane %v4567_v43, 5  ;;  %v4577_v31 = vrot.slane %v4575_v6, 5  ;;  %v4499_v28 = vld [vmem:[#allocation2 + $0x28] sm:$0xf]  ;;  %v6607_v21 = vrot.slane %v5300_v47, 9 }
 0x14a   : > { %7164 = vmatpush3.bf16.msra.mxu0 %v8783_v59  ;;  %7101 = vmatprep.mubr.msk.bf16.mxu0 %vm1425_vm10, %v7251_v32  ;;  %v4563_v23 = vrot.slane %v4561_v20, 5  ;;  %v6606_v32 = vrot.slane %v5299_v50, 9  ;;  %v4583_v36 = vrot.slane %v4581_v56, 5  ;;  %v4498_v27 = vld [vmem:[#allocation2 + $0x24] sm:$0x1]  ;;  %v5401_v34 = vrot.slane %v4496_v14, 5 }
 0x14b   : > { %v4574_v59 = vrot.slane %v4572_v42, 4  ;;  %v7253_v46 = vld [vmem:[#allocation2 + $0x60] ss:$8 sps:$4 sm:$0xff]   ;;  %v4586_v18 = vshrl.u32 %v4497_v41, 16  ;;  %v4589_v4 = vshll.u32 %v4497_v41, 16  ;;  %v10341_v20 = vrot.slane %v8462_v2, 5 }
 0x14c   : > { %v4564_v13 = vor.u32 %v4563_v23, %v4560_v7  ;;  %v10342_v50 = vrot.slane %v8810_v44, 9  ;;  %v10343_v19 = vrot.slane %v8468_v51, 5  ;;  %v4500_v58 = vld [vmem:[#allocation2 + $0x2c] sm:$0x1]  ;;  %v4600_v54 = vshrl.u32 %v4499_v28, 16  ;;  %v9006_v44 = vpop.f32.mrf.mxu0 }
 0x14d   : > { %v4578_v62 = vor.u32 %v4577_v31, %v4574_v59  ;;  %v10344_v31 = vrot.slane %v8819_v15, 9  ;;  %v5301_v6 = vld [vmem:[#allocation2 + $0x20] sm:$0xe]  ;;  %v10345_v2 = vcombine.low %v8797_v61, %v8804_v35  ;;  %v4588_v47 = vrot.slane %v4586_v18, 4  ;;  %v5302_v23 = vld [vmem:[#allocation2 + $0x28] sm:$0xe] }
 0x14e   : > { %v8991_v43 = vsel %vm7976_vm13, %v10342_v50, %v10341_v20  ;;  %v4565_v42 = vrot.slane %v4564_v13, 4  ;;  %v4591_v15 = vrot.slane %v4589_v4, 5  ;;  %v4595_v7 = vshll.u32 %v4498_v27, 16  ;;  %v4501_v56 = vld [vmem:[#allocation2 + $0x30] sm:$0xf]  ;;  %v9024_v20 = vpop.f32.mrf.mxu0 }
 0x14f   : > { %7064 = vmatmul.mubr.msk.bf16.vlgmr.msra.gmra.mxu1 %vm1425_vm10, %v10340_v25  ;;  %v8999_v14 = vsel %vm7976_vm13, %v10344_v31, %v10343_v19  ;;  %v4579_v51 = vrot.slane %v4578_v62, 4  ;;  %v9017_v61 = vsel %vm7976_vm13, %v6607_v21, %v5401_v34  ;;  %v4602_v35 = vrot.slane %v4600_v54, 4  ;;  %v4502_v41 = vld [vmem:[#allocation2 + $0x34] sm:$0x1]  ;;  %v4503_v34 = vld [vmem:[#allocation2 + $0x38] sm:$0xf] }
 0x150   : > { %7130 = vmatpush3.bf16.msra.mxu1 %v8768_v60  ;;  %7067 = vmatprep.mubr.msk.bf16.mxu1 %vm1425_vm10, %v10345_v2  ;;  %v4570_v13 = vsel %vm7558_vm9, %v4565_v42, %v4569_v1  ;;  %v9013_v60 = vsel %vm7976_vm13, %v6606_v32, %v5397_v5  ;;  %v4592_v62 = vor.u32 %v4591_v15, %v4588_v47  ;;  %v4603_v4 = vshll.u32 %v4499_v28, 16  ;;  %v7254_v1 = vld [vmem:[#allocation2 + $0x70] ss:$8 sps:$4 sm:$0xff]   ;;  %v7255_v21 = vld [vmem:[#allocation2 + $0x80] ss:$8 sps:$4 sm:$0xff]  }
 0x151   : > { %7102 = vmatmul.mubr.msk.bf16.gmra.mxu0 %vm1425_vm10, %v7252_v12  ;;  %v4584_v18 = vsel %vm7558_vm9, %v4579_v51, %v4583_v36  ;;  %v4609_v12 = vshll.u32 %v4500_v58, 16  ;;  %v6608_v32 = vrot.slane %v5301_v6, 9  ;;  %v5405_v5 = vrot.slane %v4498_v27, 5  ;;  %v4504_v19 = vld [vmem:[#allocation2 + $0x3c] sm:$0x1] }
 0x152   : > { %7105 = vmatprep.mubr.msk.bf16.mxu0 %vm1425_vm10, %v7253_v46  ;;  %v6609_v25 = vrot.slane %v5302_v23, 9  ;;  %v9028_v36 = vrot.slane %v4595_v7, 5  ;;  %v4605_v28 = vrot.slane %v4603_v4, 5  ;;  %v5409_v50 = vrot.slane %v4500_v58, 5  ;;  %v5303_v27 = vld [vmem:[#allocation2 + $0x30] sm:$0xe]  ;;  %v9040_v58 = vpop.f32.mrf.mxu1 }
 0x153   : > { %v9030_v31 = vcombine.low %v4570_v13, %v4584_v18  ;;  %v9032_v42 = vrot.slane %v4592_v62, 4  ;;  %v4614_v54 = vshrl.u32 %v4501_v56, 16  ;;  %v4617_v6 = vshll.u32 %v4501_v56, 16  ;;  %v5304_v23 = vld [vmem:[#allocation2 + $0x38] sm:$0xe]  ;;  %10347 = vst [vmem:[#allocation3_spill] sm:$0xff] %v9040_v58 }
 0x154   : > { %v4606_v2 = vor.u32 %v4605_v28, %v4602_v35  ;;  %v9034_v51 = vrot.slane %v4609_v12, 5  ;;  %v4623_v47 = vshll.u32 %v4502_v41, 16  ;;  %v4628_v15 = vshrl.u32 %v4503_v34, 16  ;;  %v7257_v22 = vld [vmem:[#allocation2 + $0xb0] ss:$8 sps:$4 sm:$0xff]  }
 0x155   : > { %v10346_v7 = vcombine.low %v8808_v45, %v8815_v24  ;;  %v9044_v13 = vsel %vm7976_vm13, %v6608_v32, %v5405_v5  ;;  %v9048_v18 = vsel %vm7976_vm13, %v6609_v25, %v5409_v50  ;;  %v4616_v35 = vrot.slane %v4614_v54, 4  ;;  %v9054_v45 = vpop.f32.mrf.mxu0  ;;  %v9057_v54 = vld [vmem:[#allocation2 + $0x44] sm:$0x1]  ;;  %v4509_v59 = vld [vmem:[#allocation2 + $0x60] sm:$0xf] }
 0x156   : > { %v4619_v62 = vrot.slane %v4617_v6, 5  ;;  %v10348_v4 = vcombine.low %v8825_v53, %v8830_v26  ;;  %v4607_v24 = vrot.slane %v4606_v2, 4  ;;  %v4630_v12 = vrot.slane %v4628_v15, 4  ;;  %v4507_v2 = vld [vmem:[#allocation2 + $0x48] sm:$0xf] }
 0x157   : > { %7068 = vmatmul.mubr.msk.bf16.gmra.mxu1 %vm1425_vm10, %v10346_v7  ;;  %v4631_v56 = vshll.u32 %v4503_v34, 16  ;;  %v4637_v28 = vshll.u32 %v4504_v19, 16  ;;  %v4505_v7 = vld [vmem:[#allocation2 + $0x40] sm:$0xf]  ;;  %v6610_v5 = vrot.slane %v5303_v27, 9  ;;  %v5413_v25 = vrot.slane %v4502_v41, 5 }
 0x158   : > { %7071 = vmatprep.mubr.msk.bf16.mxu1 %vm1425_vm10, %v10348_v4  ;;  %v4620_v32 = vor.u32 %v4619_v62, %v4616_v35  ;;  %v6611_v50 = vrot.slane %v5304_v23, 9  ;;  %v4598_v53 = vsel %vm7558_vm9, %v9032_v42, %v9028_v36  ;;  %v4625_v26 = vrot.slane %v4623_v47, 5  ;;  %v7256_v15 = vld [vmem:[#allocation2 + $0x90] ss:$8 sps:$4 sm:$0xff]   ;;  %v9064_v4 = vpop.f32.mrf.mxu1  ;;  %v9071_v23 = vpop.f32.mrf.mxu0  ;;  %v4508_v42 = vld [vmem:[#allocation2 + $0x4c] sm:$0x1] }
 0x159   : > { %7106 = vmatmul.mubr.msk.bf16.gmra.mxu0 %vm1425_vm10, %v7254_v1  ;;  %v4633_v6 = vrot.slane %v4631_v56, 5  ;;  %v5417_v34 = vrot.slane %v4504_v19, 5  ;;  %10349 = vst [vmem:[#allocation4_spill] sm:$0xff] %v9064_v4  ;;  %v4612_v41 = vsel %vm7558_vm9, %v4607_v24, %v9034_v51  ;;  %v4642_v27 = vshrl.u32 %v4505_v7, 16  ;;  %v5305_v62 = vld [vmem:[#allocation2 + $0x40] sm:$0xe] }
 0x15a   : > { %7109 = vmatprep.mubr.msk.bf16.mxu0 %vm1425_vm10, %v7255_v21  ;;  %v4621_v21 = vrot.slane %v4620_v32, 4  ;;  %v4639_v36 = vrot.slane %v4637_v28, 5  ;;  %v9075_v19 = vsel %vm7976_vm13, %v6610_v5, %v5413_v25  ;;  %v4645_v47 = vshll.u32 %v4505_v7, 16  ;;  %v5306_v1 = vld [vmem:[#allocation2 + $0x48] sm:$0xe]  ;;  %v9088_v25 = vpop.f32.mrf.mxu1 }
 0x15b   : > { %v4634_v35 = vor.u32 %v4633_v6, %v4630_v12  ;;  %v9079_v56 = vsel %vm7976_vm13, %v6611_v50, %v5417_v34  ;;  %v4644_v51 = vrot.slane %v4642_v27, 4  ;;  %v4651_v24 = vshll.u32 %v9057_v54, 16  ;;  %10351 = vst [vmem:[#allocation22_spill] sm:$0xff] %v9088_v25  ;;  %v9134_v58 = vld [vmem:[#allocation2 + $0x74] sm:$0x1] }
 0x15c   : > { %v4656_v32 = vshrl.u32 %v4507_v2, 16  ;;  %v4626_v12 = vsel %vm7558_vm9, %v4621_v21, %v4625_v26  ;;  %v4647_v6 = vrot.slane %v4645_v47, 5  ;;  %v4659_v5 = vshll.u32 %v4507_v2, 16  ;;  %v9095_v26 = vpop.f32.mrf.mxu0  ;;  %v4511_v47 = vld [vmem:[#allocation2 + $0x68] sm:$0xf] }
 0x15d   : > { %v4635_v28 = vrot.slane %v4634_v35, 4  ;;  %v10350_v7 = vcombine.low %v8844_v33, %v8848_v0  ;;  %v4665_v34 = vshll.u32 %v4508_v42, 16  ;;  %v6612_v27 = vrot.slane %v5305_v62, 9  ;;  %10353 = vst [vmem:[#allocation23_spill] sm:$0xff] %v9095_v26  ;;  %v9099_v35 = vld [vmem:[#allocation2 + $0x64] sm:$0x1] }
 0x15e   : > { %v4658_v50 = vrot.slane %v4656_v32, 4  ;;  %v5421_v46 = vrot.slane %v9057_v54, 5  ;;  %v10352_v4 = vcombine.low %v8991_v43, %v8999_v14  ;;  %v4648_v0 = vor.u32 %v4647_v6, %v4644_v51  ;;  %v4512_v51 = vld [vmem:[#allocation2 + $0x6c] sm:$0x1]  ;;  %v9111_v6 = vpop.f32.mrf.mxu1 }
 0x15f   : > { %7072 = vmatmul.mubr.msk.bf16.gmra.mxu1 %vm1425_vm10, %v10350_v7  ;;  %v4640_v33 = vsel %vm7558_vm9, %v4635_v28, %v4639_v36  ;;  %v4661_v2 = vrot.slane %v4659_v5, 5  ;;  %v6613_v21 = vrot.slane %v5306_v1, 9  ;;  %v9102_v54 = vcombine.low %v4598_v53, %v4612_v41  ;;  %v7258_v28 = vld [vmem:[#allocation2 + $0xc0] ss:$8 sps:$4 sm:$0xff]   ;;  %10354 = vst [vmem:[#allocation5_spill] sm:$0xff] %v9111_v6 }
 0x160   : > { %7075 = vmatprep.mubr.msk.bf16.mxu1 %vm1425_vm10, %v10352_v4  ;;  %v9106_v14 = vrot.slane %v4651_v24, 5  ;;  %v5425_v4 = vrot.slane %v4508_v42, 5  ;;  %v9109_v62 = vrot.slane %v4648_v0, 4  ;;  %v4670_v1 = vshrl.u32 %v4509_v59, 16  ;;  %v5307_v24 = vld [vmem:[#allocation2 + $0x60] sm:$0xe]  ;;  %v9116_v42 = vpop.f32.mrf.mxu0 }
 0x161   : > { %7110 = vmatmul.mubr.msk.bf16.gmra.mxu0 %vm1425_vm10, %v7256_v15  ;;  %v4662_v36 = vor.u32 %v4661_v2, %v4658_v50  ;;  %v4673_v32 = vshll.u32 %v4509_v59, 16  ;;  %v9113_v15 = vcombine.low %v4626_v12, %v4640_v33  ;;  %v4679_v53 = vshll.u32 %v9099_v35, 16  ;;  %v7259_v7 = vld [vmem:[#allocation2 + $0xd0] ss:$8 sps:$4 sm:$0xff]   ;;  %10355 = vst [vmem:[#allocation6_spill] sm:$0xff] %v9116_v42 }
 0x162   : > { %7113 = vmatprep.mubr.msk.bf16.mxu0 %vm1425_vm10, %v7257_v22  ;;  %v4684_v41 = vshrl.u32 %v4511_v47, 16  ;;  %v4687_v5 = vshll.u32 %v4511_v47, 16  ;;  %v9118_v22 = vrot.slane %v4665_v34, 5  ;;  %v9122_v50 = vsel %vm7976_vm13, %v6612_v27, %v5421_v46  ;;  %v5308_v33 = vld [vmem:[#allocation2 + $0x68] sm:$0xe] }
 0x163   : > { %v9126_v59 = vsel %vm7976_vm13, %v6613_v21, %v5425_v4  ;;  %v4672_v12 = vrot.slane %v4670_v1, 4  ;;  %v4654_v0 = vsel %vm7558_vm9, %v9109_v62, %v9106_v14  ;;  %v4675_v2 = vrot.slane %v4673_v32, 5  ;;  %v4513_v34 = vld [vmem:[#allocation2 + $0x70] sm:$0xf]  ;;  %v9140_v4 = vpop.f32.mrf.mxu1  ;;  %v4519_v42 = vld [vmem:[#allocation2 + $0x88] sm:$0xf] }
 0x164   : > { %v4686_v47 = vrot.slane %v4684_v41, 4  ;;  %v4689_v43 = vrot.slane %v4687_v5, 5  ;;  %v4663_v6 = vrot.slane %v4662_v36, 4  ;;  %v9132_v25 = vrot.slane %v4679_v53, 5  ;;  %10357 = vst [vmem:[#allocation16_spill] sm:$0xff] %v9140_v4  ;;  %v9147_v53 = vpop.f32.mrf.mxu0 }
 0x165   : > { %v4693_v46 = vshll.u32 %v4512_v51, 16  ;;  %v6614_v27 = vrot.slane %v5307_v24, 9  ;;  %v10356_v21 = vcombine.low %v8865_v38, %v8870_v17  ;;  %v4676_v1 = vor.u32 %v4675_v2, %v4672_v12  ;;  %v4515_v41 = vld [vmem:[#allocation2 + $0x78] sm:$0xf]  ;;  %10359 = vst [vmem:[#allocation18_spill] sm:$0xff] %v9147_v53 }
 0x166   : > { %v4690_v14 = vor.u32 %v4689_v43, %v4686_v47  ;;  %v5429_v62 = vrot.slane %v9099_v35, 5  ;;  %v6615_v32 = vrot.slane %v5308_v33, 9  ;;  %v10358_v36 = vcombine.low %v8877_v10, %v8882_v40  ;;  %v4516_v35 = vld [vmem:[#allocation2 + $0x7c] sm:$0x1] }
 0x167   : > { %7076 = vmatmul.mubr.msk.bf16.gmra.mxu1 %vm1425_vm10, %v10356_v21  ;;  %v4695_v17 = vrot.slane %v4693_v46, 5  ;;  %v5433_v5 = vrot.slane %v4512_v51, 5  ;;  %v4698_v24 = vshrl.u32 %v4513_v34, 16  ;;  %v4677_v43 = vrot.slane %v4676_v1, 4  ;;  %v5309_v46 = vld [vmem:[#allocation2 + $0x70] sm:$0xe] }
 0x168   : > { %7079 = vmatprep.mubr.msk.bf16.mxu1 %vm1425_vm10, %v10358_v36  ;;  %v4691_v12 = vrot.slane %v4690_v14, 4  ;;  %v4701_v33 = vshll.u32 %v4513_v34, 16  ;;  %v4707_v2 = vshll.u32 %v9134_v58, 16  ;;  %v4668_v40 = vsel %vm7558_vm9, %v4663_v6, %v9118_v22  ;;  %v7260_v51 = vld [vmem:[#allocation2 + $0xe0] ss:$8 sps:$4 sm:$0xff]   ;;  %v9157_v36 = vpop.f32.mrf.mxu1  ;;  %v9170_v14 = vpop.f32.mrf.mxu0 }
 0x169   : > { %7114 = vmatmul.mubr.msk.bf16.gmra.mxu0 %vm1425_vm10, %v7258_v28  ;;  %v4700_v10 = vrot.slane %v4698_v24, 4  ;;  %v4712_v47 = vshrl.u32 %v4515_v41, 16  ;;  %v4715_v21 = vshll.u32 %v4515_v41, 16  ;;  %10360 = vst [vmem:[#allocation20_spill] sm:$0xff] %v9157_v36  ;;  %v4682_v28 = vsel %vm7558_vm9, %v4677_v43, %v9132_v25  ;;  %v5310_v22 = vld [vmem:[#allocation2 + $0x78] sm:$0xe] }
 0x16a   : > { %7117 = vmatprep.mubr.msk.bf16.mxu0 %vm1425_vm10, %v7259_v7  ;;  %v9164_v34 = vsel %vm7976_vm13, %v6614_v27, %v5429_v62  ;;  %v9168_v7 = vsel %vm7976_vm13, %v6615_v32, %v5433_v5  ;;  %v4703_v6 = vrot.slane %v4701_v33, 5  ;;  %v4517_v1 = vld [vmem:[#allocation2 + $0x80] sm:$0xf]  ;;  %10361 = vst [vmem:[#allocation15_spill] sm:$0xff] %v9170_v14  ;;  %v4696_v24 = vsel %vm7558_vm9, %v4691_v12, %v4695_v17  ;;  %v4518_v32 = vld [vmem:[#allocation2 + $0x84] sm:$0x1]  ;;  %v9181_v17 = vpop.f32.mrf.mxu1 }
 0x16b   : > { %v7261_v41 = vld [vmem:[#allocation2 + $0x100] ss:$8 sps:$4 sm:$0xff]   ;;  %v9174_v38 = vrot.slane %v4707_v2, 5  ;;  %v4714_v25 = vrot.slane %v4712_v47, 4  ;;  %v4717_v43 = vrot.slane %v4715_v21, 5  ;;  %v4721_v27 = vshll.u32 %v4516_v35, 16  ;;  %v9193_v21 = vpop.f32.mrf.mxu0 }
 0x16c   : > { %v4704_v36 = vor.u32 %v4703_v6, %v4700_v10  ;;  %v6616_v62 = vrot.slane %v5309_v46, 9  ;;  %v5437_v4 = vrot.slane %v9134_v58, 5  ;;  %v6617_v33 = vrot.slane %v5310_v22, 9  ;;  %10363 = vst [vmem:[#allocation17_spill] sm:$0xff] %v9181_v17  ;;  %v4520_v58 = vld [vmem:[#allocation2 + $0x8c] sm:$0x1] }
 0x16d   : > { %v4718_v5 = vor.u32 %v4717_v43, %v4714_v25  ;;  %v5441_v53 = vrot.slane %v4516_v35, 5  ;;  %v4726_v26 = vshrl.u32 %v4517_v1, 16  ;;  %v10362_v14 = vcombine.low %v8891_v52, %v8897_v37  ;;  %10365 = vst [vmem:[#allocation11_spill] sm:$0xff] %v9193_v21  ;;  %v5312_v22 = vld [vmem:[#allocation2 + $0x88] sm:$0xe] }
 0x16e   : > { %v9183_v12 = vcombine.low %v4654_v0, %v4668_v40  ;;  %v9185_v2 = vrot.slane %v4704_v36, 4  ;;  %v9187_v10 = vrot.slane %v4721_v27, 5  ;;  %v4729_v47 = vshll.u32 %v4517_v1, 16  ;;  %v5311_v40 = vld [vmem:[#allocation2 + $0x80] sm:$0xe] }
 0x16f   : > { %7080 = vmatmul.mubr.msk.bf16.gmra.mxu1 %vm1425_vm10, %v10362_v14  ;;  %v10364_v35 = vcombine.low %v8901_v8, %v8909_v63  ;;  %v4719_v37 = vrot.slane %v4718_v5, 4  ;;  %v4728_v46 = vrot.slane %v4726_v26, 4  ;;  %v4735_v0 = vshll.u32 %v4518_v32, 16  ;;  %v4521_v14 = vld [vmem:[#allocation2 + $0x90] sm:$0xf]  ;;  %v9218_v5 = vpop.f32.mrf.mxu0 }
 0x170   : > { %v9198_v36 = vcombine.low %v4682_v28, %v4696_v24  ;;  %v9202_v6 = vsel %vm7976_vm13, %v6616_v62, %v5437_v4  ;;  %v4731_v8 = vrot.slane %v4729_v47, 5  ;;  %v4740_v63 = vshrl.u32 %v4519_v42, 16  ;;  %v9213_v24 = vpop.f32.mrf.mxu1  ;;  %v7262_v4 = vld [vmem:[#allocation2 + $0x110] ss:$8 sps:$4 sm:$0xff]   ;;  %v7263_v47 = vld [vmem:[#allocation2 + $0x120] ss:$8 sps:$4 sm:$0xff]  }
 0x171   : > { %7083 = vmatprep.mubr.msk.bf16.mxu1 %vm1425_vm10, %v10364_v35  ;;  %7118 = vmatmul.mubr.msk.bf16.gmra.mxu0 %vm1425_vm10, %v7260_v51  ;;  %v4710_v26 = vsel %vm7558_vm9, %v9185_v2, %v9174_v38  ;;  %v9211_v1 = vsel %vm7976_vm13, %v6617_v33, %v5441_v53  ;;  %v4743_v51 = vshll.u32 %v4519_v42, 16  ;;  %v4749_v28 = vshll.u32 %v4520_v58, 16  ;;  %10367 = vst [vmem:[#allocation8_spill] sm:$0xff] %v9213_v24  ;;  %v4523_v62 = vld [vmem:[#allocation2 + $0x98] sm:$0xf] }
 0x172   : > { %10366 = vst [vmem:[#allocation7_spill] sm:$0xff] %v9198_v36  ;;  %7121 = vmatprep.mubr.msk.bf16.mxu0 %vm1425_vm10, %v7261_v41  ;;  %v4724_v25 = vsel %vm7558_vm9, %v4719_v37, %v9187_v10  ;;  %v4732_v41 = vor.u32 %v4731_v8, %v4728_v46  ;;  %v4742_v43 = vrot.slane %v4740_v63, 4  ;;  %v6618_v27 = vrot.slane %v5311_v40, 9  ;;  %v4522_v42 = vld [vmem:[#allocation2 + $0x94] sm:$0x1] }
 0x173   : > { %v4737_v38 = vrot.slane %v4735_v0, 5  ;;  %v4745_v2 = vrot.slane %v4743_v51, 5  ;;  %v5445_v53 = vrot.slane %v4518_v32, 5  ;;  %v6619_v33 = vrot.slane %v5312_v22, 9  ;;  %v4524_v37 = vld [vmem:[#allocation2 + $0x9c] sm:$0x1]  ;;  %v9228_v32 = vpop.f32.mrf.mxu1 }
 0x174   : > { %v4733_v35 = vrot.slane %v4732_v41, 4  ;;  %v5449_v52 = vrot.slane %v4520_v58, 5  ;;  %v4754_v24 = vshrl.u32 %v4521_v14, 16  ;;  %v4757_v17 = vshll.u32 %v4521_v14, 16  ;;  %v5313_v40 = vld [vmem:[#allocation2 + $0x90] sm:$0xe] }
 0x175   : > { %v4746_v21 = vor.u32 %v4745_v2, %v4742_v43  ;;  %v4751_v36 = vrot.slane %v4749_v28, 5  ;;  %v9222_v10 = vsel %vm7976_vm13, %v6618_v27, %v5445_v53  ;;  %v4768_v46 = vshrl.u32 %v4523_v62, 16  ;;  %10369 = vst [vmem:[#allocation12_spill] sm:$0xff] %v9228_v32  ;;  %v9238_v28 = vpop.f32.mrf.mxu0  ;;  %v4526_v53 = vld [vmem:[#allocation2 + $0xb4] sm:$0x1] }
 0x176   : > { %v10368_v0 = vcombine.low %v8917_v30, %v8922_v9  ;;  %v9232_v58 = vsel %vm7976_vm13, %v6619_v33, %v5449_v52  ;;  %v4756_v8 = vrot.slane %v4754_v24, 4  ;;  %v4759_v63 = vrot.slane %v4757_v17, 5  ;;  %v5314_v52 = vld [vmem:[#allocation2 + $0x98] sm:$0xe] }
 0x177   : > { %v4763_v22 = vshll.u32 %v4522_v42, 16  ;;  %v10370_v51 = vcombine.low %v8929_v16, %v8934_v57  ;;  %v4738_v9 = vsel %vm7558_vm9, %v4733_v35, %v4737_v38  ;;  %v4747_v14 = vrot.slane %v4746_v21, 4  ;;  %v4525_v16 = vld [vmem:[#allocation2 + $0xb0] sm:$0xf]  ;;  %v4527_v33 = vld [vmem:[#allocation2 + $0xb8] sm:$0xf]  ;;  %v9252_v35 = vpop.f32.mrf.mxu1 }
 0x178   : > { %7084 = vmatmul.mubr.msk.bf16.gmra.mxu1 %vm1425_vm10, %v10368_v0  ;;  %v4770_v41 = vrot.slane %v4768_v46, 4  ;;  %v4760_v17 = vor.u32 %v4759_v63, %v4756_v8  ;;  %v4771_v24 = vshll.u32 %v4523_v62, 16  ;;  %v4777_v43 = vshll.u32 %v4524_v37, 16  ;;  %10371 = vst [vmem:[#allocation9_spill] sm:$0xff] %v9252_v35  ;;  %v4528_v0 = vld [vmem:[#allocation2 + $0xbc] sm:$0x1]  ;;  %v9254_v8 = vpop.f32.mrf.mxu0 }
 0x179   : > { %7087 = vmatprep.mubr.msk.bf16.mxu1 %vm1425_vm10, %v10370_v51  ;;  %7122 = vmatmul.mubr.msk.bf16.gmra.mxu0 %vm1425_vm10, %v7262_v4  ;;  %v6620_v27 = vrot.slane %v5313_v40, 9  ;;  %v9246_v57 = vcombine.low %v4710_v26, %v4724_v25  ;;  %v4752_v2 = vsel %vm7558_vm9, %v4747_v14, %v4751_v36  ;;  %v5453_v21 = vrot.slane %v4522_v42, 5  ;;  %v5315_v63 = vld [vmem:[#allocation2 + $0xb0] sm:$0xe]  ;;  %v5316_v35 = vld [vmem:[#allocation2 + $0xb8] sm:$0xe] }
 0x17a   : > { %7125 = vmatprep.mubr.msk.bf16.mxu0 %vm1425_vm10, %v7263_v47  ;;  %v4765_v4 = vrot.slane %v4763_v22, 5  ;;  %v4773_v62 = vrot.slane %v4771_v24, 5  ;;  %v6621_v46 = vrot.slane %v5314_v52, 9  ;;  %v5457_v40 = vrot.slane %v4524_v37, 5  ;;  %v7264_v51 = vld [vmem:[#allocation2 + $0x130] ss:$8 sps:$4 sm:$0xff]  }
 0x17b   : > { %v9256_v26 = vcombine.low %v4738_v9, %v4752_v2  ;;  %v4761_v25 = vrot.slane %v4760_v17, 4  ;;  %v4782_v47 = vshrl.u32 %v4525_v16, 16  ;;  %v4785_v36 = vshll.u32 %v4525_v16, 16  ;;  %v9266_v17 = vpop.f32.mrf.mxu1  ;;  %v10374_v2 = vld [vmem:[#allocation14_spill] sm:$0xff] }
 0x17c   : > { %v4774_v14 = vor.u32 %v4773_v62, %v4770_v41  ;;  %v4779_v42 = vrot.slane %v4777_v43, 5  ;;  %v9260_v38 = vsel %vm7976_vm13, %v6620_v27, %v5453_v21  ;;  %v4791_v22 = vshll.u32 %v4526_v53, 16  ;;  %10373 = vst [vmem:[#allocation10_spill] sm:$0xff] %v9266_v17 }
 0x17d   : > { %v4784_v24 = vrot.slane %v4782_v47, 4  ;;  %v4787_v52 = vrot.slane %v4785_v36, 5  ;;  %v4796_v37 = vshrl.u32 %v4527_v33, 16  ;;  %v4799_v30 = vshll.u32 %v4527_v33, 16  ;;  %v9276_v33 = vpop.f32.mrf.mxu0  ;;  %v4529_v36 = vld [vmem:[#allocation2 + $0xc0] sm:$0xf] }
 0x17e   : > { %v10372_v9 = vcombine.low %v8942_v11, %v8948_v29  ;;  %v4775_v16 = vrot.slane %v4774_v14, 4  ;;  %v9270_v41 = vsel %vm7976_vm13, %v6621_v46, %v5457_v40  ;;  %v4805_v43 = vshll.u32 %v4528_v0, 16 }
 0x17f   : > { %v6622_v27 = vrot.slane %v5315_v63, 9  ;;  %v10375_v21 = vcombine.low %v8952_v48, %v10374_v2  ;;  %v4788_v62 = vor.u32 %v4787_v52, %v4784_v24  ;;  %v4798_v11 = vrot.slane %v4796_v37, 4  ;;  %v9283_v48 = vld [vmem:[#allocation2 + $0xc4] sm:$0x1]  ;;  %v9285_v2 = vpop.f32.mrf.mxu0  ;;  %v9293_v24 = vpop.f32.mrf.mxu1  ;;  %v5317_v52 = vld [vmem:[#allocation2 + $0xc0] sm:$0xe] }
 0x180   : > { %7088 = vmatmul.mubr.msk.bf16.gmra.mxu1 %vm1425_vm10, %v10372_v9  ;;  %v4801_v29 = vrot.slane %v4799_v30, 5  ;;  %v5461_v47 = vrot.slane %v4526_v53, 5  ;;  %v4766_v46 = vsel %vm7558_vm9, %v4761_v25, %v4765_v4  ;;  %v4780_v40 = vsel %vm7558_vm9, %v4775_v16, %v4779_v42  ;;  %v4531_v9 = vld [vmem:[#allocation2 + $0xc8] sm:$0xf]  ;;  %10377 = vst [vmem:[#allocation19_spill] sm:$0xff] %v9293_v24 }
 0x181   : > { %7091 = vmatprep.mubr.msk.bf16.mxu1 %vm1425_vm10, %v10375_v21  ;;  %7126 = vmatmul.mubr.msk.bf16.gmra.mxu0 %vm1425_vm10, %v7264_v51  ;;  %v6623_v63 = vrot.slane %v5316_v35, 9  ;;  %v5465_v14 = vrot.slane %v4528_v0, 5  ;;  %v10376_v30 = vcombine.low %v9013_v60, %v9017_v61  ;;  %v4789_v51 = vrot.slane %v4788_v62, 4  ;;  %v4532_v42 = vld [vmem:[#allocation2 + $0xcc] sm:$0x1]  ;;  %v9303_v37 = vpop.f32.mrf.mxu0  ;;  %v9316_v24 = vpop.f32.mrf.mxu1 }
 0x182   : > { %v4793_v4 = vrot.slane %v4791_v22, 5  ;;  %v4802_v25 = vor.u32 %v4801_v29, %v4798_v11  ;;  %v9297_v35 = vsel %vm7976_vm13, %v6622_v27, %v5461_v47  ;;  %v4810_v60 = vshrl.u32 %v4529_v36, 16  ;;  %v5318_v11 = vld [vmem:[#allocation2 + $0xc8] sm:$0xe]  ;;  %v4533_v53 = vld [vmem:[#allocation2 + $0xd0] sm:$0xf] }
 0x183   : > { %7165 = vmatprep.mubr.msk.bf16.mxu0 %vm1425_vm10, %v10376_v30  ;;  %v9301_v0 = vsel %vm7976_vm13, %v6623_v63, %v5465_v14  ;;  %v4813_v61 = vshll.u32 %v4529_v36, 16  ;;  %v9305_v16 = vcombine.low %v4766_v46, %v4780_v40  ;;  %v4807_v22 = vrot.slane %v4805_v43, 5  ;;  %v9308_v63 = vpop.f32.mrf.mxu0  ;;  %v9314_v43 = vld [vmem:[#allocation2 + $0xd4] sm:$0x1]  ;;  %10379 = vst [vmem:[#allocation13_spill] sm:$0xff] %v9316_v24 }
 0x184   : > { %v4819_v21 = vshll.u32 %v9283_v48, 16  ;;  %v4824_v62 = vshrl.u32 %v4531_v9, 16  ;;  %v4803_v29 = vrot.slane %v4802_v25, 4  ;;  %v4812_v27 = vrot.slane %v4810_v60, 4  ;;  %10378 = vst [vmem:[#allocation21_spill] sm:$0xff] %v9308_v63  ;;  %v9327_v63 = vpop.f32.mrf.mxu1 }
 0x185   : > { %v4815_v47 = vrot.slane %v4813_v61, 5  ;;  %v4827_v30 = vshll.u32 %v4531_v9, 16  ;;  %v4794_v36 = vsel %vm7558_vm9, %v4789_v51, %v4793_v4  ;;  %v4833_v40 = vshll.u32 %v4532_v42, 16  ;;  %v4535_v51 = vld [vmem:[#allocation2 + $0xd8] sm:$0xf]  ;;  %v6963_v4 = vpop.f32.mrf.mxu0 }
 0x186   : > { %v4826_v46 = vrot.slane %v4824_v62, 4  ;;  %v10380_v25 = vcombine.low %v8971_v3, %v8977_v39  ;;  %v6624_v61 = vrot.slane %v5317_v52, 9  ;;  %v5469_v17 = vrot.slane %v9283_v48, 5 }
 0x187   : > { %v4816_v9 = vor.u32 %v4815_v47, %v4812_v27  ;;  %v4829_v60 = vrot.slane %v4827_v30, 5  ;;  %v9325_v62 = vrot.slane %v4819_v21, 5  ;;  %v6625_v14 = vrot.slane %v5318_v11, 9  ;;  %v4536_v27 = vld [vmem:[#allocation2 + $0xdc] sm:$0x1]  ;;  %v2293_v47 = vpop.f32.mrf.mxu0  ;;  %v10411_v55 = vld [vmem:[#allocation19_spill] sm:$0xff] }
 0x188   : > { %7092 = vmatmul.mubr.msk.bf16.gmra.mxu1 %vm1425_vm10, %v10380_v25  ;;  %v5473_v32 = vrot.slane %v4532_v42, 5  ;;  %v4838_v24 = vshrl.u32 %v4533_v53, 16  ;;  %v10381_v3 = vcombine.low %v9044_v13, %v9048_v18  ;;  %v4808_v39 = vsel %vm7558_vm9, %v4803_v29, %v4807_v22  ;;  %v5319_v18 = vld [vmem:[#allocation2 + $0xd0] sm:$0xe]  ;;  %v9340_v25 = vpop.f32.mrf.mxu1 }
 0x189   : > { %7131 = vmatprep.mubr.msk.bf16.mxu1 %vm1425_vm10, %v9030_v31  ;;  %v4817_v48 = vrot.slane %v4816_v9, 4  ;;  %v4830_v52 = vor.u32 %v4829_v60, %v4826_v46  ;;  %v4841_v31 = vshll.u32 %v4533_v53, 16  ;;  %v10382_v21 = vcombine.low %v9075_v19, %v9079_v56  ;;  %10383 = vst [vmem:[#allocation14_spill] sm:$0xff] %v9340_v25  ;;  %v5320_v56 = vld [vmem:[#allocation2 + $0xd8] sm:$0xe]  ;;  %v6964_v29 = vpop.f32.mrf.mxu0 }
 0x18a   : > { %7166 = vmatmul.mubr.msk.bf16.vlgmr.msra.gmra.mxu0 %vm1425_vm10, %v10381_v3  ;;  %v4835_v42 = vrot.slane %v4833_v40, 5  ;;  %v4840_v11 = vrot.slane %v4838_v24, 4  ;;  %v4847_v30 = vshll.u32 %v9314_v43, 16  ;;  %v4852_v13 = vshrl.u32 %v4535_v51, 16  ;;  %v4537_v60 = vld [vmem:[#allocation2 + $0xe0] sm:$0xf] }
 0x18b   : > { %7169 = vmatprep.mubr.msk.bf16.mxu0 %vm1425_vm10, %v10382_v21  ;;  %v4831_v3 = vrot.slane %v4830_v52, 4  ;;  %v9344_v22 = vsel %vm7976_vm13, %v6624_v61, %v5469_v17  ;;  %v9348_v53 = vsel %vm7976_vm13, %v6625_v14, %v5473_v32  ;;  %v4843_v19 = vrot.slane %v4841_v31, 5  ;;  %v9352_v21 = vpop.f32.mrf.mxu1  ;;  %v2296_v14 = vpop.f32.mrf.mxu0 }
 0x18c   : > { %v9350_v46 = vcombine.low %v4794_v36, %v4808_v39  ;;  %v4854_v24 = vrot.slane %v4852_v13, 4  ;;  %v4855_v40 = vshll.u32 %v4535_v51, 16  ;;  %v4861_v9 = vshll.u32 %v4536_v27, 16  ;;  %10384 = vst [vmem:[#allocation24_spill] sm:$0xff] %v9352_v21  ;;  %v4539_v13 = vld [vmem:[#allocation2 + $0xe8] sm:$0xf] }
 0x18d   : > { %v4822_v17 = vsel %vm7558_vm9, %v4817_v48, %v9325_v62  ;;  %v4844_v61 = vor.u32 %v4843_v19, %v4840_v11  ;;  %v6626_v52 = vrot.slane %v5319_v18, 9  ;;  %v5477_v32 = vrot.slane %v9314_v43, 5  ;;  %v6929_v25 = vpop.f32.mrf.mxu1  ;;  %v6967_v21 = vpop.f32.mrf.mxu0 }
 0x18e   : > { %v9360_v36 = vrot.slane %v4847_v30, 5  ;;  %v4857_v39 = vrot.slane %v4855_v40, 5  ;;  %v6627_v51 = vrot.slane %v5320_v56, 9  ;;  %v4836_v62 = vsel %vm7558_vm9, %v4831_v3, %v4835_v42  ;;  %v9371_v56 = vld [vmem:[#allocation2 + $0xe4] sm:$0x1] }
 0x18f   : > { %v9366_v48 = vrot.slane %v4861_v9, 5  ;;  %v5481_v11 = vrot.slane %v4536_v27, 5  ;;  %v4866_v43 = vshrl.u32 %v4537_v60, 16  ;;  %v1813_v18 = vadd.f32 %v6929_v25, %v9006_v44  ;;  %v1804_v31 = vpop.f32.mrf.mxu1  ;;  %v4540_v9 = vld [vmem:[#allocation2 + $0xec] sm:$0x1] }
 0x190   : > { %7132 = vmatmul.mubr.msk.bf16.vlgmr.msra.gmra.mxu1 %vm1425_vm10, %v9102_v54  ;;  %v4845_v30 = vrot.slane %v4844_v61, 4  ;;  %v4858_v19 = vor.u32 %v4857_v39, %v4854_v24  ;;  %v4869_v40 = vshll.u32 %v4537_v60, 16  ;;  %v10385_v54 = vcombine.low %v9122_v50, %v9126_v59  ;;  %v2309_v61 = vpop.f32.mrf.mxu0 }
 0x191   : > { %7135 = vmatprep.mubr.msk.bf16.mxu1 %vm1425_vm10, %v9113_v15  ;;  %v9379_v27 = vsel %vm7976_vm13, %v6626_v52, %v5477_v32  ;;  %v9383_v44 = vsel %vm7976_vm13, %v6627_v51, %v5481_v11  ;;  %v4868_v15 = vrot.slane %v4866_v43, 4  ;;  %v4880_v42 = vshrl.u32 %v4539_v13, 16  ;;  %v6930_v60 = vpop.f32.mrf.mxu1 }
 0x192   : > { %7170 = vmatmul.mubr.msk.bf16.gmra.mxu0 %vm1425_vm10, %v10385_v54  ;;  %v9385_v25 = vadd.f32 %v6963_v4, %v1813_v18  ;;  %v1805_v3 = vadd.f32 %v1804_v31, %v9024_v20  ;;  %v10386_v24 = vcombine.low %v9164_v34, %v9168_v7  ;;  %v9392_v50 = vcombine.low %v4822_v17, %v4836_v62  ;;  %v5321_v4 = vld [vmem:[#allocation2 + $0xe0] sm:$0xe]  ;;  %v5322_v17 = vld [vmem:[#allocation2 + $0xe8] sm:$0xe]  ;;  %v6968_v62 = vpop.f32.mrf.mxu0 }
 0x193   : > { %v4859_v59 = vrot.slane %v4858_v19, 4  ;;  %v4871_v52 = vrot.slane %v4869_v40, 5  ;;  %v4875_v32 = vshll.u32 %v9371_v56, 16  ;;  %v4882_v39 = vrot.slane %v4880_v42, 4  ;;  %v1807_v31 = vpop.f32.mrf.mxu1  ;;  %v4541_v19 = vld [vmem:[#allocation2 + $0x100] sm:$0xf] }
 0x194   : > { %7173 = vmatprep.mubr.msk.bf16.mxu0 %vm1425_vm10, %v10386_v24  ;;  %v4883_v51 = vshll.u32 %v4539_v13, 16  ;;  %v9395_v11 = vadd.f32 %v2293_v47, %v1805_v3  ;;  %v1816_v20 = vadd.f32 %v6930_v60, %v9054_v45  ;;  %v4850_v34 = vsel %vm7558_vm9, %v4845_v30, %v9360_v36  ;;  %v2312_v42 = vpop.f32.mrf.mxu0 }
 0x195   : > { %v4864_v43 = vsel %vm7558_vm9, %v4859_v59, %v9366_v48  ;;  %v4872_v13 = vor.u32 %v4871_v52, %v4868_v15  ;;  %v4889_v47 = vshll.u32 %v4540_v9, 16  ;;  %v1808_v45 = vadd.f32 %v1807_v31, %v9071_v23  ;;  %v6933_v30 = vpop.f32.mrf.mxu1  ;;  %v10388_v52 = vld [vmem:[#allocation7_spill] sm:$0xff] }
 0x196   : > { %v4885_v18 = vrot.slane %v4883_v51, 5  ;;  %v9406_v40 = vadd.f32 %v6964_v29, %v1816_v20  ;;  %v6628_v54 = vrot.slane %v5321_v4, 9  ;;  %v5485_v36 = vrot.slane %v9371_v56, 5  ;;  %v10387_v29 = vld [vmem:[#allocation23_spill] sm:$0xff]  ;;  %v4543_v51 = vld [vmem:[#allocation2 + $0x108] sm:$0xf] }
 0x197   : > { %v9412_v3 = vrot.slane %v4872_v13, 4  ;;  %v9414_v24 = vrot.slane %v4875_v32, 5  ;;  %v6629_v15 = vrot.slane %v5322_v17, 9  ;;  %v9416_v59 = vadd.f32 %v2296_v14, %v1808_v45  ;;  %v4542_v56 = vld [vmem:[#allocation2 + $0x104] sm:$0x1]  ;;  %v1820_v20 = vpop.f32.mrf.mxu1 }
 0x198   : > { %7136 = vmatmul.mubr.msk.bf16.gmra.mxu1 %vm1425_vm10, %v9183_v12  ;;  %v4886_v48 = vor.u32 %v4885_v18, %v4882_v39  ;;  %v1829_v60 = vadd.f32 %v6933_v30, %v10387_v29  ;;  %v5489_v23 = vrot.slane %v4540_v9, 5  ;;  %v4894_v4 = vshrl.u32 %v4541_v19, 16  ;;  %v6971_v12 = vpop.f32.mrf.mxu0  ;;  %v10390_v9 = vld [vmem:[#allocation6_spill] sm:$0xff]  ;;  %v5323_v29 = vld [vmem:[#allocation2 + $0x100] sm:$0xe] }
 0x199   : > { %7139 = vmatprep.mubr.msk.bf16.mxu1 %vm1425_vm10, %v10388_v52  ;;  %v10389_v31 = vcombine.low %v9202_v6, %v9211_v1  ;;  %v9425_v32 = vcombine.low %v4850_v34, %v4864_v43  ;;  %v9429_v39 = vrot.slane %v4889_v47, 5  ;;  %v4897_v17 = vshll.u32 %v4541_v19, 16  ;;  %v4544_v1 = vld [vmem:[#allocation2 + $0x10c] sm:$0x1]  ;;  %v6934_v43 = vpop.f32.mrf.mxu1  ;;  %v5324_v52 = vld [vmem:[#allocation2 + $0x108] sm:$0xe] }
 0x19a   : > { %v9427_v14 = vrot.slane %v4886_v48, 4  ;;  %v9431_v13 = vadd.f32 %v6967_v21, %v1829_v60  ;;  %v1821_v18 = vadd.f32 %v1820_v20, %v10390_v9  ;;  %v10391_v45 = vcombine.low %v9222_v10, %v9232_v58  ;;  %v2325_v30 = vpop.f32.mrf.mxu0  ;;  %v10392_v58 = vld [vmem:[#allocation18_spill] sm:$0xff]  ;;  %v10393_v9 = vld [vmem:[#allocation15_spill] sm:$0xff] }
 0x19b   : > { %7174 = vmatmul.mubr.msk.bf16.gmra.mxu0 %vm1425_vm10, %v10389_v31  ;;  %v9440_v6 = vsel %vm7976_vm13, %v6628_v54, %v5485_v36  ;;  %v4896_v34 = vrot.slane %v4894_v4, 4  ;;  %v4878_v21 = vsel %vm7558_vm9, %v9412_v3, %v9414_v24  ;;  %v4899_v47 = vrot.slane %v4897_v17, 5  ;;  %v1823_v4 = vpop.f32.mrf.mxu1 }
 0x19c   : > { %7177 = vmatprep.mubr.msk.bf16.mxu0 %vm1425_vm10, %v10391_v45  ;;  %v4903_v19 = vshll.u32 %v4542_v56, 16  ;;  %v4908_v48 = vshrl.u32 %v4543_v51, 16  ;;  %v9446_v10 = vadd.f32 %v2309_v61, %v1821_v18  ;;  %v1832_v60 = vadd.f32 %v6934_v43, %v10392_v58  ;;  %v6972_v20 = vpop.f32.mrf.mxu0 }
 0x19d   : > { %v9451_v54 = vsel %vm7976_vm13, %v6629_v15, %v5489_v23  ;;  %v4911_v36 = vshll.u32 %v4543_v51, 16  ;;  %v4892_v3 = vsel %vm7558_vm9, %v9427_v14, %v9429_v39  ;;  %v4900_v24 = vor.u32 %v4899_v47, %v4896_v34  ;;  %v4545_v15 = vld [vmem:[#allocation2 + $0x110] sm:$0xf]  ;;  %v6937_v23 = vpop.f32.mrf.mxu1 }
 0x19e   : > { %v4910_v31 = vrot.slane %v4908_v48, 4  ;;  %v4917_v17 = vshll.u32 %v4544_v1, 16  ;;  %v9457_v61 = vadd.f32 %v6968_v62, %v1832_v60  ;;  %v1824_v18 = vadd.f32 %v1823_v4, %v10393_v9  ;;  %v2328_v51 = vpop.f32.mrf.mxu0  ;;  %v10394_v62 = vld [vmem:[#allocation11_spill] sm:$0xff]  ;;  %v9471_v60 = vld [vmem:[#allocation2 + $0x114] sm:$0x1] }
 0x19f   : > { %v4913_v45 = vrot.slane %v4911_v36, 5  ;;  %v6630_v43 = vrot.slane %v5323_v29, 9  ;;  %v9462_v58 = vrot.slane %v4900_v24, 4  ;;  %v9464_v7 = vrot.slane %v4903_v19, 5  ;;  %v1836_v36 = vpop.f32.mrf.mxu1  ;;  %v4547_v19 = vld [vmem:[#allocation2 + $0x118] sm:$0xf] }
 0x1a0   : > { %7140 = vmatmul.mubr.msk.bf16.gmra.mxu1 %vm1425_vm10, %v9246_v57  ;;  %v5493_v14 = vrot.slane %v4542_v56, 5  ;;  %v6631_v39 = vrot.slane %v5324_v52, 9  ;;  %v9466_v34 = vadd.f32 %v2312_v42, %v1824_v18  ;;  %v1845_v47 = vadd.f32 %v6937_v23, %v10394_v62  ;;  %v6975_v57 = vpop.f32.mrf.mxu0 }
 0x1a1   : > { %7143 = vmatprep.mubr.msk.bf16.mxu1 %vm1425_vm10, %v9256_v26  ;;  %v4914_v48 = vor.u32 %v4913_v45, %v4910_v31  ;;  %v5497_v29 = vrot.slane %v4544_v1, 5  ;;  %v10395_v4 = vcombine.low %v9260_v38, %v9270_v41  ;;  %v4919_v56 = vrot.slane %v4917_v17, 5  ;;  %v6938_v17 = vpop.f32.mrf.mxu1 }
 0x1a2   : > { %v9479_v42 = vsel %vm7976_vm13, %v6630_v43, %v5493_v14  ;;  %v4922_v52 = vshrl.u32 %v4545_v15, 16  ;;  %v4925_v24 = vshll.u32 %v4545_v15, 16  ;;  %v9481_v26 = vadd.f32 %v6971_v12, %v1845_v47  ;;  %v2341_v9 = vpop.f32.mrf.mxu0  ;;  %v4548_v15 = vld [vmem:[#allocation2 + $0x11c] sm:$0x1] }
 0x1a3   : > { %7178 = vmatmul.mubr.msk.bf16.gmra.mxu0 %vm1425_vm10, %v10395_v4  ;;  %v1837_v1 = vadd.f32 %v1836_v36, %v9218_v5  ;;  %v10396_v31 = vcombine.low %v9297_v35, %v9301_v0  ;;  %v4915_v38 = vrot.slane %v4914_v48, 4  ;;  %v9490_v41 = vsel %vm7976_vm13, %v6631_v39, %v5497_v29  ;;  %v1839_v14 = vpop.f32.mrf.mxu1  ;;  %v5326_v4 = vld [vmem:[#allocation2 + $0x118] sm:$0xe] }
 0x1a4   : > { %v6650_v18 = vcombine.low %v9440_v6, %v9451_v54  ;;  %v4924_v45 = vrot.slane %v4922_v52, 4  ;;  %v4927_v12 = vrot.slane %v4925_v24, 5  ;;  %v4931_v43 = vshll.u32 %v9471_v60, 16  ;;  %v6976_v39 = vpop.f32.mrf.mxu0  ;;  %v4554_v54 = vld [vmem:[#allocation2 + $0x134] sm:$0x1] }
 0x1a5   : > { %7181 = vmatprep.mubr.msk.bf16.mxu0 %vm1425_vm10, %v10396_v31  ;;  %v9495_v5 = vadd.f32 %v2325_v30, %v1837_v1  ;;  %v1848_v35 = vadd.f32 %v6938_v17, %v9238_v28  ;;  %v9498_v0 = vcombine.low %v4878_v21, %v4892_v3  ;;  %v4936_v23 = vshrl.u32 %v4547_v19, 16  ;;  %v5325_v30 = vld [vmem:[#allocation2 + $0x110] sm:$0xe]  ;;  %v6941_v52 = vpop.f32.mrf.mxu1  ;;  %v9523_v17 = vld [vmem:[#allocation2 + $0x124] sm:$0x1] }
 0x1a6   : > { %v4906_v62 = vsel %vm7558_vm9, %v9462_v58, %v9464_v7  ;;  %v6651_v47 = vcombine.low %v9479_v42, %v9490_v41  ;;  %v4928_v48 = vor.u32 %v4927_v12, %v4924_v45  ;;  %v4939_v29 = vshll.u32 %v4547_v19, 16  ;;  %v2344_v7 = vpop.f32.mrf.mxu0 }
 0x1a7   : > { %v9506_v36 = vadd.f32 %v6972_v20, %v1848_v35  ;;  %v1840_v28 = vadd.f32 %v1839_v14, %v9254_v8  ;;  %v4920_v21 = vsel %vm7558_vm9, %v4915_v38, %v4919_v56  ;;  %v4938_v3 = vrot.slane %v4936_v23, 4  ;;  %v4549_v20 = vld [vmem:[#allocation2 + $0x120] sm:$0xf]  ;;  %v1852_v45 = vpop.f32.mrf.mxu1 }
 0x1a8   : > { %7144 = vmatmul.mubr.msk.bf16.gmra.mxu1 %vm1425_vm10, %v9305_v16  ;;  %v9513_v58 = vrot.slane %v4928_v48, 4  ;;  %v9515_v24 = vrot.slane %v4931_v43, 5  ;;  %v4941_v19 = vrot.slane %v4939_v29, 5  ;;  %v4945_v1 = vshll.u32 %v4548_v15, 16  ;;  %v4551_v16 = vld [vmem:[#allocation2 + $0x128] sm:$0xf]  ;;  %v6979_v12 = vpop.f32.mrf.mxu0 }
 0x1a9   : > { %v9517_v31 = vadd.f32 %v2328_v51, %v1840_v28  ;;  %v1861_v8 = vadd.f32 %v6941_v52, %v9276_v33  ;;  %7147 = vmatprep.mubr.msk.bf16.mxu1 %vm1425_vm10, %v9350_v46  ;;  %v6632_v56 = vrot.slane %v5325_v30, 9  ;;  %v5501_v38 = vrot.slane %v9471_v60, 5  ;;  %v6942_v30 = vpop.f32.mrf.mxu1  ;;  %v4552_v28 = vld [vmem:[#allocation2 + $0x12c] sm:$0x1] }
 0x1aa   : > { %v10397_v43 = vcombine.low %v9344_v22, %v9348_v53  ;;  %v9529_v51 = vcombine.low %v4906_v62, %v4920_v21  ;;  %v4942_v35 = vor.u32 %v4941_v19, %v4938_v3  ;;  %v6633_v33 = vrot.slane %v5326_v4, 9  ;;  %v2357_v22 = vpop.f32.mrf.mxu0  ;;  %v5327_v3 = vld [vmem:[#allocation2 + $0x120] sm:$0xe] }
 0x1ab   : > { %v5505_v23 = vrot.slane %v4548_v15, 5  ;;  %v9531_v14 = vadd.f32 %v6975_v57, %v1861_v8  ;;  %v1853_v46 = vadd.f32 %v1852_v45, %v9285_v2  ;;  %v10398_v60 = vcombine.low %v9379_v27, %v9383_v44  ;;  %v1855_v4 = vpop.f32.mrf.mxu1  ;;  %v5328_v8 = vld [vmem:[#allocation2 + $0x128] sm:$0xe]  ;;  %v10399_v45 = vld [vmem:[#allocation21_spill] sm:$0xff] }
 0x1ac   : > { %7182 = vmatmul.mubr.msk.bf16.gmra.mxu0 %vm1425_vm10, %v10397_v43  ;;  %v4950_v48 = vshrl.u32 %v4549_v20, 16  ;;  %v4953_v29 = vshll.u32 %v4549_v20, 16  ;;  %v4934_v53 = vsel %vm7558_vm9, %v9513_v58, %v9515_v24  ;;  %v9542_v62 = vrot.slane %v4945_v1, 5  ;;  %v6980_v52 = vpop.f32.mrf.mxu0 }
 0x1ad   : > { %7185 = vmatprep.mubr.msk.bf16.mxu0 %vm1425_vm10, %v10398_v60  ;;  %v4959_v57 = vshll.u32 %v9523_v17, 16  ;;  %v4964_v15 = vshrl.u32 %v4551_v16, 16  ;;  %v9545_v2 = vadd.f32 %v2341_v9, %v1853_v46  ;;  %v1864_v27 = vadd.f32 %v6942_v30, %v9303_v37  ;;  %v6945_v46 = vpop.f32.mrf.mxu1 }
 0x1ae   : > { %v9550_v44 = vsel %vm7976_vm13, %v6632_v56, %v5501_v38  ;;  %v4952_v21 = vrot.slane %v4950_v48, 4  ;;  %v9552_v19 = vrot.slane %v4942_v35, 4  ;;  %v9556_v1 = vsel %vm7976_vm13, %v6633_v33, %v5505_v23  ;;  %v2360_v35 = vpop.f32.mrf.mxu0  ;;  %v4553_v23 = vld [vmem:[#allocation2 + $0x130] sm:$0xf] }
 0x1af   : > { %v4955_v20 = vrot.slane %v4953_v29, 5  ;;  %v9558_v9 = vrot.slane %v4959_v57, 5  ;;  %v9560_v37 = vadd.f32 %v6976_v39, %v1864_v27  ;;  %v1856_v56 = vadd.f32 %v1855_v4, %v10399_v45  ;;  %v10400_v57 = vld [vmem:[#allocation3_spill] sm:$0xff]  ;;  %v1868_v27 = vpop.f32.mrf.mxu1 }
 0x1b0   : > { %v4966_v38 = vrot.slane %v4964_v15, 4  ;;  %v4967_v43 = vshll.u32 %v4551_v16, 16  ;;  %7148 = vmatmul.mubr.msk.bf16.gmra.mxu1 %vm1425_vm10, %v9392_v50  ;;  %v4973_v48 = vshll.u32 %v4552_v28, 16  ;;  %v6634_v30 = vrot.slane %v5327_v3, 9  ;;  %v6983_v4 = vpop.f32.mrf.mxu0  ;;  %v10401_v3 = vld [vmem:[#allocation4_spill] sm:$0xff] }
 0x1b1   : > { %v4956_v60 = vor.u32 %v4955_v20, %v4952_v21  ;;  %v5509_v33 = vrot.slane %v9523_v17, 5  ;;  %v9566_v29 = vadd.f32 %v2344_v7, %v1856_v56  ;;  %v1877_v39 = vadd.f32 %v6945_v46, %v10400_v57  ;;  %7151 = vmatprep.mubr.msk.bf16.mxu1 %vm1425_vm10, %v9425_v32  ;;  %v6946_v45 = vpop.f32.mrf.mxu1  ;;  %v10402_v56 = vld [vmem:[#allocation22_spill] sm:$0xff] }
 0x1b2   : > { %v4969_v15 = vrot.slane %v4967_v43, 5  ;;  %v6635_v16 = vrot.slane %v5328_v8, 9  ;;  %v4948_v50 = vsel %vm7558_vm9, %v9552_v19, %v9542_v62  ;;  %v6652_v7 = vcombine.low %v9550_v44, %v9556_v1  ;;  %v2373_v62 = vpop.f32.mrf.mxu0 }
 0x1b3   : > { %v4957_v17 = vrot.slane %v4956_v60, 4  ;;  %v5513_v21 = vrot.slane %v4552_v28, 5  ;;  %v9581_v32 = vadd.f32 %v6979_v12, %v1877_v39  ;;  %v1869_v20 = vadd.f32 %v1868_v27, %v10401_v3  ;;  %v1871_v43 = vpop.f32.mrf.mxu1  ;;  %v5330_v27 = vld [vmem:[#allocation2 + $0x138] sm:$0xe] }
 0x1b4   : > { %7186 = vmatmul.mubr.msk.bf16.gmra.mxu0 %vm1425_vm10, %v6650_v18  ;;  %v4970_v6 = vor.u32 %v4969_v15, %v4966_v38  ;;  %v4555_v18 = vld [vmem:[#allocation2 + $0x138] sm:$0xf]  ;;  %v4978_v8 = vshrl.u32 %v4553_v23, 16  ;;  %v4975_v19 = vrot.slane %v4973_v48, 5  ;;  %v5510_v44 = vsel %vm7976_vm13, %v6634_v30, %v5509_v33  ;;  %v4556_v38 = vld [vmem:[#allocation2 + $0x13c] sm:$0x1]  ;;  %v6984_v46 = vpop.f32.mrf.mxu0 }
 0x1b5   : > { %7189 = vmatprep.mubr.msk.bf16.mxu0 %vm1425_vm10, %v6651_v47  ;;  %v5514_v12 = vsel %vm7976_vm13, %v6635_v16, %v5513_v21  ;;  %v4981_v28 = vshll.u32 %v4553_v23, 16  ;;  %v9592_v1 = vadd.f32 %v2357_v22, %v1869_v20  ;;  %v1880_v42 = vadd.f32 %v6946_v45, %v10402_v56  ;;  %v5329_v33 = vld [vmem:[#allocation2 + $0x130] sm:$0xe] }
 0x1b6   : > { %v4962_v41 = vsel %vm7558_vm9, %v4957_v17, %v9558_v9  ;;  %v4971_v47 = vrot.slane %v4970_v6, 4  ;;  %v4980_v60 = vrot.slane %v4978_v8, 4  ;;  %v4987_v57 = vshll.u32 %v4554_v54, 16  ;;  %v10403_v23 = vld [vmem:[#allocation5_spill] sm:$0xff]  ;;  %v6949_v21 = vpop.f32.mrf.mxu1  ;;  %v2376_v9 = vpop.f32.mrf.mxu0 }
 0x1b7   : > { %v4983_v48 = vrot.slane %v4981_v28, 5  ;;  %v4992_v30 = vshrl.u32 %v4555_v18, 16  ;;  %v9598_v39 = vadd.f32 %v6980_v52, %v1880_v42  ;;  %v1872_v22 = vadd.f32 %v1871_v43, %v10403_v23  ;;  %v10404_v52 = vld [vmem:[#allocation16_spill] sm:$0xff] }
 0x1b8   : > { %v6653_v15 = vcombine.low %v5510_v44, %v5514_v12  ;;  %v4995_v16 = vshll.u32 %v4555_v18, 16  ;;  %7152 = vmatmul.mubr.msk.bf16.gmra.mxu1 %vm1425_vm10, %v9498_v0  ;;  %v4976_v17 = vsel %vm7558_vm9, %v4971_v47, %v4975_v19  ;;  %v5001_v6 = vshll.u32 %v4556_v38, 16  ;;  %v1884_v12 = vpop.f32.mrf.mxu1  ;;  %v6987_v28 = vpop.f32.mrf.mxu0  ;;  %v10405_v47 = vld [vmem:[#allocation20_spill] sm:$0xff] }
 0x1b9   : > { %v4984_v3 = vor.u32 %v4983_v48, %v4980_v60  ;;  %v4994_v20 = vrot.slane %v4992_v30, 4  ;;  %v9605_v8 = vadd.f32 %v2360_v35, %v1872_v22  ;;  %v1893_v45 = vadd.f32 %v6949_v21, %v10404_v52  ;;  %7155 = vmatprep.mubr.msk.bf16.mxu1 %vm1425_vm10, %v9529_v51 }
 0x1ba   : > { %v4997_v18 = vrot.slane %v4995_v16, 5  ;;  %v6636_v44 = vrot.slane %v5329_v33, 9  ;;  %v6587_v0 = vcombine.low %v4934_v53, %v4948_v50  ;;  %v4989_v19 = vrot.slane %v4987_v57, 5  ;;  %v6950_v48 = vpop.f32.mrf.mxu1  ;;  %v2389_v30 = vpop.f32.mrf.mxu0  ;;  %v10406_v53 = vld [vmem:[#allocation17_spill] sm:$0xff]  ;;  %v10407_v16 = vld [vmem:[#allocation8_spill] sm:$0xff] }
 0x1bb   : > { %v5517_v35 = vrot.slane %v4554_v54, 5  ;;  %v6637_v56 = vrot.slane %v5330_v27, 9  ;;  %v9616_v42 = vadd.f32 %v6983_v4, %v1893_v45  ;;  %v1885_v43 = vadd.f32 %v1884_v12, %v10405_v47  ;;  %v10409_v45 = vld [vmem:[#allocation9_spill] sm:$0xff] }
 0x1bc   : > { %7190 = vmatmul.mubr.msk.bf16.gmra.mxu0 %vm1425_vm10, %v6652_v7  ;;  %v4998_v51 = vor.u32 %v4997_v18, %v4994_v20  ;;  %v5521_v60 = vrot.slane %v4556_v38, 5  ;;  %v6588_v33 = vcombine.low %v4962_v41, %v4976_v17  ;;  %v4985_v23 = vrot.slane %v4984_v3, 4  ;;  %v1887_v54 = vpop.f32.mrf.mxu1  ;;  %v6988_v57 = vpop.f32.mrf.mxu0 }
 0x1bd   : > { %7193 = vmatprep.mubr.msk.bf16.mxu0 %vm1425_vm10, %v6653_v15  ;;  %v5003_v22 = vrot.slane %v5001_v6, 5  ;;  %v5518_v58 = vsel %vm7976_vm13, %v6636_v44, %v5517_v35  ;;  %v9622_v24 = vadd.f32 %v2373_v62, %v1885_v43  ;;  %v1896_v50 = vadd.f32 %v6950_v48, %v10406_v53  ;;  %v10408_v62 = vld [vmem:[#allocation12_spill] sm:$0xff]  ;;  %v10410_v35 = vld [vmem:[#allocation10_spill] sm:$0xff] }
 0x1be   : > { %v4999_v4 = vrot.slane %v4998_v51, 4  ;;  %v5522_v7 = vsel %vm7976_vm13, %v6637_v56, %v5521_v60  ;;  %v1888_v41 = vadd.f32 %v1887_v54, %v10407_v16  ;;  %v2392_v21 = vpop.f32.mrf.mxu0  ;;  %v4990_v49 = vsel %vm7558_vm9, %v4985_v23, %v4989_v19  ;;  %v10413_v54 = vld [vmem:[#allocation14_spill] sm:$0xff] }
 0x1bf   : > { %v6654_v15 = vcombine.low %v5518_v58, %v5522_v7  ;;  %v9627_v38 = vadd.f32 %v6984_v46, %v1896_v50  ;;  %v6953_v27 = vpop.f32.mrf.mxu1 }
 0x1c0   : > { %7156 = vmatmul.mubr.msk.bf16.gmra.mxu1 %vm1425_vm10, %v6587_v0  ;;  %v9631_v17 = vadd.f32 %v2376_v9, %v1888_v41  ;;  %v1909_v3 = vadd.f32 %v6953_v27, %v10408_v62  ;;  %v5004_v20 = vsel %vm7558_vm9, %v4999_v4, %v5003_v22  ;;  %v10414_v27 = vld [vmem:[#allocation24_spill] sm:$0xff] }
 0x1c1   : > { %7159 = vmatprep.mubr.msk.bf16.mxu1 %vm1425_vm10, %v6588_v33  ;;  %v1900_v46 = vpop.f32.mrf.mxu1  ;;  %v6991_v6 = vpop.f32.mrf.mxu0  ;;  %v6589_v44 = vcombine.low %v4990_v49, %v5004_v20  ;;  %v10412_v33 = vld [vmem:[#allocation13_spill] sm:$0xff] }
 0x1c2   : > { %v9640_v52 = vadd.f32 %v6987_v28, %v1909_v3  ;;  %v1901_v18 = vadd.f32 %v1900_v46, %v10409_v45 }
 0x1c3   : > { %v6954_v9 = vpop.f32.mrf.mxu1  ;;  %v2405_v12 = vpop.f32.mrf.mxu0 }
 0x1c4   : > { %7194 = vmatmul.mubr.msk.bf16.gmra.mxu0 %vm1425_vm10, %v6654_v15  ;;  %v9643_v0 = vadd.f32 %v2389_v30, %v1901_v18  ;;  %v1912_v56 = vadd.f32 %v6954_v9, %v10410_v35 }
 0x1c5   : > { %v1903_v47 = vpop.f32.mrf.mxu1  ;;  %v6992_v19 = vpop.f32.mrf.mxu0 }
 0x1c6   : > { %v9646_v43 = vadd.f32 %v6988_v57, %v1912_v56  ;;  %v1904_v51 = vadd.f32 %v1903_v47, %v10411_v55 }
 0x1c7   : > { %v6957_v60 = vpop.f32.mrf.mxu1  ;;  %v2408_v28 = vpop.f32.mrf.mxu0 }
 0x1c8   : > { %7160 = vmatmul.mubr.msk.bf16.gmra.mxu1 %vm1425_vm10, %v6589_v44  ;;  %v9650_v48 = vadd.f32 %v2392_v21, %v1904_v51  ;;  %v1925_v23 = vadd.f32 %v6957_v60, %v10412_v33 }
 0x1c9   : > { %v1916_v22 = vpop.f32.mrf.mxu1  ;;  %v7031_v58 = vpop.f32.mrf.mxu0 }
 0x1ca   : > { %v9653_v30 = vadd.f32 %v6991_v6, %v1925_v23  ;;  %v1917_v53 = vadd.f32 %v1916_v22, %v9327_v63 }
 0x1cb   : > { %v6958_v50 = vpop.f32.mrf.mxu1  ;;  %v3457_v4 = vpop.f32.mrf.mxu0 }
 0x1cc   : > { %v9656_v7 = vadd.f32 %v2405_v12, %v1917_v53  ;;  %v1928_v57 = vadd.f32 %v6958_v50, %v10413_v54 }
 0x1cd   : > { %v1919_v15 = vpop.f32.mrf.mxu1  ;;  %v7032_v16 = vpop.f32.mrf.mxu0 }
 0x1ce   : > { %v9659_v41 = vadd.f32 %v6992_v19, %v1928_v57  ;;  %v1920_v21 = vadd.f32 %v1919_v15, %v10414_v27 }
 0x1cf   : > { %v6997_v62 = vpop.f32.mrf.mxu1  ;;  %v3460_v3 = vpop.f32.mrf.mxu0 }
 0x1d0   : > { %v9662_v49 = vadd.f32 %v2408_v28, %v1920_v21  ;;  %v2780_v20 = vadd.f32 %v6997_v62, %v9385_v25 }
 0x1d1   : > { %v2651_v46 = vpop.f32.mrf.mxu1  ;;  %v7035_v63 = vpop.f32.mrf.mxu0 }
 0x1d2   : > { %v9665_v6 = vadd.f32 %v7031_v58, %v2780_v20  ;;  %v2778_v45 = vadd.f32 %v2651_v46, %v9395_v11 }
 0x1d3   : > { %v6998_v18 = vpop.f32.mrf.mxu1  ;;  %v3473_v9 = vpop.f32.mrf.mxu0 }
 0x1d4   : > { %v9668_v44 = vadd.f32 %v3457_v4, %v2778_v45  ;;  %v2781_v12 = vadd.f32 %v6998_v18, %v9406_v40 }
 0x1d5   : > { %v2654_v35 = vpop.f32.mrf.mxu1  ;;  %v7036_v56 = vpop.f32.mrf.mxu0 }
 0x1d6   : > { %v9671_v47 = vadd.f32 %v7032_v16, %v2781_v12  ;;  %v2779_v19 = vadd.f32 %v2654_v35, %v9416_v59 }
 0x1d7   : > { %v7001_v55 = vpop.f32.mrf.mxu1  ;;  %v3476_v25 = vpop.f32.mrf.mxu0 }
 0x1d8   : > { %v9674_v51 = vadd.f32 %v3460_v3, %v2779_v19  ;;  %v2784_v60 = vadd.f32 %v7001_v55, %v9431_v13 }
 0x1d9   : > { %v2667_v28 = vpop.f32.mrf.mxu1  ;;  %v7039_v11 = vpop.f32.mrf.mxu0 }
 0x1da   : > { %v9677_v33 = vadd.f32 %v7035_v63, %v2784_v60  ;;  %v2782_v23 = vadd.f32 %v2667_v28, %v9446_v10 }
 0x1db   : > { %v7002_v22 = vpop.f32.mrf.mxu1  ;;  %v3489_v40 = vpop.f32.mrf.mxu0 }
 0x1dc   : > { %v9680_v58 = vadd.f32 %v3473_v9, %v2782_v23  ;;  %v2785_v53 = vadd.f32 %v7002_v22, %v9457_v61 }
 0x1dd   : > { %v2670_v50 = vpop.f32.mrf.mxu1  ;;  %v7040_v59 = vpop.f32.mrf.mxu0 }
 0x1de   : > { %v9683_v4 = vadd.f32 %v7036_v56, %v2785_v53  ;;  %v2783_v54 = vadd.f32 %v2670_v50, %v9466_v34 }
 0x1df   : > { %v7005_v57 = vpop.f32.mrf.mxu1  ;;  %v3492_v13 = vpop.f32.mrf.mxu0 }
 0x1e0   : > { %v9686_v15 = vadd.f32 %v3476_v25, %v2783_v54  ;;  %v2788_v16 = vadd.f32 %v7005_v57, %v9481_v26 }
 0x1e1   : > { %v2683_v27 = vpop.f32.mrf.mxu1  ;;  %v7043_v10 = vpop.f32.mrf.mxu0 }
 0x1e2   : > { %v9689_v21 = vadd.f32 %v7039_v11, %v2788_v16  ;;  %v2786_v62 = vadd.f32 %v2683_v27, %v9495_v5 }
 0x1e3   : > { %v7006_v3 = vpop.f32.mrf.mxu1  ;;  %v3505_v61 = vpop.f32.mrf.mxu0 }
 0x1e4   : > { %v9692_v20 = vadd.f32 %v3489_v40, %v2786_v62  ;;  %v2789_v46 = vadd.f32 %v7006_v3, %v9506_v36 }
 0x1e5   : > { %v2686_v63 = vpop.f32.mrf.mxu1  ;;  %v7044_v34 = vpop.f32.mrf.mxu0 }
 0x1e6   : > { %v9695_v45 = vadd.f32 %v7040_v59, %v2789_v46  ;;  %v2787_v18 = vadd.f32 %v2686_v63, %v9517_v31 }
 0x1e7   : > { %v7009_v9 = vpop.f32.mrf.mxu1  ;;  %v3508_v26 = vpop.f32.mrf.mxu0 }
 0x1e8   : > { %v9698_v12 = vadd.f32 %v3492_v13, %v2787_v18  ;;  %v2792_v35 = vadd.f32 %v7009_v9, %v9531_v14 }
 0x1e9   : > { %v2699_v56 = vpop.f32.mrf.mxu1  ;;  %v7047_v5 = vpop.f32.mrf.mxu0 }
 0x1ea   : > { %v9701_v19 = vadd.f32 %v7043_v10, %v2792_v35  ;;  %v2790_v55 = vadd.f32 %v2699_v56, %v9545_v2 }
 0x1eb   : > { %v7010_v25 = vpop.f32.mrf.mxu1  ;;  %v3521_v36 = vpop.f32.mrf.mxu0 }
 0x1ec   : > { %v9704_v60 = vadd.f32 %v3505_v61, %v2790_v55  ;;  %v2793_v28 = vadd.f32 %v7010_v25, %v9560_v37 }
 0x1ed   : > { %v2702_v11 = vpop.f32.mrf.mxu1  ;;  %v7048_v31 = vpop.f32.mrf.mxu0 }
 0x1ee   : > { %v9707_v23 = vadd.f32 %v7044_v34, %v2793_v28  ;;  %v2791_v22 = vadd.f32 %v2702_v11, %v9566_v29 }
 0x1ef   : > { %v7013_v40 = vpop.f32.mrf.mxu1  ;;  %v3524_v14 = vpop.f32.mrf.mxu0 }
 0x1f0   : > { %v9710_v53 = vadd.f32 %v3508_v26, %v2791_v22  ;;  %v2796_v50 = vadd.f32 %v7013_v40, %v9581_v32 }
 0x1f1   : > { %v2715_v59 = vpop.f32.mrf.mxu1  ;;  %v7051_v2 = vpop.f32.mrf.mxu0 }
 0x1f2   : > { %v9713_v54 = vadd.f32 %v7047_v5, %v2796_v50  ;;  %v2794_v57 = vadd.f32 %v2715_v59, %v9592_v1 }
 0x1f3   : > { %v7014_v13 = vpop.f32.mrf.mxu1  ;;  %v3537_v37 = vpop.f32.mrf.mxu0 }
 0x1f4   : > { %v9716_v16 = vadd.f32 %v3521_v36, %v2794_v57  ;;  %v2797_v27 = vadd.f32 %v7014_v13, %v9598_v39 }
 0x1f5   : > { %v2718_v10 = vpop.f32.mrf.mxu1  ;;  %v7052_v29 = vpop.f32.mrf.mxu0 }
 0x1f6   : > { %v9719_v62 = vadd.f32 %v7048_v31, %v2797_v27  ;;  %v2795_v3 = vadd.f32 %v2718_v10, %v9605_v8 }
 0x1f7   : > { %v7017_v61 = vpop.f32.mrf.mxu1  ;;  %v3540_v32 = vpop.f32.mrf.mxu0 }
 0x1f8   : > { %v9722_v46 = vadd.f32 %v3524_v14, %v2795_v3  ;;  %v2800_v63 = vadd.f32 %v7017_v61, %v9616_v42 }
 0x1f9   : > { %v2731_v34 = vpop.f32.mrf.mxu1  ;;  %v7055_v1 = vpop.f32.mrf.mxu0 }
 0x1fa   : > { %10415 = vst [vmem:[#allocation23_spill] sm:$0xff] %v9722_v46  ;;  %v9725_v18 = vadd.f32 %v7051_v2, %v2800_v63  ;;  %v2798_v9 = vadd.f32 %v2731_v34, %v9622_v24 }
 0x1fb   : > { %v7018_v26 = vpop.f32.mrf.mxu1  ;;  %v3553_v39 = vpop.f32.mrf.mxu0 }
 0x1fc   : > { %10416 = vst [vmem:[#allocation7_spill] sm:$0xff] %v9725_v18  ;;  %v9728_v35 = vadd.f32 %v3537_v37, %v2798_v9  ;;  %v2801_v56 = vadd.f32 %v7018_v26, %v9627_v38 }
 0x1fd   : > { %v2734_v5 = vpop.f32.mrf.mxu1  ;;  %v7056_v8 = vpop.f32.mrf.mxu0 }
 0x1fe   : > { %10417 = vst [vmem:[#allocation6_spill] sm:$0xff] %v9728_v35  ;;  %v9731_v55 = vadd.f32 %v7052_v29, %v2801_v56  ;;  %v2799_v25 = vadd.f32 %v2734_v5, %v9631_v17 }
 0x1ff   : > { %v7021_v36 = vpop.f32.mrf.mxu1  ;;  %v3556_v42 = vpop.f32.mrf.mxu0 }
 0x200   : > { %10418 = vst [vmem:[#allocation18_spill] sm:$0xff] %v9731_v55  ;;  %v9734_v28 = vadd.f32 %v3540_v32, %v2799_v25  ;;  %v2804_v11 = vadd.f32 %v7021_v36, %v9640_v52 }
 0x201   : > { %v2747_v31 = vpop.f32.mrf.mxu1  ;;  %v7059_v24 = vpop.f32.mrf.mxu0 }
 0x202   : > { %10419 = vst [vmem:[#allocation15_spill] sm:$0xff] %v9734_v28  ;;  %v9737_v22 = vadd.f32 %v7055_v1, %v2804_v11  ;;  %v2802_v40 = vadd.f32 %v2747_v31, %v9643_v0 }
 0x203   : > { %v7022_v14 = vpop.f32.mrf.mxu1  ;;  %v3569_v38 = vpop.f32.mrf.mxu0 }
 0x204   : > { %10420 = vst [vmem:[#allocation11_spill] sm:$0xff] %v9737_v22  ;;  %v9740_v50 = vadd.f32 %v3553_v39, %v2802_v40  ;;  %v2805_v59 = vadd.f32 %v7022_v14, %v9646_v43 }
 0x205   : > { %v2750_v2 = vpop.f32.mrf.mxu1  ;;  %v7060_v17 = vpop.f32.mrf.mxu0 }
 0x206   : > { %10421 = vst [vmem:[#allocation21_spill] sm:$0xff] %v9740_v50  ;;  %v9743_v57 = vadd.f32 %v7056_v8, %v2805_v59  ;;  %v2803_v13 = vadd.f32 %v2750_v2, %v9650_v48 }
 0x207   : > { %v7025_v37 = vpop.f32.mrf.mxu1  ;;  %v3572_v52 = vpop.f32.mrf.mxu0 }
 0x208   : > { %10422 = vst [vmem:[#allocation3_spill] sm:$0xff] %v9743_v57  ;;  %v9746_v27 = vadd.f32 %v3556_v42, %v2803_v13  ;;  %v2808_v10 = vadd.f32 %v7025_v37, %v9653_v30 }
 0x209   : > { %v2763_v29 = vpop.f32.mrf.mxu1  ;;  %v9749_v0 = vpop.f32.mrf.mxu0 }
 0x20a   : > { %10423 = vst [vmem:[#allocation4_spill] sm:$0xff] %v9746_v27  ;;  %v9751_v3 = vadd.f32 %v7059_v24, %v2808_v10  ;;  %v2806_v61 = vadd.f32 %v2763_v29, %v9656_v7 }
 0x20b   : > { %v7026_v43 = vpop.f32.mrf.mxu1  ;;  %v9754_v32 = vpop.f32.mrf.mxu0 }
 0x20c   : > { %10424 = vst [vmem:[#allocation22_spill] sm:$0xff] %v9751_v3  ;;  %v9756_v63 = vadd.f32 %v3569_v38, %v2806_v61  ;;  %v2809_v48 = vadd.f32 %v7026_v43, %v9659_v41 }
 0x20d   : > { %v2766_v34 = vpop.f32.mrf.mxu1  ;;  %v9759_v1 = vpop.f32.mrf.mxu0 }
 0x20e   : > { %10425 = vst [vmem:[#allocation5_spill] sm:$0xff] %v9756_v63  ;;  %v9761_v9 = vadd.f32 %v7060_v17, %v2809_v48  ;;  %v2807_v30 = vadd.f32 %v2766_v34, %v9662_v49 }
 0x20f   : > { %v7065_v26 = vpop.f32.mrf.mxu1  ;;  %v9764_v39 = vpop.f32.mrf.mxu0 }
 0x210   : > { %10426 = vst [vmem:[#allocation16_spill] sm:$0xff] %v9761_v9  ;;  %v9766_v56 = vadd.f32 %v3572_v52, %v2807_v30 }
 0x211   : > { %v3975_v7 = vpop.f32.mrf.mxu1  ;;  %v9768_v5 = vpop.f32.mrf.mxu0 }
 0x212   : > { %10427 = vst [vmem:[#allocation20_spill] sm:$0xff] %v9766_v56 }
 0x213   : > { %v7066_v8 = vpop.f32.mrf.mxu1  ;;  %v9770_v25 = vpop.f32.mrf.mxu0 }
 0x215   : > { %v3978_v36 = vpop.f32.mrf.mxu1  ;;  %v9772_v41 = vpop.f32.mrf.mxu0 }
 0x217   : > { %v7069_v42 = vpop.f32.mrf.mxu1  ;;  %v9774_v11 = vpop.f32.mrf.mxu0 }
 0x219   : > { %v3991_v31 = vpop.f32.mrf.mxu1  ;;  %v9776_v24 = vpop.f32.mrf.mxu0 }
 0x21b   : > { %v7070_v49 = vpop.f32.mrf.mxu1  ;;  %v9778_v40 = vpop.f32.mrf.mxu0 }
 0x21d   : > { %v3994_v14 = vpop.f32.mrf.mxu1  ;;  %v9780_v38 = vpop.f32.mrf.mxu0 }
 0x21f   : > { %v7073_v59 = vpop.f32.mrf.mxu1  ;;  %v9782_v2 = vpop.f32.mrf.mxu0 }
 0x221   : > { %v4007_v17 = vpop.f32.mrf.mxu1  ;;  %v9784_v13 = vpop.f32.mrf.mxu0 }
 0x223   : > { %v7074_v37 = vpop.f32.mrf.mxu1  ;;  %v9786_v52 = vpop.f32.mrf.mxu0 }
 0x225   : > { %v4010_v10 = vpop.f32.mrf.mxu1  ;;  %v9788_v29 = vpop.f32.mrf.mxu0 }
 0x227   : > { %v7077_v61 = vpop.f32.mrf.mxu1  ;;  %v9790_v43 = vpop.f32.mrf.mxu0 }
 0x228   : > { %10428 = vst [vmem:[#allocation17_spill] sm:$0xff] %v9790_v43 }
 0x229   : > { %v4023_v48 = vpop.f32.mrf.mxu1  ;;  %v9792_v34 = vpop.f32.mrf.mxu0 }
 0x22a   : > { %10429 = vst [vmem:[#allocation8_spill] sm:$0xff] %v9792_v34 }
 0x22b   : > { %v7078_v30 = vpop.f32.mrf.mxu1  ;;  %v9794_v56 = vpop.f32.mrf.mxu0 }
 0x22c   : > { %10430 = vst [vmem:[#allocation12_spill] sm:$0xff] %v9794_v56 }
 0x22d   : > { %v4026_v9 = vpop.f32.mrf.mxu1  ;;  %v9796_v63 = vpop.f32.mrf.mxu0 }
 0x22e   : > { %10431 = vst [vmem:[#allocation9_spill] sm:$0xff] %v9796_v63 }
 0x22f   : > { %v7081_v3 = vpop.f32.mrf.mxu1  ;;  %v9798_v27 = vpop.f32.mrf.mxu0 }
 0x230   : > { %10432 = vst [vmem:[#allocation10_spill] sm:$0xff] %v9798_v27 }
 0x231   : > { %v9800_v57 = vpop.f32.mrf.mxu1  ;;  %v9802_v50 = vpop.f32.mrf.mxu0 }
 0x232   : > { %10433 = vst [vmem:[#allocation19_spill] sm:$0xff] %v9802_v50 }
 0x233   : > { %v7082_v22 = vpop.f32.mrf.mxu1  ;;  %v9804_v28 = vpop.f32.mrf.mxu0 }
 0x234   : > { %10434 = vst [vmem:[#allocation13_spill] sm:$0xff] %v9804_v28 }
 0x235   : > { %v9806_v55 = vpop.f32.mrf.mxu1  ;;  %v9808_v35 = vpop.f32.mrf.mxu0 }
 0x236   : > { %10435 = vst [vmem:[#allocation14_spill] sm:$0xff] %v9806_v55  ;;  %10436 = vst [vmem:[#allocation24_spill] sm:$0xff] %v9808_v35 }
 0x237   : > { %v9812_v56 = vpop.f32.mrf.mxu0 }
 0x238   : > { %v9810_v18 = vpop.f32.mrf.mxu1  ;;  %10438 = vst [vmem:[#allocation26_spill] sm:$0xff] %v9812_v56 }
 0x239   : > { %10437 = vst [vmem:[#allocation25_spill] sm:$0xff] %v9810_v18  ;;  %v9816_v46 = vpop.f32.mrf.mxu0 }
 0x23a   : > { %v9814_v63 = vpop.f32.mrf.mxu1  ;;  %10440 = vst [vmem:[#allocation28_spill] sm:$0xff] %v9816_v46  ;;  %v4104_v46 = vadd.f32 %v7065_v26, %v9665_v6  ;;  %v4108_v26 = vadd.f32 %v7069_v42, %v9677_v33 }
 0x23b   : > { %10439 = vst [vmem:[#allocation27_spill] sm:$0xff] %v9814_v63  ;;  %v9820_v34 = vpop.f32.mrf.mxu0 }
 0x23c   : > { %v9818_v27 = vpop.f32.mrf.mxu1  ;;  %10442 = vst [vmem:[#allocation30_spill] sm:$0xff] %v9820_v34  ;;  %v4463_v6 = vadd.f32 %v9749_v0, %v4104_v46 }
 0x23d   : > { %10441 = vst [vmem:[#allocation29_spill] sm:$0xff] %v9818_v27  ;;  %v9824_v28 = vpop.f32.mrf.mxu0 }
 0x23e   : > { %v9822_v50 = vpop.f32.mrf.mxu1  ;;  %10443 = vst [vmem:[#allocation31_spill] sm:$0xff] %v9824_v28  ;;  %v4102_v28 = vadd.f32 %v3975_v7, %v9668_v44  ;;  %v4109_v44 = vadd.f32 %v7070_v49, %v9683_v4  ;;  %v4116_v4 = vadd.f32 %v7077_v61, %v9701_v19  ;;  %v10452_v49 = vld [vmem:[#allocation8_spill] sm:$0xff]  ;;  %v10461_v61 = vld [vmem:[#allocation15_spill] sm:$0xff] }
 0x23f   : > { %v9828_v35 = vpop.f32.mrf.mxu0 }
 0x240   : > { %v9826_v55 = vpop.f32.mrf.mxu1  ;;  %10445 = vst [vmem:[#allocation33_spill] sm:$0xff] %v9828_v35  ;;  %v4461_v46 = vadd.f32 %v9754_v32, %v4102_v28  ;;  %v9886_v19 = vadd.f32 %v9772_v41, %v4109_v44  ;;  %v10463_v44 = vld [vmem:[#allocation9_spill] sm:$0xff] }
 0x241   : > { %10444 = vst [vmem:[#allocation32_spill] sm:$0xff] %v9826_v55  ;;  %v9832_v56 = vpop.f32.mrf.mxu0  ;;  %v4105_v55 = vadd.f32 %v7066_v8, %v9671_v47  ;;  %v4107_v8 = vadd.f32 %v3994_v14, %v9686_v15  ;;  %v4114_v15 = vadd.f32 %v4023_v48, %v9704_v60  ;;  %v10453_v14 = vld [vmem:[#allocation23_spill] sm:$0xff]  ;;  %v4123_v48 = vadd.f32 %v9822_v50, %v10461_v61 }
 0x242   : > { %v9830_v18 = vpop.f32.mrf.mxu1  ;;  %10447 = vst [vmem:[#allocation35_spill] sm:$0xff] %v9832_v56  ;;  %v4103_v56 = vadd.f32 %v3978_v36, %v9674_v51  ;;  %v4112_v51 = vadd.f32 %v7073_v59, %v9689_v21  ;;  %v4110_v36 = vadd.f32 %v4007_v17, %v9692_v20  ;;  %v4117_v21 = vadd.f32 %v7078_v30, %v9707_v23  ;;  %v10457_v59 = vld [vmem:[#allocation6_spill] sm:$0xff] }
 0x243   : > { %10446 = vst [vmem:[#allocation34_spill] sm:$0xff] %v9830_v18  ;;  %v9836_v63 = vpop.f32.mrf.mxu0  ;;  %v4464_v33 = vadd.f32 %v9759_v1, %v4105_v55  ;;  %v4115_v20 = vadd.f32 %v4026_v9, %v9710_v53  ;;  %v4120_v55 = vadd.f32 %v7081_v3, %v9713_v54  ;;  %v9892_v23 = vadd.f32 %v9774_v11, %v4107_v8 }
 0x244   : > { %v9834_v43 = vpop.f32.mrf.mxu1  ;;  %v9895_v53 = vadd.f32 %v9776_v24, %v4112_v51  ;;  %v9898_v32 = vadd.f32 %v9778_v40, %v4110_v36  ;;  %v9907_v54 = vadd.f32 %v9784_v13, %v4116_v4  ;;  %v4118_v3 = vadd.f32 %v9800_v57, %v9716_v16  ;;  %v10454_v16 = vld [vmem:[#allocation14_spill] sm:$0xff]  ;;  %v10464_v51 = vld [vmem:[#allocation11_spill] sm:$0xff]  ;;  %v10466_v4 = vld [vmem:[#allocation21_spill] sm:$0xff] }
 0x245   : > { %v9841_v34 = vpop.f32.mrf.mxu0  ;;  %v9916_v41 = vadd.f32 %v9788_v29, %v4117_v21  ;;  %v9923_v40 = vadd.f32 %v10452_v49, %v4120_v55  ;;  %v4119_v57 = vadd.f32 %v10454_v16, %v10453_v14  ;;  %v10469_v55 = vld [vmem:[#allocation4_spill] sm:$0xff]  ;;  %v10471_v49 = vld [vmem:[#allocation19_spill] sm:$0xff]  ;;  %v10472_v16 = vld [vmem:[#allocation22_spill] sm:$0xff] }
 0x246   : > { %v9839_v27 = vpop.f32.mrf.mxu1  ;;  %10448 = vst [vmem:[#allocation36_spill] sm:$0xff] %v9841_v34  ;;  %v4106_v34 = vadd.f32 %v3991_v31, %v9680_v58  ;;  %v4111_v58 = vadd.f32 %v4010_v10, %v9698_v12  ;;  %v4462_v31 = vadd.f32 %v9764_v39, %v4103_v56  ;;  %v4121_v39 = vadd.f32 %v7082_v22, %v9719_v62  ;;  %v10455_v62 = vld [vmem:[#allocation7_spill] sm:$0xff]  ;;  %v10456_v22 = vld [vmem:[#allocation25_spill] sm:$0xff] }
 0x247   : > { %v9848_v18 = vpop.f32.mrf.mxu0  ;;  %v10460_v10 = vld [vmem:[#allocation29_spill] sm:$0xff] }
 0x248   : > { %v9846_v35 = vpop.f32.mrf.mxu1  ;;  %10449 = vst [vmem:[#allocation37_spill] sm:$0xff] %v9848_v18  ;;  %v4113_v18 = vadd.f32 %v7074_v37, %v9695_v45  ;;  %v9880_v45 = vadd.f32 %v9768_v5, %v4108_v26  ;;  %v9883_v12 = vadd.f32 %v9770_v25, %v4106_v34  ;;  %v9904_v9 = vadd.f32 %v9782_v2, %v4111_v58  ;;  %v10458_v2 = vld [vmem:[#allocation27_spill] sm:$0xff]  ;;  %v10465_v36 = vld [vmem:[#allocation32_spill] sm:$0xff] }
 0x249   : > { %v9913_v25 = vadd.f32 %v9786_v52, %v4114_v15  ;;  %v4122_v17 = vadd.f32 %v10458_v2, %v10457_v59  ;;  %v10459_v52 = vld [vmem:[#allocation18_spill] sm:$0xff]  ;;  %v9939_v8 = vadd.f32 %v10463_v44, %v4121_v39  ;;  %v4128_v58 = vadd.f32 %v10465_v36, %v10464_v51  ;;  %v10478_v51 = vld [vmem:[#allocation31_spill] sm:$0xff] }
 0x24a   : > { %v9859_v7 = vpop.f32.mrf.mxu1  ;;  %v7167_v47 = vpop.f32.mrf.mxu0  ;;  %v9901_v1 = vadd.f32 %v9780_v38, %v4113_v18  ;;  %v10451_v18 = vld [vmem:[#allocation17_spill] sm:$0xff]  ;;  %v4124_v38 = vadd.f32 %v10456_v22, %v10455_v62  ;;  %v4125_v29 = vadd.f32 %v10460_v10, %v10459_v52  ;;  %v10467_v15 = vld [vmem:[#allocation34_spill] sm:$0xff]  ;;  %v4132_v62 = vadd.f32 %v9846_v35, %v10472_v16  ;;  %v10474_v52 = vld [vmem:[#allocation24_spill] sm:$0xff] }
 0x24b   : > { %v9919_v11 = vadd.f32 %v10451_v18, %v4115_v20  ;;  %v4126_v21 = vadd.f32 %v10467_v15, %v10466_v4  ;;  %v10470_v18 = vld [vmem:[#allocation10_spill] sm:$0xff]  ;;  %v10480_v15 = vld [vmem:[#allocation35_spill] sm:$0xff] }
 0x24c   : > { %v9869_v0 = vpop.f32.mrf.mxu1  ;;  %v5658_v42 = vpop.f32.mrf.mxu0  ;;  %v9958_v14 = vadd.f32 %v10471_v49, %v4124_v38  ;;  %v10476_v38 = vld [vmem:[#allocation28_spill] sm:$0xff]  ;;  %v10477_v35 = vld [vmem:[#allocation30_spill] sm:$0xff] }
 0x24d   : > { %v9974_v61 = vadd.f32 %v10476_v38, %v4128_v58 }
 0x24e   : > { %v9889_v28 = vpop.f32.mrf.mxu1  ;;  %v7168_v60 = vpop.f32.mrf.mxu0 }
 0x250   : > { %v7133_v56 = vpop.f32.mrf.mxu1  ;;  %v5661_v5 = vpop.f32.mrf.mxu0 }
 0x251   : > { %v5269_v24 = vadd.f32 %v7133_v56, %v4463_v6  ;;  %v10462_v6 = vld [vmem:[#allocation12_spill] sm:$0xff] }
 0x252   : > { %v5140_v13 = vpop.f32.mrf.mxu1  ;;  %v7171_v37 = vpop.f32.mrf.mxu0  ;;  %v9936_v26 = vadd.f32 %v10462_v6, %v4118_v3  ;;  %v4127_v3 = vadd.f32 %v9839_v27, %v10469_v55  ;;  %v9966_v27 = vadd.f32 %v10474_v52, %v4125_v29  ;;  %v10479_v29 = vld [vmem:[#allocation33_spill] sm:$0xff] }
 0x253   : > { %v5787_v34 = vadd.f32 %v7167_v47, %v5269_v24  ;;  %v5267_v30 = vadd.f32 %v5140_v13, %v4461_v46  ;;  %v10468_v46 = vld [vmem:[#allocation3_spill] sm:$0xff]  ;;  %v9955_v24 = vadd.f32 %v10470_v18, %v4119_v57  ;;  %v10473_v13 = vld [vmem:[#allocation13_spill] sm:$0xff] }
 0x254   : > { %v7134_v50 = vpop.f32.mrf.mxu1  ;;  %v5674_v47 = vpop.f32.mrf.mxu0  ;;  %v4129_v20 = vadd.f32 %v9834_v43, %v10468_v46  ;;  %v9963_v43 = vadd.f32 %v10473_v13, %v4122_v17 }
 0x255   : > { %v6708_v39 = vpack.c.bf16 %v5787_v34, %v5787_v34  ;;  %v5785_v56 = vadd.f32 %v5658_v42, %v5267_v30  ;;  %v5270_v22 = vadd.f32 %v7134_v50, %v4464_v33  ;;  %v10475_v42 = vld [vmem:[#allocation26_spill] sm:$0xff]  ;;  %v9977_v33 = vadd.f32 %v10477_v35, %v4126_v21  ;;  %v10481_v21 = vld [vmem:[#allocation5_spill] sm:$0xff] }
 0x256   : > { %v5143_v59 = vpop.f32.mrf.mxu1  ;;  %v7172_v2 = vpop.f32.mrf.mxu0  ;;  %v9969_v10 = vadd.f32 %v10475_v42, %v4123_v48  ;;  %v9980_v36 = vadd.f32 %v10478_v51, %v4129_v20  ;;  %v9983_v48 = vadd.f32 %v10479_v29, %v4127_v3  ;;  %v9989_v50 = vadd.f32 %v10480_v15, %v4132_v62 }
 0x257   : > { %5947 = vst.msk [vmem:[%s9948_s22 + $0x8] sm:$0xf] %vm226_vm1, %v6708_v39  ;;  %v6706_v57 = vpack.c.bf16 %v5785_v56, %v5785_v56  ;;  %v5788_v30 = vadd.f32 %v7168_v60, %v5270_v22  ;;  %v5268_v6 = vadd.f32 %v5143_v59, %v4462_v31  ;;  %v6046_v4 = vmul.f32 %v5785_v56, %v5785_v56  ;;  %v10482_v39 = vld [vmem:[#allocation16_spill] sm:$0xff] }
 0x258   : > { %v7137_v44 = vpop.f32.mrf.mxu1  ;;  %v5677_v17 = vpop.f32.mrf.mxu0  ;;  %v4130_v31 = vadd.f32 %v9859_v7, %v10481_v21  ;;  %v9995_v18 = vadd.f32 %v9869_v0, %v10482_v39  ;;  %v6048_v3 = vmul.f32 %v5787_v34, %v5787_v34  ;;  %v5980_v13 = vsel %vm1425_vm10, %v5787_v34, 0.0 }
 0x259   : > { %5945 = vst.msk [vmem:[%s9948_s22] sm:$0xf] %vm226_vm1, %v6706_v57  ;;  %v5273_v58 = vadd.f32 %v7137_v44, %v9880_v45  ;;  %v6709_v60 = vpack.c.bf16 %v5788_v30, %v5788_v30  ;;  %v5786_v46 = vadd.f32 %v5661_v5, %v5268_v6  ;;  %v5977_v45 = vsel %vm1425_vm10, %v5785_v56, 0.0 }
 0x25a   : > { %v5156_v55 = vpop.f32.mrf.mxu1  ;;  %v6078_v0 = vsel %vm1425_vm10, %v6046_v4, 0.0  ;;  %v6081_v6 = vsel %vm1425_vm10, %v6048_v3, 0.0  ;;  %v5982_v29 = vsel %vm1425_vm10, %v5788_v30, 0.0 }
 0x25b   : > { %v7175_v20 = vpop.f32.mrf.mxu0  ;;  %v5791_v49 = vadd.f32 %v7171_v37, %v5273_v58  ;;  %v5271_v16 = vadd.f32 %v5156_v55, %v9883_v12  ;;  %5948 = vst.msk [vmem:[%s9948_s22 + $0xc] sm:$0xf] %vm226_vm1, %v6709_v60  ;;  %v6707_v62 = vpack.c.bf16 %v5786_v46, %v5786_v46  ;;  %v5978_v7 = vsel %vm1425_vm10, %v5786_v46, 0.0 }
 0x25c   : > { %v6047_v22 = vmul.f32 %v5786_v46, %v5786_v46  ;;  %v7138_v5 = vpop.f32.mrf.mxu1  ;;  %v5979_v52 = vadd.f32 %v5978_v7, %v5977_v45  ;;  %v6049_v37 = vmul.f32 %v5788_v30, %v5788_v30 }
 0x25d   : > { %v5690_v59 = vpop.f32.mrf.mxu0  ;;  %v6712_v42 = vpack.c.bf16 %v5791_v49, %v5791_v49  ;;  %5946 = vst.msk [vmem:[%s9948_s22 + $0x4] sm:$0xf] %vm226_vm1, %v6707_v62  ;;  %v5789_v56 = vadd.f32 %v5674_v47, %v5271_v16  ;;  %v5274_v57 = vadd.f32 %v7138_v5, %v9886_v19  ;;  %v6052_v3 = vmul.f32 %v5791_v49, %v5791_v49 }
 0x25e   : > { %v6079_v12 = vsel %vm1425_vm10, %v6047_v22, 0.0  ;;  %v5159_v38 = vpop.f32.mrf.mxu1  ;;  %v5981_v44 = vadd.f32 %v5980_v13, %v5979_v52  ;;  %v6083_v39 = vsel %vm1425_vm10, %v6049_v37, 0.0 }
 0x25f   : > { %v7176_v35 = vpop.f32.mrf.mxu0  ;;  %v6080_v51 = vadd.f32 %v6079_v12, %v6078_v0  ;;  %5951 = vst.msk [vmem:[%s9948_s22 + $0x18] sm:$0xf] %vm226_vm1, %v6712_v42  ;;  %v5272_v34 = vadd.f32 %v5159_v38, %v9892_v23  ;;  %v6710_v4 = vpack.c.bf16 %v5789_v56, %v5789_v56  ;;  %v6050_v58 = vmul.f32 %v5789_v56, %v5789_v56 }
 0x260   : > { %v5792_v15 = vadd.f32 %v7172_v2, %v5274_v57  ;;  %v7141_v21 = vpop.f32.mrf.mxu1  ;;  %v5983_v19 = vadd.f32 %v5982_v29, %v5981_v44  ;;  %v5984_v23 = vsel %vm1425_vm10, %v5789_v56, 0.0  ;;  %v10024_v42 = vadd.f32 %v9836_v63, %v4130_v31  ;;  %v10483_v31 = vld [vmem:[#allocation36_spill] sm:$0xff] }
 0x261   : > { %v5693_v47 = vpop.f32.mrf.mxu0  ;;  %v6082_v60 = vadd.f32 %v6081_v6, %v6080_v51  ;;  %v5790_v46 = vadd.f32 %v5677_v17, %v5272_v34  ;;  %v5277_v55 = vadd.f32 %v7141_v21, %v9895_v53  ;;  %5949 = vst.msk [vmem:[%s9948_s22 + $0x10] sm:$0xf] %vm226_vm1, %v6710_v4  ;;  %v6085_v17 = vsel %vm1425_vm10, %v6050_v58, 0.0 }
 0x262   : > { %v6713_v16 = vpack.c.bf16 %v5792_v15, %v5792_v15  ;;  %v5172_v30 = vpop.f32.mrf.mxu1  ;;  %v5985_v2 = vadd.f32 %v5984_v23, %v5983_v19  ;;  %v5988_v57 = vsel %vm1425_vm10, %v5791_v49, 0.0  ;;  %v6053_v38 = vmul.f32 %v5792_v15, %v5792_v15  ;;  %v10484_v19 = vld [vmem:[#allocation20_spill] sm:$0xff] }
 0x263   : > { %v7179_v45 = vpop.f32.mrf.mxu0  ;;  %v6084_v62 = vadd.f32 %v6083_v39, %v6082_v60  ;;  %v6711_v7 = vpack.c.bf16 %v5790_v46, %v5790_v46  ;;  %v5986_v22 = vsel %vm1425_vm10, %v5790_v46, 0.0  ;;  %v6051_v53 = vmul.f32 %v5790_v46, %v5790_v46 }
 0x264   : > { %5952 = vst.msk [vmem:[%s9948_s22 + $0x1c] sm:$0xf] %vm226_vm1, %v6713_v16  ;;  %v5795_v5 = vadd.f32 %v7175_v20, %v5277_v55  ;;  %v5275_v13 = vadd.f32 %v5172_v30, %v9898_v32  ;;  %v7142_v0 = vpop.f32.mrf.mxu1  ;;  %v5987_v12 = vadd.f32 %v5986_v22, %v5985_v2  ;;  %v10033_v4 = vadd.f32 %v10483_v31, %v9995_v18 }
 0x265   : > { %v5706_v52 = vpop.f32.mrf.mxu0  ;;  %v6086_v37 = vadd.f32 %v6085_v17, %v6084_v62  ;;  %5950 = vst.msk [vmem:[%s9948_s22 + $0x14] sm:$0xf] %vm226_vm1, %v6711_v7  ;;  %v5278_v56 = vadd.f32 %v7142_v0, %v9901_v1  ;;  %v6087_v6 = vsel %vm1425_vm10, %v6051_v53, 0.0  ;;  %v6089_v58 = vsel %vm1425_vm10, %v6052_v3, 0.0 }
 0x266   : > { %v6716_v20 = vpack.c.bf16 %v5795_v5, %v5795_v5  ;;  %v5175_v44 = vpop.f32.mrf.mxu1  ;;  %v5989_v51 = vadd.f32 %v5988_v57, %v5987_v12  ;;  %v5793_v29 = vadd.f32 %v5690_v59, %v5275_v13  ;;  %v5990_v1 = vsel %vm1425_vm10, %v5792_v15, 0.0 }
 0x267   : > { %v7180_v32 = vpop.f32.mrf.mxu0  ;;  %v6088_v34 = vadd.f32 %v6087_v6, %v6086_v37  ;;  %v5796_v63 = vadd.f32 %v7176_v35, %v5278_v56  ;;  %v5276_v49 = vadd.f32 %v5175_v44, %v9904_v9  ;;  %v4131_v46 = vadd.f32 %v9889_v28, %v10484_v19  ;;  %v10485_v44 = vld [vmem:[#allocation37_spill] sm:$0xff] }
 0x268   : > { %5955 = vst.msk [vmem:[%s9948_s22 + $0x28] sm:$0xf] %vm226_vm1, %v6716_v20  ;;  %v7145_v21 = vpop.f32.mrf.mxu1  ;;  %v6714_v35 = vpack.c.bf16 %v5793_v29, %v5793_v29  ;;  %v5991_v55 = vadd.f32 %v5990_v1, %v5989_v51  ;;  %v6091_v18 = vsel %vm1425_vm10, %v6053_v38, 0.0  ;;  %v5992_v39 = vsel %vm1425_vm10, %v5793_v29, 0.0 }
 0x269   : > { %v5709_v60 = vpop.f32.mrf.mxu0  ;;  %v6090_v59 = vadd.f32 %v6089_v58, %v6088_v34  ;;  %v6054_v3 = vmul.f32 %v5793_v29, %v5793_v29  ;;  %v6717_v23 = vpack.c.bf16 %v5796_v63, %v5796_v63  ;;  %v5794_v2 = vadd.f32 %v5693_v47, %v5276_v49 }
 0x26a   : > { %v5188_v15 = vpop.f32.mrf.mxu1  ;;  %5953 = vst.msk [vmem:[%s9948_s22 + $0x20] sm:$0xf] %vm226_vm1, %v6714_v35  ;;  %v5993_v9 = vadd.f32 %v5992_v39, %v5991_v55  ;;  %v5281_v28 = vadd.f32 %v7145_v21, %v9907_v54  ;;  %v6056_v62 = vmul.f32 %v5795_v5, %v5795_v5  ;;  %v6057_v22 = vmul.f32 %v5796_v63, %v5796_v63 }
 0x26b   : > { %v6092_v30 = vadd.f32 %v6091_v18, %v6090_v59  ;;  %v6093_v7 = vsel %vm1425_vm10, %v6054_v3, 0.0  ;;  %5956 = vst.msk [vmem:[%s9948_s22 + $0x2c] sm:$0xf] %vm226_vm1, %v6717_v23  ;;  %v5279_v17 = vadd.f32 %v5188_v15, %v9913_v25  ;;  %v6715_v37 = vpack.c.bf16 %v5794_v2, %v5794_v2 }
 0x26c   : > { %v10044_v16 = vpop.f32.mrf.mxu0  ;;  %v7146_v53 = vpop.f32.mrf.mxu1  ;;  %v5994_v12 = vsel %vm1425_vm10, %v5794_v2, 0.0  ;;  %v6055_v56 = vmul.f32 %v5794_v2, %v5794_v2  ;;  %v5799_v47 = vadd.f32 %v7179_v45, %v5281_v28  ;;  %v10058_v51 = vadd.f32 %v10485_v44, %v4131_v46 }
 0x26d   : > { %v6094_v0 = vadd.f32 %v6093_v7, %v6092_v30  ;;  %v5995_v57 = vadd.f32 %v5994_v12, %v5993_v9  ;;  %v5797_v38 = vadd.f32 %v5706_v52, %v5279_v17  ;;  %v5282_v54 = vadd.f32 %v7146_v53, %v9916_v41  ;;  %5954 = vst.msk [vmem:[%s9948_s22 + $0x24] sm:$0xf] %vm226_vm1, %v6715_v37 }
 0x26e   : > { %v5722_v13 = vpop.f32.mrf.mxu0  ;;  %v5191_v6 = vpop.f32.mrf.mxu1  ;;  %v5996_v25 = vsel %vm1425_vm10, %v5795_v5, 0.0  ;;  %v6095_v34 = vsel %vm1425_vm10, %v6055_v56, 0.0  ;;  %v6097_v45 = vsel %vm1425_vm10, %v6056_v62, 0.0  ;;  %v6720_v41 = vpack.c.bf16 %v5799_v47, %v5799_v47 }
 0x26f   : > { %v5280_v29 = vadd.f32 %v5191_v6, %v9919_v11  ;;  %v5997_v52 = vadd.f32 %v5996_v25, %v5995_v57  ;;  %v6096_v31 = vadd.f32 %v6095_v34, %v6094_v0  ;;  %v5998_v49 = vsel %vm1425_vm10, %v5796_v63, 0.0 }
 0x270   : > { %v10055_v20 = vpop.f32.mrf.mxu0  ;;  %v7149_v58 = vpop.f32.mrf.mxu1  ;;  %v6099_v21 = vsel %vm1425_vm10, %v6057_v22, 0.0  ;;  %v6718_v19 = vpack.c.bf16 %v5797_v38, %v5797_v38  ;;  %v6058_v5 = vmul.f32 %v5797_v38, %v5797_v38  ;;  %5959 = vst.msk [vmem:[%s9948_s22 + $0x38] sm:$0xf] %vm226_vm1, %v6720_v41  ;;  %v5800_v35 = vadd.f32 %v7180_v32, %v5282_v54 }
 0x271   : > { %v6098_v46 = vadd.f32 %v6097_v45, %v6096_v31  ;;  %v5999_v59 = vadd.f32 %v5998_v49, %v5997_v52  ;;  %v5798_v11 = vadd.f32 %v5709_v60, %v5280_v29  ;;  %v6060_v39 = vmul.f32 %v5799_v47, %v5799_v47 }
 0x272   : > { %v5725_v1 = vpop.f32.mrf.mxu0  ;;  %v5204_v55 = vpop.f32.mrf.mxu1  ;;  %5957 = vst.msk [vmem:[%s9948_s22 + $0x30] sm:$0xf] %vm226_vm1, %v6718_v19  ;;  %v6000_v3 = vsel %vm1425_vm10, %v5797_v38, 0.0  ;;  %v5285_v63 = vadd.f32 %v7149_v58, %v9923_v40  ;;  %v6101_v30 = vsel %vm1425_vm10, %v6058_v5, 0.0  ;;  %v6721_v32 = vpack.c.bf16 %v5800_v35, %v5800_v35 }
 0x273   : > { %v5283_v23 = vadd.f32 %v5204_v55, %v9936_v26  ;;  %v6001_v15 = vadd.f32 %v6000_v3, %v5999_v59  ;;  %v6100_v9 = vadd.f32 %v6099_v21, %v6098_v46  ;;  %v6061_v28 = vmul.f32 %v5800_v35, %v5800_v35 }
 0x274   : > { %v10070_v18 = vpop.f32.mrf.mxu0  ;;  %v7150_v60 = vpop.f32.mrf.mxu1  ;;  %v6719_v62 = vpack.c.bf16 %v5798_v11, %v5798_v11  ;;  %v6002_v7 = vsel %vm1425_vm10, %v5798_v11, 0.0  ;;  %v6059_v22 = vmul.f32 %v5798_v11, %v5798_v11  ;;  %5960 = vst.msk [vmem:[%s9948_s22 + $0x3c] sm:$0xf] %vm226_vm1, %v6721_v32  ;;  %v5803_v40 = vadd.f32 %v10044_v16, %v5285_v63 }
 0x275   : > { %v6102_v17 = vadd.f32 %v6101_v30, %v6100_v9  ;;  %v6003_v53 = vadd.f32 %v6002_v7, %v6001_v15  ;;  %v5801_v26 = vadd.f32 %v5722_v13, %v5283_v23  ;;  %v6004_v12 = vsel %vm1425_vm10, %v5799_v47, 0.0 }
 0x276   : > { %v5738_v2 = vpop.f32.mrf.mxu0  ;;  %v5207_v0 = vpop.f32.mrf.mxu1  ;;  %5958 = vst.msk [vmem:[%s9948_s22 + $0x34] sm:$0xf] %vm226_vm1, %v6719_v62  ;;  %v6103_v56 = vsel %vm1425_vm10, %v6059_v22, 0.0  ;;  %v5286_v57 = vadd.f32 %v7150_v60, %v9939_v8  ;;  %v6105_v54 = vsel %vm1425_vm10, %v6060_v39, 0.0  ;;  %v6724_v16 = vpack.c.bf16 %v5803_v40, %v5803_v40 }
 0x277   : > { %v5284_v38 = vadd.f32 %v5207_v0, %v9955_v24  ;;  %v6005_v6 = vadd.f32 %v6004_v12, %v6003_v53  ;;  %v6104_v44 = vadd.f32 %v6103_v56, %v6102_v17  ;;  %v6006_v34 = vsel %vm1425_vm10, %v5800_v35, 0.0 }
 0x278   : > { %v10082_v37 = vpop.f32.mrf.mxu0  ;;  %v7153_v13 = vpop.f32.mrf.mxu1  ;;  %v6107_v47 = vsel %vm1425_vm10, %v6061_v28, 0.0  ;;  %v6722_v29 = vpack.c.bf16 %v5801_v26, %v5801_v26  ;;  %v6062_v45 = vmul.f32 %v5801_v26, %v5801_v26  ;;  %5963 = vst.msk [vmem:[%s9948_s22 + $0x48] sm:$0xf] %vm226_vm1, %v6724_v16  ;;  %v5804_v24 = vadd.f32 %v10055_v20, %v5286_v57 }
 0x279   : > { %v6106_v52 = vadd.f32 %v6105_v54, %v6104_v44  ;;  %v6007_v8 = vadd.f32 %v6006_v34, %v6005_v6  ;;  %v5802_v31 = vadd.f32 %v5725_v1, %v5284_v38  ;;  %v6064_v49 = vmul.f32 %v5803_v40, %v5803_v40 }
 0x27a   : > { %v5741_v25 = vpop.f32.mrf.mxu0  ;;  %v5220_v41 = vpop.f32.mrf.mxu1  ;;  %5961 = vst.msk [vmem:[%s9948_s22 + $0x40] sm:$0xf] %vm226_vm1, %v6722_v29  ;;  %v6008_v21 = vsel %vm1425_vm10, %v5801_v26, 0.0  ;;  %v5289_v19 = vadd.f32 %v7153_v13, %v9958_v14  ;;  %v6109_v35 = vsel %vm1425_vm10, %v6062_v45, 0.0  ;;  %v6725_v11 = vpack.c.bf16 %v5804_v24, %v5804_v24 }
 0x27b   : > { %v5287_v5 = vadd.f32 %v5220_v41, %v9963_v43  ;;  %v6009_v46 = vadd.f32 %v6008_v21, %v6007_v8  ;;  %v6108_v59 = vadd.f32 %v6107_v47, %v6106_v52  ;;  %v6065_v55 = vmul.f32 %v5804_v24, %v5804_v24 }
 0x27c   : > { %v7191_v58 = vpop.f32.mrf.mxu0  ;;  %v7154_v20 = vpop.f32.mrf.mxu1  ;;  %v6723_v39 = vpack.c.bf16 %v5802_v31, %v5802_v31  ;;  %v6010_v3 = vsel %vm1425_vm10, %v5802_v31, 0.0  ;;  %v6063_v63 = vmul.f32 %v5802_v31, %v5802_v31  ;;  %5964 = vst.msk [vmem:[%s9948_s22 + $0x4c] sm:$0xf] %vm226_vm1, %v6725_v11  ;;  %v5807_v14 = vadd.f32 %v10070_v18, %v5289_v19 }
 0x27d   : > { %v6110_v23 = vadd.f32 %v6109_v35, %v6108_v59  ;;  %v6011_v15 = vadd.f32 %v6010_v3, %v6009_v46  ;;  %v5805_v43 = vadd.f32 %v5738_v2, %v5287_v5  ;;  %v6012_v32 = vsel %vm1425_vm10, %v5803_v40, 0.0 }
 0x27e   : > { %v5754_v1 = vpop.f32.mrf.mxu0  ;;  %v5223_v9 = vpop.f32.mrf.mxu1  ;;  %5962 = vst.msk [vmem:[%s9948_s22 + $0x44] sm:$0xf] %vm226_vm1, %v6723_v39  ;;  %v6111_v60 = vsel %vm1425_vm10, %v6063_v63, 0.0  ;;  %v5290_v28 = vadd.f32 %v7154_v20, %v9966_v27  ;;  %v6113_v7 = vsel %vm1425_vm10, %v6064_v49, 0.0  ;;  %v6728_v18 = vpack.c.bf16 %v5807_v14, %v5807_v14 }
 0x27f   : > { %v5288_v62 = vadd.f32 %v5223_v9, %v9969_v10  ;;  %v6013_v22 = vadd.f32 %v6012_v32, %v6011_v15  ;;  %v6112_v17 = vadd.f32 %v6111_v60, %v6110_v23  ;;  %v6014_v53 = vsel %vm1425_vm10, %v5804_v24, 0.0 }
 0x280   : > { %v7192_v30 = vpop.f32.mrf.mxu0  ;;  %v7157_v2 = vpop.f32.mrf.mxu1  ;;  %v6115_v40 = vsel %vm1425_vm10, %v6065_v55, 0.0  ;;  %v6726_v26 = vpack.c.bf16 %v5805_v43, %v5805_v43  ;;  %v6066_v0 = vmul.f32 %v5805_v43, %v5805_v43  ;;  %5967 = vst.msk [vmem:[%s9948_s22 + $0x58] sm:$0xf] %vm226_vm1, %v6728_v18  ;;  %v5808_v10 = vadd.f32 %v10082_v37, %v5290_v28 }
 0x281   : > { %v6114_v56 = vadd.f32 %v6113_v7, %v6112_v17  ;;  %v6015_v27 = vadd.f32 %v6014_v53, %v6013_v22  ;;  %v5806_v57 = vadd.f32 %v5741_v25, %v5288_v62  ;;  %v6068_v54 = vmul.f32 %v5807_v14, %v5807_v14 }
 0x282   : > { %v5757_v12 = vpop.f32.mrf.mxu0  ;;  %v5236_v38 = vpop.f32.mrf.mxu1  ;;  %5965 = vst.msk [vmem:[%s9948_s22 + $0x50] sm:$0xf] %vm226_vm1, %v6726_v26  ;;  %v6016_v6 = vsel %vm1425_vm10, %v5805_v43, 0.0  ;;  %v5293_v44 = vadd.f32 %v7157_v2, %v9974_v61  ;;  %v6117_v47 = vsel %vm1425_vm10, %v6066_v0, 0.0  ;;  %v6729_v29 = vpack.c.bf16 %v5808_v10, %v5808_v10 }
 0x283   : > { %v5291_v16 = vadd.f32 %v5236_v38, %v9977_v33  ;;  %v6017_v13 = vadd.f32 %v6016_v6, %v6015_v27  ;;  %v6116_v34 = vadd.f32 %v6115_v40, %v6114_v56  ;;  %v6069_v37 = vmul.f32 %v5808_v10, %v5808_v10 }
 0x284   : > { %v7158_v45 = vpop.f32.mrf.mxu1  ;;  %v6727_v25 = vpack.c.bf16 %v5806_v57, %v5806_v57  ;;  %v6018_v52 = vsel %vm1425_vm10, %v5806_v57, 0.0  ;;  %v6067_v8 = vmul.f32 %v5806_v57, %v5806_v57  ;;  %v7195_v24 = vpop.f32.mrf.mxu0  ;;  %5968 = vst.msk [vmem:[%s9948_s22 + $0x5c] sm:$0xf] %vm226_vm1, %v6729_v29  ;;  %v5811_v61 = vadd.f32 %v7191_v58, %v5293_v44 }
 0x285   : > { %v6118_v31 = vadd.f32 %v6117_v47, %v6116_v34  ;;  %v6019_v41 = vadd.f32 %v6018_v52, %v6017_v13  ;;  %v5809_v49 = vadd.f32 %v5754_v1, %v5291_v16  ;;  %v6020_v21 = vsel %vm1425_vm10, %v5807_v14, 0.0 }
 0x286   : > { %v5239_v33 = vpop.f32.mrf.mxu1  ;;  %5966 = vst.msk [vmem:[%s9948_s22 + $0x54] sm:$0xf] %vm226_vm1, %v6727_v25  ;;  %v6119_v19 = vsel %vm1425_vm10, %v6067_v8, 0.0  ;;  %v5294_v5 = vadd.f32 %v7158_v45, %v9980_v36  ;;  %v6121_v59 = vsel %vm1425_vm10, %v6068_v54, 0.0  ;;  %v6732_v20 = vpack.c.bf16 %v5811_v61, %v5811_v61  ;;  %v5770_v63 = vpop.f32.mrf.mxu0 }
 0x287   : > { %v5292_v46 = vadd.f32 %v5239_v33, %v9983_v48  ;;  %v6021_v35 = vadd.f32 %v6020_v21, %v6019_v41  ;;  %v6120_v11 = vadd.f32 %v6119_v19, %v6118_v31  ;;  %v6022_v1 = vsel %vm1425_vm10, %v5808_v10, 0.0 }
 0x288   : > { %v7161_v58 = vpop.f32.mrf.mxu1  ;;  %v6123_v55 = vsel %vm1425_vm10, %v6069_v37, 0.0  ;;  %v6730_v39 = vpack.c.bf16 %v5809_v49, %v5809_v49  ;;  %v6070_v3 = vmul.f32 %v5809_v49, %v5809_v49  ;;  %5971 = vst.msk [vmem:[%s9948_s22 + $0x68] sm:$0xf] %vm226_vm1, %v6732_v20  ;;  %v5812_v15 = vadd.f32 %v7192_v30, %v5294_v5  ;;  %v7196_v40 = vpop.f32.mrf.mxu0 }
 0x289   : > { %v6122_v23 = vadd.f32 %v6121_v59, %v6120_v11  ;;  %v6023_v36 = vadd.f32 %v6022_v1, %v6021_v35  ;;  %v5810_v48 = vadd.f32 %v5757_v12, %v5292_v46  ;;  %v6028_v43 = vsel %vm1425_vm10, %v5811_v61, 0.0 }
 0x28a   : > { %v5252_v14 = vpop.f32.mrf.mxu1  ;;  %5969 = vst.msk [vmem:[%s9948_s22 + $0x60] sm:$0xf] %vm226_vm1, %v6730_v39  ;;  %v6024_v9 = vsel %vm1425_vm10, %v5809_v49, 0.0  ;;  %v5297_v32 = vadd.f32 %v7161_v58, %v9989_v50  ;;  %v6072_v28 = vmul.f32 %v5811_v61, %v5811_v61  ;;  %v6733_v22 = vpack.c.bf16 %v5812_v15, %v5812_v15  ;;  %v5773_v47 = vpop.f32.mrf.mxu0 }
 0x28b   : > { %v5295_v60 = vadd.f32 %v5252_v14, %v10024_v42  ;;  %v6025_v62 = vadd.f32 %v6024_v9, %v6023_v36  ;;  %v6124_v7 = vadd.f32 %v6123_v55, %v6122_v23  ;;  %v6125_v30 = vsel %vm1425_vm10, %v6070_v3, 0.0 }
 0x28c   : > { %v7162_v17 = vpop.f32.mrf.mxu1  ;;  %v6731_v18 = vpack.c.bf16 %v5810_v48, %v5810_v48  ;;  %v6026_v2 = vsel %vm1425_vm10, %v5810_v48, 0.0  ;;  %v6071_v53 = vmul.f32 %v5810_v48, %v5810_v48  ;;  %5972 = vst.msk [vmem:[%s9948_s22 + $0x6c] sm:$0xf] %vm226_vm1, %v6733_v22  ;;  %v5815_v50 = vadd.f32 %v7195_v24, %v5297_v32 }
 0x28d   : > { %v6126_v26 = vadd.f32 %v6125_v30, %v6124_v7  ;;  %v6027_v0 = vadd.f32 %v6026_v2, %v6025_v62  ;;  %v5813_v12 = vadd.f32 %v5770_v63, %v5295_v60  ;;  %v6073_v56 = vmul.f32 %v5812_v15, %v5812_v15 }
 0x28e   : > { %v5255_v42 = vpop.f32.mrf.mxu1  ;;  %5970 = vst.msk [vmem:[%s9948_s22 + $0x64] sm:$0xf] %vm226_vm1, %v6731_v18  ;;  %v6127_v27 = vsel %vm1425_vm10, %v6071_v53, 0.0  ;;  %v5298_v10 = vadd.f32 %v7162_v17, %v10033_v4  ;;  %v6736_v6 = vpack.c.bf16 %v5815_v50, %v5815_v50  ;;  %v6129_v44 = vsel %vm1425_vm10, %v6072_v28, 0.0 }
 0x28f   : > { %v5296_v57 = vadd.f32 %v5255_v42, %v10058_v51  ;;  %v6029_v38 = vadd.f32 %v6028_v43, %v6027_v0  ;;  %v6128_v54 = vadd.f32 %v6127_v27, %v6126_v26  ;;  %v6030_v16 = vsel %vm1425_vm10, %v5812_v15, 0.0 }
 0x290   : > { %v6734_v13 = vpack.c.bf16 %v5813_v12, %v5813_v12  ;;  %v6074_v34 = vmul.f32 %v5813_v12, %v5813_v12  ;;  %5975 = vst.msk [vmem:[%s9948_s22 + $0x78] sm:$0xf] %vm226_vm1, %v6736_v6  ;;  %v5816_v37 = vadd.f32 %v7196_v40, %v5298_v10  ;;  %v6131_v25 = vsel %vm1425_vm10, %v6073_v56, 0.0 }
 0x291   : > { %v6130_v29 = vadd.f32 %v6129_v44, %v6128_v54  ;;  %v6031_v45 = vadd.f32 %v6030_v16, %v6029_v38  ;;  %v5814_v4 = vadd.f32 %v5773_v47, %v5296_v57  ;;  %v6032_v51 = vsel %vm1425_vm10, %v5813_v12, 0.0 }
 0x292   : > { %5973 = vst.msk [vmem:[%s9948_s22 + $0x70] sm:$0xf] %vm226_vm1, %v6734_v13  ;;  %v6076_v52 = vmul.f32 %v5815_v50, %v5815_v50  ;;  %v6737_v31 = vpack.c.bf16 %v5816_v37, %v5816_v37  ;;  %v6133_v41 = vsel %vm1425_vm10, %v6074_v34, 0.0  ;;  %v6036_v5 = vsel %vm1425_vm10, %v5815_v50, 0.0 }
 0x293   : > { %v6033_v8 = vadd.f32 %v6032_v51, %v6031_v45  ;;  %v6132_v24 = vadd.f32 %v6131_v25, %v6130_v29  ;;  %v6735_v61 = vpack.c.bf16 %v5814_v4, %v5814_v4  ;;  %v6034_v49 = vsel %vm1425_vm10, %v5814_v4, 0.0 }
 0x294   : > { %v6075_v33 = vmul.f32 %v5814_v4, %v5814_v4  ;;  %5976 = vst.msk [vmem:[%s9948_s22 + $0x7c] sm:$0xf] %vm226_vm1, %v6737_v31  ;;  %v6077_v46 = vmul.f32 %v5816_v37, %v5816_v37  ;;  %v6137_v20 = vsel %vm1425_vm10, %v6076_v52, 0.0  ;;  %v6038_v58 = vsel %vm1425_vm10, %v5816_v37, 0.0 }
 0x295   : > { %v6134_v21 = vadd.f32 %v6133_v41, %v6132_v24  ;;  %v6035_v19 = vadd.f32 %v6034_v49, %v6033_v8  ;;  %5974 = vst.msk [vmem:[%s9948_s22 + $0x74] sm:$0xf] %vm226_vm1, %v6735_v61 }
 0x296   : > { %v6135_v59 = vsel %vm1425_vm10, %v6075_v33, 0.0  ;;  %v6139_v39 = vsel %vm1425_vm10, %v6077_v46, 0.0 }
 0x297   : > { %v6037_v35 = vadd.f32 %v6036_v5, %v6035_v19  ;;  %v6136_v11 = vadd.f32 %v6135_v59, %v6134_v21 }
 0x299   : > { %v6039_v1 = vadd.f32 %v6038_v58, %v6037_v35  ;;  %v6138_v55 = vadd.f32 %v6137_v20, %v6136_v11 }
 0x29b   : > { %v6040_v3 = vrot.slane %v6039_v1, 4  ;;  %v6140_v63 = vadd.f32 %v6139_v39, %v6138_v55 }
 0x29d   : > { %v6041_v23 = vadd.f32 %v6040_v3, %v6039_v1  ;;  %v6141_v36 = vrot.slane %v6140_v63, 4 }
 0x29f   : > { %v6042_v15 = vrot.slane %v6041_v23, 2  ;;  %v6142_v48 = vadd.f32 %v6141_v36, %v6140_v63 }
 0x2a1   : > { %v6043_v14 = vadd.f32 %v6042_v15, %v6041_v23  ;;  %v6143_v43 = vrot.slane %v6142_v48, 2 }
 0x2a3   : > { %v6044_v9 = vrot.slane %v6043_v14, 1  ;;  %v6144_v32 = vadd.f32 %v6143_v43, %v6142_v48 }
 0x2a5   : > { %v6045_v60 = vadd.f32 %v6044_v9, %v6043_v14  ;;  %v6145_v28 = vrot.slane %v6144_v32, 1 }
 0x2a7   : > { %v6146_v62 = vadd.f32 %v6145_v28, %v6144_v32  ;;  %6147 = vst.msk [vmem:[%s220_s26] sm:$0xff] %vm1425_vm10, %v6045_v60 }
 0x2a9   : > { %6148 = vst.msk [vmem:[%s224_s29] sm:$0xff] %vm1425_vm10, %v6146_v62 }
 0x2aa PF: > { %s15_s15 = sadd.s32 1, %s7286_s15  }
 0x2ab   : > { %p12_p6 = scmp.ge.s32.totalorder %s15_s15, 4  }
 0x2ad   :  { %14 = sbr.rel (!%p12_p6) target bundleno = 1 (0x1), region = 92 }

</bundles_post_ra>
